<compile_context>
chip_gen: v6e
topology: v6e:2x2x1
jax: 0.10.0
libtpu: 0.0.40
codegen_flags: <defaults>
</compile_context>

<pallas_src>
import functools

import jax
import jax.numpy as jnp
from jax.experimental import pallas as pl
from jax.experimental.pallas import tpu as pltpu


# ----------------------------------------------------------------------------
# Pallas kernel: one fused bidirectional LSTM layer (optionally + final FC)
# ----------------------------------------------------------------------------
def _bilstm_layer_kernel(len_ref, x_ref, wih_ref, whhf_ref, whhb_ref, b_ref,
                         *rest, seq_len, n_batch, hidden_dim, with_fc):
    T, B, H = seq_len, n_batch, hidden_dim
    if with_fc:
        fcw_ref, fcb_ref, logits_ref, gates_ref = rest
        out_ref = None
    else:
        out_ref, gates_ref = rest

    len_col = len_ref[...]                       # (B, 1) int32, loaded once

    # ---- hoisted input projection for BOTH directions (one big MXU matmul) ----
    x_bf = x_ref[...].astype(jnp.bfloat16)       # (T*B, I)
    gates_ref[...] = (
        jnp.dot(x_bf, wih_ref[...], preferred_element_type=jnp.float32)
        + b_ref[...])                            # (T*B, 8H) f32, fwd|bwd gates

    w_hh_f = whhf_ref[...]                       # (H, 4H) bf16
    w_hh_b = whhb_ref[...]                       # (H, 4H) bf16

    def cell(g, c):
        # PyTorch gate order: i, f, g, o
        i_g = jax.nn.sigmoid(g[:, 0 * H:1 * H])
        f_g = jax.nn.sigmoid(g[:, 1 * H:2 * H])
        g_g = jnp.tanh(g[:, 2 * H:3 * H])
        o_g = jax.nn.sigmoid(g[:, 3 * H:4 * H])
        c_new = f_g * c + i_g * g_g
        h_new = o_g * jnp.tanh(c_new)
        return h_new, c_new

    zeros = jnp.zeros((B, H), jnp.float32)
    h_f, c_f, h_b, c_b = zeros, zeros, zeros, zeros

    # Static (unrolled) time loop: only the recurrent h @ W_hh matmuls remain
    # inside the serial recurrence.
    for k in range(T):
        tf = k               # forward direction timestep
        tb = T - 1 - k       # backward direction timestep

        g_f = gates_ref[tf * B:(tf + 1) * B, 0:4 * H] + jnp.dot(
            h_f.astype(jnp.bfloat16), w_hh_f, preferred_element_type=jnp.float32)
        g_b = gates_ref[tb * B:(tb + 1) * B, 4 * H:8 * H] + jnp.dot(
            h_b.astype(jnp.bfloat16), w_hh_b, preferred_element_type=jnp.float32)

        hf_new, cf_new = cell(g_f, c_f)
        hb_new, cb_new = cell(g_b, c_b)

        valid_f = len_col > tf                   # (B, 1) packed-seq masks
        valid_b = len_col > tb

        h_f = jnp.where(valid_f, hf_new, h_f)
        c_f = jnp.where(valid_f, cf_new, c_f)
        h_b = jnp.where(valid_b, hb_new, h_b)
        c_b = jnp.where(valid_b, cb_new, c_b)

        if not with_fc:
            # pad_packed_sequence semantics: zeros at padded positions.
            # Each direction writes straight into its half of the (T*B, 2H)
            # output (no concatenate between layers).
            out_ref[tf * B:(tf + 1) * B, 0:H] = jnp.where(valid_f, hf_new, 0.0)
            out_ref[tb * B:(tb + 1) * B, H:2 * H] = jnp.where(valid_b, hb_new, 0.0)

    if with_fc:
        # hidden = cat(h_fwd_final, h_bwd_final); logits = hidden @ fc_w + fc_b
        logits_ref[...] = (
            jnp.dot(h_f.astype(jnp.bfloat16), fcw_ref[0:H, :],
                    preferred_element_type=jnp.float32)
            + jnp.dot(h_b.astype(jnp.bfloat16), fcw_ref[H:2 * H, :],
                      preferred_element_type=jnp.float32)
            + fcb_ref[...])


# ----------------------------------------------------------------------------
# Wrappers
# ----------------------------------------------------------------------------
def bilstm_layer(x2d, len_col, w_ih, w_hh_f, w_hh_b, b, *, seq_len, batch, fc=None):
    """Run one fused bidirectional LSTM layer (single pallas_call, no time grid)."""
    TB, _ = x2d.shape
    H = w_hh_f.shape[0]
    with_fc = fc is not None

    kernel = functools.partial(_bilstm_layer_kernel, seq_len=seq_len,
                               n_batch=batch, hidden_dim=H, with_fc=with_fc)

    args = [len_col, x2d, w_ih, w_hh_f, w_hh_b, b]
    if with_fc:
        fc_w, fc_b = fc
        args += [fc_w, fc_b]
        out_shape = jax.ShapeDtypeStruct((batch, fc_b.shape[1]), jnp.float32)
    else:
        out_shape = jax.ShapeDtypeStruct((TB, 2 * H), jnp.float32)

    vm = pl.BlockSpec(memory_space=pltpu.MemorySpace.VMEM)
    return pl.pallas_call(
        kernel,
        out_shape=out_shape,
        in_specs=[vm] * len(args),
        out_specs=vm,
        scratch_shapes=[pltpu.VMEM((TB, 8 * H), jnp.float32)],   # hoisted gates
    )(*args)


def rnn_forward(text, text_lengths, params):
    T, B = text.shape
    # Embedding lookup (gather) + dropout(identity, eval) kept in plain JAX glue.
    emb = jnp.take(params["embedding"], text, axis=0)            # (T, B, E)
    x2d = emb.reshape(T * B, -1)                                 # (T*B, E)
    len_col = text_lengths.reshape(-1, 1).astype(jnp.int32)      # (B, 1)

    n_layers = len(params["lstm"])
    logits = None
    for li, lp in enumerate(params["lstm"]):
        # pack both directions' input weights/biases side by side: (I, 8H) / (1, 8H)
        w_ih = jnp.concatenate([lp["w_ih_f"], lp["w_ih_b"]], axis=1).astype(jnp.bfloat16)
        b = jnp.concatenate([lp["b_f"], lp["b_b"]], axis=1)
        w_hh_f = lp["w_hh_f"].astype(jnp.bfloat16)
        w_hh_b = lp["w_hh_b"].astype(jnp.bfloat16)

        if li == n_layers - 1:
            # last layer: skip per-step output, fuse the final Linear
            logits = bilstm_layer(
                x2d, len_col, w_ih, w_hh_f, w_hh_b, b,
                seq_len=T, batch=B,
                fc=(params["fc_w"].astype(jnp.bfloat16), params["fc_b"]))
        else:
            x2d = bilstm_layer(x2d, len_col, w_ih, w_hh_f, w_hh_b, b,
                               seq_len=T, batch=B, fc=None)
    return logits


# ----------------------------------------------------------------------------
# Deterministic parameter init (synthetic; shapes from the nn.Module __init__)
# ----------------------------------------------------------------------------
def init_params(key, vocab_size, embedding_dim, hidden_dim, output_dim,
                n_layers, pad_idx):
    keys = iter(jax.random.split(key, 4 + 8 * n_layers))

    def uni(shape, bound):
        return jax.random.uniform(next(keys), shape, jnp.float32, -bound, bound)

    emb = jax.random.normal(next(keys), (vocab_size, embedding_dim), jnp.float32)
    emb = emb.at[pad_idx].set(0.0)  # padding_idx row is zero

    k = 1.0 / jnp.sqrt(hidden_dim)
    lstm = []
    for layer in range(n_layers):
        in_dim = embedding_dim if layer == 0 else 2 * hidden_dim
        lstm.append(dict(
            w_ih_f=uni((in_dim, 4 * hidden_dim), k),
            w_hh_f=uni((hidden_dim, 4 * hidden_dim), k),
            b_f=uni((1, 4 * hidden_dim), k) + uni((1, 4 * hidden_dim), k),
            w_ih_b=uni((in_dim, 4 * hidden_dim), k),
            w_hh_b=uni((hidden_dim, 4 * hidden_dim), k),
            b_b=uni((1, 4 * hidden_dim), k) + uni((1, 4 * hidden_dim), k),
        ))

    kf = 1.0 / jnp.sqrt(2 * hidden_dim)
    fc_w = uni((2 * hidden_dim, output_dim), kf)
    fc_b = uni((1, output_dim), kf)
    return dict(embedding=emb, lstm=lstm, fc_w=fc_w, fc_b=fc_b)


# ----------------------------------------------------------------------------
if __name__ == "__main__":
    # H multiple of 128 and B = 8 keep gate slices / output stores lane- and
    # sublane-aligned (per perf review); sizes otherwise small.
    VOCAB, EMB, HID, OUT = 50, 128, 128, 4
    N_LAYERS, PAD_IDX = 2, 0
    T, B = 12, 8

    root = jax.random.PRNGKey(0)
    k_params, k_text, k_len = jax.random.split(root, 3)

    params = init_params(k_params, VOCAB, EMB, HID, OUT, N_LAYERS, PAD_IDX)

    # text: [T, B] token ids; positions beyond each length are pad_idx
    text = jax.random.randint(k_text, (T, B), 1, VOCAB, dtype=jnp.int32)
    text_lengths = jax.random.randint(k_len, (B,), 3, T + 1, dtype=jnp.int32)
    t_iota = jnp.arange(T, dtype=jnp.int32)[:, None]
    text = jnp.where(t_iota < text_lengths[None, :], text, PAD_IDX)

    logits = rnn_forward(text, text_lengths, params)
    jax.block_until_ready(logits)
    assert logits.shape == (B, OUT) and logits.dtype == jnp.float32
    assert bool(jnp.all(jnp.isfinite(logits)))
    print("KERNEL_OK")
</pallas_src>

<mosaic_0001>
module attributes {stable_mosaic.version = 11 : i64} {
  func.func @_bilstm_layer_kernel(%arg0: memref<8x1xi32, #tpu.memory_space<vmem>>, %arg1: memref<96x128xf32, #tpu.memory_space<vmem>>, %arg2: memref<128x1024xbf16, #tpu.memory_space<vmem>>, %arg3: memref<128x512xbf16, #tpu.memory_space<vmem>>, %arg4: memref<128x512xbf16, #tpu.memory_space<vmem>>, %arg5: memref<1x1024xf32, #tpu.memory_space<vmem>>, %arg6: memref<96x256xf32, #tpu.memory_space<vmem>>, %arg7: memref<96x1024xf32, #tpu.memory_space<vmem>>) attributes {dimension_semantics = [], scalar_prefetch = 0 : i64, scratch_operands = 1 : i64, tpu.core_type = #tpu.core_type<tc>} {
    %c0 = arith.constant 0 : index
    %c0_0 = arith.constant 0 : index
    %0 = vector.load %arg0[%c0, %c0_0] : memref<8x1xi32, #tpu.memory_space<vmem>>, vector<8x1xi32>
    %c0_1 = arith.constant 0 : index
    %c0_2 = arith.constant 0 : index
    %1 = vector.load %arg1[%c0_1, %c0_2] : memref<96x128xf32, #tpu.memory_space<vmem>>, vector<96x128xf32>
    %2 = arith.truncf %1 : vector<96x128xf32> to vector<96x128xbf16>
    %c0_3 = arith.constant 0 : index
    %c0_4 = arith.constant 0 : index
    %3 = vector.load %arg2[%c0_3, %c0_4] : memref<128x1024xbf16, #tpu.memory_space<vmem>>, vector<128x1024xbf16>
    %cst = arith.constant dense<0.000000e+00> : vector<96x1024xf32>
    %4 = tpu.matmul %2, %3, %cst {dimension_numbers = #tpu.dot_dimension_numbers<[1], [0], [0], [1], [0, 0, 1, 1], [], []>} : vector<96x128xbf16>, vector<128x1024xbf16>, vector<96x1024xf32> -> vector<96x1024xf32>
    %c0_5 = arith.constant 0 : index
    %c0_6 = arith.constant 0 : index
    %5 = vector.load %arg5[%c0_5, %c0_6] : memref<1x1024xf32, #tpu.memory_space<vmem>>, vector<1x1024xf32>
    %6 = vector.broadcast %5 : vector<1x1024xf32> to vector<96x1024xf32>
    %7 = arith.addf %4, %6 : vector<96x1024xf32>
    %c0_7 = arith.constant 0 : index
    %c0_8 = arith.constant 0 : index
    %8 = vector.load %arg7[%c0_7, %c0_8] : memref<96x1024xf32, #tpu.memory_space<vmem>>, vector<96x1024xf32>
    tpu.vector_store %arg7[%c0_7, %c0_8], %7 {strides = array<i32>} : memref<96x1024xf32, #tpu.memory_space<vmem>>, vector<96x1024xf32>,
    %c0_9 = arith.constant 0 : index
    %c0_10 = arith.constant 0 : index
    %9 = vector.load %arg3[%c0_9, %c0_10] : memref<128x512xbf16, #tpu.memory_space<vmem>>, vector<128x512xbf16>
    %c0_11 = arith.constant 0 : index
    %c0_12 = arith.constant 0 : index
    %10 = vector.load %arg4[%c0_11, %c0_12] : memref<128x512xbf16, #tpu.memory_space<vmem>>, vector<128x512xbf16>
    %cst_13 = arith.constant 0.000000e+00 : f32
    %11 = vector.broadcast %cst_13 : f32 to vector<8x128xf32>
    %c0_14 = arith.constant 0 : index
    %c0_15 = arith.constant 0 : index
    %12 = vector.load %arg7[%c0_14, %c0_15] : memref<96x1024xf32, #tpu.memory_space<vmem>>, vector<8x512xf32>
    %13 = arith.truncf %11 : vector<8x128xf32> to vector<8x128xbf16>
    %cst_16 = arith.constant dense<0.000000e+00> : vector<8x512xf32>
    %14 = tpu.matmul %13, %9, %cst_16 {dimension_numbers = #tpu.dot_dimension_numbers<[1], [0], [0], [1], [0, 0, 1, 1], [], []>} : vector<8x128xbf16>, vector<128x512xbf16>, vector<8x512xf32> -> vector<8x512xf32>
    %15 = arith.addf %12, %14 : vector<8x512xf32>
    %c88 = arith.constant 88 : index
    %c512 = arith.constant 512 : index
    %16 = vector.load %arg7[%c88, %c512] : memref<96x1024xf32, #tpu.memory_space<vmem>>, vector<8x512xf32>
    %17 = arith.truncf %11 : vector<8x128xf32> to vector<8x128xbf16>
    %cst_17 = arith.constant dense<0.000000e+00> : vector<8x512xf32>
    %18 = tpu.matmul %17, %10, %cst_17 {dimension_numbers = #tpu.dot_dimension_numbers<[1], [0], [0], [1], [0, 0, 1, 1], [], []>} : vector<8x128xbf16>, vector<128x512xbf16>, vector<8x512xf32> -> vector<8x512xf32>
    %19 = arith.addf %16, %18 : vector<8x512xf32>
    %20 = vector.extract_strided_slice %15 {offsets = [0, 0], sizes = [8, 128], strides = [1, 1]} : vector<8x512xf32> to vector<8x128xf32>
    %21 = arith.negf %20 : vector<8x128xf32>
    %22 = math.exp %21 : vector<8x128xf32>
    %cst_18 = arith.constant 1.000000e+00 : f32
    %23 = vector.broadcast %cst_18 : f32 to vector<8x128xf32>
    %24 = arith.addf %23, %22 : vector<8x128xf32>
    %25 = arith.divf %23, %24 : vector<8x128xf32>
    %26 = vector.extract_strided_slice %15 {offsets = [0, 128], sizes = [8, 128], strides = [1, 1]} : vector<8x512xf32> to vector<8x128xf32>
    %27 = arith.negf %26 : vector<8x128xf32>
    %28 = math.exp %27 : vector<8x128xf32>
    %cst_19 = arith.constant 1.000000e+00 : f32
    %29 = vector.broadcast %cst_19 : f32 to vector<8x128xf32>
    %30 = arith.addf %29, %28 : vector<8x128xf32>
    %31 = arith.divf %29, %30 : vector<8x128xf32>
    %32 = vector.extract_strided_slice %15 {offsets = [0, 256], sizes = [8, 128], strides = [1, 1]} : vector<8x512xf32> to vector<8x128xf32>
    %33 = math.tanh %32 : vector<8x128xf32>
    %34 = vector.extract_strided_slice %15 {offsets = [0, 384], sizes = [8, 128], strides = [1, 1]} : vector<8x512xf32> to vector<8x128xf32>
    %35 = arith.negf %34 : vector<8x128xf32>
    %36 = math.exp %35 : vector<8x128xf32>
    %cst_20 = arith.constant 1.000000e+00 : f32
    %37 = vector.broadcast %cst_20 : f32 to vector<8x128xf32>
    %38 = arith.addf %37, %36 : vector<8x128xf32>
    %39 = arith.divf %37, %38 : vector<8x128xf32>
    %40 = arith.mulf %31, %11 : vector<8x128xf32>
    %41 = arith.mulf %25, %33 : vector<8x128xf32>
    %42 = arith.addf %40, %41 : vector<8x128xf32>
    %43 = math.tanh %42 : vector<8x128xf32>
    %44 = arith.mulf %39, %43 : vector<8x128xf32>
    %45 = vector.extract_strided_slice %19 {offsets = [0, 0], sizes = [8, 128], strides = [1, 1]} : vector<8x512xf32> to vector<8x128xf32>
    %46 = arith.negf %45 : vector<8x128xf32>
    %47 = math.exp %46 : vector<8x128xf32>
    %cst_21 = arith.constant 1.000000e+00 : f32
    %48 = vector.broadcast %cst_21 : f32 to vector<8x128xf32>
    %49 = arith.addf %48, %47 : vector<8x128xf32>
    %50 = arith.divf %48, %49 : vector<8x128xf32>
    %51 = vector.extract_strided_slice %19 {offsets = [0, 128], sizes = [8, 128], strides = [1, 1]} : vector<8x512xf32> to vector<8x128xf32>
    %52 = arith.negf %51 : vector<8x128xf32>
    %53 = math.exp %52 : vector<8x128xf32>
    %cst_22 = arith.constant 1.000000e+00 : f32
    %54 = vector.broadcast %cst_22 : f32 to vector<8x128xf32>
    %55 = arith.addf %54, %53 : vector<8x128xf32>
    %56 = arith.divf %54, %55 : vector<8x128xf32>
    %57 = vector.extract_strided_slice %19 {offsets = [0, 256], sizes = [8, 128], strides = [1, 1]} : vector<8x512xf32> to vector<8x128xf32>
    %58 = math.tanh %57 : vector<8x128xf32>
    %59 = vector.extract_strided_slice %19 {offsets = [0, 384], sizes = [8, 128], strides = [1, 1]} : vector<8x512xf32> to vector<8x128xf32>
    %60 = arith.negf %59 : vector<8x128xf32>
    %61 = math.exp %60 : vector<8x128xf32>
    %cst_23 = arith.constant 1.000000e+00 : f32
    %62 = vector.broadcast %cst_23 : f32 to vector<8x128xf32>
    %63 = arith.addf %62, %61 : vector<8x128xf32>
    %64 = arith.divf %62, %63 : vector<8x128xf32>
    %65 = arith.mulf %56, %11 : vector<8x128xf32>
    %66 = arith.mulf %50, %58 : vector<8x128xf32>
    %67 = arith.addf %65, %66 : vector<8x128xf32>
    %68 = math.tanh %67 : vector<8x128xf32>
    %69 = arith.mulf %64, %68 : vector<8x128xf32>
    %c0_i32 = arith.constant 0 : i32
    %70 = vector.broadcast %c0_i32 : i32 to vector<8x1xi32>
    %71 = arith.cmpi sgt, %0, %70 : vector<8x1xi32>
    %c11_i32 = arith.constant 11 : i32
    %72 = vector.broadcast %c11_i32 : i32 to vector<8x1xi32>
    %73 = arith.cmpi sgt, %0, %72 : vector<8x1xi32>
    %74 = vector.shape_cast %71 : vector<8x1xi1> to vector<8x1xi1>
    %75 = vector.broadcast %74 : vector<8x1xi1> to vector<8x128xi1>
    %76 = arith.select %75, %44, %11 : vector<8x128xi1>, vector<8x128xf32>
    %77 = vector.shape_cast %71 : vector<8x1xi1> to vector<8x1xi1>
    %78 = vector.broadcast %77 : vector<8x1xi1> to vector<8x128xi1>
    %79 = arith.select %78, %42, %11 : vector<8x128xi1>, vector<8x128xf32>
    %80 = vector.shape_cast %73 : vector<8x1xi1> to vector<8x1xi1>
    %81 = vector.broadcast %80 : vector<8x1xi1> to vector<8x128xi1>
    %82 = arith.select %81, %69, %11 : vector<8x128xi1>, vector<8x128xf32>
    %83 = vector.shape_cast %73 : vector<8x1xi1> to vector<8x1xi1>
    %84 = vector.broadcast %83 : vector<8x1xi1> to vector<8x128xi1>
    %85 = arith.select %84, %67, %11 : vector<8x128xi1>, vector<8x128xf32>
    %cst_24 = arith.constant 0.000000e+00 : f32
    %86 = vector.shape_cast %71 : vector<8x1xi1> to vector<8x1xi1>
    %87 = vector.broadcast %86 : vector<8x1xi1> to vector<8x128xi1>
    %88 = vector.broadcast %cst_24 : f32 to vector<8x128xf32>
    %89 = arith.select %87, %44, %88 : vector<8x128xi1>, vector<8x128xf32>
    %c0_25 = arith.constant 0 : index
    %c0_26 = arith.constant 0 : index
    %90 = vector.load %arg6[%c0_25, %c0_26] : memref<96x256xf32, #tpu.memory_space<vmem>>, vector<8x128xf32>
    tpu.vector_store %arg6[%c0_25, %c0_26], %89 {strides = array<i32>} : memref<96x256xf32, #tpu.memory_space<vmem>>, vector<8x128xf32>,
    %cst_27 = arith.constant 0.000000e+00 : f32
    %91 = vector.shape_cast %73 : vector<8x1xi1> to vector<8x1xi1>
    %92 = vector.broadcast %91 : vector<8x1xi1> to vector<8x128xi1>
    %93 = vector.broadcast %cst_27 : f32 to vector<8x128xf32>
    %94 = arith.select %92, %69, %93 : vector<8x128xi1>, vector<8x128xf32>
    %c88_28 = arith.constant 88 : index
    %c128 = arith.constant 128 : index
    %95 = vector.load %arg6[%c88_28, %c128] : memref<96x256xf32, #tpu.memory_space<vmem>>, vector<8x128xf32>
    tpu.vector_store %arg6[%c88_28, %c128], %94 {strides = array<i32>} : memref<96x256xf32, #tpu.memory_space<vmem>>, vector<8x128xf32>,
    %c8 = arith.constant 8 : index
    %c0_29 = arith.constant 0 : index
    %96 = vector.load %arg7[%c8, %c0_29] : memref<96x1024xf32, #tpu.memory_space<vmem>>, vector<8x512xf32>
    %97 = arith.truncf %76 : vector<8x128xf32> to vector<8x128xbf16>
    %cst_30 = arith.constant dense<0.000000e+00> : vector<8x512xf32>
    %98 = tpu.matmul %97, %9, %cst_30 {dimension_numbers = #tpu.dot_dimension_numbers<[1], [0], [0], [1], [0, 0, 1, 1], [], []>} : vector<8x128xbf16>, vector<128x512xbf16>, vector<8x512xf32> -> vector<8x512xf32>
    %99 = arith.addf %96, %98 : vector<8x512xf32>
    %c80 = arith.constant 80 : index
    %c512_31 = arith.constant 512 : index
    %100 = vector.load %arg7[%c80, %c512_31] : memref<96x1024xf32, #tpu.memory_space<vmem>>, vector<8x512xf32>
    %101 = arith.truncf %82 : vector<8x128xf32> to vector<8x128xbf16>
    %cst_32 = arith.constant dense<0.000000e+00> : vector<8x512xf32>
    %102 = tpu.matmul %101, %10, %cst_32 {dimension_numbers = #tpu.dot_dimension_numbers<[1], [0], [0], [1], [0, 0, 1, 1], [], []>} : vector<8x128xbf16>, vector<128x512xbf16>, vector<8x512xf32> -> vector<8x512xf32>
    %103 = arith.addf %100, %102 : vector<8x512xf32>
    %104 = vector.extract_strided_slice %99 {offsets = [0, 0], sizes = [8, 128], strides = [1, 1]} : vector<8x512xf32> to vector<8x128xf32>
    %105 = arith.negf %104 : vector<8x128xf32>
    %106 = math.exp %105 : vector<8x128xf32>
    %cst_33 = arith.constant 1.000000e+00 : f32
    %107 = vector.broadcast %cst_33 : f32 to vector<8x128xf32>
    %108 = arith.addf %107, %106 : vector<8x128xf32>
    %109 = arith.divf %107, %108 : vector<8x128xf32>
    %110 = vector.extract_strided_slice %99 {offsets = [0, 128], sizes = [8, 128], strides = [1, 1]} : vector<8x512xf32> to vector<8x128xf32>
    %111 = arith.negf %110 : vector<8x128xf32>
    %112 = math.exp %111 : vector<8x128xf32>
    %cst_34 = arith.constant 1.000000e+00 : f32
    %113 = vector.broadcast %cst_34 : f32 to vector<8x128xf32>
    %114 = arith.addf %113, %112 : vector<8x128xf32>
    %115 = arith.divf %113, %114 : vector<8x128xf32>
    %116 = vector.extract_strided_slice %99 {offsets = [0, 256], sizes = [8, 128], strides = [1, 1]} : vector<8x512xf32> to vector<8x128xf32>
    %117 = math.tanh %116 : vector<8x128xf32>
    %118 = vector.extract_strided_slice %99 {offsets = [0, 384], sizes = [8, 128], strides = [1, 1]} : vector<8x512xf32> to vector<8x128xf32>
    %119 = arith.negf %118 : vector<8x128xf32>
    %120 = math.exp %119 : vector<8x128xf32>
    %cst_35 = arith.constant 1.000000e+00 : f32
    %121 = vector.broadcast %cst_35 : f32 to vector<8x128xf32>
    %122 = arith.addf %121, %120 : vector<8x128xf32>
    %123 = arith.divf %121, %122 : vector<8x128xf32>
    %124 = arith.mulf %115, %79 : vector<8x128xf32>
    %125 = arith.mulf %109, %117 : vector<8x128xf32>
    %126 = arith.addf %124, %125 : vector<8x128xf32>
    %127 = math.tanh %126 : vector<8x128xf32>
    %128 = arith.mulf %123, %127 : vector<8x128xf32>
    %129 = vector.extract_strided_slice %103 {offsets = [0, 0], sizes = [8, 128], strides = [1, 1]} : vector<8x512xf32> to vector<8x128xf32>
    %130 = arith.negf %129 : vector<8x128xf32>
    %131 = math.exp %130 : vector<8x128xf32>
    %cst_36 = arith.constant 1.000000e+00 : f32
    %132 = vector.broadcast %cst_36 : f32 to vector<8x128xf32>
    %133 = arith.addf %132, %131 : vector<8x128xf32>
    %134 = arith.divf %132, %133 : vector<8x128xf32>
    %135 = vector.extract_strided_slice %103 {offsets = [0, 128], sizes = [8, 128], strides = [1, 1]} : vector<8x512xf32> to vector<8x128xf32>
    %136 = arith.negf %135 : vector<8x128xf32>
    %137 = math.exp %136 : vector<8x128xf32>
    %cst_37 = arith.constant 1.000000e+00 : f32
    %138 = vector.broadcast %cst_37 : f32 to vector<8x128xf32>
    %139 = arith.addf %138, %137 : vector<8x128xf32>
    %140 = arith.divf %138, %139 : vector<8x128xf32>
    %141 = vector.extract_strided_slice %103 {offsets = [0, 256], sizes = [8, 128], strides = [1, 1]} : vector<8x512xf32> to vector<8x128xf32>
    %142 = math.tanh %141 : vector<8x128xf32>
    %143 = vector.extract_strided_slice %103 {offsets = [0, 384], sizes = [8, 128], strides = [1, 1]} : vector<8x512xf32> to vector<8x128xf32>
    %144 = arith.negf %143 : vector<8x128xf32>
    %145 = math.exp %144 : vector<8x128xf32>
    %cst_38 = arith.constant 1.000000e+00 : f32
    %146 = vector.broadcast %cst_38 : f32 to vector<8x128xf32>
    %147 = arith.addf %146, %145 : vector<8x128xf32>
    %148 = arith.divf %146, %147 : vector<8x128xf32>
    %149 = arith.mulf %140, %85 : vector<8x128xf32>
    %150 = arith.mulf %134, %142 : vector<8x128xf32>
    %151 = arith.addf %149, %150 : vector<8x128xf32>
    %152 = math.tanh %151 : vector<8x128xf32>
    %153 = arith.mulf %148, %152 : vector<8x128xf32>
    %c1_i32 = arith.constant 1 : i32
    %154 = vector.broadcast %c1_i32 : i32 to vector<8x1xi32>
    %155 = arith.cmpi sgt, %0, %154 : vector<8x1xi32>
    %c10_i32 = arith.constant 10 : i32
    %156 = vector.broadcast %c10_i32 : i32 to vector<8x1xi32>
    %157 = arith.cmpi sgt, %0, %156 : vector<8x1xi32>
    %158 = vector.shape_cast %155 : vector<8x1xi1> to vector<8x1xi1>
    %159 = vector.broadcast %158 : vector<8x1xi1> to vector<8x128xi1>
    %160 = arith.select %159, %128, %76 : vector<8x128xi1>, vector<8x128xf32>
    %161 = vector.shape_cast %155 : vector<8x1xi1> to vector<8x1xi1>
    %162 = vector.broadcast %161 : vector<8x1xi1> to vector<8x128xi1>
    %163 = arith.select %162, %126, %79 : vector<8x128xi1>, vector<8x128xf32>
    %164 = vector.shape_cast %157 : vector<8x1xi1> to vector<8x1xi1>
    %165 = vector.broadcast %164 : vector<8x1xi1> to vector<8x128xi1>
    %166 = arith.select %165, %153, %82 : vector<8x128xi1>, vector<8x128xf32>
    %167 = vector.shape_cast %157 : vector<8x1xi1> to vector<8x1xi1>
    %168 = vector.broadcast %167 : vector<8x1xi1> to vector<8x128xi1>
    %169 = arith.select %168, %151, %85 : vector<8x128xi1>, vector<8x128xf32>
    %cst_39 = arith.constant 0.000000e+00 : f32
    %170 = vector.shape_cast %155 : vector<8x1xi1> to vector<8x1xi1>
    %171 = vector.broadcast %170 : vector<8x1xi1> to vector<8x128xi1>
    %172 = vector.broadcast %cst_39 : f32 to vector<8x128xf32>
    %173 = arith.select %171, %128, %172 : vector<8x128xi1>, vector<8x128xf32>
    %c8_40 = arith.constant 8 : index
    %c0_41 = arith.constant 0 : index
    %174 = vector.load %arg6[%c8_40, %c0_41] : memref<96x256xf32, #tpu.memory_space<vmem>>, vector<8x128xf32>
    tpu.vector_store %arg6[%c8_40, %c0_41], %173 {strides = array<i32>} : memref<96x256xf32, #tpu.memory_space<vmem>>, vector<8x128xf32>,
    %cst_42 = arith.constant 0.000000e+00 : f32
    %175 = vector.shape_cast %157 : vector<8x1xi1> to vector<8x1xi1>
    %176 = vector.broadcast %175 : vector<8x1xi1> to vector<8x128xi1>
    %177 = vector.broadcast %cst_42 : f32 to vector<8x128xf32>
    %178 = arith.select %176, %153, %177 : vector<8x128xi1>, vector<8x128xf32>
    %c80_43 = arith.constant 80 : index
    %c128_44 = arith.constant 128 : index
    %179 = vector.load %arg6[%c80_43, %c128_44] : memref<96x256xf32, #tpu.memory_space<vmem>>, vector<8x128xf32>
    tpu.vector_store %arg6[%c80_43, %c128_44], %178 {strides = array<i32>} : memref<96x256xf32, #tpu.memory_space<vmem>>, vector<8x128xf32>,
    %c16 = arith.constant 16 : index
    %c0_45 = arith.constant 0 : index
    %180 = vector.load %arg7[%c16, %c0_45] : memref<96x1024xf32, #tpu.memory_space<vmem>>, vector<8x512xf32>
    %181 = arith.truncf %160 : vector<8x128xf32> to vector<8x128xbf16>
    %cst_46 = arith.constant dense<0.000000e+00> : vector<8x512xf32>
    %182 = tpu.matmul %181, %9, %cst_46 {dimension_numbers = #tpu.dot_dimension_numbers<[1], [0], [0], [1], [0, 0, 1, 1], [], []>} : vector<8x128xbf16>, vector<128x512xbf16>, vector<8x512xf32> -> vector<8x512xf32>
    %183 = arith.addf %180, %182 : vector<8x512xf32>
    %c72 = arith.constant 72 : index
    %c512_47 = arith.constant 512 : index
    %184 = vector.load %arg7[%c72, %c512_47] : memref<96x1024xf32, #tpu.memory_space<vmem>>, vector<8x512xf32>
    %185 = arith.truncf %166 : vector<8x128xf32> to vector<8x128xbf16>
    %cst_48 = arith.constant dense<0.000000e+00> : vector<8x512xf32>
    %186 = tpu.matmul %185, %10, %cst_48 {dimension_numbers = #tpu.dot_dimension_numbers<[1], [0], [0], [1], [0, 0, 1, 1], [], []>} : vector<8x128xbf16>, vector<128x512xbf16>, vector<8x512xf32> -> vector<8x512xf32>
    %187 = arith.addf %184, %186 : vector<8x512xf32>
    %188 = vector.extract_strided_slice %183 {offsets = [0, 0], sizes = [8, 128], strides = [1, 1]} : vector<8x512xf32> to vector<8x128xf32>
    %189 = arith.negf %188 : vector<8x128xf32>
    %190 = math.exp %189 : vector<8x128xf32>
    %cst_49 = arith.constant 1.000000e+00 : f32
    %191 = vector.broadcast %cst_49 : f32 to vector<8x128xf32>
    %192 = arith.addf %191, %190 : vector<8x128xf32>
    %193 = arith.divf %191, %192 : vector<8x128xf32>
    %194 = vector.extract_strided_slice %183 {offsets = [0, 128], sizes = [8, 128], strides = [1, 1]} : vector<8x512xf32> to vector<8x128xf32>
    %195 = arith.negf %194 : vector<8x128xf32>
    %196 = math.exp %195 : vector<8x128xf32>
    %cst_50 = arith.constant 1.000000e+00 : f32
    %197 = vector.broadcast %cst_50 : f32 to vector<8x128xf32>
    %198 = arith.addf %197, %196 : vector<8x128xf32>
    %199 = arith.divf %197, %198 : vector<8x128xf32>
    %200 = vector.extract_strided_slice %183 {offsets = [0, 256], sizes = [8, 128], strides = [1, 1]} : vector<8x512xf32> to vector<8x128xf32>
    %201 = math.tanh %200 : vector<8x128xf32>
    %202 = vector.extract_strided_slice %183 {offsets = [0, 384], sizes = [8, 128], strides = [1, 1]} : vector<8x512xf32> to vector<8x128xf32>
    %203 = arith.negf %202 : vector<8x128xf32>
    %204 = math.exp %203 : vector<8x128xf32>
    %cst_51 = arith.constant 1.000000e+00 : f32
    %205 = vector.broadcast %cst_51 : f32 to vector<8x128xf32>
    %206 = arith.addf %205, %204 : vector<8x128xf32>
    %207 = arith.divf %205, %206 : vector<8x128xf32>
    %208 = arith.mulf %199, %163 : vector<8x128xf32>
    %209 = arith.mulf %193, %201 : vector<8x128xf32>
    %210 = arith.addf %208, %209 : vector<8x128xf32>
    %211 = math.tanh %210 : vector<8x128xf32>
    %212 = arith.mulf %207, %211 : vector<8x128xf32>
    %213 = vector.extract_strided_slice %187 {offsets = [0, 0], sizes = [8, 128], strides = [1, 1]} : vector<8x512xf32> to vector<8x128xf32>
    %214 = arith.negf %213 : vector<8x128xf32>
    %215 = math.exp %214 : vector<8x128xf32>
    %cst_52 = arith.constant 1.000000e+00 : f32
    %216 = vector.broadcast %cst_52 : f32 to vector<8x128xf32>
    %217 = arith.addf %216, %215 : vector<8x128xf32>
    %218 = arith.divf %216, %217 : vector<8x128xf32>
    %219 = vector.extract_strided_slice %187 {offsets = [0, 128], sizes = [8, 128], strides = [1, 1]} : vector<8x512xf32> to vector<8x128xf32>
    %220 = arith.negf %219 : vector<8x128xf32>
    %221 = math.exp %220 : vector<8x128xf32>
    %cst_53 = arith.constant 1.000000e+00 : f32
    %222 = vector.broadcast %cst_53 : f32 to vector<8x128xf32>
    %223 = arith.addf %222, %221 : vector<8x128xf32>
    %224 = arith.divf %222, %223 : vector<8x128xf32>
    %225 = vector.extract_strided_slice %187 {offsets = [0, 256], sizes = [8, 128], strides = [1, 1]} : vector<8x512xf32> to vector<8x128xf32>
    %226 = math.tanh %225 : vector<8x128xf32>
    %227 = vector.extract_strided_slice %187 {offsets = [0, 384], sizes = [8, 128], strides = [1, 1]} : vector<8x512xf32> to vector<8x128xf32>
    %228 = arith.negf %227 : vector<8x128xf32>
    %229 = math.exp %228 : vector<8x128xf32>
    %cst_54 = arith.constant 1.000000e+00 : f32
    %230 = vector.broadcast %cst_54 : f32 to vector<8x128xf32>
    %231 = arith.addf %230, %229 : vector<8x128xf32>
    %232 = arith.divf %230, %231 : vector<8x128xf32>
    %233 = arith.mulf %224, %169 : vector<8x128xf32>
    %234 = arith.mulf %218, %226 : vector<8x128xf32>
    %235 = arith.addf %233, %234 : vector<8x128xf32>
    %236 = math.tanh %235 : vector<8x128xf32>
    %237 = arith.mulf %232, %236 : vector<8x128xf32>
    %c2_i32 = arith.constant 2 : i32
    %238 = vector.broadcast %c2_i32 : i32 to vector<8x1xi32>
    %239 = arith.cmpi sgt, %0, %238 : vector<8x1xi32>
    %c9_i32 = arith.constant 9 : i32
    %240 = vector.broadcast %c9_i32 : i32 to vector<8x1xi32>
    %241 = arith.cmpi sgt, %0, %240 : vector<8x1xi32>
    %242 = vector.shape_cast %239 : vector<8x1xi1> to vector<8x1xi1>
    %243 = vector.broadcast %242 : vector<8x1xi1> to vector<8x128xi1>
    %244 = arith.select %243, %212, %160 : vector<8x128xi1>, vector<8x128xf32>
    %245 = vector.shape_cast %239 : vector<8x1xi1> to vector<8x1xi1>
    %246 = vector.broadcast %245 : vector<8x1xi1> to vector<8x128xi1>
    %247 = arith.select %246, %210, %163 : vector<8x128xi1>, vector<8x128xf32>
    %248 = vector.shape_cast %241 : vector<8x1xi1> to vector<8x1xi1>
    %249 = vector.broadcast %248 : vector<8x1xi1> to vector<8x128xi1>
    %250 = arith.select %249, %237, %166 : vector<8x128xi1>, vector<8x128xf32>
    %251 = vector.shape_cast %241 : vector<8x1xi1> to vector<8x1xi1>
    %252 = vector.broadcast %251 : vector<8x1xi1> to vector<8x128xi1>
    %253 = arith.select %252, %235, %169 : vector<8x128xi1>, vector<8x128xf32>
    %cst_55 = arith.constant 0.000000e+00 : f32
    %254 = vector.shape_cast %239 : vector<8x1xi1> to vector<8x1xi1>
    %255 = vector.broadcast %254 : vector<8x1xi1> to vector<8x128xi1>
    %256 = vector.broadcast %cst_55 : f32 to vector<8x128xf32>
    %257 = arith.select %255, %212, %256 : vector<8x128xi1>, vector<8x128xf32>
    %c16_56 = arith.constant 16 : index
    %c0_57 = arith.constant 0 : index
    %258 = vector.load %arg6[%c16_56, %c0_57] : memref<96x256xf32, #tpu.memory_space<vmem>>, vector<8x128xf32>
    tpu.vector_store %arg6[%c16_56, %c0_57], %257 {strides = array<i32>} : memref<96x256xf32, #tpu.memory_space<vmem>>, vector<8x128xf32>,
    %cst_58 = arith.constant 0.000000e+00 : f32
    %259 = vector.shape_cast %241 : vector<8x1xi1> to vector<8x1xi1>
    %260 = vector.broadcast %259 : vector<8x1xi1> to vector<8x128xi1>
    %261 = vector.broadcast %cst_58 : f32 to vector<8x128xf32>
    %262 = arith.select %260, %237, %261 : vector<8x128xi1>, vector<8x128xf32>
    %c72_59 = arith.constant 72 : index
    %c128_60 = arith.constant 128 : index
    %263 = vector.load %arg6[%c72_59, %c128_60] : memref<96x256xf32, #tpu.memory_space<vmem>>, vector<8x128xf32>
    tpu.vector_store %arg6[%c72_59, %c128_60], %262 {strides = array<i32>} : memref<96x256xf32, #tpu.memory_space<vmem>>, vector<8x128xf32>,
    %c24 = arith.constant 24 : index
    %c0_61 = arith.constant 0 : index
    %264 = vector.load %arg7[%c24, %c0_61] : memref<96x1024xf32, #tpu.memory_space<vmem>>, vector<8x512xf32>
    %265 = arith.truncf %244 : vector<8x128xf32> to vector<8x128xbf16>
    %cst_62 = arith.constant dense<0.000000e+00> : vector<8x512xf32>
    %266 = tpu.matmul %265, %9, %cst_62 {dimension_numbers = #tpu.dot_dimension_numbers<[1], [0], [0], [1], [0, 0, 1, 1], [], []>} : vector<8x128xbf16>, vector<128x512xbf16>, vector<8x512xf32> -> vector<8x512xf32>
    %267 = arith.addf %264, %266 : vector<8x512xf32>
    %c64 = arith.constant 64 : index
    %c512_63 = arith.constant 512 : index
    %268 = vector.load %arg7[%c64, %c512_63] : memref<96x1024xf32, #tpu.memory_space<vmem>>, vector<8x512xf32>
    %269 = arith.truncf %250 : vector<8x128xf32> to vector<8x128xbf16>
    %cst_64 = arith.constant dense<0.000000e+00> : vector<8x512xf32>
    %270 = tpu.matmul %269, %10, %cst_64 {dimension_numbers = #tpu.dot_dimension_numbers<[1], [0], [0], [1], [0, 0, 1, 1], [], []>} : vector<8x128xbf16>, vector<128x512xbf16>, vector<8x512xf32> -> vector<8x512xf32>
    %271 = arith.addf %268, %270 : vector<8x512xf32>
    %272 = vector.extract_strided_slice %267 {offsets = [0, 0], sizes = [8, 128], strides = [1, 1]} : vector<8x512xf32> to vector<8x128xf32>
    %273 = arith.negf %272 : vector<8x128xf32>
    %274 = math.exp %273 : vector<8x128xf32>
    %cst_65 = arith.constant 1.000000e+00 : f32
    %275 = vector.broadcast %cst_65 : f32 to vector<8x128xf32>
    %276 = arith.addf %275, %274 : vector<8x128xf32>
    %277 = arith.divf %275, %276 : vector<8x128xf32>
    %278 = vector.extract_strided_slice %267 {offsets = [0, 128], sizes = [8, 128], strides = [1, 1]} : vector<8x512xf32> to vector<8x128xf32>
    %279 = arith.negf %278 : vector<8x128xf32>
    %280 = math.exp %279 : vector<8x128xf32>
    %cst_66 = arith.constant 1.000000e+00 : f32
    %281 = vector.broadcast %cst_66 : f32 to vector<8x128xf32>
    %282 = arith.addf %281, %280 : vector<8x128xf32>
    %283 = arith.divf %281, %282 : vector<8x128xf32>
    %284 = vector.extract_strided_slice %267 {offsets = [0, 256], sizes = [8, 128], strides = [1, 1]} : vector<8x512xf32> to vector<8x128xf32>
    %285 = math.tanh %284 : vector<8x128xf32>
    %286 = vector.extract_strided_slice %267 {offsets = [0, 384], sizes = [8, 128], strides = [1, 1]} : vector<8x512xf32> to vector<8x128xf32>
    %287 = arith.negf %286 : vector<8x128xf32>
    %288 = math.exp %287 : vector<8x128xf32>
    %cst_67 = arith.constant 1.000000e+00 : f32
    %289 = vector.broadcast %cst_67 : f32 to vector<8x128xf32>
    %290 = arith.addf %289, %288 : vector<8x128xf32>
    %291 = arith.divf %289, %290 : vector<8x128xf32>
    %292 = arith.mulf %283, %247 : vector<8x128xf32>
    %293 = arith.mulf %277, %285 : vector<8x128xf32>
    %294 = arith.addf %292, %293 : vector<8x128xf32>
    %295 = math.tanh %294 : vector<8x128xf32>
    %296 = arith.mulf %291, %295 : vector<8x128xf32>
    %297 = vector.extract_strided_slice %271 {offsets = [0, 0], sizes = [8, 128], strides = [1, 1]} : vector<8x512xf32> to vector<8x128xf32>
    %298 = arith.negf %297 : vector<8x128xf32>
    %299 = math.exp %298 : vector<8x128xf32>
    %cst_68 = arith.constant 1.000000e+00 : f32
    %300 = vector.broadcast %cst_68 : f32 to vector<8x128xf32>
    %301 = arith.addf %300, %299 : vector<8x128xf32>
    %302 = arith.divf %300, %301 : vector<8x128xf32>
    %303 = vector.extract_strided_slice %271 {offsets = [0, 128], sizes = [8, 128], strides = [1, 1]} : vector<8x512xf32> to vector<8x128xf32>
    %304 = arith.negf %303 : vector<8x128xf32>
    %305 = math.exp %304 : vector<8x128xf32>
    %cst_69 = arith.constant 1.000000e+00 : f32
    %306 = vector.broadcast %cst_69 : f32 to vector<8x128xf32>
    %307 = arith.addf %306, %305 : vector<8x128xf32>
    %308 = arith.divf %306, %307 : vector<8x128xf32>
    %309 = vector.extract_strided_slice %271 {offsets = [0, 256], sizes = [8, 128], strides = [1, 1]} : vector<8x512xf32> to vector<8x128xf32>
    %310 = math.tanh %309 : vector<8x128xf32>
    %311 = vector.extract_strided_slice %271 {offsets = [0, 384], sizes = [8, 128], strides = [1, 1]} : vector<8x512xf32> to vector<8x128xf32>
    %312 = arith.negf %311 : vector<8x128xf32>
    %313 = math.exp %312 : vector<8x128xf32>
    %cst_70 = arith.constant 1.000000e+00 : f32
    %314 = vector.broadcast %cst_70 : f32 to vector<8x128xf32>
    %315 = arith.addf %314, %313 : vector<8x128xf32>
    %316 = arith.divf %314, %315 : vector<8x128xf32>
    %317 = arith.mulf %308, %253 : vector<8x128xf32>
    %318 = arith.mulf %302, %310 : vector<8x128xf32>
    %319 = arith.addf %317, %318 : vector<8x128xf32>
    %320 = math.tanh %319 : vector<8x128xf32>
    %321 = arith.mulf %316, %320 : vector<8x128xf32>
    %c3_i32 = arith.constant 3 : i32
    %322 = vector.broadcast %c3_i32 : i32 to vector<8x1xi32>
    %323 = arith.cmpi sgt, %0, %322 : vector<8x1xi32>
    %c8_i32 = arith.constant 8 : i32
    %324 = vector.broadcast %c8_i32 : i32 to vector<8x1xi32>
    %325 = arith.cmpi sgt, %0, %324 : vector<8x1xi32>
    %326 = vector.shape_cast %323 : vector<8x1xi1> to vector<8x1xi1>
    %327 = vector.broadcast %326 : vector<8x1xi1> to vector<8x128xi1>
    %328 = arith.select %327, %296, %244 : vector<8x128xi1>, vector<8x128xf32>
    %329 = vector.shape_cast %323 : vector<8x1xi1> to vector<8x1xi1>
    %330 = vector.broadcast %329 : vector<8x1xi1> to vector<8x128xi1>
    %331 = arith.select %330, %294, %247 : vector<8x128xi1>, vector<8x128xf32>
    %332 = vector.shape_cast %325 : vector<8x1xi1> to vector<8x1xi1>
    %333 = vector.broadcast %332 : vector<8x1xi1> to vector<8x128xi1>
    %334 = arith.select %333, %321, %250 : vector<8x128xi1>, vector<8x128xf32>
    %335 = vector.shape_cast %325 : vector<8x1xi1> to vector<8x1xi1>
    %336 = vector.broadcast %335 : vector<8x1xi1> to vector<8x128xi1>
    %337 = arith.select %336, %319, %253 : vector<8x128xi1>, vector<8x128xf32>
    %cst_71 = arith.constant 0.000000e+00 : f32
    %338 = vector.shape_cast %323 : vector<8x1xi1> to vector<8x1xi1>
    %339 = vector.broadcast %338 : vector<8x1xi1> to vector<8x128xi1>
    %340 = vector.broadcast %cst_71 : f32 to vector<8x128xf32>
    %341 = arith.select %339, %296, %340 : vector<8x128xi1>, vector<8x128xf32>
    %c24_72 = arith.constant 24 : index
    %c0_73 = arith.constant 0 : index
    %342 = vector.load %arg6[%c24_72, %c0_73] : memref<96x256xf32, #tpu.memory_space<vmem>>, vector<8x128xf32>
    tpu.vector_store %arg6[%c24_72, %c0_73], %341 {strides = array<i32>} : memref<96x256xf32, #tpu.memory_space<vmem>>, vector<8x128xf32>,
    %cst_74 = arith.constant 0.000000e+00 : f32
    %343 = vector.shape_cast %325 : vector<8x1xi1> to vector<8x1xi1>
    %344 = vector.broadcast %343 : vector<8x1xi1> to vector<8x128xi1>
    %345 = vector.broadcast %cst_74 : f32 to vector<8x128xf32>
    %346 = arith.select %344, %321, %345 : vector<8x128xi1>, vector<8x128xf32>
    %c64_75 = arith.constant 64 : index
    %c128_76 = arith.constant 128 : index
    %347 = vector.load %arg6[%c64_75, %c128_76] : memref<96x256xf32, #tpu.memory_space<vmem>>, vector<8x128xf32>
    tpu.vector_store %arg6[%c64_75, %c128_76], %346 {strides = array<i32>} : memref<96x256xf32, #tpu.memory_space<vmem>>, vector<8x128xf32>,
    %c32 = arith.constant 32 : index
    %c0_77 = arith.constant 0 : index
    %348 = vector.load %arg7[%c32, %c0_77] : memref<96x1024xf32, #tpu.memory_space<vmem>>, vector<8x512xf32>
    %349 = arith.truncf %328 : vector<8x128xf32> to vector<8x128xbf16>
    %cst_78 = arith.constant dense<0.000000e+00> : vector<8x512xf32>
    %350 = tpu.matmul %349, %9, %cst_78 {dimension_numbers = #tpu.dot_dimension_numbers<[1], [0], [0], [1], [0, 0, 1, 1], [], []>} : vector<8x128xbf16>, vector<128x512xbf16>, vector<8x512xf32> -> vector<8x512xf32>
    %351 = arith.addf %348, %350 : vector<8x512xf32>
    %c56 = arith.constant 56 : index
    %c512_79 = arith.constant 512 : index
    %352 = vector.load %arg7[%c56, %c512_79] : memref<96x1024xf32, #tpu.memory_space<vmem>>, vector<8x512xf32>
    %353 = arith.truncf %334 : vector<8x128xf32> to vector<8x128xbf16>
    %cst_80 = arith.constant dense<0.000000e+00> : vector<8x512xf32>
    %354 = tpu.matmul %353, %10, %cst_80 {dimension_numbers = #tpu.dot_dimension_numbers<[1], [0], [0], [1], [0, 0, 1, 1], [], []>} : vector<8x128xbf16>, vector<128x512xbf16>, vector<8x512xf32> -> vector<8x512xf32>
    %355 = arith.addf %352, %354 : vector<8x512xf32>
    %356 = vector.extract_strided_slice %351 {offsets = [0, 0], sizes = [8, 128], strides = [1, 1]} : vector<8x512xf32> to vector<8x128xf32>
    %357 = arith.negf %356 : vector<8x128xf32>
    %358 = math.exp %357 : vector<8x128xf32>
    %cst_81 = arith.constant 1.000000e+00 : f32
    %359 = vector.broadcast %cst_81 : f32 to vector<8x128xf32>
    %360 = arith.addf %359, %358 : vector<8x128xf32>
    %361 = arith.divf %359, %360 : vector<8x128xf32>
    %362 = vector.extract_strided_slice %351 {offsets = [0, 128], sizes = [8, 128], strides = [1, 1]} : vector<8x512xf32> to vector<8x128xf32>
    %363 = arith.negf %362 : vector<8x128xf32>
    %364 = math.exp %363 : vector<8x128xf32>
    %cst_82 = arith.constant 1.000000e+00 : f32
    %365 = vector.broadcast %cst_82 : f32 to vector<8x128xf32>
    %366 = arith.addf %365, %364 : vector<8x128xf32>
    %367 = arith.divf %365, %366 : vector<8x128xf32>
    %368 = vector.extract_strided_slice %351 {offsets = [0, 256], sizes = [8, 128], strides = [1, 1]} : vector<8x512xf32> to vector<8x128xf32>
    %369 = math.tanh %368 : vector<8x128xf32>
    %370 = vector.extract_strided_slice %351 {offsets = [0, 384], sizes = [8, 128], strides = [1, 1]} : vector<8x512xf32> to vector<8x128xf32>
    %371 = arith.negf %370 : vector<8x128xf32>
    %372 = math.exp %371 : vector<8x128xf32>
    %cst_83 = arith.constant 1.000000e+00 : f32
    %373 = vector.broadcast %cst_83 : f32 to vector<8x128xf32>
    %374 = arith.addf %373, %372 : vector<8x128xf32>
    %375 = arith.divf %373, %374 : vector<8x128xf32>
    %376 = arith.mulf %367, %331 : vector<8x128xf32>
    %377 = arith.mulf %361, %369 : vector<8x128xf32>
    %378 = arith.addf %376, %377 : vector<8x128xf32>
    %379 = math.tanh %378 : vector<8x128xf32>
    %380 = arith.mulf %375, %379 : vector<8x128xf32>
    %381 = vector.extract_strided_slice %355 {offsets = [0, 0], sizes = [8, 128], strides = [1, 1]} : vector<8x512xf32> to vector<8x128xf32>
    %382 = arith.negf %381 : vector<8x128xf32>
    %383 = math.exp %382 : vector<8x128xf32>
    %cst_84 = arith.constant 1.000000e+00 : f32
    %384 = vector.broadcast %cst_84 : f32 to vector<8x128xf32>
    %385 = arith.addf %384, %383 : vector<8x128xf32>
    %386 = arith.divf %384, %385 : vector<8x128xf32>
    %387 = vector.extract_strided_slice %355 {offsets = [0, 128], sizes = [8, 128], strides = [1, 1]} : vector<8x512xf32> to vector<8x128xf32>
    %388 = arith.negf %387 : vector<8x128xf32>
    %389 = math.exp %388 : vector<8x128xf32>
    %cst_85 = arith.constant 1.000000e+00 : f32
    %390 = vector.broadcast %cst_85 : f32 to vector<8x128xf32>
    %391 = arith.addf %390, %389 : vector<8x128xf32>
    %392 = arith.divf %390, %391 : vector<8x128xf32>
    %393 = vector.extract_strided_slice %355 {offsets = [0, 256], sizes = [8, 128], strides = [1, 1]} : vector<8x512xf32> to vector<8x128xf32>
    %394 = math.tanh %393 : vector<8x128xf32>
    %395 = vector.extract_strided_slice %355 {offsets = [0, 384], sizes = [8, 128], strides = [1, 1]} : vector<8x512xf32> to vector<8x128xf32>
    %396 = arith.negf %395 : vector<8x128xf32>
    %397 = math.exp %396 : vector<8x128xf32>
    %cst_86 = arith.constant 1.000000e+00 : f32
    %398 = vector.broadcast %cst_86 : f32 to vector<8x128xf32>
    %399 = arith.addf %398, %397 : vector<8x128xf32>
    %400 = arith.divf %398, %399 : vector<8x128xf32>
    %401 = arith.mulf %392, %337 : vector<8x128xf32>
    %402 = arith.mulf %386, %394 : vector<8x128xf32>
    %403 = arith.addf %401, %402 : vector<8x128xf32>
    %404 = math.tanh %403 : vector<8x128xf32>
    %405 = arith.mulf %400, %404 : vector<8x128xf32>
    %c4_i32 = arith.constant 4 : i32
    %406 = vector.broadcast %c4_i32 : i32 to vector<8x1xi32>
    %407 = arith.cmpi sgt, %0, %406 : vector<8x1xi32>
    %c7_i32 = arith.constant 7 : i32
    %408 = vector.broadcast %c7_i32 : i32 to vector<8x1xi32>
    %409 = arith.cmpi sgt, %0, %408 : vector<8x1xi32>
    %410 = vector.shape_cast %407 : vector<8x1xi1> to vector<8x1xi1>
    %411 = vector.broadcast %410 : vector<8x1xi1> to vector<8x128xi1>
    %412 = arith.select %411, %380, %328 : vector<8x128xi1>, vector<8x128xf32>
    %413 = vector.shape_cast %407 : vector<8x1xi1> to vector<8x1xi1>
    %414 = vector.broadcast %413 : vector<8x1xi1> to vector<8x128xi1>
    %415 = arith.select %414, %378, %331 : vector<8x128xi1>, vector<8x128xf32>
    %416 = vector.shape_cast %409 : vector<8x1xi1> to vector<8x1xi1>
    %417 = vector.broadcast %416 : vector<8x1xi1> to vector<8x128xi1>
    %418 = arith.select %417, %405, %334 : vector<8x128xi1>, vector<8x128xf32>
    %419 = vector.shape_cast %409 : vector<8x1xi1> to vector<8x1xi1>
    %420 = vector.broadcast %419 : vector<8x1xi1> to vector<8x128xi1>
    %421 = arith.select %420, %403, %337 : vector<8x128xi1>, vector<8x128xf32>
    %cst_87 = arith.constant 0.000000e+00 : f32
    %422 = vector.shape_cast %407 : vector<8x1xi1> to vector<8x1xi1>
    %423 = vector.broadcast %422 : vector<8x1xi1> to vector<8x128xi1>
    %424 = vector.broadcast %cst_87 : f32 to vector<8x128xf32>
    %425 = arith.select %423, %380, %424 : vector<8x128xi1>, vector<8x128xf32>
    %c32_88 = arith.constant 32 : index
    %c0_89 = arith.constant 0 : index
    %426 = vector.load %arg6[%c32_88, %c0_89] : memref<96x256xf32, #tpu.memory_space<vmem>>, vector<8x128xf32>
    tpu.vector_store %arg6[%c32_88, %c0_89], %425 {strides = array<i32>} : memref<96x256xf32, #tpu.memory_space<vmem>>, vector<8x128xf32>,
    %cst_90 = arith.constant 0.000000e+00 : f32
    %427 = vector.shape_cast %409 : vector<8x1xi1> to vector<8x1xi1>
    %428 = vector.broadcast %427 : vector<8x1xi1> to vector<8x128xi1>
    %429 = vector.broadcast %cst_90 : f32 to vector<8x128xf32>
    %430 = arith.select %428, %405, %429 : vector<8x128xi1>, vector<8x128xf32>
    %c56_91 = arith.constant 56 : index
    %c128_92 = arith.constant 128 : index
    %431 = vector.load %arg6[%c56_91, %c128_92] : memref<96x256xf32, #tpu.memory_space<vmem>>, vector<8x128xf32>
    tpu.vector_store %arg6[%c56_91, %c128_92], %430 {strides = array<i32>} : memref<96x256xf32, #tpu.memory_space<vmem>>, vector<8x128xf32>,
    %c40 = arith.constant 40 : index
    %c0_93 = arith.constant 0 : index
    %432 = vector.load %arg7[%c40, %c0_93] : memref<96x1024xf32, #tpu.memory_space<vmem>>, vector<8x512xf32>
    %433 = arith.truncf %412 : vector<8x128xf32> to vector<8x128xbf16>
    %cst_94 = arith.constant dense<0.000000e+00> : vector<8x512xf32>
    %434 = tpu.matmul %433, %9, %cst_94 {dimension_numbers = #tpu.dot_dimension_numbers<[1], [0], [0], [1], [0, 0, 1, 1], [], []>} : vector<8x128xbf16>, vector<128x512xbf16>, vector<8x512xf32> -> vector<8x512xf32>
    %435 = arith.addf %432, %434 : vector<8x512xf32>
    %c48 = arith.constant 48 : index
    %c512_95 = arith.constant 512 : index
    %436 = vector.load %arg7[%c48, %c512_95] : memref<96x1024xf32, #tpu.memory_space<vmem>>, vector<8x512xf32>
    %437 = arith.truncf %418 : vector<8x128xf32> to vector<8x128xbf16>
    %cst_96 = arith.constant dense<0.000000e+00> : vector<8x512xf32>
    %438 = tpu.matmul %437, %10, %cst_96 {dimension_numbers = #tpu.dot_dimension_numbers<[1], [0], [0], [1], [0, 0, 1, 1], [], []>} : vector<8x128xbf16>, vector<128x512xbf16>, vector<8x512xf32> -> vector<8x512xf32>
    %439 = arith.addf %436, %438 : vector<8x512xf32>
    %440 = vector.extract_strided_slice %435 {offsets = [0, 0], sizes = [8, 128], strides = [1, 1]} : vector<8x512xf32> to vector<8x128xf32>
    %441 = arith.negf %440 : vector<8x128xf32>
    %442 = math.exp %441 : vector<8x128xf32>
    %cst_97 = arith.constant 1.000000e+00 : f32
    %443 = vector.broadcast %cst_97 : f32 to vector<8x128xf32>
    %444 = arith.addf %443, %442 : vector<8x128xf32>
    %445 = arith.divf %443, %444 : vector<8x128xf32>
    %446 = vector.extract_strided_slice %435 {offsets = [0, 128], sizes = [8, 128], strides = [1, 1]} : vector<8x512xf32> to vector<8x128xf32>
    %447 = arith.negf %446 : vector<8x128xf32>
    %448 = math.exp %447 : vector<8x128xf32>
    %cst_98 = arith.constant 1.000000e+00 : f32
    %449 = vector.broadcast %cst_98 : f32 to vector<8x128xf32>
    %450 = arith.addf %449, %448 : vector<8x128xf32>
    %451 = arith.divf %449, %450 : vector<8x128xf32>
    %452 = vector.extract_strided_slice %435 {offsets = [0, 256], sizes = [8, 128], strides = [1, 1]} : vector<8x512xf32> to vector<8x128xf32>
    %453 = math.tanh %452 : vector<8x128xf32>
    %454 = vector.extract_strided_slice %435 {offsets = [0, 384], sizes = [8, 128], strides = [1, 1]} : vector<8x512xf32> to vector<8x128xf32>
    %455 = arith.negf %454 : vector<8x128xf32>
    %456 = math.exp %455 : vector<8x128xf32>
    %cst_99 = arith.constant 1.000000e+00 : f32
    %457 = vector.broadcast %cst_99 : f32 to vector<8x128xf32>
    %458 = arith.addf %457, %456 : vector<8x128xf32>
    %459 = arith.divf %457, %458 : vector<8x128xf32>
    %460 = arith.mulf %451, %415 : vector<8x128xf32>
    %461 = arith.mulf %445, %453 : vector<8x128xf32>
    %462 = arith.addf %460, %461 : vector<8x128xf32>
    %463 = math.tanh %462 : vector<8x128xf32>
    %464 = arith.mulf %459, %463 : vector<8x128xf32>
    %465 = vector.extract_strided_slice %439 {offsets = [0, 0], sizes = [8, 128], strides = [1, 1]} : vector<8x512xf32> to vector<8x128xf32>
    %466 = arith.negf %465 : vector<8x128xf32>
    %467 = math.exp %466 : vector<8x128xf32>
    %cst_100 = arith.constant 1.000000e+00 : f32
    %468 = vector.broadcast %cst_100 : f32 to vector<8x128xf32>
    %469 = arith.addf %468, %467 : vector<8x128xf32>
    %470 = arith.divf %468, %469 : vector<8x128xf32>
    %471 = vector.extract_strided_slice %439 {offsets = [0, 128], sizes = [8, 128], strides = [1, 1]} : vector<8x512xf32> to vector<8x128xf32>
    %472 = arith.negf %471 : vector<8x128xf32>
    %473 = math.exp %472 : vector<8x128xf32>
    %cst_101 = arith.constant 1.000000e+00 : f32
    %474 = vector.broadcast %cst_101 : f32 to vector<8x128xf32>
    %475 = arith.addf %474, %473 : vector<8x128xf32>
    %476 = arith.divf %474, %475 : vector<8x128xf32>
    %477 = vector.extract_strided_slice %439 {offsets = [0, 256], sizes = [8, 128], strides = [1, 1]} : vector<8x512xf32> to vector<8x128xf32>
    %478 = math.tanh %477 : vector<8x128xf32>
    %479 = vector.extract_strided_slice %439 {offsets = [0, 384], sizes = [8, 128], strides = [1, 1]} : vector<8x512xf32> to vector<8x128xf32>
    %480 = arith.negf %479 : vector<8x128xf32>
    %481 = math.exp %480 : vector<8x128xf32>
    %cst_102 = arith.constant 1.000000e+00 : f32
    %482 = vector.broadcast %cst_102 : f32 to vector<8x128xf32>
    %483 = arith.addf %482, %481 : vector<8x128xf32>
    %484 = arith.divf %482, %483 : vector<8x128xf32>
    %485 = arith.mulf %476, %421 : vector<8x128xf32>
    %486 = arith.mulf %470, %478 : vector<8x128xf32>
    %487 = arith.addf %485, %486 : vector<8x128xf32>
    %488 = math.tanh %487 : vector<8x128xf32>
    %489 = arith.mulf %484, %488 : vector<8x128xf32>
    %c5_i32 = arith.constant 5 : i32
    %490 = vector.broadcast %c5_i32 : i32 to vector<8x1xi32>
    %491 = arith.cmpi sgt, %0, %490 : vector<8x1xi32>
    %c6_i32 = arith.constant 6 : i32
    %492 = vector.broadcast %c6_i32 : i32 to vector<8x1xi32>
    %493 = arith.cmpi sgt, %0, %492 : vector<8x1xi32>
    %494 = vector.shape_cast %491 : vector<8x1xi1> to vector<8x1xi1>
    %495 = vector.broadcast %494 : vector<8x1xi1> to vector<8x128xi1>
    %496 = arith.select %495, %464, %412 : vector<8x128xi1>, vector<8x128xf32>
    %497 = vector.shape_cast %491 : vector<8x1xi1> to vector<8x1xi1>
    %498 = vector.broadcast %497 : vector<8x1xi1> to vector<8x128xi1>
    %499 = arith.select %498, %462, %415 : vector<8x128xi1>, vector<8x128xf32>
    %500 = vector.shape_cast %493 : vector<8x1xi1> to vector<8x1xi1>
    %501 = vector.broadcast %500 : vector<8x1xi1> to vector<8x128xi1>
    %502 = arith.select %501, %489, %418 : vector<8x128xi1>, vector<8x128xf32>
    %503 = vector.shape_cast %493 : vector<8x1xi1> to vector<8x1xi1>
    %504 = vector.broadcast %503 : vector<8x1xi1> to vector<8x128xi1>
    %505 = arith.select %504, %487, %421 : vector<8x128xi1>, vector<8x128xf32>
    %cst_103 = arith.constant 0.000000e+00 : f32
    %506 = vector.shape_cast %491 : vector<8x1xi1> to vector<8x1xi1>
    %507 = vector.broadcast %506 : vector<8x1xi1> to vector<8x128xi1>
    %508 = vector.broadcast %cst_103 : f32 to vector<8x128xf32>
    %509 = arith.select %507, %464, %508 : vector<8x128xi1>, vector<8x128xf32>
    %c40_104 = arith.constant 40 : index
    %c0_105 = arith.constant 0 : index
    %510 = vector.load %arg6[%c40_104, %c0_105] : memref<96x256xf32, #tpu.memory_space<vmem>>, vector<8x128xf32>
    tpu.vector_store %arg6[%c40_104, %c0_105], %509 {strides = array<i32>} : memref<96x256xf32, #tpu.memory_space<vmem>>, vector<8x128xf32>,
    %cst_106 = arith.constant 0.000000e+00 : f32
    %511 = vector.shape_cast %493 : vector<8x1xi1> to vector<8x1xi1>
    %512 = vector.broadcast %511 : vector<8x1xi1> to vector<8x128xi1>
    %513 = vector.broadcast %cst_106 : f32 to vector<8x128xf32>
    %514 = arith.select %512, %489, %513 : vector<8x128xi1>, vector<8x128xf32>
    %c48_107 = arith.constant 48 : index
    %c128_108 = arith.constant 128 : index
    %515 = vector.load %arg6[%c48_107, %c128_108] : memref<96x256xf32, #tpu.memory_space<vmem>>, vector<8x128xf32>
    tpu.vector_store %arg6[%c48_107, %c128_108], %514 {strides = array<i32>} : memref<96x256xf32, #tpu.memory_space<vmem>>, vector<8x128xf32>,
    %c48_109 = arith.constant 48 : index
    %c0_110 = arith.constant 0 : index
    %516 = vector.load %arg7[%c48_109, %c0_110] : memref<96x1024xf32, #tpu.memory_space<vmem>>, vector<8x512xf32>
    %517 = arith.truncf %496 : vector<8x128xf32> to vector<8x128xbf16>
    %cst_111 = arith.constant dense<0.000000e+00> : vector<8x512xf32>
    %518 = tpu.matmul %517, %9, %cst_111 {dimension_numbers = #tpu.dot_dimension_numbers<[1], [0], [0], [1], [0, 0, 1, 1], [], []>} : vector<8x128xbf16>, vector<128x512xbf16>, vector<8x512xf32> -> vector<8x512xf32>
    %519 = arith.addf %516, %518 : vector<8x512xf32>
    %c40_112 = arith.constant 40 : index
    %c512_113 = arith.constant 512 : index
    %520 = vector.load %arg7[%c40_112, %c512_113] : memref<96x1024xf32, #tpu.memory_space<vmem>>, vector<8x512xf32>
    %521 = arith.truncf %502 : vector<8x128xf32> to vector<8x128xbf16>
    %cst_114 = arith.constant dense<0.000000e+00> : vector<8x512xf32>
    %522 = tpu.matmul %521, %10, %cst_114 {dimension_numbers = #tpu.dot_dimension_numbers<[1], [0], [0], [1], [0, 0, 1, 1], [], []>} : vector<8x128xbf16>, vector<128x512xbf16>, vector<8x512xf32> -> vector<8x512xf32>
    %523 = arith.addf %520, %522 : vector<8x512xf32>
    %524 = vector.extract_strided_slice %519 {offsets = [0, 0], sizes = [8, 128], strides = [1, 1]} : vector<8x512xf32> to vector<8x128xf32>
    %525 = arith.negf %524 : vector<8x128xf32>
    %526 = math.exp %525 : vector<8x128xf32>
    %cst_115 = arith.constant 1.000000e+00 : f32
    %527 = vector.broadcast %cst_115 : f32 to vector<8x128xf32>
    %528 = arith.addf %527, %526 : vector<8x128xf32>
    %529 = arith.divf %527, %528 : vector<8x128xf32>
    %530 = vector.extract_strided_slice %519 {offsets = [0, 128], sizes = [8, 128], strides = [1, 1]} : vector<8x512xf32> to vector<8x128xf32>
    %531 = arith.negf %530 : vector<8x128xf32>
    %532 = math.exp %531 : vector<8x128xf32>
    %cst_116 = arith.constant 1.000000e+00 : f32
    %533 = vector.broadcast %cst_116 : f32 to vector<8x128xf32>
    %534 = arith.addf %533, %532 : vector<8x128xf32>
    %535 = arith.divf %533, %534 : vector<8x128xf32>
    %536 = vector.extract_strided_slice %519 {offsets = [0, 256], sizes = [8, 128], strides = [1, 1]} : vector<8x512xf32> to vector<8x128xf32>
    %537 = math.tanh %536 : vector<8x128xf32>
    %538 = vector.extract_strided_slice %519 {offsets = [0, 384], sizes = [8, 128], strides = [1, 1]} : vector<8x512xf32> to vector<8x128xf32>
    %539 = arith.negf %538 : vector<8x128xf32>
    %540 = math.exp %539 : vector<8x128xf32>
    %cst_117 = arith.constant 1.000000e+00 : f32
    %541 = vector.broadcast %cst_117 : f32 to vector<8x128xf32>
    %542 = arith.addf %541, %540 : vector<8x128xf32>
    %543 = arith.divf %541, %542 : vector<8x128xf32>
    %544 = arith.mulf %535, %499 : vector<8x128xf32>
    %545 = arith.mulf %529, %537 : vector<8x128xf32>
    %546 = arith.addf %544, %545 : vector<8x128xf32>
    %547 = math.tanh %546 : vector<8x128xf32>
    %548 = arith.mulf %543, %547 : vector<8x128xf32>
    %549 = vector.extract_strided_slice %523 {offsets = [0, 0], sizes = [8, 128], strides = [1, 1]} : vector<8x512xf32> to vector<8x128xf32>
    %550 = arith.negf %549 : vector<8x128xf32>
    %551 = math.exp %550 : vector<8x128xf32>
    %cst_118 = arith.constant 1.000000e+00 : f32
    %552 = vector.broadcast %cst_118 : f32 to vector<8x128xf32>
    %553 = arith.addf %552, %551 : vector<8x128xf32>
    %554 = arith.divf %552, %553 : vector<8x128xf32>
    %555 = vector.extract_strided_slice %523 {offsets = [0, 128], sizes = [8, 128], strides = [1, 1]} : vector<8x512xf32> to vector<8x128xf32>
    %556 = arith.negf %555 : vector<8x128xf32>
    %557 = math.exp %556 : vector<8x128xf32>
    %cst_119 = arith.constant 1.000000e+00 : f32
    %558 = vector.broadcast %cst_119 : f32 to vector<8x128xf32>
    %559 = arith.addf %558, %557 : vector<8x128xf32>
    %560 = arith.divf %558, %559 : vector<8x128xf32>
    %561 = vector.extract_strided_slice %523 {offsets = [0, 256], sizes = [8, 128], strides = [1, 1]} : vector<8x512xf32> to vector<8x128xf32>
    %562 = math.tanh %561 : vector<8x128xf32>
    %563 = vector.extract_strided_slice %523 {offsets = [0, 384], sizes = [8, 128], strides = [1, 1]} : vector<8x512xf32> to vector<8x128xf32>
    %564 = arith.negf %563 : vector<8x128xf32>
    %565 = math.exp %564 : vector<8x128xf32>
    %cst_120 = arith.constant 1.000000e+00 : f32
    %566 = vector.broadcast %cst_120 : f32 to vector<8x128xf32>
    %567 = arith.addf %566, %565 : vector<8x128xf32>
    %568 = arith.divf %566, %567 : vector<8x128xf32>
    %569 = arith.mulf %560, %505 : vector<8x128xf32>
    %570 = arith.mulf %554, %562 : vector<8x128xf32>
    %571 = arith.addf %569, %570 : vector<8x128xf32>
    %572 = math.tanh %571 : vector<8x128xf32>
    %573 = arith.mulf %568, %572 : vector<8x128xf32>
    %c6_i32_121 = arith.constant 6 : i32
    %574 = vector.broadcast %c6_i32_121 : i32 to vector<8x1xi32>
    %575 = arith.cmpi sgt, %0, %574 : vector<8x1xi32>
    %c5_i32_122 = arith.constant 5 : i32
    %576 = vector.broadcast %c5_i32_122 : i32 to vector<8x1xi32>
    %577 = arith.cmpi sgt, %0, %576 : vector<8x1xi32>
    %578 = vector.shape_cast %575 : vector<8x1xi1> to vector<8x1xi1>
    %579 = vector.broadcast %578 : vector<8x1xi1> to vector<8x128xi1>
    %580 = arith.select %579, %548, %496 : vector<8x128xi1>, vector<8x128xf32>
    %581 = vector.shape_cast %575 : vector<8x1xi1> to vector<8x1xi1>
    %582 = vector.broadcast %581 : vector<8x1xi1> to vector<8x128xi1>
    %583 = arith.select %582, %546, %499 : vector<8x128xi1>, vector<8x128xf32>
    %584 = vector.shape_cast %577 : vector<8x1xi1> to vector<8x1xi1>
    %585 = vector.broadcast %584 : vector<8x1xi1> to vector<8x128xi1>
    %586 = arith.select %585, %573, %502 : vector<8x128xi1>, vector<8x128xf32>
    %587 = vector.shape_cast %577 : vector<8x1xi1> to vector<8x1xi1>
    %588 = vector.broadcast %587 : vector<8x1xi1> to vector<8x128xi1>
    %589 = arith.select %588, %571, %505 : vector<8x128xi1>, vector<8x128xf32>
    %cst_123 = arith.constant 0.000000e+00 : f32
    %590 = vector.shape_cast %575 : vector<8x1xi1> to vector<8x1xi1>
    %591 = vector.broadcast %590 : vector<8x1xi1> to vector<8x128xi1>
    %592 = vector.broadcast %cst_123 : f32 to vector<8x128xf32>
    %593 = arith.select %591, %548, %592 : vector<8x128xi1>, vector<8x128xf32>
    %c48_124 = arith.constant 48 : index
    %c0_125 = arith.constant 0 : index
    %594 = vector.load %arg6[%c48_124, %c0_125] : memref<96x256xf32, #tpu.memory_space<vmem>>, vector<8x128xf32>
    tpu.vector_store %arg6[%c48_124, %c0_125], %593 {strides = array<i32>} : memref<96x256xf32, #tpu.memory_space<vmem>>, vector<8x128xf32>,
    %cst_126 = arith.constant 0.000000e+00 : f32
    %595 = vector.shape_cast %577 : vector<8x1xi1> to vector<8x1xi1>
    %596 = vector.broadcast %595 : vector<8x1xi1> to vector<8x128xi1>
    %597 = vector.broadcast %cst_126 : f32 to vector<8x128xf32>
    %598 = arith.select %596, %573, %597 : vector<8x128xi1>, vector<8x128xf32>
    %c40_127 = arith.constant 40 : index
    %c128_128 = arith.constant 128 : index
    %599 = vector.load %arg6[%c40_127, %c128_128] : memref<96x256xf32, #tpu.memory_space<vmem>>, vector<8x128xf32>
    tpu.vector_store %arg6[%c40_127, %c128_128], %598 {strides = array<i32>} : memref<96x256xf32, #tpu.memory_space<vmem>>, vector<8x128xf32>,
    %c56_129 = arith.constant 56 : index
    %c0_130 = arith.constant 0 : index
    %600 = vector.load %arg7[%c56_129, %c0_130] : memref<96x1024xf32, #tpu.memory_space<vmem>>, vector<8x512xf32>
    %601 = arith.truncf %580 : vector<8x128xf32> to vector<8x128xbf16>
    %cst_131 = arith.constant dense<0.000000e+00> : vector<8x512xf32>
    %602 = tpu.matmul %601, %9, %cst_131 {dimension_numbers = #tpu.dot_dimension_numbers<[1], [0], [0], [1], [0, 0, 1, 1], [], []>} : vector<8x128xbf16>, vector<128x512xbf16>, vector<8x512xf32> -> vector<8x512xf32>
    %603 = arith.addf %600, %602 : vector<8x512xf32>
    %c32_132 = arith.constant 32 : index
    %c512_133 = arith.constant 512 : index
    %604 = vector.load %arg7[%c32_132, %c512_133] : memref<96x1024xf32, #tpu.memory_space<vmem>>, vector<8x512xf32>
    %605 = arith.truncf %586 : vector<8x128xf32> to vector<8x128xbf16>
    %cst_134 = arith.constant dense<0.000000e+00> : vector<8x512xf32>
    %606 = tpu.matmul %605, %10, %cst_134 {dimension_numbers = #tpu.dot_dimension_numbers<[1], [0], [0], [1], [0, 0, 1, 1], [], []>} : vector<8x128xbf16>, vector<128x512xbf16>, vector<8x512xf32> -> vector<8x512xf32>
    %607 = arith.addf %604, %606 : vector<8x512xf32>
    %608 = vector.extract_strided_slice %603 {offsets = [0, 0], sizes = [8, 128], strides = [1, 1]} : vector<8x512xf32> to vector<8x128xf32>
    %609 = arith.negf %608 : vector<8x128xf32>
    %610 = math.exp %609 : vector<8x128xf32>
    %cst_135 = arith.constant 1.000000e+00 : f32
    %611 = vector.broadcast %cst_135 : f32 to vector<8x128xf32>
    %612 = arith.addf %611, %610 : vector<8x128xf32>
    %613 = arith.divf %611, %612 : vector<8x128xf32>
    %614 = vector.extract_strided_slice %603 {offsets = [0, 128], sizes = [8, 128], strides = [1, 1]} : vector<8x512xf32> to vector<8x128xf32>
    %615 = arith.negf %614 : vector<8x128xf32>
    %616 = math.exp %615 : vector<8x128xf32>
    %cst_136 = arith.constant 1.000000e+00 : f32
    %617 = vector.broadcast %cst_136 : f32 to vector<8x128xf32>
    %618 = arith.addf %617, %616 : vector<8x128xf32>
    %619 = arith.divf %617, %618 : vector<8x128xf32>
    %620 = vector.extract_strided_slice %603 {offsets = [0, 256], sizes = [8, 128], strides = [1, 1]} : vector<8x512xf32> to vector<8x128xf32>
    %621 = math.tanh %620 : vector<8x128xf32>
    %622 = vector.extract_strided_slice %603 {offsets = [0, 384], sizes = [8, 128], strides = [1, 1]} : vector<8x512xf32> to vector<8x128xf32>
    %623 = arith.negf %622 : vector<8x128xf32>
    %624 = math.exp %623 : vector<8x128xf32>
    %cst_137 = arith.constant 1.000000e+00 : f32
    %625 = vector.broadcast %cst_137 : f32 to vector<8x128xf32>
    %626 = arith.addf %625, %624 : vector<8x128xf32>
    %627 = arith.divf %625, %626 : vector<8x128xf32>
    %628 = arith.mulf %619, %583 : vector<8x128xf32>
    %629 = arith.mulf %613, %621 : vector<8x128xf32>
    %630 = arith.addf %628, %629 : vector<8x128xf32>
    %631 = math.tanh %630 : vector<8x128xf32>
    %632 = arith.mulf %627, %631 : vector<8x128xf32>
    %633 = vector.extract_strided_slice %607 {offsets = [0, 0], sizes = [8, 128], strides = [1, 1]} : vector<8x512xf32> to vector<8x128xf32>
    %634 = arith.negf %633 : vector<8x128xf32>
    %635 = math.exp %634 : vector<8x128xf32>
    %cst_138 = arith.constant 1.000000e+00 : f32
    %636 = vector.broadcast %cst_138 : f32 to vector<8x128xf32>
    %637 = arith.addf %636, %635 : vector<8x128xf32>
    %638 = arith.divf %636, %637 : vector<8x128xf32>
    %639 = vector.extract_strided_slice %607 {offsets = [0, 128], sizes = [8, 128], strides = [1, 1]} : vector<8x512xf32> to vector<8x128xf32>
    %640 = arith.negf %639 : vector<8x128xf32>
    %641 = math.exp %640 : vector<8x128xf32>
    %cst_139 = arith.constant 1.000000e+00 : f32
    %642 = vector.broadcast %cst_139 : f32 to vector<8x128xf32>
    %643 = arith.addf %642, %641 : vector<8x128xf32>
    %644 = arith.divf %642, %643 : vector<8x128xf32>
    %645 = vector.extract_strided_slice %607 {offsets = [0, 256], sizes = [8, 128], strides = [1, 1]} : vector<8x512xf32> to vector<8x128xf32>
    %646 = math.tanh %645 : vector<8x128xf32>
    %647 = vector.extract_strided_slice %607 {offsets = [0, 384], sizes = [8, 128], strides = [1, 1]} : vector<8x512xf32> to vector<8x128xf32>
    %648 = arith.negf %647 : vector<8x128xf32>
    %649 = math.exp %648 : vector<8x128xf32>
    %cst_140 = arith.constant 1.000000e+00 : f32
    %650 = vector.broadcast %cst_140 : f32 to vector<8x128xf32>
    %651 = arith.addf %650, %649 : vector<8x128xf32>
    %652 = arith.divf %650, %651 : vector<8x128xf32>
    %653 = arith.mulf %644, %589 : vector<8x128xf32>
    %654 = arith.mulf %638, %646 : vector<8x128xf32>
    %655 = arith.addf %653, %654 : vector<8x128xf32>
    %656 = math.tanh %655 : vector<8x128xf32>
    %657 = arith.mulf %652, %656 : vector<8x128xf32>
    %c7_i32_141 = arith.constant 7 : i32
    %658 = vector.broadcast %c7_i32_141 : i32 to vector<8x1xi32>
    %659 = arith.cmpi sgt, %0, %658 : vector<8x1xi32>
    %c4_i32_142 = arith.constant 4 : i32
    %660 = vector.broadcast %c4_i32_142 : i32 to vector<8x1xi32>
    %661 = arith.cmpi sgt, %0, %660 : vector<8x1xi32>
    %662 = vector.shape_cast %659 : vector<8x1xi1> to vector<8x1xi1>
    %663 = vector.broadcast %662 : vector<8x1xi1> to vector<8x128xi1>
    %664 = arith.select %663, %632, %580 : vector<8x128xi1>, vector<8x128xf32>
    %665 = vector.shape_cast %659 : vector<8x1xi1> to vector<8x1xi1>
    %666 = vector.broadcast %665 : vector<8x1xi1> to vector<8x128xi1>
    %667 = arith.select %666, %630, %583 : vector<8x128xi1>, vector<8x128xf32>
    %668 = vector.shape_cast %661 : vector<8x1xi1> to vector<8x1xi1>
    %669 = vector.broadcast %668 : vector<8x1xi1> to vector<8x128xi1>
    %670 = arith.select %669, %657, %586 : vector<8x128xi1>, vector<8x128xf32>
    %671 = vector.shape_cast %661 : vector<8x1xi1> to vector<8x1xi1>
    %672 = vector.broadcast %671 : vector<8x1xi1> to vector<8x128xi1>
    %673 = arith.select %672, %655, %589 : vector<8x128xi1>, vector<8x128xf32>
    %cst_143 = arith.constant 0.000000e+00 : f32
    %674 = vector.shape_cast %659 : vector<8x1xi1> to vector<8x1xi1>
    %675 = vector.broadcast %674 : vector<8x1xi1> to vector<8x128xi1>
    %676 = vector.broadcast %cst_143 : f32 to vector<8x128xf32>
    %677 = arith.select %675, %632, %676 : vector<8x128xi1>, vector<8x128xf32>
    %c56_144 = arith.constant 56 : index
    %c0_145 = arith.constant 0 : index
    %678 = vector.load %arg6[%c56_144, %c0_145] : memref<96x256xf32, #tpu.memory_space<vmem>>, vector<8x128xf32>
    tpu.vector_store %arg6[%c56_144, %c0_145], %677 {strides = array<i32>} : memref<96x256xf32, #tpu.memory_space<vmem>>, vector<8x128xf32>,
    %cst_146 = arith.constant 0.000000e+00 : f32
    %679 = vector.shape_cast %661 : vector<8x1xi1> to vector<8x1xi1>
    %680 = vector.broadcast %679 : vector<8x1xi1> to vector<8x128xi1>
    %681 = vector.broadcast %cst_146 : f32 to vector<8x128xf32>
    %682 = arith.select %680, %657, %681 : vector<8x128xi1>, vector<8x128xf32>
    %c32_147 = arith.constant 32 : index
    %c128_148 = arith.constant 128 : index
    %683 = vector.load %arg6[%c32_147, %c128_148] : memref<96x256xf32, #tpu.memory_space<vmem>>, vector<8x128xf32>
    tpu.vector_store %arg6[%c32_147, %c128_148], %682 {strides = array<i32>} : memref<96x256xf32, #tpu.memory_space<vmem>>, vector<8x128xf32>,
    %c64_149 = arith.constant 64 : index
    %c0_150 = arith.constant 0 : index
    %684 = vector.load %arg7[%c64_149, %c0_150] : memref<96x1024xf32, #tpu.memory_space<vmem>>, vector<8x512xf32>
    %685 = arith.truncf %664 : vector<8x128xf32> to vector<8x128xbf16>
    %cst_151 = arith.constant dense<0.000000e+00> : vector<8x512xf32>
    %686 = tpu.matmul %685, %9, %cst_151 {dimension_numbers = #tpu.dot_dimension_numbers<[1], [0], [0], [1], [0, 0, 1, 1], [], []>} : vector<8x128xbf16>, vector<128x512xbf16>, vector<8x512xf32> -> vector<8x512xf32>
    %687 = arith.addf %684, %686 : vector<8x512xf32>
    %c24_152 = arith.constant 24 : index
    %c512_153 = arith.constant 512 : index
    %688 = vector.load %arg7[%c24_152, %c512_153] : memref<96x1024xf32, #tpu.memory_space<vmem>>, vector<8x512xf32>
    %689 = arith.truncf %670 : vector<8x128xf32> to vector<8x128xbf16>
    %cst_154 = arith.constant dense<0.000000e+00> : vector<8x512xf32>
    %690 = tpu.matmul %689, %10, %cst_154 {dimension_numbers = #tpu.dot_dimension_numbers<[1], [0], [0], [1], [0, 0, 1, 1], [], []>} : vector<8x128xbf16>, vector<128x512xbf16>, vector<8x512xf32> -> vector<8x512xf32>
    %691 = arith.addf %688, %690 : vector<8x512xf32>
    %692 = vector.extract_strided_slice %687 {offsets = [0, 0], sizes = [8, 128], strides = [1, 1]} : vector<8x512xf32> to vector<8x128xf32>
    %693 = arith.negf %692 : vector<8x128xf32>
    %694 = math.exp %693 : vector<8x128xf32>
    %cst_155 = arith.constant 1.000000e+00 : f32
    %695 = vector.broadcast %cst_155 : f32 to vector<8x128xf32>
    %696 = arith.addf %695, %694 : vector<8x128xf32>
    %697 = arith.divf %695, %696 : vector<8x128xf32>
    %698 = vector.extract_strided_slice %687 {offsets = [0, 128], sizes = [8, 128], strides = [1, 1]} : vector<8x512xf32> to vector<8x128xf32>
    %699 = arith.negf %698 : vector<8x128xf32>
    %700 = math.exp %699 : vector<8x128xf32>
    %cst_156 = arith.constant 1.000000e+00 : f32
    %701 = vector.broadcast %cst_156 : f32 to vector<8x128xf32>
    %702 = arith.addf %701, %700 : vector<8x128xf32>
    %703 = arith.divf %701, %702 : vector<8x128xf32>
    %704 = vector.extract_strided_slice %687 {offsets = [0, 256], sizes = [8, 128], strides = [1, 1]} : vector<8x512xf32> to vector<8x128xf32>
    %705 = math.tanh %704 : vector<8x128xf32>
    %706 = vector.extract_strided_slice %687 {offsets = [0, 384], sizes = [8, 128], strides = [1, 1]} : vector<8x512xf32> to vector<8x128xf32>
    %707 = arith.negf %706 : vector<8x128xf32>
    %708 = math.exp %707 : vector<8x128xf32>
    %cst_157 = arith.constant 1.000000e+00 : f32
    %709 = vector.broadcast %cst_157 : f32 to vector<8x128xf32>
    %710 = arith.addf %709, %708 : vector<8x128xf32>
    %711 = arith.divf %709, %710 : vector<8x128xf32>
    %712 = arith.mulf %703, %667 : vector<8x128xf32>
    %713 = arith.mulf %697, %705 : vector<8x128xf32>
    %714 = arith.addf %712, %713 : vector<8x128xf32>
    %715 = math.tanh %714 : vector<8x128xf32>
    %716 = arith.mulf %711, %715 : vector<8x128xf32>
    %717 = vector.extract_strided_slice %691 {offsets = [0, 0], sizes = [8, 128], strides = [1, 1]} : vector<8x512xf32> to vector<8x128xf32>
    %718 = arith.negf %717 : vector<8x128xf32>
    %719 = math.exp %718 : vector<8x128xf32>
    %cst_158 = arith.constant 1.000000e+00 : f32
    %720 = vector.broadcast %cst_158 : f32 to vector<8x128xf32>
    %721 = arith.addf %720, %719 : vector<8x128xf32>
    %722 = arith.divf %720, %721 : vector<8x128xf32>
    %723 = vector.extract_strided_slice %691 {offsets = [0, 128], sizes = [8, 128], strides = [1, 1]} : vector<8x512xf32> to vector<8x128xf32>
    %724 = arith.negf %723 : vector<8x128xf32>
    %725 = math.exp %724 : vector<8x128xf32>
    %cst_159 = arith.constant 1.000000e+00 : f32
    %726 = vector.broadcast %cst_159 : f32 to vector<8x128xf32>
    %727 = arith.addf %726, %725 : vector<8x128xf32>
    %728 = arith.divf %726, %727 : vector<8x128xf32>
    %729 = vector.extract_strided_slice %691 {offsets = [0, 256], sizes = [8, 128], strides = [1, 1]} : vector<8x512xf32> to vector<8x128xf32>
    %730 = math.tanh %729 : vector<8x128xf32>
    %731 = vector.extract_strided_slice %691 {offsets = [0, 384], sizes = [8, 128], strides = [1, 1]} : vector<8x512xf32> to vector<8x128xf32>
    %732 = arith.negf %731 : vector<8x128xf32>
    %733 = math.exp %732 : vector<8x128xf32>
    %cst_160 = arith.constant 1.000000e+00 : f32
    %734 = vector.broadcast %cst_160 : f32 to vector<8x128xf32>
    %735 = arith.addf %734, %733 : vector<8x128xf32>
    %736 = arith.divf %734, %735 : vector<8x128xf32>
    %737 = arith.mulf %728, %673 : vector<8x128xf32>
    %738 = arith.mulf %722, %730 : vector<8x128xf32>
    %739 = arith.addf %737, %738 : vector<8x128xf32>
    %740 = math.tanh %739 : vector<8x128xf32>
    %741 = arith.mulf %736, %740 : vector<8x128xf32>
    %c8_i32_161 = arith.constant 8 : i32
    %742 = vector.broadcast %c8_i32_161 : i32 to vector<8x1xi32>
    %743 = arith.cmpi sgt, %0, %742 : vector<8x1xi32>
    %c3_i32_162 = arith.constant 3 : i32
    %744 = vector.broadcast %c3_i32_162 : i32 to vector<8x1xi32>
    %745 = arith.cmpi sgt, %0, %744 : vector<8x1xi32>
    %746 = vector.shape_cast %743 : vector<8x1xi1> to vector<8x1xi1>
    %747 = vector.broadcast %746 : vector<8x1xi1> to vector<8x128xi1>
    %748 = arith.select %747, %716, %664 : vector<8x128xi1>, vector<8x128xf32>
    %749 = vector.shape_cast %743 : vector<8x1xi1> to vector<8x1xi1>
    %750 = vector.broadcast %749 : vector<8x1xi1> to vector<8x128xi1>
    %751 = arith.select %750, %714, %667 : vector<8x128xi1>, vector<8x128xf32>
    %752 = vector.shape_cast %745 : vector<8x1xi1> to vector<8x1xi1>
    %753 = vector.broadcast %752 : vector<8x1xi1> to vector<8x128xi1>
    %754 = arith.select %753, %741, %670 : vector<8x128xi1>, vector<8x128xf32>
    %755 = vector.shape_cast %745 : vector<8x1xi1> to vector<8x1xi1>
    %756 = vector.broadcast %755 : vector<8x1xi1> to vector<8x128xi1>
    %757 = arith.select %756, %739, %673 : vector<8x128xi1>, vector<8x128xf32>
    %cst_163 = arith.constant 0.000000e+00 : f32
    %758 = vector.shape_cast %743 : vector<8x1xi1> to vector<8x1xi1>
    %759 = vector.broadcast %758 : vector<8x1xi1> to vector<8x128xi1>
    %760 = vector.broadcast %cst_163 : f32 to vector<8x128xf32>
    %761 = arith.select %759, %716, %760 : vector<8x128xi1>, vector<8x128xf32>
    %c64_164 = arith.constant 64 : index
    %c0_165 = arith.constant 0 : index
    %762 = vector.load %arg6[%c64_164, %c0_165] : memref<96x256xf32, #tpu.memory_space<vmem>>, vector<8x128xf32>
    tpu.vector_store %arg6[%c64_164, %c0_165], %761 {strides = array<i32>} : memref<96x256xf32, #tpu.memory_space<vmem>>, vector<8x128xf32>,
    %cst_166 = arith.constant 0.000000e+00 : f32
    %763 = vector.shape_cast %745 : vector<8x1xi1> to vector<8x1xi1>
    %764 = vector.broadcast %763 : vector<8x1xi1> to vector<8x128xi1>
    %765 = vector.broadcast %cst_166 : f32 to vector<8x128xf32>
    %766 = arith.select %764, %741, %765 : vector<8x128xi1>, vector<8x128xf32>
    %c24_167 = arith.constant 24 : index
    %c128_168 = arith.constant 128 : index
    %767 = vector.load %arg6[%c24_167, %c128_168] : memref<96x256xf32, #tpu.memory_space<vmem>>, vector<8x128xf32>
    tpu.vector_store %arg6[%c24_167, %c128_168], %766 {strides = array<i32>} : memref<96x256xf32, #tpu.memory_space<vmem>>, vector<8x128xf32>,
    %c72_169 = arith.constant 72 : index
    %c0_170 = arith.constant 0 : index
    %768 = vector.load %arg7[%c72_169, %c0_170] : memref<96x1024xf32, #tpu.memory_space<vmem>>, vector<8x512xf32>
    %769 = arith.truncf %748 : vector<8x128xf32> to vector<8x128xbf16>
    %cst_171 = arith.constant dense<0.000000e+00> : vector<8x512xf32>
    %770 = tpu.matmul %769, %9, %cst_171 {dimension_numbers = #tpu.dot_dimension_numbers<[1], [0], [0], [1], [0, 0, 1, 1], [], []>} : vector<8x128xbf16>, vector<128x512xbf16>, vector<8x512xf32> -> vector<8x512xf32>
    %771 = arith.addf %768, %770 : vector<8x512xf32>
    %c16_172 = arith.constant 16 : index
    %c512_173 = arith.constant 512 : index
    %772 = vector.load %arg7[%c16_172, %c512_173] : memref<96x1024xf32, #tpu.memory_space<vmem>>, vector<8x512xf32>
    %773 = arith.truncf %754 : vector<8x128xf32> to vector<8x128xbf16>
    %cst_174 = arith.constant dense<0.000000e+00> : vector<8x512xf32>
    %774 = tpu.matmul %773, %10, %cst_174 {dimension_numbers = #tpu.dot_dimension_numbers<[1], [0], [0], [1], [0, 0, 1, 1], [], []>} : vector<8x128xbf16>, vector<128x512xbf16>, vector<8x512xf32> -> vector<8x512xf32>
    %775 = arith.addf %772, %774 : vector<8x512xf32>
    %776 = vector.extract_strided_slice %771 {offsets = [0, 0], sizes = [8, 128], strides = [1, 1]} : vector<8x512xf32> to vector<8x128xf32>
    %777 = arith.negf %776 : vector<8x128xf32>
    %778 = math.exp %777 : vector<8x128xf32>
    %cst_175 = arith.constant 1.000000e+00 : f32
    %779 = vector.broadcast %cst_175 : f32 to vector<8x128xf32>
    %780 = arith.addf %779, %778 : vector<8x128xf32>
    %781 = arith.divf %779, %780 : vector<8x128xf32>
    %782 = vector.extract_strided_slice %771 {offsets = [0, 128], sizes = [8, 128], strides = [1, 1]} : vector<8x512xf32> to vector<8x128xf32>
    %783 = arith.negf %782 : vector<8x128xf32>
    %784 = math.exp %783 : vector<8x128xf32>
    %cst_176 = arith.constant 1.000000e+00 : f32
    %785 = vector.broadcast %cst_176 : f32 to vector<8x128xf32>
    %786 = arith.addf %785, %784 : vector<8x128xf32>
    %787 = arith.divf %785, %786 : vector<8x128xf32>
    %788 = vector.extract_strided_slice %771 {offsets = [0, 256], sizes = [8, 128], strides = [1, 1]} : vector<8x512xf32> to vector<8x128xf32>
    %789 = math.tanh %788 : vector<8x128xf32>
    %790 = vector.extract_strided_slice %771 {offsets = [0, 384], sizes = [8, 128], strides = [1, 1]} : vector<8x512xf32> to vector<8x128xf32>
    %791 = arith.negf %790 : vector<8x128xf32>
    %792 = math.exp %791 : vector<8x128xf32>
    %cst_177 = arith.constant 1.000000e+00 : f32
    %793 = vector.broadcast %cst_177 : f32 to vector<8x128xf32>
    %794 = arith.addf %793, %792 : vector<8x128xf32>
    %795 = arith.divf %793, %794 : vector<8x128xf32>
    %796 = arith.mulf %787, %751 : vector<8x128xf32>
    %797 = arith.mulf %781, %789 : vector<8x128xf32>
    %798 = arith.addf %796, %797 : vector<8x128xf32>
    %799 = math.tanh %798 : vector<8x128xf32>
    %800 = arith.mulf %795, %799 : vector<8x128xf32>
    %801 = vector.extract_strided_slice %775 {offsets = [0, 0], sizes = [8, 128], strides = [1, 1]} : vector<8x512xf32> to vector<8x128xf32>
    %802 = arith.negf %801 : vector<8x128xf32>
    %803 = math.exp %802 : vector<8x128xf32>
    %cst_178 = arith.constant 1.000000e+00 : f32
    %804 = vector.broadcast %cst_178 : f32 to vector<8x128xf32>
    %805 = arith.addf %804, %803 : vector<8x128xf32>
    %806 = arith.divf %804, %805 : vector<8x128xf32>
    %807 = vector.extract_strided_slice %775 {offsets = [0, 128], sizes = [8, 128], strides = [1, 1]} : vector<8x512xf32> to vector<8x128xf32>
    %808 = arith.negf %807 : vector<8x128xf32>
    %809 = math.exp %808 : vector<8x128xf32>
    %cst_179 = arith.constant 1.000000e+00 : f32
    %810 = vector.broadcast %cst_179 : f32 to vector<8x128xf32>
    %811 = arith.addf %810, %809 : vector<8x128xf32>
    %812 = arith.divf %810, %811 : vector<8x128xf32>
    %813 = vector.extract_strided_slice %775 {offsets = [0, 256], sizes = [8, 128], strides = [1, 1]} : vector<8x512xf32> to vector<8x128xf32>
    %814 = math.tanh %813 : vector<8x128xf32>
    %815 = vector.extract_strided_slice %775 {offsets = [0, 384], sizes = [8, 128], strides = [1, 1]} : vector<8x512xf32> to vector<8x128xf32>
    %816 = arith.negf %815 : vector<8x128xf32>
    %817 = math.exp %816 : vector<8x128xf32>
    %cst_180 = arith.constant 1.000000e+00 : f32
    %818 = vector.broadcast %cst_180 : f32 to vector<8x128xf32>
    %819 = arith.addf %818, %817 : vector<8x128xf32>
    %820 = arith.divf %818, %819 : vector<8x128xf32>
    %821 = arith.mulf %812, %757 : vector<8x128xf32>
    %822 = arith.mulf %806, %814 : vector<8x128xf32>
    %823 = arith.addf %821, %822 : vector<8x128xf32>
    %824 = math.tanh %823 : vector<8x128xf32>
    %825 = arith.mulf %820, %824 : vector<8x128xf32>
    %c9_i32_181 = arith.constant 9 : i32
    %826 = vector.broadcast %c9_i32_181 : i32 to vector<8x1xi32>
    %827 = arith.cmpi sgt, %0, %826 : vector<8x1xi32>
    %c2_i32_182 = arith.constant 2 : i32
    %828 = vector.broadcast %c2_i32_182 : i32 to vector<8x1xi32>
    %829 = arith.cmpi sgt, %0, %828 : vector<8x1xi32>
    %830 = vector.shape_cast %827 : vector<8x1xi1> to vector<8x1xi1>
    %831 = vector.broadcast %830 : vector<8x1xi1> to vector<8x128xi1>
    %832 = arith.select %831, %800, %748 : vector<8x128xi1>, vector<8x128xf32>
    %833 = vector.shape_cast %827 : vector<8x1xi1> to vector<8x1xi1>
    %834 = vector.broadcast %833 : vector<8x1xi1> to vector<8x128xi1>
    %835 = arith.select %834, %798, %751 : vector<8x128xi1>, vector<8x128xf32>
    %836 = vector.shape_cast %829 : vector<8x1xi1> to vector<8x1xi1>
    %837 = vector.broadcast %836 : vector<8x1xi1> to vector<8x128xi1>
    %838 = arith.select %837, %825, %754 : vector<8x128xi1>, vector<8x128xf32>
    %839 = vector.shape_cast %829 : vector<8x1xi1> to vector<8x1xi1>
    %840 = vector.broadcast %839 : vector<8x1xi1> to vector<8x128xi1>
    %841 = arith.select %840, %823, %757 : vector<8x128xi1>, vector<8x128xf32>
    %cst_183 = arith.constant 0.000000e+00 : f32
    %842 = vector.shape_cast %827 : vector<8x1xi1> to vector<8x1xi1>
    %843 = vector.broadcast %842 : vector<8x1xi1> to vector<8x128xi1>
    %844 = vector.broadcast %cst_183 : f32 to vector<8x128xf32>
    %845 = arith.select %843, %800, %844 : vector<8x128xi1>, vector<8x128xf32>
    %c72_184 = arith.constant 72 : index
    %c0_185 = arith.constant 0 : index
    %846 = vector.load %arg6[%c72_184, %c0_185] : memref<96x256xf32, #tpu.memory_space<vmem>>, vector<8x128xf32>
    tpu.vector_store %arg6[%c72_184, %c0_185], %845 {strides = array<i32>} : memref<96x256xf32, #tpu.memory_space<vmem>>, vector<8x128xf32>,
    %cst_186 = arith.constant 0.000000e+00 : f32
    %847 = vector.shape_cast %829 : vector<8x1xi1> to vector<8x1xi1>
    %848 = vector.broadcast %847 : vector<8x1xi1> to vector<8x128xi1>
    %849 = vector.broadcast %cst_186 : f32 to vector<8x128xf32>
    %850 = arith.select %848, %825, %849 : vector<8x128xi1>, vector<8x128xf32>
    %c16_187 = arith.constant 16 : index
    %c128_188 = arith.constant 128 : index
    %851 = vector.load %arg6[%c16_187, %c128_188] : memref<96x256xf32, #tpu.memory_space<vmem>>, vector<8x128xf32>
    tpu.vector_store %arg6[%c16_187, %c128_188], %850 {strides = array<i32>} : memref<96x256xf32, #tpu.memory_space<vmem>>, vector<8x128xf32>,
    %c80_189 = arith.constant 80 : index
    %c0_190 = arith.constant 0 : index
    %852 = vector.load %arg7[%c80_189, %c0_190] : memref<96x1024xf32, #tpu.memory_space<vmem>>, vector<8x512xf32>
    %853 = arith.truncf %832 : vector<8x128xf32> to vector<8x128xbf16>
    %cst_191 = arith.constant dense<0.000000e+00> : vector<8x512xf32>
    %854 = tpu.matmul %853, %9, %cst_191 {dimension_numbers = #tpu.dot_dimension_numbers<[1], [0], [0], [1], [0, 0, 1, 1], [], []>} : vector<8x128xbf16>, vector<128x512xbf16>, vector<8x512xf32> -> vector<8x512xf32>
    %855 = arith.addf %852, %854 : vector<8x512xf32>
    %c8_192 = arith.constant 8 : index
    %c512_193 = arith.constant 512 : index
    %856 = vector.load %arg7[%c8_192, %c512_193] : memref<96x1024xf32, #tpu.memory_space<vmem>>, vector<8x512xf32>
    %857 = arith.truncf %838 : vector<8x128xf32> to vector<8x128xbf16>
    %cst_194 = arith.constant dense<0.000000e+00> : vector<8x512xf32>
    %858 = tpu.matmul %857, %10, %cst_194 {dimension_numbers = #tpu.dot_dimension_numbers<[1], [0], [0], [1], [0, 0, 1, 1], [], []>} : vector<8x128xbf16>, vector<128x512xbf16>, vector<8x512xf32> -> vector<8x512xf32>
    %859 = arith.addf %856, %858 : vector<8x512xf32>
    %860 = vector.extract_strided_slice %855 {offsets = [0, 0], sizes = [8, 128], strides = [1, 1]} : vector<8x512xf32> to vector<8x128xf32>
    %861 = arith.negf %860 : vector<8x128xf32>
    %862 = math.exp %861 : vector<8x128xf32>
    %cst_195 = arith.constant 1.000000e+00 : f32
    %863 = vector.broadcast %cst_195 : f32 to vector<8x128xf32>
    %864 = arith.addf %863, %862 : vector<8x128xf32>
    %865 = arith.divf %863, %864 : vector<8x128xf32>
    %866 = vector.extract_strided_slice %855 {offsets = [0, 128], sizes = [8, 128], strides = [1, 1]} : vector<8x512xf32> to vector<8x128xf32>
    %867 = arith.negf %866 : vector<8x128xf32>
    %868 = math.exp %867 : vector<8x128xf32>
    %cst_196 = arith.constant 1.000000e+00 : f32
    %869 = vector.broadcast %cst_196 : f32 to vector<8x128xf32>
    %870 = arith.addf %869, %868 : vector<8x128xf32>
    %871 = arith.divf %869, %870 : vector<8x128xf32>
    %872 = vector.extract_strided_slice %855 {offsets = [0, 256], sizes = [8, 128], strides = [1, 1]} : vector<8x512xf32> to vector<8x128xf32>
    %873 = math.tanh %872 : vector<8x128xf32>
    %874 = vector.extract_strided_slice %855 {offsets = [0, 384], sizes = [8, 128], strides = [1, 1]} : vector<8x512xf32> to vector<8x128xf32>
    %875 = arith.negf %874 : vector<8x128xf32>
    %876 = math.exp %875 : vector<8x128xf32>
    %cst_197 = arith.constant 1.000000e+00 : f32
    %877 = vector.broadcast %cst_197 : f32 to vector<8x128xf32>
    %878 = arith.addf %877, %876 : vector<8x128xf32>
    %879 = arith.divf %877, %878 : vector<8x128xf32>
    %880 = arith.mulf %871, %835 : vector<8x128xf32>
    %881 = arith.mulf %865, %873 : vector<8x128xf32>
    %882 = arith.addf %880, %881 : vector<8x128xf32>
    %883 = math.tanh %882 : vector<8x128xf32>
    %884 = arith.mulf %879, %883 : vector<8x128xf32>
    %885 = vector.extract_strided_slice %859 {offsets = [0, 0], sizes = [8, 128], strides = [1, 1]} : vector<8x512xf32> to vector<8x128xf32>
    %886 = arith.negf %885 : vector<8x128xf32>
    %887 = math.exp %886 : vector<8x128xf32>
    %cst_198 = arith.constant 1.000000e+00 : f32
    %888 = vector.broadcast %cst_198 : f32 to vector<8x128xf32>
    %889 = arith.addf %888, %887 : vector<8x128xf32>
    %890 = arith.divf %888, %889 : vector<8x128xf32>
    %891 = vector.extract_strided_slice %859 {offsets = [0, 128], sizes = [8, 128], strides = [1, 1]} : vector<8x512xf32> to vector<8x128xf32>
    %892 = arith.negf %891 : vector<8x128xf32>
    %893 = math.exp %892 : vector<8x128xf32>
    %cst_199 = arith.constant 1.000000e+00 : f32
    %894 = vector.broadcast %cst_199 : f32 to vector<8x128xf32>
    %895 = arith.addf %894, %893 : vector<8x128xf32>
    %896 = arith.divf %894, %895 : vector<8x128xf32>
    %897 = vector.extract_strided_slice %859 {offsets = [0, 256], sizes = [8, 128], strides = [1, 1]} : vector<8x512xf32> to vector<8x128xf32>
    %898 = math.tanh %897 : vector<8x128xf32>
    %899 = vector.extract_strided_slice %859 {offsets = [0, 384], sizes = [8, 128], strides = [1, 1]} : vector<8x512xf32> to vector<8x128xf32>
    %900 = arith.negf %899 : vector<8x128xf32>
    %901 = math.exp %900 : vector<8x128xf32>
    %cst_200 = arith.constant 1.000000e+00 : f32
    %902 = vector.broadcast %cst_200 : f32 to vector<8x128xf32>
    %903 = arith.addf %902, %901 : vector<8x128xf32>
    %904 = arith.divf %902, %903 : vector<8x128xf32>
    %905 = arith.mulf %896, %841 : vector<8x128xf32>
    %906 = arith.mulf %890, %898 : vector<8x128xf32>
    %907 = arith.addf %905, %906 : vector<8x128xf32>
    %908 = math.tanh %907 : vector<8x128xf32>
    %909 = arith.mulf %904, %908 : vector<8x128xf32>
    %c10_i32_201 = arith.constant 10 : i32
    %910 = vector.broadcast %c10_i32_201 : i32 to vector<8x1xi32>
    %911 = arith.cmpi sgt, %0, %910 : vector<8x1xi32>
    %c1_i32_202 = arith.constant 1 : i32
    %912 = vector.broadcast %c1_i32_202 : i32 to vector<8x1xi32>
    %913 = arith.cmpi sgt, %0, %912 : vector<8x1xi32>
    %914 = vector.shape_cast %911 : vector<8x1xi1> to vector<8x1xi1>
    %915 = vector.broadcast %914 : vector<8x1xi1> to vector<8x128xi1>
    %916 = arith.select %915, %884, %832 : vector<8x128xi1>, vector<8x128xf32>
    %917 = vector.shape_cast %911 : vector<8x1xi1> to vector<8x1xi1>
    %918 = vector.broadcast %917 : vector<8x1xi1> to vector<8x128xi1>
    %919 = arith.select %918, %882, %835 : vector<8x128xi1>, vector<8x128xf32>
    %920 = vector.shape_cast %913 : vector<8x1xi1> to vector<8x1xi1>
    %921 = vector.broadcast %920 : vector<8x1xi1> to vector<8x128xi1>
    %922 = arith.select %921, %909, %838 : vector<8x128xi1>, vector<8x128xf32>
    %923 = vector.shape_cast %913 : vector<8x1xi1> to vector<8x1xi1>
    %924 = vector.broadcast %923 : vector<8x1xi1> to vector<8x128xi1>
    %925 = arith.select %924, %907, %841 : vector<8x128xi1>, vector<8x128xf32>
    %cst_203 = arith.constant 0.000000e+00 : f32
    %926 = vector.shape_cast %911 : vector<8x1xi1> to vector<8x1xi1>
    %927 = vector.broadcast %926 : vector<8x1xi1> to vector<8x128xi1>
    %928 = vector.broadcast %cst_203 : f32 to vector<8x128xf32>
    %929 = arith.select %927, %884, %928 : vector<8x128xi1>, vector<8x128xf32>
    %c80_204 = arith.constant 80 : index
    %c0_205 = arith.constant 0 : index
    %930 = vector.load %arg6[%c80_204, %c0_205] : memref<96x256xf32, #tpu.memory_space<vmem>>, vector<8x128xf32>
    tpu.vector_store %arg6[%c80_204, %c0_205], %929 {strides = array<i32>} : memref<96x256xf32, #tpu.memory_space<vmem>>, vector<8x128xf32>,
    %cst_206 = arith.constant 0.000000e+00 : f32
    %931 = vector.shape_cast %913 : vector<8x1xi1> to vector<8x1xi1>
    %932 = vector.broadcast %931 : vector<8x1xi1> to vector<8x128xi1>
    %933 = vector.broadcast %cst_206 : f32 to vector<8x128xf32>
    %934 = arith.select %932, %909, %933 : vector<8x128xi1>, vector<8x128xf32>
    %c8_207 = arith.constant 8 : index
    %c128_208 = arith.constant 128 : index
    %935 = vector.load %arg6[%c8_207, %c128_208] : memref<96x256xf32, #tpu.memory_space<vmem>>, vector<8x128xf32>
    tpu.vector_store %arg6[%c8_207, %c128_208], %934 {strides = array<i32>} : memref<96x256xf32, #tpu.memory_space<vmem>>, vector<8x128xf32>,
    %c88_209 = arith.constant 88 : index
    %c0_210 = arith.constant 0 : index
    %936 = vector.load %arg7[%c88_209, %c0_210] : memref<96x1024xf32, #tpu.memory_space<vmem>>, vector<8x512xf32>
    %937 = arith.truncf %916 : vector<8x128xf32> to vector<8x128xbf16>
    %cst_211 = arith.constant dense<0.000000e+00> : vector<8x512xf32>
    %938 = tpu.matmul %937, %9, %cst_211 {dimension_numbers = #tpu.dot_dimension_numbers<[1], [0], [0], [1], [0, 0, 1, 1], [], []>} : vector<8x128xbf16>, vector<128x512xbf16>, vector<8x512xf32> -> vector<8x512xf32>
    %939 = arith.addf %936, %938 : vector<8x512xf32>
    %c0_212 = arith.constant 0 : index
    %c512_213 = arith.constant 512 : index
    %940 = vector.load %arg7[%c0_212, %c512_213] : memref<96x1024xf32, #tpu.memory_space<vmem>>, vector<8x512xf32>
    %941 = arith.truncf %922 : vector<8x128xf32> to vector<8x128xbf16>
    %cst_214 = arith.constant dense<0.000000e+00> : vector<8x512xf32>
    %942 = tpu.matmul %941, %10, %cst_214 {dimension_numbers = #tpu.dot_dimension_numbers<[1], [0], [0], [1], [0, 0, 1, 1], [], []>} : vector<8x128xbf16>, vector<128x512xbf16>, vector<8x512xf32> -> vector<8x512xf32>
    %943 = arith.addf %940, %942 : vector<8x512xf32>
    %944 = vector.extract_strided_slice %939 {offsets = [0, 0], sizes = [8, 128], strides = [1, 1]} : vector<8x512xf32> to vector<8x128xf32>
    %945 = arith.negf %944 : vector<8x128xf32>
    %946 = math.exp %945 : vector<8x128xf32>
    %cst_215 = arith.constant 1.000000e+00 : f32
    %947 = vector.broadcast %cst_215 : f32 to vector<8x128xf32>
    %948 = arith.addf %947, %946 : vector<8x128xf32>
    %949 = arith.divf %947, %948 : vector<8x128xf32>
    %950 = vector.extract_strided_slice %939 {offsets = [0, 128], sizes = [8, 128], strides = [1, 1]} : vector<8x512xf32> to vector<8x128xf32>
    %951 = arith.negf %950 : vector<8x128xf32>
    %952 = math.exp %951 : vector<8x128xf32>
    %cst_216 = arith.constant 1.000000e+00 : f32
    %953 = vector.broadcast %cst_216 : f32 to vector<8x128xf32>
    %954 = arith.addf %953, %952 : vector<8x128xf32>
    %955 = arith.divf %953, %954 : vector<8x128xf32>
    %956 = vector.extract_strided_slice %939 {offsets = [0, 256], sizes = [8, 128], strides = [1, 1]} : vector<8x512xf32> to vector<8x128xf32>
    %957 = math.tanh %956 : vector<8x128xf32>
    %958 = vector.extract_strided_slice %939 {offsets = [0, 384], sizes = [8, 128], strides = [1, 1]} : vector<8x512xf32> to vector<8x128xf32>
    %959 = arith.negf %958 : vector<8x128xf32>
    %960 = math.exp %959 : vector<8x128xf32>
    %cst_217 = arith.constant 1.000000e+00 : f32
    %961 = vector.broadcast %cst_217 : f32 to vector<8x128xf32>
    %962 = arith.addf %961, %960 : vector<8x128xf32>
    %963 = arith.divf %961, %962 : vector<8x128xf32>
    %964 = arith.mulf %955, %919 : vector<8x128xf32>
    %965 = arith.mulf %949, %957 : vector<8x128xf32>
    %966 = arith.addf %964, %965 : vector<8x128xf32>
    %967 = math.tanh %966 : vector<8x128xf32>
    %968 = arith.mulf %963, %967 : vector<8x128xf32>
    %969 = vector.extract_strided_slice %943 {offsets = [0, 0], sizes = [8, 128], strides = [1, 1]} : vector<8x512xf32> to vector<8x128xf32>
    %970 = arith.negf %969 : vector<8x128xf32>
    %971 = math.exp %970 : vector<8x128xf32>
    %cst_218 = arith.constant 1.000000e+00 : f32
    %972 = vector.broadcast %cst_218 : f32 to vector<8x128xf32>
    %973 = arith.addf %972, %971 : vector<8x128xf32>
    %974 = arith.divf %972, %973 : vector<8x128xf32>
    %975 = vector.extract_strided_slice %943 {offsets = [0, 128], sizes = [8, 128], strides = [1, 1]} : vector<8x512xf32> to vector<8x128xf32>
    %976 = arith.negf %975 : vector<8x128xf32>
    %977 = math.exp %976 : vector<8x128xf32>
    %cst_219 = arith.constant 1.000000e+00 : f32
    %978 = vector.broadcast %cst_219 : f32 to vector<8x128xf32>
    %979 = arith.addf %978, %977 : vector<8x128xf32>
    %980 = arith.divf %978, %979 : vector<8x128xf32>
    %981 = vector.extract_strided_slice %943 {offsets = [0, 256], sizes = [8, 128], strides = [1, 1]} : vector<8x512xf32> to vector<8x128xf32>
    %982 = math.tanh %981 : vector<8x128xf32>
    %983 = vector.extract_strided_slice %943 {offsets = [0, 384], sizes = [8, 128], strides = [1, 1]} : vector<8x512xf32> to vector<8x128xf32>
    %984 = arith.negf %983 : vector<8x128xf32>
    %985 = math.exp %984 : vector<8x128xf32>
    %cst_220 = arith.constant 1.000000e+00 : f32
    %986 = vector.broadcast %cst_220 : f32 to vector<8x128xf32>
    %987 = arith.addf %986, %985 : vector<8x128xf32>
    %988 = arith.divf %986, %987 : vector<8x128xf32>
    %989 = arith.mulf %980, %925 : vector<8x128xf32>
    %990 = arith.mulf %974, %982 : vector<8x128xf32>
    %991 = arith.addf %989, %990 : vector<8x128xf32>
    %992 = math.tanh %991 : vector<8x128xf32>
    %993 = arith.mulf %988, %992 : vector<8x128xf32>
    %c11_i32_221 = arith.constant 11 : i32
    %994 = vector.broadcast %c11_i32_221 : i32 to vector<8x1xi32>
    %995 = arith.cmpi sgt, %0, %994 : vector<8x1xi32>
    %c0_i32_222 = arith.constant 0 : i32
    %996 = vector.broadcast %c0_i32_222 : i32 to vector<8x1xi32>
    %997 = arith.cmpi sgt, %0, %996 : vector<8x1xi32>
    %cst_223 = arith.constant 0.000000e+00 : f32
    %998 = vector.shape_cast %995 : vector<8x1xi1> to vector<8x1xi1>
    %999 = vector.broadcast %998 : vector<8x1xi1> to vector<8x128xi1>
    %1000 = vector.broadcast %cst_223 : f32 to vector<8x128xf32>
    %1001 = arith.select %999, %968, %1000 : vector<8x128xi1>, vector<8x128xf32>
    %c88_224 = arith.constant 88 : index
    %c0_225 = arith.constant 0 : index
    %1002 = vector.load %arg6[%c88_224, %c0_225] : memref<96x256xf32, #tpu.memory_space<vmem>>, vector<8x128xf32>
    tpu.vector_store %arg6[%c88_224, %c0_225], %1001 {strides = array<i32>} : memref<96x256xf32, #tpu.memory_space<vmem>>, vector<8x128xf32>,
    %cst_226 = arith.constant 0.000000e+00 : f32
    %1003 = vector.shape_cast %997 : vector<8x1xi1> to vector<8x1xi1>
    %1004 = vector.broadcast %1003 : vector<8x1xi1> to vector<8x128xi1>
    %1005 = vector.broadcast %cst_226 : f32 to vector<8x128xf32>
    %1006 = arith.select %1004, %993, %1005 : vector<8x128xi1>, vector<8x128xf32>
    %c0_227 = arith.constant 0 : index
    %c128_228 = arith.constant 128 : index
    %1007 = vector.load %arg6[%c0_227, %c128_228] : memref<96x256xf32, #tpu.memory_space<vmem>>, vector<8x128xf32>
    tpu.vector_store %arg6[%c0_227, %c128_228], %1006 {strides = array<i32>} : memref<96x256xf32, #tpu.memory_space<vmem>>, vector<8x128xf32>,
    return
  }
}

</mosaic_0001>

<bundles_post_ra>
// kernel: tpu_custom_call.1
= control target key start
LH: loop header
LB: loop body
LE: loop exit
PB: predicated region body
PF: predicated region fallthrough
CT: control target
= control target key end

     0   :  { %11 = vsyncpa [#allocation4], 0  ;;  %s7573_s0 = inlined_call_operand.vmem [shape: s32[8,1], index: 0, kind: input, shape index: {}]   ;;  %s7574_s1 = inlined_call_operand.hbm [shape: f32[96,128], index: 1, kind: input, shape index: {}]   ;;  %s7575_s2 = inlined_call_operand.hbm [shape: bf16[128,1024], index: 2, kind: input, shape index: {}]   ;;  %s7576_s3 = inlined_call_operand.hbm [shape: bf16[128,512], index: 3, kind: input, shape index: {}]   ;;  %s7577_s4 = inlined_call_operand.hbm [shape: bf16[128,512], index: 4, kind: input, shape index: {}]   ;;  %s7578_s5 = inlined_call_operand.vmem [shape: f32[1,1024], index: 5, kind: input, shape index: {}]   ;;  %s7579_s6 = inlined_call_operand.hbm [shape: f32[96,256], index: 6, kind: output, shape index: {}]  }
   0x1   :  { %12 = vsyncpa [#allocation7], 0 }
   0x2   :  { %13 = vsyncpa [#allocation10], 0 }
   0x3   :  { %14 = vsyncpa [#allocation5], 0  ;;  %s5322_s21 = smov [#allocation6]  }
   0x4   :  { %s34_s22 = sshll.u32 %s5322_s21, 4  ;;  %s35_s22 = int_to_ptr.vmem [resolvable:$true] %s34_s22 }
   0x5   :  { %s5222_s23 = scalar_lea.vmem %s35_s22, 8192  ;;  %p5227_p1 = scmp.lt.s32.totalorder %s35_s22, %s35_s22 }
   0x6   :  { %p5223_p0 = scmp.ne.s32.totalorder %s35_s22, %s5222_s23  ;;  %p5228_p2 = scmp.lt.s32.totalorder %s5222_s23, %s5222_s23 }
   0x8   :  { %p5229_p3 = por %p5228_p2, %p5227_p1 }
   0xa   :  { %p5230_p4 = pnand %p5229_p3, %p5223_p0 }
   0xc   :  { %5233 = shalt.err (!%p5230_p4)
}
   0xd   :  { %s5323_s24 = smov 512   ;;  %s5324_s25 = smov 32  }
   0xe   :  { %40 = dma.hbm_to_vmem [thread:$0]  %s7575_s2, 8192, %s35_s22, [#allocation7], %s5323_s24, %s5323_s24, %s5324_s25  }
   0xf   :  { %s5325_s28 = smov [#allocation3]  }
  0x10   :  { %s22_s29 = sshll.u32 %s5325_s28, 4  ;;  %s23_s29 = int_to_ptr.vmem [resolvable:$true] %s22_s29 }
  0x11   :  { %s5242_s30 = scalar_lea.vmem %s23_s29, 1536  ;;  %p5247_p6 = scmp.lt.s32.totalorder %s23_s29, %s23_s29 }
  0x12   :  { %p5243_p5 = scmp.ne.s32.totalorder %s23_s29, %s5242_s30  ;;  %p5248_p7 = scmp.lt.s32.totalorder %s5242_s30, %s5242_s30 }
  0x14   :  { %p5249_p8 = por %p5248_p7, %p5247_p6 }
  0x16   :  { %p5250_p9 = pnand %p5249_p8, %p5243_p5 }
  0x18   :  { %5253 = shalt.err (!%p5250_p9)
}
  0x19   :  { %s5326_s7 = smov 128   ;;  %s5327_s8 = smov 8  }
  0x1a   :  { %28 = dma.hbm_to_vmem [thread:$0]  %s7574_s1, 1536, %s23_s29, [#allocation4], %s5326_s7, %s5326_s7, %s5327_s8  }
  0x1b   :  { %s5328_s11 = smov [#allocation8]  }
  0x1c   :  { %s46_s12 = sshll.u32 %s5328_s11, 4  ;;  %s47_s12 = int_to_ptr.vmem [resolvable:$true] %s46_s12 }
  0x1d   :  { %s5262_s2 = scalar_lea.vmem %s47_s12, 4096  ;;  %p5267_p11 = scmp.lt.s32.totalorder %s47_s12, %s47_s12 }
  0x1e   :  { %p5263_p10 = scmp.ne.s32.totalorder %s47_s12, %s5262_s2  ;;  %p5268_p12 = scmp.lt.s32.totalorder %s5262_s2, %s5262_s2 }
  0x20   :  { %p5269_p13 = por %p5268_p12, %p5267_p11 }
  0x22   :  { %p5270_p0 = pnand %p5269_p13, %p5263_p10 }
  0x24   :  { %5273 = shalt.err (!%p5270_p0)
}
  0x25   :  { %s5329_s13 = smov 256   ;;  %s5330_s14 = smov 16  }
  0x26   :  { %52 = dma.hbm_to_vmem [thread:$0]  %s7576_s3, 4096, %s47_s12, [#allocation7], %s5329_s13, %s5329_s13, %s5330_s14  }
  0x27   :  { %s5331_s1 = smov [#allocation9]  }
  0x28   :  { %s58_s17 = sshll.u32 %s5331_s1, 4  ;;  %s59_s17 = int_to_ptr.vmem [resolvable:$true] %s58_s17 }
  0x29   :  { %s5282_s18 = scalar_lea.vmem %s59_s17, 4096  ;;  %p5287_p2 = scmp.lt.s32.totalorder %s59_s17, %s59_s17 }
  0x2a   :  { %p5283_p1 = scmp.ne.s32.totalorder %s59_s17, %s5282_s18  ;;  %p5288_p3 = scmp.lt.s32.totalorder %s5282_s18, %s5282_s18 }
  0x2c   :  { %p5289_p4 = por %p5288_p3, %p5287_p2 }
  0x2e   :  { %p5290_p5 = pnand %p5289_p4, %p5283_p1 }
  0x30   :  { %5293 = shalt.err (!%p5290_p5)
}
  0x31   :  { %64 = dma.hbm_to_vmem [thread:$0]  %s7577_s4, 4096, %s59_s17, [#allocation10], %s5329_s13, %s5329_s13, %s5330_s14  }
  0x32   :  { %5314 = dma.done.wait [#allocation4], 1536  }
  0x33   :  { %5315 = vsyncadd [#allocation4], 4294965760 }
  0x34   :  { %5316 = dma.done.wait [#allocation7], 12288  }
  0x35   :  { %5317 = vsyncadd [#allocation7], 4294955008 }
  0x36   :  { %5318 = dma.done.wait [#allocation10], 4096  }
  0x37   :  { %5319 = vsyncadd [#allocation10], 4294963200  ;;  %v7580_v0 = vmov 0   ;;  %v155_v1 = vld [vmem:[#allocation6 + $0x1c0] sm:$0xff]  ;;  %v156_v3 = vld [vmem:[#allocation6 + $0x1c8] sm:$0xff] }
  0x38   :  { %557 = vmatprep.mubr.bf16.mxu0 %v7580_v0  ;;  %650 = vmatprep.mubr.bf16.mxu1 %v7580_v0  ;;  %v159_v2 = vld [vmem:[#allocation6 + $0x1e0] sm:$0xff]  ;;  %v160_v5 = vld [vmem:[#allocation6 + $0x1e8] sm:$0xff] }
  0x39   :  { %4540 = vset.pattern.permute.xlu0 %v7580_v0  ;;  %4541 = vset.pattern.permute.xlu1 %v7580_v0  ;;  %v4373_v4 = vcombine.high %v155_v1, %v159_v2  ;;  %v4372_v6 = vcombine.low %v155_v1, %v159_v2  ;;  %v147_v7 = vld [vmem:[#allocation6 + $0x180] sm:$0xff]  ;;  %v4375_v9 = vcombine.high %v156_v3, %v160_v5  ;;  %v148_v12 = vld [vmem:[#allocation6 + $0x188] sm:$0xff]  ;;  %v157_v1 = vld [vmem:[#allocation6 + $0x1d0] sm:$0xff] }
  0x3a   :  { %v151_v8 = vld [vmem:[#allocation6 + $0x1a0] sm:$0xff]  ;;  %v4374_v10 = vcombine.low %v156_v3, %v160_v5  ;;  %v152_v13 = vld [vmem:[#allocation6 + $0x1a8] sm:$0xff]  ;;  %v161_v2 = vld [vmem:[#allocation6 + $0x1f0] sm:$0xff] }
  0x3b   :  { %v4365_v11 = vcombine.high %v147_v7, %v151_v8  ;;  %v139_v14 = vld [vmem:[#allocation6 + $0x140] sm:$0xff]  ;;  %525 = vmatprep.subr.bf16.mxu0 %v4373_v4  ;;  %v4367_v15 = vcombine.high %v148_v12, %v152_v13  ;;  %v140_v17 = vld [vmem:[#allocation6 + $0x148] sm:$0xff]  ;;  %618 = vmatprep.subr.bf16.mxu1 %v4375_v9  ;;  %v4364_v19 = vcombine.low %v147_v7, %v151_v8  ;;  %v158_v3 = vld [vmem:[#allocation6 + $0x1d8] sm:$0xff] }
  0x3c   :  { %v143_v16 = vld [vmem:[#allocation6 + $0x160] sm:$0xff]  ;;  %v144_v18 = vld [vmem:[#allocation6 + $0x168] sm:$0xff]  ;;  %526 = vmatpush1.bf16.msra.mxu0 %v4372_v6  ;;  %619 = vmatpush1.bf16.msra.mxu1 %v4374_v10  ;;  %v4366_v20 = vcombine.low %v148_v12, %v152_v13  ;;  %v162_v4 = vld [vmem:[#allocation6 + $0x1f8] sm:$0xff]  ;;  %v4377_v8 = vcombine.high %v157_v1, %v161_v2 }
  0x3d   :  { %527 = vmatprep.subr.bf16.mxu0 %v4365_v11  ;;  %v4357_v21 = vcombine.high %v139_v14, %v143_v16  ;;  %620 = vmatprep.subr.bf16.mxu1 %v4367_v15  ;;  %v4359_v22 = vcombine.high %v140_v17, %v144_v18  ;;  %v131_v23 = vld [vmem:[#allocation6 + $0x100] sm:$0xff]  ;;  %v132_v25 = vld [vmem:[#allocation6 + $0x108] sm:$0xff]  ;;  %v4356_v27 = vcombine.low %v139_v14, %v143_v16  ;;  %v149_v9 = vld [vmem:[#allocation6 + $0x190] sm:$0xff] }
  0x3e   :  { %v135_v24 = vld [vmem:[#allocation6 + $0x120] sm:$0xff]  ;;  %v136_v26 = vld [vmem:[#allocation6 + $0x128] sm:$0xff]  ;;  %v4358_v28 = vcombine.low %v140_v17, %v144_v18  ;;  %v153_v10 = vld [vmem:[#allocation6 + $0x1b0] sm:$0xff]  ;;  %v4379_v11 = vcombine.high %v158_v3, %v162_v4  ;;  %v4376_v14 = vcombine.low %v157_v1, %v161_v2 }
  0x3f   :  { %v4349_v29 = vcombine.high %v131_v23, %v135_v24  ;;  %v4351_v30 = vcombine.high %v132_v25, %v136_v26  ;;  %v123_v31 = vld [vmem:[#allocation6 + $0xc0] sm:$0xff]  ;;  %v124_v33 = vld [vmem:[#allocation6 + $0xc8] sm:$0xff]  ;;  %v4348_v35 = vcombine.low %v131_v23, %v135_v24  ;;  %v4350_v36 = vcombine.low %v132_v25, %v136_v26  ;;  %v150_v13 = vld [vmem:[#allocation6 + $0x198] sm:$0xff] }
  0x40   :  { %528 = vmatpush1.bf16.msra.mxu0 %v4364_v19  ;;  %621 = vmatpush1.bf16.msra.mxu1 %v4366_v20  ;;  %v127_v32 = vld [vmem:[#allocation6 + $0xe0] sm:$0xff]  ;;  %v128_v34 = vld [vmem:[#allocation6 + $0xe8] sm:$0xff]  ;;  %v154_v15 = vld [vmem:[#allocation6 + $0x1b8] sm:$0xff]  ;;  %v4369_v16 = vcombine.high %v149_v9, %v153_v10  ;;  %v4378_v19 = vcombine.low %v158_v3, %v162_v4  ;;  %v4368_v24 = vcombine.low %v149_v9, %v153_v10 }
  0x41   :  { %529 = vmatprep.subr.bf16.mxu0 %v4357_v21  ;;  %622 = vmatprep.subr.bf16.mxu1 %v4359_v22  ;;  %v4341_v37 = vcombine.high %v123_v31, %v127_v32  ;;  %v4343_v38 = vcombine.high %v124_v33, %v128_v34  ;;  %v115_v39 = vld [vmem:[#allocation6 + $0x80] sm:$0xff]  ;;  %v116_v41 = vld [vmem:[#allocation6 + $0x88] sm:$0xff]  ;;  %v4340_v43 = vcombine.low %v123_v31, %v127_v32  ;;  %v141_v17 = vld [vmem:[#allocation6 + $0x150] sm:$0xff] }
  0x42   :  { %v119_v40 = vld [vmem:[#allocation6 + $0xa0] sm:$0xff]  ;;  %v120_v42 = vld [vmem:[#allocation6 + $0xa8] sm:$0xff]  ;;  %v4342_v44 = vcombine.low %v124_v33, %v128_v34  ;;  %v145_v18 = vld [vmem:[#allocation6 + $0x170] sm:$0xff]  ;;  %v4371_v22 = vcombine.high %v150_v13, %v154_v15 }
  0x43   :  { %v4333_v45 = vcombine.high %v115_v39, %v119_v40  ;;  %v4335_v46 = vcombine.high %v116_v41, %v120_v42  ;;  %v107_v47 = vld [vmem:[#allocation6 + $0x40] sm:$0xff]  ;;  %v108_v49 = vld [vmem:[#allocation6 + $0x48] sm:$0xff]  ;;  %v4332_v51 = vcombine.low %v115_v39, %v119_v40  ;;  %v4334_v52 = vcombine.low %v116_v41, %v120_v42  ;;  %v83_v20 = vld [vmem:[#allocation3 + $0x10] sm:$0xff] }
  0x44   :  { %530 = vmatpush1.bf16.msra.mxu0 %v4356_v27  ;;  %623 = vmatpush1.bf16.msra.mxu1 %v4358_v28  ;;  %v111_v48 = vld [vmem:[#allocation6 + $0x60] sm:$0xff]  ;;  %v112_v50 = vld [vmem:[#allocation6 + $0x68] sm:$0xff]  ;;  %v84_v21 = vld [vmem:[#allocation3 + $0x18] sm:$0xff]  ;;  %v4361_v26 = vcombine.high %v141_v17, %v145_v18  ;;  %v4370_v28 = vcombine.low %v150_v13, %v154_v15  ;;  %v4360_v33 = vcombine.low %v141_v17, %v145_v18 }
  0x45   :  { %531 = vmatprep.subr.bf16.mxu0 %v4349_v29  ;;  %624 = vmatprep.subr.bf16.mxu1 %v4351_v30  ;;  %v4325_v53 = vcombine.high %v107_v47, %v111_v48  ;;  %v4327_v54 = vcombine.high %v108_v49, %v112_v50  ;;  %v99_v55 = vld [vmem:[#allocation6] sm:$0xff]  ;;  %v100_v57 = vld [vmem:[#allocation6 + $0x8] sm:$0xff]  ;;  %v4324_v59 = vcombine.low %v107_v47, %v111_v48  ;;  %v142_v23 = vld [vmem:[#allocation6 + $0x158] sm:$0xff] }
  0x46   :  { %v103_v56 = vld [vmem:[#allocation6 + $0x20] sm:$0xff]  ;;  %v104_v58 = vld [vmem:[#allocation6 + $0x28] sm:$0xff]  ;;  %v4326_v60 = vcombine.low %v108_v49, %v112_v50  ;;  %v146_v25 = vld [vmem:[#allocation6 + $0x178] sm:$0xff]  ;;  %v5397_v29 = vpack.c.bf16 %v84_v21, %v83_v20 }
  0x47   :  { %v4317_v61 = vcombine.high %v99_v55, %v103_v56  ;;  %v4319_v62 = vcombine.high %v100_v57, %v104_v58  ;;  %v81_v63 = vld [vmem:[#allocation3] sm:$0xff]  ;;  %v4316_v5 = vcombine.low %v99_v55, %v103_v56  ;;  %v82_v6 = vld [vmem:[#allocation3 + $0x8] sm:$0xff]  ;;  %v4318_v7 = vcombine.low %v100_v57, %v104_v58  ;;  %v133_v27 = vld [vmem:[#allocation6 + $0x110] sm:$0xff] }
  0x48   :  { %532 = vmatpush1.bf16.msra.mxu0 %v4348_v35  ;;  %625 = vmatpush1.bf16.msra.mxu1 %v4350_v36  ;;  %v5391_v12 = vpack.c.bf16 %v82_v6, %v81_v63  ;;  %v137_v30 = vld [vmem:[#allocation6 + $0x130] sm:$0xff]  ;;  %v4363_v31 = vcombine.high %v142_v23, %v146_v25  ;;  %v134_v32 = vld [vmem:[#allocation6 + $0x118] sm:$0xff]  ;;  %v85_v35 = vld [vmem:[#allocation3 + $0x20] sm:$0xff]  ;;  %v4362_v39 = vcombine.low %v142_v23, %v146_v25 }
  0x49   :  { %533 = vmatprep.subr.bf16.mxu0 %v4341_v37  ;;  %626 = vmatprep.subr.bf16.mxu1 %v4343_v38  ;;  %v138_v34 = vld [vmem:[#allocation6 + $0x138] sm:$0xff]  ;;  %v4353_v36 = vcombine.high %v133_v27, %v137_v30  ;;  %v125_v37 = vld [vmem:[#allocation6 + $0xd0] sm:$0xff]  ;;  %v86_v40 = vld [vmem:[#allocation3 + $0x28] sm:$0xff] }
  0x4a   :  { %v129_v38 = vld [vmem:[#allocation6 + $0xf0] sm:$0xff]  ;;  %v4355_v41 = vcombine.high %v134_v32, %v138_v34  ;;  %v126_v42 = vld [vmem:[#allocation6 + $0xd8] sm:$0xff]  ;;  %v5403_v48 = vpack.c.bf16 %v86_v40, %v85_v35  ;;  %v89_v13 = vld [vmem:[#allocation3 + $0x40] sm:$0xff] }
  0x4b   :  { %v117_v47 = vld [vmem:[#allocation6 + $0x90] sm:$0xff]  ;;  %v88_v55 = vld [vmem:[#allocation3 + $0x38] sm:$0xff]  ;;  %v90_v15 = vld [vmem:[#allocation3 + $0x48] sm:$0xff] }
  0x4c   :  { %534 = vmatpush1.bf16.msra.mxu0 %v4340_v43  ;;  %627 = vmatpush1.bf16.msra.mxu1 %v4342_v44  ;;  %v4352_v43 = vcombine.low %v133_v27, %v137_v30  ;;  %v130_v44 = vld [vmem:[#allocation6 + $0xf8] sm:$0xff]  ;;  %v121_v49 = vld [vmem:[#allocation6 + $0xb0] sm:$0xff] }
  0x4d   :  { %535 = vmatprep.subr.bf16.mxu0 %v4333_v45  ;;  %628 = vmatprep.subr.bf16.mxu1 %v4335_v46  ;;  %v4345_v45 = vcombine.high %v125_v37, %v129_v38  ;;  %v4354_v46 = vcombine.low %v134_v32, %v138_v34  ;;  %v4347_v50 = vcombine.high %v126_v42, %v130_v44  ;;  %v109_v58 = vld [vmem:[#allocation6 + $0x50] sm:$0xff]  ;;  %v5419_v20 = vld [vmem:[#allocation8 + $0xec] ss:$16 sps:$4 sm:$0xff]   ;;  %v5464_v34 = vld [vmem:[#allocation8 + $0xa8] ss:$16 sps:$4 sm:$0xff]  }
  0x4e   :  { %v4337_v56 = vcombine.high %v117_v47, %v121_v49  ;;  %v4346_v57 = vcombine.low %v126_v42, %v130_v44  ;;  %v4336_v63 = vcombine.low %v117_v47, %v121_v49  ;;  %v101_v3 = vld [vmem:[#allocation6 + $0x10] sm:$0xff]  ;;  %v5440_v27 = vld [vmem:[#allocation8 + $0xcc] ss:$16 sps:$4 sm:$0xff]  }
  0x4f   :  { %v105_v6 = vld [vmem:[#allocation6 + $0x30] sm:$0xff]  ;;  %v5455_v32 = vld [vmem:[#allocation8 + $0xac] ss:$16 sps:$4 sm:$0xff]  }
  0x50   :  { %536 = vmatpush1.bf16.msra.mxu0 %v4332_v51  ;;  %629 = vmatpush1.bf16.msra.mxu1 %v4334_v52  ;;  %v118_v51 = vld [vmem:[#allocation6 + $0x98] sm:$0xff]  ;;  %v5415_v18 = vld [vmem:[#allocation8 + $0xe4] ss:$16 sps:$4 sm:$0xff]   ;;  %v5514_v47 = vld [vmem:[#allocation8 + $0x20] ss:$16 sps:$4 sm:$0xff]  }
  0x51   :  { %537 = vmatprep.subr.bf16.mxu0 %v4325_v53  ;;  %630 = vmatprep.subr.bf16.mxu1 %v4327_v54  ;;  %v122_v52 = vld [vmem:[#allocation6 + $0xb8] sm:$0xff]  ;;  %v4344_v53 = vcombine.low %v125_v37, %v129_v38  ;;  %v87_v54 = vld [vmem:[#allocation3 + $0x30] sm:$0xff] }
  0x52   :  { %v4338_v2 = vcombine.low %v118_v51, %v122_v52  ;;  %v5409_v4 = vpack.c.bf16 %v88_v55, %v87_v54  ;;  %v91_v21 = vld [vmem:[#allocation3 + $0x50] sm:$0xff]  ;;  %v5468_v35 = vld [vmem:[#allocation8 + $0x8c] ss:$16 sps:$4 sm:$0xff]   ;;  %v5480_v38 = vld [vmem:[#allocation8 + $0x88] ss:$16 sps:$4 sm:$0xff]  }
  0x53   :  { %v5435_v25 = vld [vmem:[#allocation8 + $0xc4] ss:$16 sps:$4 sm:$0xff]   ;;  %v5496_v42 = vld [vmem:[#allocation8 + $0x4c] ss:$16 sps:$4 sm:$0xff]   ;;  %v5541_v54 = vld [vmem:[#allocation8 + $0x8] ss:$16 sps:$4 sm:$0xff]  }
  0x54   :  { %538 = vmatpush1.bf16.msra.mxu0 %v4324_v59  ;;  %631 = vmatpush1.bf16.msra.mxu1 %v4326_v60  ;;  %v113_v59 = vld [vmem:[#allocation6 + $0x70] sm:$0xff]  ;;  %v4339_v60 = vcombine.high %v118_v51, %v122_v52  ;;  %v5529_v51 = vld [vmem:[%s7573_s0] sm:$0xff] }
  0x55   :  { %539 = vmatprep.subr.bf16.mxu0 %v4317_v61  ;;  %632 = vmatprep.subr.bf16.mxu1 %v4319_v62  ;;  %v110_v61 = vld [vmem:[#allocation6 + $0x58] sm:$0xff]  ;;  %v4329_v1 = vcombine.high %v109_v58, %v113_v59  ;;  %v4328_v9 = vcombine.low %v109_v58, %v113_v59  ;;  %v5448_v30 = vld [vmem:[#allocation8 + $0xa4] ss:$16 sps:$4 sm:$0xff]   ;;  %vm1605_vm0 = vcmp.gt.s32.totalorder %v5529_v51, 0  ;;  %v5536_v52 = vld [vmem:[#allocation8] ss:$16 sps:$4 sm:$0xff]  }
  0x56   :  { %v114_v62 = vld [vmem:[#allocation6 + $0x78] sm:$0xff]  ;;  %v5476_v37 = vld [vmem:[#allocation8 + $0x64] ss:$16 sps:$4 sm:$0xff]   ;;  %vm1606_vm1 = vcmp.gt.s32.totalorder %v5529_v51, 11  ;;  %vm2103_vm2 = vcmp.gt.s32.totalorder %v5529_v51, 2  ;;  %vm2353_vm3 = vcmp.gt.s32.totalorder %v5529_v51, 3 }
  0x57   :  { %v4330_v10 = vcombine.low %v110_v61, %v114_v62  ;;  %v5490_v40 = vld [vmem:[#allocation8 + $0x44] ss:$16 sps:$4 sm:$0xff]   ;;  %v2105_v58 = vsel %vm2103_vm2, 1, %v7580_v0  ;;  %v2355_v59 = vsel %vm2353_vm3, 1, %v7580_v0  ;;  %vm2603_vm4 = vcmp.gt.s32.totalorder %v5529_v51, 4 }
  0x58   :  { %540 = vmatpush1.bf16.msra.mxu0 %v4316_v5  ;;  %633 = vmatpush1.bf16.msra.mxu1 %v4318_v7  ;;  %v4331_v5 = vcombine.high %v110_v61, %v114_v62  ;;  %v102_v7 = vld [vmem:[#allocation6 + $0x18] sm:$0xff]  ;;  %v5506_v44 = vld [vmem:[#allocation8 + $0x24] ss:$16 sps:$4 sm:$0xff]   ;;  %v5568_v61 = vld [vmem:[#allocation9 + $0xe0] ss:$16 sps:$4 sm:$0xff]   ;;  %vm2853_vm5 = vcmp.gt.s32.totalorder %v5529_v51, 5 }
  0x59   :  { %711 = vmatprep.subr.bf16.mxu0 %v4377_v8  ;;  %804 = vmatprep.subr.bf16.mxu1 %v4379_v11  ;;  %v106_v8 = vld [vmem:[#allocation6 + $0x38] sm:$0xff]  ;;  %v4321_v11 = vcombine.high %v101_v3, %v105_v6  ;;  %v5520_v49 = vld [vmem:[#allocation8 + $0x4] ss:$16 sps:$4 sm:$0xff]   ;;  %vm1853_vm6 = vcmp.gt.s32.totalorder %v5529_v51, 1  ;;  %vm1854_vm7 = vcmp.gt.s32.totalorder %v5529_v51, 10  ;;  %vm2104_vm8 = vcmp.gt.s32.totalorder %v5529_v51, 9 }
  0x5a   :  { %v4322_v17 = vcombine.low %v102_v7, %v106_v8  ;;  %v5543_v55 = vld [vmem:[#allocation9 + $0xe4] ss:$16 sps:$4 sm:$0xff]   ;;  %v5570_v62 = vld [vmem:[#allocation9 + $0xe8] ss:$16 sps:$4 sm:$0xff]   ;;  %vm2354_vm9 = vcmp.gt.s32.totalorder %v5529_v51, 8  ;;  %vm2604_vm10 = vcmp.gt.s32.totalorder %v5529_v51, 7 }
  0x5b   :  { %558 = vmatmul.mubr.bf16.vlgmr.msra.gmra.mxu0 %v5391_v12  ;;  %651 = vmatmul.mubr.bf16.vlgmr.msra.gmra.mxu1 %v5391_v12  ;;  %vm2854_vm11 = vcmp.gt.s32.totalorder %v5529_v51, 6 }
  0x5c   :  { %712 = vmatpush1.bf16.msra.mxu0 %v4376_v14  ;;  %567 = vmatprep.mubr.bf16.mxu0 %v7580_v0  ;;  %v4323_v14 = vcombine.high %v102_v7, %v106_v8  ;;  %v5595_v7 = vld [vmem:[#allocation9 + $0xa0] ss:$16 sps:$4 sm:$0xff]   ;;  %v5599_v8 = vld [vmem:[#allocation9 + $0xa8] ss:$16 sps:$4 sm:$0xff]  }
  0x5d   :  { %713 = vmatprep.subr.bf16.mxu0 %v4369_v16  ;;  %660 = vmatprep.mubr.bf16.mxu1 %v7580_v0  ;;  %v4320_v16 = vcombine.low %v101_v3, %v105_v6  ;;  %v2855_v3 = vsel %vm2853_vm5, 1, %v7580_v0  ;;  %v5590_v6 = vld [vmem:[#allocation9 + $0xac] ss:$16 sps:$4 sm:$0xff]  }
  0x5e   :  { %805 = vmatpush1.bf16.msra.mxu1 %v4378_v19  ;;  %v5417_v19 = vpack.c.bf16 %v90_v15, %v89_v13  ;;  %v5611_v13 = vld [vmem:[#allocation9 + $0x88] ss:$16 sps:$4 sm:$0xff]   ;;  %v5616_v15 = vld [vmem:[#allocation9 + $0x6c] ss:$16 sps:$4 sm:$0xff]  }
  0x5f   :  { %806 = vmatprep.subr.bf16.mxu1 %v4371_v22  ;;  %v92_v22 = vld [vmem:[#allocation3 + $0x58] sm:$0xff] }
  0x60   :  { %714 = vmatpush1.bf16.msra.mxu0 %v4368_v24  ;;  %v5427_v23 = vpack.c.bf16 %v92_v22, %v91_v21  ;;  %v5433_v24 = vld [vmem:[#allocation8 + $0xe0] ss:$16 sps:$4 sm:$0xff]   ;;  %v5628_v21 = vld [vmem:[#allocation9 + $0x4c] ss:$16 sps:$4 sm:$0xff]  }
  0x61   :  { %715 = vmatprep.subr.bf16.mxu0 %v4361_v26  ;;  %v5437_v26 = vld [vmem:[#allocation8 + $0xe8] ss:$16 sps:$4 sm:$0xff]   ;;  %v5631_v22 = vld [vmem:[#allocation9 + $0x40] ss:$16 sps:$4 sm:$0xff]  }
  0x62   :  { %807 = vmatpush1.bf16.msra.mxu1 %v4370_v28  ;;  %v5444_v28 = vld [vmem:[#allocation8 + $0xc0] ss:$16 sps:$4 sm:$0xff]   ;;  %7744 = vst [vmem:[#allocation16_spill] sm:$0xff] %v5631_v22 }
  0x63   :  { %568 = vmatmul.mubr.bf16.gmra.mxu0 %v5397_v29  ;;  %808 = vmatprep.subr.bf16.mxu1 %v4363_v31  ;;  %v5452_v31 = vld [vmem:[#allocation8 + $0xc8] ss:$16 sps:$4 sm:$0xff]  }
  0x64   :  { %661 = vmatmul.mubr.bf16.gmra.mxu1 %v5397_v29  ;;  %716 = vmatpush1.bf16.msra.mxu0 %v4360_v33  ;;  %v5461_v33 = vld [vmem:[#allocation8 + $0x84] ss:$16 sps:$4 sm:$0xff]  }
  0x65   :  { %577 = vmatprep.mubr.bf16.mxu0 %v7580_v0  ;;  %670 = vmatprep.mubr.bf16.mxu1 %v7580_v0 }
  0x66   :  { %717 = vmatprep.subr.bf16.mxu0 %v4353_v36  ;;  %809 = vmatpush1.bf16.msra.mxu1 %v4362_v39  ;;  %v5472_v36 = vld [vmem:[#allocation8 + $0x80] ss:$16 sps:$4 sm:$0xff]   ;;  %v5483_v39 = vld [vmem:[#allocation8 + $0x6c] ss:$16 sps:$4 sm:$0xff]  }
  0x67   :  { %810 = vmatprep.subr.bf16.mxu1 %v4355_v41  ;;  %v5492_v41 = vld [vmem:[#allocation8 + $0x68] ss:$16 sps:$4 sm:$0xff]  }
  0x68   :  { %718 = vmatpush1.bf16.msra.mxu0 %v4352_v43  ;;  %v5502_v43 = vld [vmem:[#allocation8 + $0x40] ss:$16 sps:$4 sm:$0xff]  }
  0x69   :  { %719 = vmatprep.subr.bf16.mxu0 %v4345_v45  ;;  %v5508_v45 = vld [vmem:[#allocation8 + $0x48] ss:$16 sps:$4 sm:$0xff]  }
  0x6a   :  { %811 = vmatpush1.bf16.msra.mxu1 %v4354_v46  ;;  %v5511_v46 = vld [vmem:[#allocation8 + $0x2c] ss:$16 sps:$4 sm:$0xff]  }
  0x6b   :  { %578 = vmatmul.mubr.bf16.gmra.mxu0 %v5403_v48  ;;  %812 = vmatprep.subr.bf16.mxu1 %v4347_v50  ;;  %v5524_v50 = vld [vmem:[#allocation8 + $0xc] ss:$16 sps:$4 sm:$0xff]  }
  0x6c   :  { %671 = vmatmul.mubr.bf16.gmra.mxu1 %v5403_v48  ;;  %587 = vmatprep.mubr.bf16.mxu0 %v7580_v0 }
  0x6d   :  { %680 = vmatprep.mubr.bf16.mxu1 %v7580_v0  ;;  %720 = vmatpush1.bf16.msra.mxu0 %v4344_v53  ;;  %v1607_v53 = vsel %vm1605_vm0, 1, %v7580_v0 }
  0x6e   :  { %721 = vmatprep.subr.bf16.mxu0 %v4337_v56  ;;  %813 = vmatpush1.bf16.msra.mxu1 %v4346_v57  ;;  %v5546_v56 = vld [vmem:[#allocation9 + $0xec] ss:$16 sps:$4 sm:$0xff]   ;;  %v1614_v57 = vsel %vm1606_vm1, 1, %v7580_v0 }
  0x6f   :  { %814 = vmatprep.subr.bf16.mxu1 %v4339_v60  ;;  %1609 = vperm.xlu0 %4540, %v1607_v53   ;;  %v2605_v60 = vsel %vm2603_vm4, 1, %v7580_v0  ;;  %v5637_v53 = vld [vmem:[#allocation9 + $0x24] ss:$16 sps:$4 sm:$0xff]  }
  0x71   :  { %722 = vmatpush1.bf16.msra.mxu0 %v4336_v63  ;;  %v5572_v63 = vld [vmem:[#allocation9 + $0xc4] ss:$16 sps:$4 sm:$0xff]  }
  0x72   :  { %723 = vmatprep.subr.bf16.mxu0 %v4329_v1  ;;  %815 = vmatpush1.bf16.msra.mxu1 %v4338_v2  ;;  %v5575_v1 = vld [vmem:[#allocation9 + $0xcc] ss:$16 sps:$4 sm:$0xff]   ;;  %v5580_v2 = vld [vmem:[#allocation9 + $0xc0] ss:$16 sps:$4 sm:$0xff]  }
  0x73   :  { %588 = vmatmul.mubr.bf16.gmra.mxu0 %v5409_v4  ;;  %816 = vmatprep.subr.bf16.mxu1 %v4331_v5  ;;  %v5587_v5 = vld [vmem:[#allocation9 + $0xa4] ss:$16 sps:$4 sm:$0xff]  }
  0x74   :  { %681 = vmatmul.mubr.bf16.gmra.mxu1 %v5409_v4  ;;  %597 = vmatprep.mubr.bf16.mxu0 %v7580_v0 }
  0x75   :  { %690 = vmatprep.mubr.bf16.mxu1 %v7580_v0  ;;  %724 = vmatpush1.bf16.msra.mxu0 %v4328_v9  ;;  %v5601_v9 = vld [vmem:[#allocation9 + $0x84] ss:$16 sps:$4 sm:$0xff]  }
  0x76   :  { %817 = vmatpush1.bf16.msra.mxu1 %v4330_v10  ;;  %725 = vmatprep.subr.bf16.mxu0 %v4321_v11  ;;  %v5604_v10 = vld [vmem:[#allocation9 + $0x8c] ss:$16 sps:$4 sm:$0xff]   ;;  %v5607_v11 = vld [vmem:[#allocation9 + $0x80] ss:$16 sps:$4 sm:$0xff]  }
  0x77   :  { %818 = vmatprep.subr.bf16.mxu1 %v4323_v14  ;;  %1616 = vperm.xlu0 %4540, %v1614_v57   ;;  %v5613_v14 = vld [vmem:[#allocation9 + $0x64] ss:$16 sps:$4 sm:$0xff]   ;;  %v5640_v57 = vld [vmem:[#allocation9 + $0x2c] ss:$16 sps:$4 sm:$0xff]  }
  0x78   :  { %7745 = vst [vmem:[#allocation17_spill] sm:$0xff] %v5640_v57 }
  0x79   :  { %726 = vmatpush1.bf16.msra.mxu0 %v4320_v16  ;;  %v5619_v16 = vld [vmem:[#allocation9 + $0x60] ss:$16 sps:$4 sm:$0xff]  }
  0x7a   :  { %819 = vmatpush1.bf16.msra.mxu1 %v4322_v17  ;;  %1221 = vmatprep.subr.bf16.mxu0 %v5415_v18  ;;  %v5623_v17 = vld [vmem:[#allocation9 + $0x68] ss:$16 sps:$4 sm:$0xff]  }
  0x7b   :  { %598 = vmatmul.mubr.bf16.gmra.mxu0 %v5417_v19  ;;  %1262 = vmatprep.subr.bf16.mxu1 %v5419_v20 }
  0x7c   :  { %691 = vmatmul.mubr.bf16.gmra.mxu1 %v5417_v19  ;;  %607 = vmatprep.mubr.bf16.mxu0 %v7580_v0 }
  0x7d   :  { %700 = vmatprep.mubr.bf16.mxu1 %v7580_v0  ;;  %2107 = vperm.xlu0 %4540, %v2105_v58   ;;  %v5643_v58 = vld [vmem:[#allocation9 + $0x20] ss:$16 sps:$4 sm:$0xff]  }
  0x81   :  { %2357 = vperm.xlu0 %4540, %v2355_v59   ;;  %v5647_v59 = vld [vmem:[#allocation9 + $0x28] ss:$16 sps:$4 sm:$0xff]  }
  0x83   :  { %608 = vmatmul.mubr.bf16.gmra.mxu0 %v5427_v23 }
  0x84   :  { %701 = vmatmul.mubr.bf16.gmra.mxu1 %v5427_v23  ;;  %743 = vmatprep.mubr.bf16.mxu0 %v7580_v0 }
  0x85   :  { %836 = vmatprep.mubr.bf16.mxu1 %v7580_v0  ;;  %2607 = vperm.xlu0 %4540, %v2605_v60   ;;  %v5649_v60 = vld [vmem:[#allocation9 + $0x4] ss:$16 sps:$4 sm:$0xff]  }
  0x89   :  { %2857 = vperm.xlu0 %4540, %v2855_v3   ;;  %v5652_v3 = vld [vmem:[#allocation9 + $0xc] ss:$16 sps:$4 sm:$0xff]  }
  0x8b   :  { %744 = vmatmul.mubr.bf16.vlgmr.msra.gmra.mxu0 %v5391_v12 }
  0x8c   :  { %837 = vmatmul.mubr.bf16.vlgmr.msra.gmra.mxu1 %v5391_v12  ;;  %1222 = vmatpush1.bf16.msra.mxu0 %v5433_v24  ;;  %v5458_v12 = vld [vmem:[#allocation8 + $0xa0] ss:$16 sps:$4 sm:$0xff]  }
  0x8d   :  { %1223 = vmatprep.subr.bf16.mxu0 %v5435_v25  ;;  %753 = vmatprep.mubr.bf16.mxu0 %v7580_v0 }
  0x8e   :  { %846 = vmatprep.mubr.bf16.mxu1 %v7580_v0  ;;  %1263 = vmatpush1.bf16.msra.mxu1 %v5437_v26 }
  0x8f   :  { %1264 = vmatprep.subr.bf16.mxu1 %v5440_v27 }
  0x90   :  { %1224 = vmatpush1.bf16.msra.mxu0 %v5444_v28 }
  0x91   :  { %1225 = vmatprep.subr.bf16.mxu0 %v5448_v30 }
  0x92   :  { %1265 = vmatpush1.bf16.msra.mxu1 %v5452_v31 }
  0x93   :  { %754 = vmatmul.mubr.bf16.gmra.mxu0 %v5397_v29  ;;  %1266 = vmatprep.subr.bf16.mxu1 %v5455_v32 }
  0x94   :  { %847 = vmatmul.mubr.bf16.gmra.mxu1 %v5397_v29  ;;  %1226 = vmatpush1.bf16.msra.mxu0 %v5458_v12  ;;  %v5487_v29 = vld [vmem:[#allocation8 + $0x60] ss:$16 sps:$4 sm:$0xff]  }
  0x95   :  { %763 = vmatprep.mubr.bf16.mxu0 %v7580_v0  ;;  %856 = vmatprep.mubr.bf16.mxu1 %v7580_v0 }
  0x96   :  { %1227 = vmatprep.subr.bf16.mxu0 %v5461_v33  ;;  %1267 = vmatpush1.bf16.msra.mxu1 %v5464_v34 }
  0x97   :  { %1268 = vmatprep.subr.bf16.mxu1 %v5468_v35 }
  0x98   :  { %1228 = vmatpush1.bf16.msra.mxu0 %v5472_v36 }
  0x99   :  { %1229 = vmatprep.subr.bf16.mxu0 %v5476_v37 }
  0x9a   :  { %1269 = vmatpush1.bf16.msra.mxu1 %v5480_v38 }
  0x9b   :  { %764 = vmatmul.mubr.bf16.gmra.mxu0 %v5403_v48  ;;  %1270 = vmatprep.subr.bf16.mxu1 %v5483_v39 }
  0x9c   :  { %857 = vmatmul.mubr.bf16.gmra.mxu1 %v5403_v48  ;;  %773 = vmatprep.mubr.bf16.mxu0 %v7580_v0  ;;  %v5518_v48 = vld [vmem:[#allocation8 + $0x28] ss:$16 sps:$4 sm:$0xff]  }
  0x9d   :  { %866 = vmatprep.mubr.bf16.mxu1 %v7580_v0  ;;  %1230 = vmatpush1.bf16.msra.mxu0 %v5487_v29 }
  0x9e   :  { %1231 = vmatprep.subr.bf16.mxu0 %v5490_v40  ;;  %1271 = vmatpush1.bf16.msra.mxu1 %v5492_v41 }
  0x9f   :  { %1272 = vmatprep.subr.bf16.mxu1 %v5496_v42 }
  0xa1   :  { %1232 = vmatpush1.bf16.msra.mxu0 %v5502_v43 }
  0xa2   :  { %1233 = vmatprep.subr.bf16.mxu0 %v5506_v44  ;;  %1273 = vmatpush1.bf16.msra.mxu1 %v5508_v45 }
  0xa3   :  { %774 = vmatmul.mubr.bf16.gmra.mxu0 %v5409_v4  ;;  %1274 = vmatprep.subr.bf16.mxu1 %v5511_v46 }
  0xa4   :  { %867 = vmatmul.mubr.bf16.gmra.mxu1 %v5409_v4  ;;  %783 = vmatprep.mubr.bf16.mxu0 %v7580_v0  ;;  %v5585_v4 = vld [vmem:[#allocation9 + $0xc8] ss:$16 sps:$4 sm:$0xff]  }
  0xa5   :  { %876 = vmatprep.mubr.bf16.mxu1 %v7580_v0  ;;  %1234 = vmatpush1.bf16.msra.mxu0 %v5514_v47 }
  0xa6   :  { %1275 = vmatpush1.bf16.msra.mxu1 %v5518_v48  ;;  %1235 = vmatprep.subr.bf16.mxu0 %v5520_v49 }
  0xa7   :  { %1276 = vmatprep.subr.bf16.mxu1 %v5524_v50 }
  0xa9   :  { %1236 = vmatpush1.bf16.msra.mxu0 %v5536_v52 }
  0xaa   :  { %1277 = vmatpush1.bf16.msra.mxu1 %v5541_v54  ;;  %1471 = vmatprep.subr.bf16.mxu0 %v5543_v55 }
  0xab   :  { %784 = vmatmul.mubr.bf16.gmra.mxu0 %v5417_v19  ;;  %1512 = vmatprep.subr.bf16.mxu1 %v5546_v56 }
  0xac   :  { %877 = vmatmul.mubr.bf16.gmra.mxu1 %v5417_v19  ;;  %793 = vmatprep.mubr.bf16.mxu0 %v7580_v0  ;;  %v5625_v19 = vld [vmem:[#allocation9 + $0x44] ss:$16 sps:$4 sm:$0xff]  }
  0xad   :  { %886 = vmatprep.mubr.bf16.mxu1 %v7580_v0 }
  0xb3   :  { %794 = vmatmul.mubr.bf16.gmra.mxu0 %v5427_v23 }
  0xb4   :  { %887 = vmatmul.mubr.bf16.gmra.mxu1 %v5427_v23  ;;  %1253 = vmatprep.mubr.bf16.mxu0 %v7580_v0  ;;  %v5635_v23 = vld [vmem:[#allocation9 + $0x48] ss:$16 sps:$4 sm:$0xff]  }
  0xb5   :  { %1294 = vmatprep.mubr.bf16.mxu1 %v7580_v0 }
  0xbb   :  { %1254 = vmatmul.mubr.bf16.vlgmr.msra.gmra.mxu0 %v7580_v0 }
  0xbc   :  { %1295 = vmatmul.mubr.bf16.vlgmr.msra.gmra.mxu1 %v7580_v0  ;;  %1472 = vmatpush1.bf16.msra.mxu0 %v5568_v61 }
  0xbd   :  { %1513 = vmatpush1.bf16.msra.mxu1 %v5570_v62  ;;  %1473 = vmatprep.subr.bf16.mxu0 %v5572_v63 }
  0xbe   :  { %1514 = vmatprep.subr.bf16.mxu1 %v5575_v1  ;;  %1503 = vmatprep.mubr.bf16.mxu0 %v7580_v0 }
  0xbf   :  { %1544 = vmatprep.mubr.bf16.mxu1 %v7580_v0  ;;  %v5655_v0 = vld [vmem:[#allocation9] ss:$16 sps:$4 sm:$0xff]  }
  0xc0   :  { %1474 = vmatpush1.bf16.msra.mxu0 %v5580_v2 }
  0xc1   :  { %1515 = vmatpush1.bf16.msra.mxu1 %v5585_v4  ;;  %1475 = vmatprep.subr.bf16.mxu0 %v5587_v5 }
  0xc2   :  { %1516 = vmatprep.subr.bf16.mxu1 %v5590_v6 }
  0xc4   :  { %1476 = vmatpush1.bf16.msra.mxu0 %v5595_v7 }
  0xc5   :  { %1517 = vmatpush1.bf16.msra.mxu1 %v5599_v8  ;;  %1477 = vmatprep.subr.bf16.mxu0 %v5601_v9 }
  0xc6   :  { %1518 = vmatprep.subr.bf16.mxu1 %v5604_v10 }
  0xc8   :  { %1478 = vmatpush1.bf16.msra.mxu0 %v5607_v11 }
  0xc9   :  { %1519 = vmatpush1.bf16.msra.mxu1 %v5611_v13  ;;  %1479 = vmatprep.subr.bf16.mxu0 %v5613_v14 }
  0xca   :  { %1520 = vmatprep.subr.bf16.mxu1 %v5616_v15 }
  0xcc   :  { %1480 = vmatpush1.bf16.msra.mxu0 %v5619_v16 }
  0xcd   :  { %1521 = vmatpush1.bf16.msra.mxu1 %v5623_v17  ;;  %1481 = vmatprep.subr.bf16.mxu0 %v5625_v19 }
  0xce   :  { %1522 = vmatprep.subr.bf16.mxu1 %v5628_v21 }
  0xd0   :  { %1482 = vmatpush1.bf16.msra.mxu0 %v5631_v22  ;;  %v5659_v22 = vld [vmem:[#allocation9 + $0x8] ss:$16 sps:$4 sm:$0xff]  }
  0xd1   :  { %1523 = vmatpush1.bf16.msra.mxu1 %v5635_v23  ;;  %1483 = vmatprep.subr.bf16.mxu0 %v5637_v53 }
  0xd2   :  { %1524 = vmatprep.subr.bf16.mxu1 %v5640_v57  ;;  %v7746_v57 = vmov 0  }
  0xd4   :  { %1484 = vmatpush1.bf16.msra.mxu0 %v5643_v58 }
  0xd5   :  { %1525 = vmatpush1.bf16.msra.mxu1 %v5647_v59  ;;  %1485 = vmatprep.subr.bf16.mxu0 %v5649_v60 }
  0xd6   :  { %1526 = vmatprep.subr.bf16.mxu1 %v5652_v3 }
  0xd8   :  { %1486 = vmatpush1.bf16.msra.mxu0 %v5655_v0 }
  0xd9   :  { %1527 = vmatpush1.bf16.msra.mxu1 %v5659_v22  ;;  %1628 = vmatprep.subr.bf16.mxu0 %v5415_v18  ;;  %v165_v18 = vlaneseq }
  0xda   :  { %1669 = vmatprep.subr.bf16.mxu1 %v5419_v20 }
  0xdb   :  { %1504 = vmatmul.mubr.bf16.vlgmr.msra.gmra.mxu0 %v7746_v57  ;;  %v5702_v20 = vshrl.u32 %v165_v18, 7 }
  0xdc   :  { %1545 = vmatmul.mubr.bf16.vlgmr.msra.gmra.mxu1 %v7746_v57  ;;  %1629 = vmatpush1.bf16.msra.mxu0 %v5433_v24 }
  0xdd   :  { %1670 = vmatpush1.bf16.msra.mxu1 %v5437_v26  ;;  %1630 = vmatprep.subr.bf16.mxu0 %v5435_v25  ;;  %v175_v24 = vsub.s32 2, %v5702_v20  ;;  %v167_v25 = vsub.s32 0, %v5702_v20  ;;  %v5709_v26 = vld [vmem:[%s7578_s5] sm:$0xff]  ;;  %s5333_s5 = smov [#allocation11]  }
  0xde   :  { %1671 = vmatprep.subr.bf16.mxu1 %v5440_v27  ;;  %1660 = vmatprep.mubr.bf16.mxu0 %v7746_v57  ;;  %s4302_s22 = sshll.u32 %s5333_s5, 4  ;;  %s4303_s22 = int_to_ptr.vmem [resolvable:$true] %s4302_s22 }
  0xdf   :  { %1701 = vmatprep.mubr.bf16.mxu1 %v7746_v57  ;;  %s5294_s23 = scalar_lea.vmem %s4303_s22, 3072  ;;  %p5299_p7 = scmp.lt.s32.totalorder %s4303_s22, %s4303_s22 }
  0xe0   :  { %1631 = vmatpush1.bf16.msra.mxu0 %v5444_v28  ;;  %p5295_p6 = scmp.ne.s32.totalorder %s4303_s22, %s5294_s23  ;;  %p5300_p8 = scmp.lt.s32.totalorder %s5294_s23, %s5294_s23 }
  0xe1   :  { %1672 = vmatpush1.bf16.msra.mxu1 %v5452_v31  ;;  %1632 = vmatprep.subr.bf16.mxu0 %v5448_v30  ;;  %v5716_v30 = vrot.slane %v5709_v26, %v175_v24 }
  0xe2   :  { %1673 = vmatprep.subr.bf16.mxu1 %v5455_v32  ;;  %v5721_v32 = vrot.slane %v5709_v26, %v167_v25  ;;  %p5301_p9 = por %p5300_p8, %p5299_p7 }
  0xe4   :  { %1633 = vmatpush1.bf16.msra.mxu0 %v5458_v12  ;;  %p5302_p10 = pnand %p5301_p9, %p5295_p6 }
  0xe5   :  { %1674 = vmatpush1.bf16.msra.mxu1 %v5464_v34  ;;  %1634 = vmatprep.subr.bf16.mxu0 %v5461_v33  ;;  %v171_v34 = vsub.s32 1, %v5702_v20 }
  0xe6   :  { %1675 = vmatprep.subr.bf16.mxu1 %v5468_v35 }
  0xe8   :  { %1635 = vmatpush1.bf16.msra.mxu0 %v5472_v36 }
  0xe9   :  { %1676 = vmatpush1.bf16.msra.mxu1 %v5480_v38  ;;  %1636 = vmatprep.subr.bf16.mxu0 %v5476_v37  ;;  %v179_v37 = vsub.s32 3, %v5702_v20 }
  0xea   :  { %1677 = vmatprep.subr.bf16.mxu1 %v5483_v39 }
  0xec   :  { %1637 = vmatpush1.bf16.msra.mxu0 %v5487_v29 }
  0xed   :  { %1678 = vmatpush1.bf16.msra.mxu1 %v5492_v41  ;;  %1638 = vmatprep.subr.bf16.mxu0 %v5490_v40  ;;  %v5738_v41 = vrot.slane %v5709_v26, %v171_v34 }
  0xee   :  { %1679 = vmatprep.subr.bf16.mxu1 %v5496_v42 }
  0xef   :  { %7751 = vst [vmem:[#allocation22_spill] sm:$0xff] %v5738_v41 }
  0xf0   :  { %1639 = vmatpush1.bf16.msra.mxu0 %v5502_v43 }
  0xf1   :  { %1680 = vmatpush1.bf16.msra.mxu1 %v5508_v45  ;;  %1640 = vmatprep.subr.bf16.mxu0 %v5506_v44  ;;  %v5744_v44 = vrot.slane %v5709_v26, %v179_v37 }
  0xf2   :  { %1681 = vmatprep.subr.bf16.mxu1 %v5511_v46 }
  0xf3   :  { %7753 = vst [vmem:[#allocation24_spill] sm:$0xff] %v5744_v44 }
  0xf4   :  { %1641 = vmatpush1.bf16.msra.mxu0 %v5514_v47 }
  0xf5   :  { %1682 = vmatpush1.bf16.msra.mxu1 %v5518_v48  ;;  %1642 = vmatprep.subr.bf16.mxu0 %v5520_v49 }
  0xf6   :  { %1683 = vmatprep.subr.bf16.mxu1 %v5524_v50 }
  0xf8   :  { %1643 = vmatpush1.bf16.msra.mxu0 %v5536_v52 }
  0xf9   :  { %1684 = vmatpush1.bf16.msra.mxu1 %v5541_v54  ;;  %1719 = vmatprep.subr.bf16.mxu0 %v5543_v55 }
  0xfa   :  { %1760 = vmatprep.subr.bf16.mxu1 %v5546_v56 }
 0x11b   :  { %v5711_v27 = vpop.f32.mrf.mxu0  ;;  %v5713_v28 = vpop.f32.mrf.mxu1 }
 0x11d   :  { %v5718_v31 = vpop.f32.mrf.mxu0  ;;  %v5723_v12 = vpop.f32.mrf.mxu1 }
 0x11f   :  { %v563_v33 = vpop.f32.mrf.mxu0  ;;  %v656_v36 = vpop.f32.mrf.mxu1 }
 0x120   :  { %v5727_v35 = vadd.f32 %v563_v33, %v5721_v32  ;;  %v5731_v38 = vadd.f32 %v656_v36, %v5716_v30 }
 0x121   :  { %v5733_v39 = vpop.f32.mrf.mxu0  ;;  %v5735_v29 = vpop.f32.mrf.mxu1 }
 0x122   :  { %7747 = vst [vmem:[#allocation18_spill] sm:$0xff] %v5727_v35  ;;  %7748 = vst [vmem:[#allocation19_spill] sm:$0xff] %v5731_v38 }
 0x123   :  { %7749 = vst [vmem:[#allocation20_spill] sm:$0xff] %v5733_v39  ;;  %7750 = vst [vmem:[#allocation21_spill] sm:$0xff] %v5735_v29  ;;  %v569_v40 = vpop.f32.mrf.mxu0 }
 0x124   :  { %v5741_v42 = vadd.f32 %v569_v40, %v5721_v32  ;;  %v662_v43 = vpop.f32.mrf.mxu1 }
 0x125   :  { %v5747_v45 = vadd.f32 %v662_v43, %v5716_v30  ;;  %v571_v46 = vpop.f32.mrf.mxu0 }
 0x126   :  { %7752 = vst [vmem:[#allocation23_spill] sm:$0xff] %v5741_v42  ;;  %v5750_v47 = vadd.f32 %v571_v46, %v5738_v41  ;;  %v664_v48 = vpop.f32.mrf.mxu1 }
 0x127   :  { %7754 = vst [vmem:[#allocation25_spill] sm:$0xff] %v5747_v45  ;;  %v5753_v49 = vadd.f32 %v664_v48, %v5744_v44  ;;  %v573_v50 = vpop.f32.mrf.mxu0 }
 0x128   :  { %7755 = vst [vmem:[#allocation26_spill] sm:$0xff] %v5750_v47  ;;  %v5756_v18 = vadd.f32 %v573_v50, %v5721_v32  ;;  %v666_v24 = vpop.f32.mrf.mxu1 }
 0x129   :  { %7756 = vst [vmem:[#allocation27_spill] sm:$0xff] %v5753_v49  ;;  %v5759_v25 = vadd.f32 %v666_v24, %v5716_v30  ;;  %v5761_v33 = vpop.f32.mrf.mxu0 }
 0x12a   :  { %7757 = vst [vmem:[#allocation28_spill] sm:$0xff] %v5756_v18  ;;  %7759 = vst [vmem:[#allocation30_spill] sm:$0xff] %v5761_v33  ;;  %v5763_v34 = vpop.f32.mrf.mxu1 }
 0x12b   :  { %7758 = vst [vmem:[#allocation29_spill] sm:$0xff] %v5759_v25  ;;  %7760 = vst [vmem:[#allocation31_spill] sm:$0xff] %v5763_v34  ;;  %v579_v36 = vpop.f32.mrf.mxu0 }
 0x12c   :  { %v5766_v37 = vadd.f32 %v579_v36, %v5721_v32  ;;  %v672_v40 = vpop.f32.mrf.mxu1 }
 0x12d   :  { %v5769_v43 = vadd.f32 %v672_v40, %v5716_v30  ;;  %v581_v46 = vpop.f32.mrf.mxu0 }
 0x12e   :  { %7761 = vst [vmem:[#allocation32_spill] sm:$0xff] %v5766_v37  ;;  %v5772_v48 = vadd.f32 %v581_v46, %v5738_v41  ;;  %v674_v50 = vpop.f32.mrf.mxu1 }
 0x12f   :  { %7762 = vst [vmem:[#allocation33_spill] sm:$0xff] %v5769_v43  ;;  %v5775_v24 = vadd.f32 %v674_v50, %v5744_v44  ;;  %v583_v25 = vpop.f32.mrf.mxu0 }
 0x130   :  { %7763 = vst [vmem:[#allocation34_spill] sm:$0xff] %v5772_v48  ;;  %v5778_v18 = vadd.f32 %v583_v25, %v5721_v32  ;;  %v676_v34 = vpop.f32.mrf.mxu1 }
 0x131   :  { %7764 = vst [vmem:[#allocation35_spill] sm:$0xff] %v5775_v24  ;;  %v5781_v36 = vadd.f32 %v676_v34, %v5716_v30  ;;  %v5783_v37 = vpop.f32.mrf.mxu0 }
 0x132   :  { %7765 = vst [vmem:[#allocation36_spill] sm:$0xff] %v5778_v18  ;;  %7767 = vst [vmem:[#allocation38_spill] sm:$0xff] %v5783_v37  ;;  %v5785_v40 = vpop.f32.mrf.mxu1 }
 0x133   :  { %7766 = vst [vmem:[#allocation37_spill] sm:$0xff] %v5781_v36  ;;  %7768 = vst [vmem:[#allocation39_spill] sm:$0xff] %v5785_v40  ;;  %v589_v43 = vpop.f32.mrf.mxu0 }
 0x134   :  { %v5788_v46 = vadd.f32 %v589_v43, %v5721_v32  ;;  %v682_v48 = vpop.f32.mrf.mxu1 }
 0x135   :  { %v5791_v50 = vadd.f32 %v682_v48, %v5716_v30  ;;  %v591_v24 = vpop.f32.mrf.mxu0 }
 0x136   :  { %7769 = vst [vmem:[#allocation40_spill] sm:$0xff] %v5788_v46  ;;  %v5794_v25 = vadd.f32 %v591_v24, %v5738_v41  ;;  %v684_v18 = vpop.f32.mrf.mxu1 }
 0x137   :  { %7770 = vst [vmem:[#allocation41_spill] sm:$0xff] %v5791_v50  ;;  %v5797_v34 = vadd.f32 %v684_v18, %v5744_v44  ;;  %v593_v36 = vpop.f32.mrf.mxu0 }
 0x138   :  { %7771 = vst [vmem:[#allocation42_spill] sm:$0xff] %v5794_v25  ;;  %v5800_v37 = vadd.f32 %v593_v36, %v5721_v32  ;;  %v686_v40 = vpop.f32.mrf.mxu1 }
 0x139   :  { %7772 = vst [vmem:[#allocation43_spill] sm:$0xff] %v5797_v34  ;;  %v5803_v43 = vadd.f32 %v686_v40, %v5716_v30  ;;  %v5805_v46 = vpop.f32.mrf.mxu0 }
 0x13a   :  { %7773 = vst [vmem:[#allocation44_spill] sm:$0xff] %v5800_v37  ;;  %7775 = vst [vmem:[#allocation46_spill] sm:$0xff] %v5805_v46  ;;  %v5807_v48 = vpop.f32.mrf.mxu1 }
 0x13b   :  { %7774 = vst [vmem:[#allocation45_spill] sm:$0xff] %v5803_v43  ;;  %7776 = vst [vmem:[#allocation47_spill] sm:$0xff] %v5807_v48  ;;  %v599_v50 = vpop.f32.mrf.mxu0 }
 0x13c   :  { %v5810_v24 = vadd.f32 %v599_v50, %v5721_v32  ;;  %v692_v25 = vpop.f32.mrf.mxu1 }
 0x13d   :  { %v5813_v18 = vadd.f32 %v692_v25, %v5716_v30  ;;  %v601_v34 = vpop.f32.mrf.mxu0 }
 0x13e   :  { %7777 = vst [vmem:[#allocation48_spill] sm:$0xff] %v5810_v24  ;;  %v5816_v36 = vadd.f32 %v601_v34, %v5738_v41  ;;  %v694_v37 = vpop.f32.mrf.mxu1 }
 0x13f   :  { %7778 = vst [vmem:[#allocation49_spill] sm:$0xff] %v5813_v18  ;;  %v5819_v40 = vadd.f32 %v694_v37, %v5744_v44  ;;  %v603_v43 = vpop.f32.mrf.mxu0  ;;  %v183_v37 = vsub.s32 4, %v5702_v20 }
 0x140   :  { %7779 = vst [vmem:[#allocation50_spill] sm:$0xff] %v5816_v36  ;;  %v5822_v46 = vadd.f32 %v603_v43, %v5721_v32  ;;  %v696_v48 = vpop.f32.mrf.mxu1 }
 0x141   :  { %7780 = vst [vmem:[#allocation51_spill] sm:$0xff] %v5819_v40  ;;  %v5825_v50 = vadd.f32 %v696_v48, %v5716_v30  ;;  %v5827_v24 = vpop.f32.mrf.mxu0 }
 0x142   :  { %7781 = vst [vmem:[#allocation52_spill] sm:$0xff] %v5822_v46  ;;  %7783 = vst [vmem:[#allocation54_spill] sm:$0xff] %v5827_v24  ;;  %v5829_v25 = vpop.f32.mrf.mxu1  ;;  %v191_v46 = vsub.s32 6, %v5702_v20  ;;  %v187_v24 = vsub.s32 5, %v5702_v20 }
 0x143   :  { %7782 = vst [vmem:[#allocation53_spill] sm:$0xff] %v5825_v50  ;;  %7784 = vst [vmem:[#allocation55_spill] sm:$0xff] %v5829_v25  ;;  %v609_v18 = vpop.f32.mrf.mxu0 }
 0x144   :  { %v5832_v34 = vadd.f32 %v609_v18, %v5721_v32  ;;  %v702_v36 = vpop.f32.mrf.mxu1 }
 0x145   :  { %v5836_v40 = vadd.f32 %v702_v36, %v5716_v30  ;;  %v611_v43 = vpop.f32.mrf.mxu0 }
 0x146   :  { %7785 = vst [vmem:[#allocation56_spill] sm:$0xff] %v5832_v34  ;;  %v5840_v48 = vadd.f32 %v611_v43, %v5738_v41  ;;  %v704_v50 = vpop.f32.mrf.mxu1  ;;  %v195_v34 = vsub.s32 7, %v5702_v20 }
 0x147   :  { %7786 = vst [vmem:[#allocation57_spill] sm:$0xff] %v5836_v40  ;;  %v5844_v25 = vadd.f32 %v704_v50, %v5744_v44  ;;  %v613_v18 = vpop.f32.mrf.mxu0  ;;  %v5851_v40 = vrot.slane %v5709_v26, %v183_v37 }
 0x148   :  { %7787 = vst [vmem:[#allocation58_spill] sm:$0xff] %v5840_v48  ;;  %v5848_v33 = vadd.f32 %v613_v18, %v5721_v32  ;;  %v706_v36 = vpop.f32.mrf.mxu1  ;;  %v5859_v48 = vrot.slane %v5709_v26, %v191_v46  ;;  %v5867_v18 = vrot.slane %v5709_v26, %v195_v34 }
 0x149   :  { %7788 = vst [vmem:[#allocation59_spill] sm:$0xff] %v5844_v25  ;;  %v5854_v45 = vadd.f32 %v706_v36, %v5716_v30  ;;  %v5856_v43 = vpop.f32.mrf.mxu0  ;;  %v5864_v25 = vrot.slane %v5709_v26, %v187_v24 }
 0x14a   :  { %7789 = vst [vmem:[#allocation60_spill] sm:$0xff] %v5848_v33  ;;  %7791 = vst [vmem:[#allocation62_spill] sm:$0xff] %v5856_v43  ;;  %v5861_v50 = vpop.f32.mrf.mxu1 }
 0x14b   :  { %7790 = vst [vmem:[#allocation61_spill] sm:$0xff] %v5854_v45  ;;  %7792 = vst [vmem:[#allocation63_spill] sm:$0xff] %v5861_v50  ;;  %v745_v20 = vpop.f32.mrf.mxu0 }
 0x14c   :  { %7793 = vst [vmem:[#allocation64_spill] sm:$0xff] %v5864_v25  ;;  %7794 = vst [vmem:[#allocation65_spill] sm:$0xff] %v5867_v18  ;;  %v5870_v37 = vadd.f32 %v745_v20, %v5851_v40  ;;  %v838_v33 = vpop.f32.mrf.mxu1 }
 0x14d   :  { %v5873_v36 = vadd.f32 %v838_v33, %v5859_v48  ;;  %v747_v45 = vpop.f32.mrf.mxu0 }
 0x14e   :  { %7795 = vst [vmem:[#allocation66_spill] sm:$0xff] %v5870_v37  ;;  %v5876_v46 = vadd.f32 %v747_v45, %v5864_v25  ;;  %v840_v43 = vpop.f32.mrf.mxu1 }
 0x14f   :  { %7796 = vst [vmem:[#allocation67_spill] sm:$0xff] %v5873_v36  ;;  %v5879_v50 = vadd.f32 %v840_v43, %v5867_v18  ;;  %v749_v24 = vpop.f32.mrf.mxu0 }
 0x150   :  { %7797 = vst [vmem:[#allocation68_spill] sm:$0xff] %v5876_v46  ;;  %v5882_v49 = vadd.f32 %v749_v24, %v5851_v40  ;;  %v842_v26 = vpop.f32.mrf.mxu1 }
 0x151   :  { %7798 = vst [vmem:[#allocation69_spill] sm:$0xff] %v5879_v50  ;;  %v5885_v34 = vadd.f32 %v842_v26, %v5859_v48  ;;  %v5887_v20 = vpop.f32.mrf.mxu0 }
 0x152   :  { %7799 = vst [vmem:[#allocation70_spill] sm:$0xff] %v5882_v49  ;;  %7801 = vst [vmem:[#allocation72_spill] sm:$0xff] %v5887_v20  ;;  %v5889_v33 = vpop.f32.mrf.mxu1  ;;  %v1862_v20 = vsel %vm1854_vm7, 1, %v7746_v57 }
 0x153   :  { %7800 = vst [vmem:[#allocation71_spill] sm:$0xff] %v5885_v34  ;;  %7802 = vst [vmem:[#allocation73_spill] sm:$0xff] %v5889_v33  ;;  %v755_v36 = vpop.f32.mrf.mxu0 }
 0x154   :  { %v5892_v45 = vadd.f32 %v755_v36, %v5851_v40  ;;  %v848_v46 = vpop.f32.mrf.mxu1  ;;  %v1855_v36 = vsel %vm1853_vm6, 1, %v7746_v57 }
 0x155   :  { %v5895_v43 = vadd.f32 %v848_v46, %v5859_v48  ;;  %v757_v50 = vpop.f32.mrf.mxu0  ;;  %1857 = vperm.xlu1 %4541, %v1855_v36  }
 0x156   :  { %7803 = vst [vmem:[#allocation74_spill] sm:$0xff] %v5892_v45  ;;  %v5898_v24 = vadd.f32 %v757_v50, %v5864_v25  ;;  %v850_v37 = vpop.f32.mrf.mxu1 }
 0x157   :  { %7804 = vst [vmem:[#allocation75_spill] sm:$0xff] %v5895_v43  ;;  %v5903_v26 = vadd.f32 %v850_v37, %v5867_v18  ;;  %v759_v34 = vpop.f32.mrf.mxu0 }
 0x158   :  { %7805 = vst [vmem:[#allocation76_spill] sm:$0xff] %v5898_v24  ;;  %v5907_v33 = vadd.f32 %v759_v34, %v5851_v40  ;;  %v852_v46 = vpop.f32.mrf.mxu1 }
 0x159   :  { %7806 = vst [vmem:[#allocation77_spill] sm:$0xff] %v5903_v26  ;;  %v5910_v49 = vadd.f32 %v852_v46, %v5859_v48  ;;  %v5912_v50 = vpop.f32.mrf.mxu0  ;;  %1864 = vperm.xlu1 %4541, %v1862_v20   ;;  %v2112_v46 = vsel %vm2104_vm8, 1, %v7746_v57 }
 0x15a   :  { %7807 = vst [vmem:[#allocation78_spill] sm:$0xff] %v5907_v33  ;;  %7809 = vst [vmem:[#allocation80_spill] sm:$0xff] %v5912_v50  ;;  %v5915_v43 = vpop.f32.mrf.mxu1 }
 0x15b   :  { %7808 = vst [vmem:[#allocation79_spill] sm:$0xff] %v5910_v49  ;;  %7810 = vst [vmem:[#allocation81_spill] sm:$0xff] %v5915_v43  ;;  %v765_v37 = vpop.f32.mrf.mxu0 }
 0x15c   :  { %v5919_v26 = vadd.f32 %v765_v37, %v5851_v40  ;;  %v858_v24 = vpop.f32.mrf.mxu1 }
 0x15d   :  { %v5922_v34 = vadd.f32 %v858_v24, %v5859_v48  ;;  %v767_v36 = vpop.f32.mrf.mxu0  ;;  %2114 = vperm.xlu1 %4541, %v2112_v46  }
 0x15e   :  { %7811 = vst [vmem:[#allocation82_spill] sm:$0xff] %v5919_v26  ;;  %v5926_v45 = vadd.f32 %v767_v36, %v5864_v25  ;;  %v860_v49 = vpop.f32.mrf.mxu1 }
 0x15f   :  { %7812 = vst [vmem:[#allocation83_spill] sm:$0xff] %v5922_v34  ;;  %v5930_v43 = vadd.f32 %v860_v49, %v5867_v18  ;;  %v769_v33 = vpop.f32.mrf.mxu0  ;;  %v2362_v34 = vsel %vm2354_vm9, 1, %v7746_v57 }
 0x160   :  { %7813 = vst [vmem:[#allocation84_spill] sm:$0xff] %v5926_v45  ;;  %v5933_v37 = vadd.f32 %v769_v33, %v5851_v40  ;;  %v862_v20 = vpop.f32.mrf.mxu1 }
 0x161   :  { %7814 = vst [vmem:[#allocation85_spill] sm:$0xff] %v5930_v43  ;;  %v5936_v24 = vadd.f32 %v862_v20, %v5859_v48  ;;  %v771_v50 = vpop.f32.mrf.mxu0  ;;  %2364 = vperm.xlu1 %4541, %v2362_v34  }
 0x162   :  { %7815 = vst [vmem:[#allocation86_spill] sm:$0xff] %v5933_v37  ;;  %v5940_v36 = vadd.f32 %v771_v50, %v5864_v25  ;;  %v864_v45 = vpop.f32.mrf.mxu1 }
 0x163   :  { %7816 = vst [vmem:[#allocation87_spill] sm:$0xff] %v5936_v24  ;;  %v5944_v49 = vadd.f32 %v864_v45, %v5867_v18  ;;  %v775_v43 = vpop.f32.mrf.mxu0  ;;  %v2612_v24 = vsel %vm2604_vm10, 1, %v7746_v57 }
 0x164   :  { %7817 = vst [vmem:[#allocation88_spill] sm:$0xff] %v5940_v36  ;;  %v5947_v33 = vadd.f32 %v775_v43, %v5851_v40  ;;  %v868_v46 = vpop.f32.mrf.mxu1 }
 0x165   :  { %7818 = vst [vmem:[#allocation89_spill] sm:$0xff] %v5944_v49  ;;  %v5950_v20 = vadd.f32 %v868_v46, %v5859_v48  ;;  %v777_v26 = vpop.f32.mrf.mxu0  ;;  %2614 = vperm.xlu1 %4541, %v2612_v24  }
 0x166   :  { %7819 = vst [vmem:[#allocation90_spill] sm:$0xff] %v5947_v33  ;;  %v5954_v50 = vadd.f32 %v777_v26, %v5864_v25  ;;  %v870_v36 = vpop.f32.mrf.mxu1 }
 0x167   :  { %7820 = vst [vmem:[#allocation91_spill] sm:$0xff] %v5950_v20  ;;  %v5958_v45 = vadd.f32 %v870_v36, %v5867_v18  ;;  %v779_v49 = vpop.f32.mrf.mxu0  ;;  %v2862_v20 = vsel %vm2854_vm11, 1, %v7746_v57 }
 0x168   :  { %7821 = vst [vmem:[#allocation92_spill] sm:$0xff] %v5954_v50  ;;  %v5961_v43 = vadd.f32 %v779_v49, %v5851_v40  ;;  %v872_v34 = vpop.f32.mrf.mxu1 }
 0x169   :  { %7822 = vst [vmem:[#allocation93_spill] sm:$0xff] %v5958_v45  ;;  %v5964_v46 = vadd.f32 %v872_v34, %v5859_v48  ;;  %v781_v37 = vpop.f32.mrf.mxu0  ;;  %2864 = vperm.xlu1 %4541, %v2862_v20  }
 0x16a   :  { %7823 = vst [vmem:[#allocation94_spill] sm:$0xff] %v5961_v43  ;;  %v5968_v26 = vadd.f32 %v781_v37, %v5864_v25  ;;  %v874_v50 = vpop.f32.mrf.mxu1 }
 0x16b   :  { %7824 = vst [vmem:[#allocation95_spill] sm:$0xff] %v5964_v46  ;;  %v5971_v51 = vadd.f32 %v874_v50, %v5867_v18  ;;  %v785_v36 = vpop.f32.mrf.mxu0 }
 0x16c   :  { %7825 = vst [vmem:[#allocation96_spill] sm:$0xff] %v5968_v26  ;;  %v5974_v45 = vadd.f32 %v785_v36, %v5851_v40  ;;  %v878_v49 = vpop.f32.mrf.mxu1 }
 0x16d   :  { %7826 = vst [vmem:[#allocation97_spill] sm:$0xff] %v5971_v51  ;;  %v5977_v24 = vadd.f32 %v878_v49, %v5859_v48  ;;  %v787_v34 = vpop.f32.mrf.mxu0 }
 0x16e   :  { %7827 = vst [vmem:[#allocation98_spill] sm:$0xff] %v5974_v45  ;;  %v5980_v33 = vadd.f32 %v787_v34, %v5864_v25  ;;  %v880_v46 = vpop.f32.mrf.mxu1 }
 0x16f   :  { %7828 = vst [vmem:[#allocation99_spill] sm:$0xff] %v5977_v24  ;;  %v5983_v37 = vadd.f32 %v880_v46, %v5867_v18  ;;  %v789_v26 = vpop.f32.mrf.mxu0 }
 0x170   :  { %7829 = vst [vmem:[#allocation100_spill] sm:$0xff] %v5980_v33  ;;  %v5986_v50 = vadd.f32 %v789_v26, %v5851_v40  ;;  %v882_v51 = vpop.f32.mrf.mxu1 }
 0x171   :  { %7830 = vst [vmem:[#allocation101_spill] sm:$0xff] %v5983_v37  ;;  %v5989_v36 = vadd.f32 %v882_v51, %v5859_v48  ;;  %v791_v20 = vpop.f32.mrf.mxu0 }
 0x172   :  { %7831 = vst [vmem:[#allocation102_spill] sm:$0xff] %v5986_v50  ;;  %v5992_v49 = vadd.f32 %v791_v20, %v5864_v25  ;;  %v884_v43 = vpop.f32.mrf.mxu1 }
 0x173   :  { %7832 = vst [vmem:[#allocation103_spill] sm:$0xff] %v5989_v36  ;;  %v5995_v34 = vadd.f32 %v884_v43, %v5867_v18  ;;  %v795_v24 = vpop.f32.mrf.mxu0 }
 0x174   :  { %7833 = vst [vmem:[#allocation104_spill] sm:$0xff] %v5992_v49  ;;  %v5998_v46 = vadd.f32 %v795_v24, %v5851_v40  ;;  %v888_v37 = vpop.f32.mrf.mxu1 }
 0x175   :  { %7834 = vst [vmem:[#allocation105_spill] sm:$0xff] %v5995_v34  ;;  %v6001_v26 = vadd.f32 %v888_v37, %v5859_v48  ;;  %v797_v33 = vpop.f32.mrf.mxu0  ;;  %v560_v34 = vadd.f32 %v5711_v27, %v5721_v32  ;;  %v562_v37 = vadd.f32 %v5718_v31, %v5738_v41  ;;  %v655_v27 = vadd.f32 %v5723_v12, %v5744_v44 }
 0x176   :  { %7835 = vst [vmem:[#allocation106_spill] sm:$0xff] %v5998_v46  ;;  %v6004_v51 = vadd.f32 %v797_v33, %v5864_v25  ;;  %v890_v45 = vpop.f32.mrf.mxu1  ;;  %v653_v31 = vadd.f32 %v5713_v28, %v5716_v30 }
 0x177   :  { %7836 = vst [vmem:[#allocation107_spill] sm:$0xff] %v6001_v26  ;;  %v6007_v20 = vadd.f32 %v890_v45, %v5867_v18  ;;  %v799_v36 = vpop.f32.mrf.mxu0 }
 0x178   :  { %7837 = vst [vmem:[#allocation108_spill] sm:$0xff] %v6004_v51  ;;  %v892_v49 = vpop.f32.mrf.mxu1 }
 0x179   :  { %7838 = vst [vmem:[#allocation109_spill] sm:$0xff] %v6007_v20  ;;  %v801_v43 = vpop.f32.mrf.mxu0 }
 0x17a   :  { %v894_v24 = vpop.f32.mrf.mxu1  ;;  %v802_v12 = vadd.f32 %v801_v43, %v5864_v25  ;;  %v6290_v25 = vld [vmem:[#allocation9 + $0x20] ss:$16 sps:$4 sm:$0xff]  }
 0x17b   :  { %v1255_v50 = vpop.f32.mrf.mxu0 }
 0x17c   :  { %v1303_v47 = vadd.f32 %v1255_v50, %v560_v34  ;;  %v1296_v42 = vpop.f32.mrf.mxu1 }
 0x17d   :  { %v1257_v26 = vpop.f32.mrf.mxu0  ;;  %v1305_v50 = vadd.f32 %v1296_v42, %v653_v31 }
 0x17e   :  { %v4444_v33 = vmul.f32 -1.442695, %v1303_v47  ;;  %v1304_v51 = vadd.f32 %v1257_v26, %v562_v37  ;;  %v1298_v46 = vpop.f32.mrf.mxu1 }
 0x17f   :  { %v1259_v38 = vpop.f32.mrf.mxu0  ;;  %v1306_v32 = vadd.f32 %v1298_v46, %v655_v27 }
 0x180   :  { %4638 = vpow2.f32 %v4444_v33  ;;  %v4445_v45 = vmul.f32 -1.442695, %v1304_v51  ;;  %v1300_v20 = vpop.f32.mrf.mxu1 }
 0x181   :  { %v1260_v29 = vpop.f32.mrf.mxu0  ;;  %v4446_v34 = vmul.f32 -1.442695, %v1306_v32 }
 0x182   :  { %4640 = vpow2.f32 %v4445_v45  ;;  %v1301_v35 = vpop.f32.mrf.mxu1  ;;  %v800_v29 = vadd.f32 %v799_v36, %v5851_v40 }
 0x183   :  { %4642 = vtanh.f32 %v1305_v50 }
 0x184   :  { %4644 = vpow2.f32 %v4446_v34 }
 0x18d   :  { %v4639_v39 = vpop.eup %4638 }
 0x18e   :  { %v1560_v47 = vadd.f32 1.0, %v4639_v39 }
 0x18f   :  { %v4641_v26 = vpop.eup %4640 }
 0x190   :  { %4646 = vrcp.f32 %v1560_v47  ;;  %v1566_v38 = vadd.f32 1.0, %v4641_v26  ;;  %v4643_v35 = vpop.eup %4642  ;;  %v895_v26 = vadd.f32 %v894_v24, %v5867_v18 }
 0x191   :  { %v4645_v20 = vpop.eup %4644 }
 0x192   :  { %4648 = vrcp.f32 %v1566_v38  ;;  %v1573_v32 = vadd.f32 1.0, %v4645_v20 }
 0x19b   :  { %v1505_v51 = vpop.f32.mrf.mxu0 }
 0x19c   :  { %v1553_v46 = vadd.f32 %v1505_v51, %v800_v29  ;;  %v1546_v37 = vpop.f32.mrf.mxu1  ;;  %v893_v29 = vadd.f32 %v892_v49, %v5859_v48 }
 0x19d   :  { %v4647_v28 = vpop.eup %4646  ;;  %v1507_v30 = vpop.f32.mrf.mxu0 }
 0x19e   :  { %v4447_v42 = vmul.f32 -1.442695, %v1553_v46  ;;  %v1554_v33 = vadd.f32 %v1507_v30, %v802_v12  ;;  %v1548_v39 = vpop.f32.mrf.mxu1  ;;  %v1577_v45 = vmul.f32 %v4647_v28, %v4643_v35  ;;  %v1555_v20 = vadd.f32 %v1546_v37, %v893_v29  ;;  %v6158_v29 = vld [vmem:[#allocation8 + $0x2c] ss:$16 sps:$4 sm:$0xff]  }
 0x19f   :  { %v4649_v27 = vpop.eup %4648  ;;  %v1509_v31 = vpop.f32.mrf.mxu0  ;;  %v1556_v38 = vadd.f32 %v1548_v39, %v895_v26  ;;  %v6152_v26 = vld [vmem:[#allocation8 + $0x48] ss:$16 sps:$4 sm:$0xff]   ;;  %7861 = vst [vmem:[#allocation128_spill] sm:$0xff] %v6158_v29 }
 0x1a0   :  { %4650 = vpow2.f32 %v4447_v42  ;;  %v4448_v50 = vmul.f32 -1.442695, %v1554_v33  ;;  %v1576_v34 = vmul.f32 0.0, %v4649_v27  ;;  %v1550_v40 = vpop.f32.mrf.mxu1  ;;  %v6024_v33 = vpop.permute.xlu0 %1609  ;;  %v6128_v27 = vld [vmem:[#allocation8 + $0x88] ss:$16 sps:$4 sm:$0xff]   ;;  %7859 = vst [vmem:[#allocation126_spill] sm:$0xff] %v6152_v26 }
 0x1a1   :  { %v1510_v36 = vpop.f32.mrf.mxu0  ;;  %v4449_v35 = vmul.f32 -1.442695, %v1556_v38  ;;  %7839 = vst [vmem:[#allocation110_spill] sm:$0xff] %v6024_v33  ;;  %vm1611_vm12 = vcmp.eq.s32.totalorder %v6024_v33, 1  ;;  %7851 = vst [vmem:[#allocation118_spill] sm:$0xff] %v6128_v27 }
 0x1a2   :  { %4652 = vpow2.f32 %v4448_v50  ;;  %v6019_v47 = vadd.f32 %v1577_v45, %v1576_v34  ;;  %v1551_v43 = vpop.f32.mrf.mxu1  ;;  %vm4450_vm13 = vmpackc.low %vm1611_vm12, %vm1611_vm12  ;;  %v6134_v31 = vld [vmem:[#allocation8 + $0x6c] ss:$16 sps:$4 sm:$0xff]   ;;  %v6137_v50 = vld [vmem:[#allocation8 + $0x60] ss:$16 sps:$4 sm:$0xff]  }
 0x1a3   :  { %4654 = vrcp.f32 %v1573_v32  ;;  %v6131_v32 = vld [vmem:[#allocation8 + $0x64] ss:$16 sps:$4 sm:$0xff]   ;;  %7853 = vst [vmem:[#allocation120_spill] sm:$0xff] %v6134_v31  ;;  %7854 = vst [vmem:[#allocation121_spill] sm:$0xff] %v6137_v50  ;;  %v6140_v34 = vld [vmem:[#allocation8 + $0x68] ss:$16 sps:$4 sm:$0xff]  }
 0x1a4   :  { %4656 = vtanh.f32 %v6019_v47  ;;  %7852 = vst [vmem:[#allocation119_spill] sm:$0xff] %v6131_v32  ;;  %7855 = vst [vmem:[#allocation122_spill] sm:$0xff] %v6140_v34  ;;  %v6143_v40 = vld [vmem:[#allocation8 + $0x44] ss:$16 sps:$4 sm:$0xff]   ;;  %v6146_v36 = vld [vmem:[#allocation8 + $0x4c] ss:$16 sps:$4 sm:$0xff]  }
 0x1a5   :  { %4658 = vpow2.f32 %v4449_v35  ;;  %7856 = vst [vmem:[#allocation123_spill] sm:$0xff] %v6143_v40  ;;  %7857 = vst [vmem:[#allocation124_spill] sm:$0xff] %v6146_v36  ;;  %v6149_v43 = vld [vmem:[#allocation8 + $0x40] ss:$16 sps:$4 sm:$0xff]   ;;  %v6155_v38 = vld [vmem:[#allocation8 + $0x24] ss:$16 sps:$4 sm:$0xff]  }
 0x1a6   :  { %7858 = vst [vmem:[#allocation125_spill] sm:$0xff] %v6149_v43  ;;  %7860 = vst [vmem:[#allocation127_spill] sm:$0xff] %v6155_v38  ;;  %v6161_v35 = vld [vmem:[#allocation8 + $0x20] ss:$16 sps:$4 sm:$0xff]   ;;  %v6281_v33 = vld [vmem:[#allocation9 + $0x48] ss:$16 sps:$4 sm:$0xff]  }
 0x1a7   :  { %7862 = vst [vmem:[#allocation129_spill] sm:$0xff] %v6161_v35 }
 0x1ad   :  { %v4651_v51 = vpop.eup %4650 }
 0x1ae   :  { %v1584_v12 = vadd.f32 1.0, %v4651_v51  ;;  %v6164_v51 = vld [vmem:[#allocation8 + $0x28] ss:$16 sps:$4 sm:$0xff]  }
 0x1af   :  { %v4653_v46 = vpop.eup %4652  ;;  %7863 = vst [vmem:[#allocation130_spill] sm:$0xff] %v6164_v51 }
 0x1b0   :  { %v4655_v28 = vpop.eup %4654  ;;  %4660 = vrcp.f32 %v1584_v12  ;;  %v1590_v30 = vadd.f32 1.0, %v4653_v46  ;;  %v6170_v12 = vld [vmem:[#allocation8 + $0xc] ss:$16 sps:$4 sm:$0xff]  }
 0x1b1   :  { %v4657_v42 = vpop.eup %4656  ;;  %4662 = vtanh.f32 %v1555_v20  ;;  %v6167_v20 = vld [vmem:[#allocation8 + $0x4] ss:$16 sps:$4 sm:$0xff]   ;;  %7865 = vst [vmem:[#allocation132_spill] sm:$0xff] %v6170_v12 }
 0x1b2   :  { %4664 = vrcp.f32 %v1590_v30  ;;  %v1580_v45 = vmul.f32 %v4657_v42, %v4655_v28  ;;  %v4659_v24 = vpop.eup %4658  ;;  %7864 = vst [vmem:[#allocation131_spill] sm:$0xff] %v6167_v20  ;;  %v7866_v30 = vld [vmem:[#allocation20_spill] sm:$0xff] }
 0x1b3   :  { %v1597_v39 = vadd.f32 1.0, %v4659_v24  ;;  %v566_v42 = vadd.f32 %v7866_v30, %v5738_v41 }
 0x1b4   :  { %v4451_v48 = vpack.c.bf16 %v1580_v45, %v1580_v45  ;;  %v6032_v49 = vsel %vm1611_vm12, %v1580_v45, 0.0  ;;  %v7867_v45 = vld [vmem:[#allocation18_spill] sm:$0xff] }
 0x1b5   :  { %1621 = vst [vmem:[#allocation11] sm:$0xff] %v6032_v49  ;;  %4666 = vrcp.f32 %v1597_v39 }
 0x1b6   :  { %4452 = vmatmul.mubr.msk.bf16.vlgmr.msra.gmra.mxu0 %vm4450_vm13, %v4451_v48  ;;  %4455 = vmatmul.mubr.msk.bf16.vlgmr.msra.gmra.mxu1 %vm4450_vm13, %v4451_v48 }
 0x1b7   :  { %1720 = vmatpush1.bf16.msra.mxu0 %v5568_v61  ;;  %1761 = vmatpush1.bf16.msra.mxu1 %v5570_v62 }
 0x1b8   :  { %1721 = vmatprep.subr.bf16.mxu0 %v5572_v63  ;;  %1762 = vmatprep.subr.bf16.mxu1 %v5575_v1 }
 0x1b9   :  { %1751 = vmatprep.mubr.bf16.mxu0 %v7746_v57  ;;  %1792 = vmatprep.mubr.bf16.mxu1 %v7746_v57 }
 0x1bb   :  { %1722 = vmatpush1.bf16.msra.mxu0 %v5580_v2  ;;  %1763 = vmatpush1.bf16.msra.mxu1 %v5585_v4  ;;  %v7840_v4 = vld [vmem:[#allocation16_spill] sm:$0xff] }
 0x1bc   :  { %1723 = vmatprep.subr.bf16.mxu0 %v5587_v5  ;;  %1764 = vmatprep.subr.bf16.mxu1 %v5590_v6  ;;  %v7841_v5 = vld [vmem:[#allocation17_spill] sm:$0xff] }
 0x1bd   :  { %v4661_v61 = vpop.eup %4660 }
 0x1be   :  { %v4663_v37 = vpop.eup %4662 }
 0x1bf   :  { %v4665_v62 = vpop.eup %4664  ;;  %1724 = vmatpush1.bf16.msra.mxu0 %v5595_v7  ;;  %1765 = vmatpush1.bf16.msra.mxu1 %v5599_v8  ;;  %v1601_v1 = vmul.f32 %v4663_v37, %v4661_v61  ;;  %v6068_v8 = vpop.permute.xlu0 %1616 }
 0x1c0   :  { %v1600_v63 = vmul.f32 0.0, %v4665_v62  ;;  %1725 = vmatprep.subr.bf16.mxu0 %v5601_v9  ;;  %1766 = vmatprep.subr.bf16.mxu1 %v5604_v10  ;;  %7842 = vst [vmem:[#allocation16_spill] sm:$0xff] %v6068_v8  ;;  %vm1618_vm14 = vcmp.eq.s32.totalorder %v6068_v8, 1  ;;  %v6284_v8 = vld [vmem:[#allocation9 + $0x24] ss:$16 sps:$4 sm:$0xff]  }
 0x1c1   :  { %vm4456_vm15 = vmpackc.low %vm1618_vm14, %vm1618_vm14 }
 0x1c2   :  { %v6049_v2 = vadd.f32 %v1601_v1, %v1600_v63  ;;  %v4667_v6 = vpop.eup %4666 }
 0x1c3   :  { %1726 = vmatpush1.bf16.msra.mxu0 %v5607_v11  ;;  %1767 = vmatpush1.bf16.msra.mxu1 %v5611_v13  ;;  %v6077_v13 = vld [vmem:[#allocation8 + $0xe4] ss:$16 sps:$4 sm:$0xff]  }
 0x1c4   :  { %4668 = vtanh.f32 %v6049_v2  ;;  %1727 = vmatprep.subr.bf16.mxu0 %v5613_v14  ;;  %1768 = vmatprep.subr.bf16.mxu1 %v5616_v15  ;;  %v6080_v14 = vld [vmem:[#allocation8 + $0xec] ss:$16 sps:$4 sm:$0xff]   ;;  %v6090_v15 = vld [vmem:[#allocation8 + $0xe8] ss:$16 sps:$4 sm:$0xff]  }
 0x1c7   :  { %1728 = vmatpush1.bf16.msra.mxu0 %v5619_v16  ;;  %1769 = vmatpush1.bf16.msra.mxu1 %v5623_v17  ;;  %v6093_v16 = vld [vmem:[#allocation8 + $0xc4] ss:$16 sps:$4 sm:$0xff]   ;;  %v6096_v17 = vld [vmem:[#allocation8 + $0xcc] ss:$16 sps:$4 sm:$0xff]  }
 0x1c8   :  { %1729 = vmatprep.subr.bf16.mxu0 %v5625_v19  ;;  %1770 = vmatprep.subr.bf16.mxu1 %v5628_v21  ;;  %v6101_v19 = vld [vmem:[#allocation8 + $0xc0] ss:$16 sps:$4 sm:$0xff]   ;;  %v6104_v21 = vld [vmem:[#allocation8 + $0xc8] ss:$16 sps:$4 sm:$0xff]  }
 0x1c9   :  { %7843 = vst [vmem:[#allocation17_spill] sm:$0xff] %v6104_v21 }
 0x1cb   :  { %1730 = vmatpush1.bf16.msra.mxu0 %v7840_v4  ;;  %1771 = vmatpush1.bf16.msra.mxu1 %v5635_v23  ;;  %v6110_v23 = vld [vmem:[#allocation8 + $0xac] ss:$16 sps:$4 sm:$0xff]  }
 0x1cc   :  { %1731 = vmatprep.subr.bf16.mxu0 %v5637_v53  ;;  %1772 = vmatprep.subr.bf16.mxu1 %v7841_v5  ;;  %7845 = vst [vmem:[#allocation112_spill] sm:$0xff] %v6110_v23  ;;  %v6113_v53 = vld [vmem:[#allocation8 + $0xa0] ss:$16 sps:$4 sm:$0xff]   ;;  %v7869_v5 = vld [vmem:[#allocation19_spill] sm:$0xff] }
 0x1cd   :  { %7846 = vst [vmem:[#allocation113_spill] sm:$0xff] %v6113_v53 }
 0x1cf   :  { %1732 = vmatpush1.bf16.msra.mxu0 %v5643_v58  ;;  %1773 = vmatpush1.bf16.msra.mxu1 %v5647_v59  ;;  %v6116_v58 = vld [vmem:[#allocation8 + $0xa8] ss:$16 sps:$4 sm:$0xff]   ;;  %v6119_v59 = vld [vmem:[#allocation8 + $0x84] ss:$16 sps:$4 sm:$0xff]  }
 0x1d0   :  { %1733 = vmatprep.subr.bf16.mxu0 %v5649_v60  ;;  %1774 = vmatprep.subr.bf16.mxu1 %v5652_v3  ;;  %7847 = vst [vmem:[#allocation114_spill] sm:$0xff] %v6116_v58  ;;  %7848 = vst [vmem:[#allocation115_spill] sm:$0xff] %v6119_v59  ;;  %v6122_v60 = vld [vmem:[#allocation8 + $0x8c] ss:$16 sps:$4 sm:$0xff]   ;;  %v6125_v3 = vld [vmem:[#allocation8 + $0x80] ss:$16 sps:$4 sm:$0xff]  }
 0x1d1   :  { %v4669_v7 = vpop.eup %4668  ;;  %7849 = vst [vmem:[#allocation116_spill] sm:$0xff] %v6122_v60  ;;  %7850 = vst [vmem:[#allocation117_spill] sm:$0xff] %v6125_v3 }
 0x1d2   :  { %v1604_v9 = vmul.f32 %v4669_v7, %v4667_v6 }
 0x1d3   :  { %1734 = vmatpush1.bf16.msra.mxu0 %v5655_v0  ;;  %1775 = vmatpush1.bf16.msra.mxu1 %v5659_v22  ;;  %v6087_v0 = vld [vmem:[#allocation8 + $0xe0] ss:$16 sps:$4 sm:$0xff]   ;;  %v6107_v22 = vld [vmem:[#allocation8 + $0xa4] ss:$16 sps:$4 sm:$0xff]  }
 0x1d4   :  { %v4457_v10 = vpack.c.bf16 %v1604_v9, %v1604_v9  ;;  %v6075_v11 = vsel %vm1618_vm14, %v1604_v9, 0.0  ;;  %1878 = vmatprep.subr.bf16.mxu0 %v6077_v13  ;;  %1919 = vmatprep.subr.bf16.mxu1 %v6080_v14  ;;  %7844 = vst [vmem:[#allocation111_spill] sm:$0xff] %v6107_v22 }
 0x1d5   :  { %1622 = vst [vmem:[#allocation11 + $0xb8] sm:$0xff] %v6075_v11 }
 0x1d6   :  { %4458 = vmatmul.mubr.msk.bf16.vlgmr.msra.gmra.mxu0 %vm4456_vm15, %v4457_v10  ;;  %4461 = vmatmul.mubr.msk.bf16.vlgmr.msra.gmra.mxu1 %vm4456_vm15, %v4457_v10 }
 0x1d7   :  { %1879 = vmatpush1.bf16.msra.mxu0 %v6087_v0  ;;  %1920 = vmatpush1.bf16.msra.mxu1 %v6090_v15 }
 0x1d8   :  { %1880 = vmatprep.subr.bf16.mxu0 %v6093_v16  ;;  %1921 = vmatprep.subr.bf16.mxu1 %v6096_v17 }
 0x1d9   :  { %1910 = vmatprep.mubr.bf16.mxu0 %v7746_v57  ;;  %1951 = vmatprep.mubr.bf16.mxu1 %v7746_v57 }
 0x1db   :  { %1881 = vmatpush1.bf16.msra.mxu0 %v6101_v19  ;;  %1922 = vmatpush1.bf16.msra.mxu1 %v6104_v21 }
 0x1dc   :  { %1882 = vmatprep.subr.bf16.mxu0 %v6107_v22  ;;  %1923 = vmatprep.subr.bf16.mxu1 %v6110_v23 }
 0x1df   :  { %1883 = vmatpush1.bf16.msra.mxu0 %v6113_v53  ;;  %1924 = vmatpush1.bf16.msra.mxu1 %v6116_v58 }
 0x1e0   :  { %1884 = vmatprep.subr.bf16.mxu0 %v6119_v59  ;;  %1925 = vmatprep.subr.bf16.mxu1 %v6122_v60 }
 0x1e3   :  { %1885 = vmatpush1.bf16.msra.mxu0 %v6125_v3  ;;  %1926 = vmatpush1.bf16.msra.mxu1 %v6128_v27 }
 0x1e4   :  { %1886 = vmatprep.subr.bf16.mxu0 %v6131_v32  ;;  %1927 = vmatprep.subr.bf16.mxu1 %v6134_v31 }
 0x1e7   :  { %1887 = vmatpush1.bf16.msra.mxu0 %v6137_v50  ;;  %1928 = vmatpush1.bf16.msra.mxu1 %v6140_v34 }
 0x1e8   :  { %1888 = vmatprep.subr.bf16.mxu0 %v6143_v40  ;;  %1929 = vmatprep.subr.bf16.mxu1 %v6146_v36 }
 0x1eb   :  { %1889 = vmatpush1.bf16.msra.mxu0 %v6149_v43  ;;  %1930 = vmatpush1.bf16.msra.mxu1 %v6152_v26 }
 0x1ec   :  { %1890 = vmatprep.subr.bf16.mxu0 %v6155_v38  ;;  %1931 = vmatprep.subr.bf16.mxu1 %v6158_v29 }
 0x1ef   :  { %1891 = vmatpush1.bf16.msra.mxu0 %v6161_v35  ;;  %1932 = vmatpush1.bf16.msra.mxu1 %v6164_v51 }
 0x1f0   :  { %1892 = vmatprep.subr.bf16.mxu0 %v6167_v20  ;;  %1933 = vmatprep.subr.bf16.mxu1 %v6170_v12 }
 0x1f3   :  { %1893 = vmatpush1.bf16.msra.mxu0 %v5536_v52  ;;  %1934 = vmatpush1.bf16.msra.mxu1 %v5541_v54 }
 0x1f4   :  { %1969 = vmatprep.subr.bf16.mxu0 %v5543_v55  ;;  %2010 = vmatprep.subr.bf16.mxu1 %v5546_v56  ;;  %v7868_v55 = vld [vmem:[#allocation21_spill] sm:$0xff] }
 0x1f5   :  { %v659_v56 = vadd.f32 %v7868_v55, %v5744_v44  ;;  %v6293_v44 = vld [vmem:[#allocation9 + $0x28] ss:$16 sps:$4 sm:$0xff]  }
 0x276   :  { %v1662_v46 = vpop.f32.mrf.mxu0  ;;  %v1703_v28 = vpop.f32.mrf.mxu1 }
 0x277   :  { %v1710_v48 = vadd.f32 %v1662_v46, %v7867_v45  ;;  %v1712_v6 = vadd.f32 %v1703_v28, %v7869_v5 }
 0x278   :  { %v1664_v24 = vpop.f32.mrf.mxu0  ;;  %v1705_v61 = vpop.f32.mrf.mxu1 }
 0x279   :  { %v4462_v37 = vmul.f32 -1.442695, %v1710_v48  ;;  %v1711_v62 = vadd.f32 %v1664_v24, %v566_v42  ;;  %v1713_v4 = vadd.f32 %v1705_v61, %v659_v56  ;;  %v1613_v56 = vsel %vm1611_vm12, %v6019_v47, 0.0  ;;  %v7873_v47 = vld [vmem:[#allocation109_spill] sm:$0xff] }
 0x27a   :  { %v1666_v39 = vpop.f32.mrf.mxu0  ;;  %v1707_v63 = vpop.f32.mrf.mxu1 }
 0x27b   :  { %4670 = vpow2.f32 %v4462_v37  ;;  %v4463_v52 = vmul.f32 -1.442695, %v1711_v62  ;;  %v4464_v7 = vmul.f32 -1.442695, %v1713_v4  ;;  %v7870_v37 = vld [vmem:[#allocation106_spill] sm:$0xff] }
 0x27c   :  { %v1667_v54 = vpop.f32.mrf.mxu0  ;;  %v1708_v1 = vpop.f32.mrf.mxu1  ;;  %7878 = vst [vmem:[#allocation106_spill] sm:$0xff] %v6281_v33 }
 0x27d   :  { %4672 = vpow2.f32 %v4463_v52  ;;  %v7871_v54 = vld [vmem:[#allocation108_spill] sm:$0xff] }
 0x27e   :  { %4674 = vtanh.f32 %v1712_v6  ;;  %7879 = vst [vmem:[#allocation108_spill] sm:$0xff] %v6284_v8 }
 0x27f   :  { %4676 = vpow2.f32 %v4464_v7 }
 0x288   :  { %v4671_v9 = vpop.eup %4670 }
 0x289   :  { %v1808_v10 = vadd.f32 1.0, %v4671_v9  ;;  %v6188_v9 = vpop.permute.xlu1 %1857 }
 0x28a   :  { %v4673_v46 = vpop.eup %4672  ;;  %7872 = vst [vmem:[#allocation20_spill] sm:$0xff] %v6188_v9  ;;  %vm1859_vm0 = vcmp.eq.s32.totalorder %v6188_v9, 1  ;;  %v6287_v9 = vld [vmem:[#allocation9 + $0x2c] ss:$16 sps:$4 sm:$0xff]  }
 0x28b   :  { %4678 = vrcp.f32 %v1808_v10  ;;  %v1814_v30 = vadd.f32 1.0, %v4673_v46  ;;  %v4675_v42 = vpop.eup %4674  ;;  %7880 = vst [vmem:[#allocation109_spill] sm:$0xff] %v6287_v9 }
 0x28c   :  { %v4677_v24 = vpop.eup %4676 }
 0x28d   :  { %4680 = vrcp.f32 %v1814_v30  ;;  %v1821_v4 = vadd.f32 1.0, %v4677_v24 }
 0x296   :  { %v1753_v45 = vpop.f32.mrf.mxu0  ;;  %v1794_v48 = vpop.f32.mrf.mxu1 }
 0x297   :  { %v1801_v62 = vadd.f32 %v1753_v45, %v7870_v37  ;;  %v7874_v37 = vld [vmem:[#allocation107_spill] sm:$0xff] }
 0x298   :  { %v4679_v39 = vpop.eup %4678  ;;  %v1755_v63 = vpop.f32.mrf.mxu0  ;;  %7881 = vst [vmem:[#allocation107_spill] sm:$0xff] %v6290_v25 }
 0x299   :  { %v1796_v61 = vpop.f32.mrf.mxu1  ;;  %v1825_v52 = vmul.f32 %v4679_v39, %v4675_v42  ;;  %v4465_v28 = vmul.f32 -1.442695, %v1801_v62  ;;  %v1802_v1 = vadd.f32 %v1755_v63, %v7871_v54  ;;  %v1803_v62 = vadd.f32 %v1794_v48, %v7874_v37  ;;  %v6229_v37 = vld [vmem:[#allocation9 + $0xac] ss:$16 sps:$4 sm:$0xff]  }
 0x29a   :  { %v4681_v55 = vpop.eup %4680  ;;  %v1757_v5 = vpop.f32.mrf.mxu0  ;;  %v1804_v24 = vadd.f32 %v1796_v61, %v7873_v47 }
 0x29b   :  { %v1798_v6 = vpop.f32.mrf.mxu1  ;;  %4682 = vpow2.f32 %v4465_v28  ;;  %v4466_v7 = vmul.f32 -1.442695, %v1802_v1  ;;  %v1824_v10 = vmul.f32 %v4681_v55, %v1613_v56  ;;  %v6206_v5 = vld [vmem:[#allocation9 + $0xe0] ss:$16 sps:$4 sm:$0xff]  }
 0x29c   :  { %v1758_v46 = vpop.f32.mrf.mxu0  ;;  %v4467_v39 = vmul.f32 -1.442695, %v1804_v24  ;;  %v6209_v6 = vld [vmem:[#allocation9 + $0xe8] ss:$16 sps:$4 sm:$0xff]   ;;  %v6226_v24 = vld [vmem:[#allocation9 + $0xa4] ss:$16 sps:$4 sm:$0xff]  }
 0x29d   :  { %v1799_v30 = vpop.f32.mrf.mxu1  ;;  %4684 = vpow2.f32 %v4466_v7  ;;  %v1826_v42 = vadd.f32 %v1825_v52, %v1824_v10  ;;  %v6212_v7 = vld [vmem:[#allocation9 + $0xc4] ss:$16 sps:$4 sm:$0xff]  }
 0x29e   :  { %4686 = vrcp.f32 %v1821_v4  ;;  %v6220_v30 = vld [vmem:[#allocation9 + $0xc0] ss:$16 sps:$4 sm:$0xff]  }
 0x29f   :  { %4688 = vtanh.f32 %v1826_v42  ;;  %v6193_v45 = vsel %vm1859_vm0, %v1826_v42, %v1613_v56  ;;  %v6223_v42 = vld [vmem:[#allocation9 + $0xc8] ss:$16 sps:$4 sm:$0xff]  }
 0x2a0   :  { %4690 = vtanh.f32 %v1803_v62 }
 0x2a1   :  { %4692 = vpow2.f32 %v4467_v39 }
 0x2a8   :  { %v4683_v63 = vpop.eup %4682 }
 0x2a9   :  { %v1832_v28 = vadd.f32 1.0, %v4683_v63  ;;  %v1620_v63 = vsel %vm1618_vm14, %v6049_v2, 0.0 }
 0x2aa   :  { %v4685_v54 = vpop.eup %4684 }
 0x2ab   :  { %v4687_v1 = vpop.eup %4686  ;;  %4694 = vrcp.f32 %v1832_v28  ;;  %v1838_v55 = vadd.f32 1.0, %v4685_v54 }
 0x2ac   :  { %v4689_v52 = vpop.eup %4688 }
 0x2ad   :  { %4696 = vrcp.f32 %v1838_v55  ;;  %v1828_v4 = vmul.f32 %v4689_v52, %v4687_v1  ;;  %v4691_v10 = vpop.eup %4690  ;;  %v6235_v1 = vld [vmem:[#allocation9 + $0xa0] ss:$16 sps:$4 sm:$0xff]   ;;  %v6238_v55 = vld [vmem:[#allocation9 + $0xa8] ss:$16 sps:$4 sm:$0xff]   ;;  %v6241_v52 = vld [vmem:[#allocation9 + $0x84] ss:$16 sps:$4 sm:$0xff]  }
 0x2ae   :  { %v4693_v46 = vpop.eup %4692 }
 0x2af   :  { %v1869_v56 = vsel %vm1859_vm0, %v1828_v4, 0.0  ;;  %v6202_v61 = vsel %vm1859_vm0, %v1828_v4, %v6032_v49  ;;  %v6215_v49 = vld [vmem:[#allocation9 + $0xcc] ss:$16 sps:$4 sm:$0xff]   ;;  %v1845_v28 = vadd.f32 1.0, %v4693_v46  ;;  %v6257_v46 = vld [vmem:[#allocation9 + $0x88] ss:$16 sps:$4 sm:$0xff]  }
 0x2b0   :  { %1870 = vst [vmem:[#allocation11 + $0x10] sm:$0xff] %v1869_v56  ;;  %v1877_v48 = vpack.c.bf16 %v6202_v61, %v6202_v61  ;;  %v6244_v4 = vld [vmem:[#allocation9 + $0x8c] ss:$16 sps:$4 sm:$0xff]   ;;  %v6247_v56 = vpop.permute.xlu1 %1864 }
 0x2b1   :  { %7875 = vst [vmem:[#allocation18_spill] sm:$0xff] %v6247_v56  ;;  %4698 = vrcp.f32 %v1845_v28  ;;  %vm1866_vm1 = vcmp.eq.s32.totalorder %v6247_v56, 1  ;;  %v6272_v28 = vld [vmem:[#allocation9 + $0x44] ss:$16 sps:$4 sm:$0xff]  }
 0x2b2   :  { %1911 = vmatmul.mubr.bf16.vlgmr.msra.gmra.mxu0 %v1877_v48  ;;  %1952 = vmatmul.mubr.bf16.vlgmr.msra.gmra.mxu1 %v1877_v48 }
 0x2b3   :  { %1970 = vmatpush1.bf16.msra.mxu0 %v6206_v5  ;;  %2011 = vmatpush1.bf16.msra.mxu1 %v6209_v6 }
 0x2b4   :  { %1971 = vmatprep.subr.bf16.mxu0 %v6212_v7  ;;  %2012 = vmatprep.subr.bf16.mxu1 %v6215_v49 }
 0x2b5   :  { %2001 = vmatprep.mubr.bf16.mxu0 %v7746_v57  ;;  %2042 = vmatprep.mubr.bf16.mxu1 %v7746_v57 }
 0x2b7   :  { %1972 = vmatpush1.bf16.msra.mxu0 %v6220_v30  ;;  %2013 = vmatpush1.bf16.msra.mxu1 %v6223_v42 }
 0x2b8   :  { %v4695_v47 = vpop.eup %4694  ;;  %1973 = vmatprep.subr.bf16.mxu0 %v6226_v24  ;;  %2014 = vmatprep.subr.bf16.mxu1 %v6229_v37 }
 0x2b9   :  { %v1849_v62 = vmul.f32 %v4695_v47, %v4691_v10  ;;  %v6254_v10 = vld [vmem:[#allocation9 + $0x80] ss:$16 sps:$4 sm:$0xff]   ;;  %v6260_v47 = vld [vmem:[#allocation9 + $0x64] ss:$16 sps:$4 sm:$0xff]  }
 0x2ba   :  { %v4697_v39 = vpop.eup %4696 }
 0x2bb   :  { %v1848_v54 = vmul.f32 %v4697_v39, %v1620_v63  ;;  %1974 = vmatpush1.bf16.msra.mxu0 %v6235_v1  ;;  %2015 = vmatpush1.bf16.msra.mxu1 %v6238_v55  ;;  %v6266_v39 = vld [vmem:[#allocation9 + $0x60] ss:$16 sps:$4 sm:$0xff]  }
 0x2bc   :  { %1975 = vmatprep.subr.bf16.mxu0 %v6241_v52  ;;  %2016 = vmatprep.subr.bf16.mxu1 %v6244_v4 }
 0x2bd   :  { %v1850_v2 = vadd.f32 %v1849_v62, %v1848_v54  ;;  %v6263_v62 = vld [vmem:[#allocation9 + $0x6c] ss:$16 sps:$4 sm:$0xff]  }
 0x2be   :  { %v6275_v54 = vld [vmem:[#allocation9 + $0x4c] ss:$16 sps:$4 sm:$0xff]   ;;  %v4699_v18 = vpop.eup %4698 }
 0x2bf   :  { %4700 = vtanh.f32 %v1850_v2  ;;  %v6252_v48 = vsel %vm1866_vm1, %v1850_v2, %v1620_v63  ;;  %1976 = vmatpush1.bf16.msra.mxu0 %v6254_v10  ;;  %2017 = vmatpush1.bf16.msra.mxu1 %v6257_v46  ;;  %v6269_v63 = vld [vmem:[#allocation9 + $0x68] ss:$16 sps:$4 sm:$0xff]   ;;  %7876 = vst [vmem:[#allocation21_spill] sm:$0xff] %v6275_v54  ;;  %v6278_v2 = vld [vmem:[#allocation9 + $0x40] ss:$16 sps:$4 sm:$0xff]  }
 0x2c0   :  { %1977 = vmatprep.subr.bf16.mxu0 %v6260_v47  ;;  %2018 = vmatprep.subr.bf16.mxu1 %v6263_v62  ;;  %7877 = vst [vmem:[#allocation19_spill] sm:$0xff] %v6278_v2 }
 0x2c3   :  { %1978 = vmatpush1.bf16.msra.mxu0 %v6266_v39  ;;  %2019 = vmatpush1.bf16.msra.mxu1 %v6269_v63 }
 0x2c4   :  { %1979 = vmatprep.subr.bf16.mxu0 %v6272_v28  ;;  %2020 = vmatprep.subr.bf16.mxu1 %v6275_v54  ;;  %v6304_v54 = vld [vmem:[#allocation9] ss:$16 sps:$4 sm:$0xff]  }
 0x2c7   :  { %1980 = vmatpush1.bf16.msra.mxu0 %v6278_v2  ;;  %2021 = vmatpush1.bf16.msra.mxu1 %v6281_v33  ;;  %v6296_v2 = vld [vmem:[#allocation9 + $0x4] ss:$16 sps:$4 sm:$0xff]   ;;  %v6299_v33 = vld [vmem:[#allocation9 + $0xc] ss:$16 sps:$4 sm:$0xff]  }
 0x2c8   :  { %1981 = vmatprep.subr.bf16.mxu0 %v6284_v8  ;;  %2022 = vmatprep.subr.bf16.mxu1 %v6287_v9  ;;  %7882 = vst [vmem:[#allocation133_spill] sm:$0xff] %v6296_v2 }
 0x2cb   :  { %1982 = vmatpush1.bf16.msra.mxu0 %v6290_v25  ;;  %2023 = vmatpush1.bf16.msra.mxu1 %v6293_v44  ;;  %v6307_v25 = vld [vmem:[#allocation9 + $0x8] ss:$16 sps:$4 sm:$0xff]  }
 0x2cc   :  { %v4701_v41 = vpop.eup %4700  ;;  %1983 = vmatprep.subr.bf16.mxu0 %v6296_v2  ;;  %2024 = vmatprep.subr.bf16.mxu1 %v6299_v33 }
 0x2cd   :  { %v1852_v8 = vmul.f32 %v4701_v41, %v4699_v18  ;;  %v6349_v18 = vld [vmem:[#allocation8] ss:$16 sps:$4 sm:$0xff]  }
 0x2ce   :  { %7883 = vst [vmem:[#allocation134_spill] sm:$0xff] %v6349_v18 }
 0x2cf   :  { %v1871_v9 = vsel %vm1866_vm1, %v1852_v8, 0.0  ;;  %1984 = vmatpush1.bf16.msra.mxu0 %v6304_v54  ;;  %2025 = vmatpush1.bf16.msra.mxu1 %v6307_v25  ;;  %v6313_v2 = vsel %vm1866_vm1, %v1852_v8, %v6075_v11  ;;  %v6352_v8 = vld [vmem:[#allocation8 + $0x8] ss:$16 sps:$4 sm:$0xff]   ;;  %v6355_v11 = vld [vmem:[#allocation9 + $0xe4] ss:$16 sps:$4 sm:$0xff]  }
 0x2d0   :  { %1872 = vst [vmem:[#allocation11 + $0xa8] sm:$0xff] %v1871_v9  ;;  %v1968_v41 = vpack.c.bf16 %v6313_v2, %v6313_v2  ;;  %2128 = vmatprep.subr.bf16.mxu0 %v6077_v13  ;;  %2169 = vmatprep.subr.bf16.mxu1 %v6080_v14  ;;  %7884 = vst [vmem:[#allocation135_spill] sm:$0xff] %v6352_v8  ;;  %v6358_v9 = vld [vmem:[#allocation9 + $0xec] ss:$16 sps:$4 sm:$0xff]  }
 0x2d1   :  { %7885 = vst [vmem:[#allocation136_spill] sm:$0xff] %v6355_v11  ;;  %7886 = vst [vmem:[#allocation137_spill] sm:$0xff] %v6358_v9 }
 0x2d2   :  { %2002 = vmatmul.mubr.bf16.vlgmr.msra.gmra.mxu0 %v1968_v41  ;;  %2043 = vmatmul.mubr.bf16.vlgmr.msra.gmra.mxu1 %v1968_v41 }
 0x2d3   :  { %2129 = vmatpush1.bf16.msra.mxu0 %v6087_v0  ;;  %2170 = vmatpush1.bf16.msra.mxu1 %v6090_v15 }
 0x2d4   :  { %2130 = vmatprep.subr.bf16.mxu0 %v6093_v16  ;;  %2171 = vmatprep.subr.bf16.mxu1 %v6096_v17 }
 0x2d5   :  { %2160 = vmatprep.mubr.bf16.mxu0 %v7746_v57  ;;  %2201 = vmatprep.mubr.bf16.mxu1 %v7746_v57 }
 0x2d7   :  { %2131 = vmatpush1.bf16.msra.mxu0 %v6101_v19  ;;  %2172 = vmatpush1.bf16.msra.mxu1 %v6104_v21 }
 0x2d8   :  { %2132 = vmatprep.subr.bf16.mxu0 %v6107_v22  ;;  %2173 = vmatprep.subr.bf16.mxu1 %v6110_v23 }
 0x2db   :  { %2133 = vmatpush1.bf16.msra.mxu0 %v6113_v53  ;;  %2174 = vmatpush1.bf16.msra.mxu1 %v6116_v58 }
 0x2dc   :  { %2134 = vmatprep.subr.bf16.mxu0 %v6119_v59  ;;  %2175 = vmatprep.subr.bf16.mxu1 %v6122_v60 }
 0x2df   :  { %2135 = vmatpush1.bf16.msra.mxu0 %v6125_v3  ;;  %2176 = vmatpush1.bf16.msra.mxu1 %v6128_v27  ;;  %v6368_v3 = vpop.permute.xlu0 %2107 }
 0x2e0   :  { %2136 = vmatprep.subr.bf16.mxu0 %v6131_v32  ;;  %2177 = vmatprep.subr.bf16.mxu1 %v6134_v31  ;;  %vm2109_vm2 = vcmp.eq.s32.totalorder %v6368_v3, 1 }
 0x2e3   :  { %2137 = vmatpush1.bf16.msra.mxu0 %v6137_v50  ;;  %2178 = vmatpush1.bf16.msra.mxu1 %v6140_v34  ;;  %v7890_v50 = vld [vmem:[#allocation25_spill] sm:$0xff] }
 0x2e4   :  { %2138 = vmatprep.subr.bf16.mxu0 %v6143_v40  ;;  %2179 = vmatprep.subr.bf16.mxu1 %v6146_v36 }
 0x2e7   :  { %2139 = vmatpush1.bf16.msra.mxu0 %v6149_v43  ;;  %2180 = vmatpush1.bf16.msra.mxu1 %v6152_v26 }
 0x2e8   :  { %2140 = vmatprep.subr.bf16.mxu0 %v6155_v38  ;;  %2181 = vmatprep.subr.bf16.mxu1 %v6158_v29 }
 0x2eb   :  { %2141 = vmatpush1.bf16.msra.mxu0 %v6161_v35  ;;  %2182 = vmatpush1.bf16.msra.mxu1 %v6164_v51 }
 0x2ec   :  { %2142 = vmatprep.subr.bf16.mxu0 %v6167_v20  ;;  %2183 = vmatprep.subr.bf16.mxu1 %v6170_v12  ;;  %v7887_v20 = vld [vmem:[#allocation23_spill] sm:$0xff] }
 0x2ed   :  { %7893 = vst [vmem:[#allocation23_spill] sm:$0xff] %v6368_v3  ;;  %v7917_v3 = vld [vmem:[#allocation130_spill] sm:$0xff] }
 0x2ef   :  { %2143 = vmatpush1.bf16.msra.mxu0 %v6349_v18  ;;  %2184 = vmatpush1.bf16.msra.mxu1 %v6352_v8  ;;  %v7888_v18 = vld [vmem:[#allocation26_spill] sm:$0xff] }
 0x2f0   :  { %2219 = vmatprep.subr.bf16.mxu0 %v6355_v11  ;;  %2260 = vmatprep.subr.bf16.mxu1 %v6358_v9  ;;  %v7889_v11 = vld [vmem:[#allocation27_spill] sm:$0xff] }
 0x372   :  { %v1912_v41 = vpop.f32.mrf.mxu0  ;;  %v1953_v56 = vpop.f32.mrf.mxu1 }
 0x373   :  { %v1960_v12 = vadd.f32 %v1912_v41, %v7887_v20  ;;  %v1962_v9 = vadd.f32 %v1953_v56, %v7890_v50 }
 0x374   :  { %v1914_v51 = vpop.f32.mrf.mxu0  ;;  %v1955_v35 = vpop.f32.mrf.mxu1 }
 0x375   :  { %v4468_v29 = vmul.f32 -1.442695, %v1960_v12  ;;  %v1961_v38 = vadd.f32 %v1914_v51, %v7888_v18  ;;  %v1963_v34 = vadd.f32 %v1955_v35, %v7889_v11 }
 0x376   :  { %v1916_v26 = vpop.f32.mrf.mxu0  ;;  %v1957_v43 = vpop.f32.mrf.mxu1 }
 0x377   :  { %4702 = vpow2.f32 %v4468_v29  ;;  %v4469_v8 = vmul.f32 -1.442695, %v1961_v38  ;;  %v4470_v31 = vmul.f32 -1.442695, %v1963_v34  ;;  %v7892_v34 = vld [vmem:[#allocation104_spill] sm:$0xff] }
 0x378   :  { %v1917_v36 = vpop.f32.mrf.mxu0  ;;  %v1958_v40 = vpop.f32.mrf.mxu1 }
 0x379   :  { %4704 = vpow2.f32 %v4469_v8  ;;  %v7891_v36 = vld [vmem:[#allocation102_spill] sm:$0xff] }
 0x37a   :  { %4706 = vtanh.f32 %v1962_v9 }
 0x37b   :  { %4708 = vpow2.f32 %v4470_v31 }
 0x384   :  { %v4703_v32 = vpop.eup %4702 }
 0x385   :  { %v2058_v27 = vadd.f32 1.0, %v4703_v32 }
 0x386   :  { %v4705_v20 = vpop.eup %4704 }
 0x387   :  { %4710 = vrcp.f32 %v2058_v27  ;;  %v2064_v12 = vadd.f32 1.0, %v4705_v20  ;;  %v4707_v26 = vpop.eup %4706 }
 0x388   :  { %v4709_v38 = vpop.eup %4708 }
 0x389   :  { %4712 = vrcp.f32 %v2064_v12  ;;  %v2071_v11 = vadd.f32 1.0, %v4709_v38  ;;  %v7894_v38 = vld [vmem:[#allocation105_spill] sm:$0xff] }
 0x392   :  { %v2003_v43 = vpop.f32.mrf.mxu0  ;;  %v2044_v29 = vpop.f32.mrf.mxu1 }
 0x393   :  { %v2051_v40 = vadd.f32 %v2003_v43, %v7891_v36 }
 0x394   :  { %v4711_v51 = vpop.eup %4710  ;;  %v2005_v18 = vpop.f32.mrf.mxu0 }
 0x395   :  { %v2046_v35 = vpop.f32.mrf.mxu1  ;;  %v2075_v8 = vmul.f32 %v4711_v51, %v4707_v26  ;;  %v4471_v50 = vmul.f32 -1.442695, %v2051_v40  ;;  %v2052_v56 = vadd.f32 %v2005_v18, %v7892_v34  ;;  %v7895_v40 = vld [vmem:[#allocation103_spill] sm:$0xff] }
 0x396   :  { %v4713_v32 = vpop.eup %4712  ;;  %v2007_v9 = vpop.f32.mrf.mxu0  ;;  %v2054_v36 = vadd.f32 %v2046_v35, %v7894_v38  ;;  %v2053_v51 = vadd.f32 %v2044_v29, %v7895_v40 }
 0x397   :  { %v2048_v31 = vpop.f32.mrf.mxu1  ;;  %v2074_v27 = vmul.f32 %v4713_v32, %v6193_v45  ;;  %4714 = vpow2.f32 %v4471_v50  ;;  %v4472_v41 = vmul.f32 -1.442695, %v2052_v56  ;;  %v6402_v38 = vpop.permute.xlu1 %2114 }
 0x398   :  { %v2008_v20 = vpop.f32.mrf.mxu0  ;;  %v4473_v18 = vmul.f32 -1.442695, %v2054_v36  ;;  %7896 = vst [vmem:[#allocation26_spill] sm:$0xff] %v6402_v38  ;;  %vm2116_vm3 = vcmp.eq.s32.totalorder %v6402_v38, 1  ;;  %v7918_v38 = vld [vmem:[#allocation131_spill] sm:$0xff] }
 0x399   :  { %v2049_v12 = vpop.f32.mrf.mxu1  ;;  %v2076_v43 = vadd.f32 %v2075_v8, %v2074_v27  ;;  %4716 = vpow2.f32 %v4472_v41 }
 0x39a   :  { %4718 = vrcp.f32 %v2071_v11 }
 0x39b   :  { %4720 = vtanh.f32 %v2076_v43  ;;  %v6374_v26 = vsel %vm2109_vm2, %v2076_v43, %v6193_v45 }
 0x39c   :  { %4722 = vtanh.f32 %v2053_v51  ;;  %v7897_v51 = vld [vmem:[#allocation21_spill] sm:$0xff] }
 0x39d   :  { %4724 = vpow2.f32 %v4473_v18  ;;  %v7898_v18 = vld [vmem:[#allocation19_spill] sm:$0xff] }
 0x3a4   :  { %v4715_v50 = vpop.eup %4714 }
 0x3a5   :  { %v2082_v34 = vadd.f32 1.0, %v4715_v50  ;;  %v7899_v50 = vld [vmem:[#allocation106_spill] sm:$0xff] }
 0x3a6   :  { %v4717_v56 = vpop.eup %4716 }
 0x3a7   :  { %v4719_v8 = vpop.eup %4718  ;;  %4726 = vrcp.f32 %v2082_v34  ;;  %v2088_v32 = vadd.f32 1.0, %v4717_v56  ;;  %v7900_v34 = vld [vmem:[#allocation108_spill] sm:$0xff] }
 0x3a8   :  { %v4721_v11 = vpop.eup %4720 }
 0x3a9   :  { %4728 = vrcp.f32 %v2088_v32  ;;  %v2078_v9 = vmul.f32 %v4721_v11, %v4719_v8  ;;  %v7902_v8 = vld [vmem:[#allocation107_spill] sm:$0xff]  ;;  %v7903_v11 = vld [vmem:[#allocation133_spill] sm:$0xff] }
 0x3ab   :  { %v6381_v45 = vsel %vm2109_vm2, %v2078_v9, %v6202_v61  ;;  %v2119_v29 = vsel %vm2109_vm2, %v2078_v9, 0.0  ;;  %v4723_v61 = vpop.eup %4722 }
 0x3ac   :  { %2120 = vst [vmem:[#allocation11 + $0x20] sm:$0xff] %v2119_v29  ;;  %v2127_v35 = vpack.c.bf16 %v6381_v45, %v6381_v45  ;;  %v4725_v31 = vpop.eup %4724 }
 0x3ad   :  { %v2095_v12 = vadd.f32 1.0, %v4725_v31  ;;  %v7905_v31 = vld [vmem:[#allocation118_spill] sm:$0xff] }
 0x3ae   :  { %2161 = vmatmul.mubr.bf16.vlgmr.msra.gmra.mxu0 %v2127_v35  ;;  %2202 = vmatmul.mubr.bf16.vlgmr.msra.gmra.mxu1 %v2127_v35 }
 0x3af   :  { %2220 = vmatpush1.bf16.msra.mxu0 %v6206_v5  ;;  %2261 = vmatpush1.bf16.msra.mxu1 %v6209_v6  ;;  %4730 = vrcp.f32 %v2095_v12  ;;  %v7909_v12 = vld [vmem:[#allocation122_spill] sm:$0xff] }
 0x3b0   :  { %2221 = vmatprep.subr.bf16.mxu0 %v6212_v7  ;;  %2262 = vmatprep.subr.bf16.mxu1 %v6215_v49 }
 0x3b1   :  { %2251 = vmatprep.mubr.bf16.mxu0 %v7746_v57  ;;  %2292 = vmatprep.mubr.bf16.mxu1 %v7746_v57 }
 0x3b3   :  { %2222 = vmatpush1.bf16.msra.mxu0 %v6220_v30  ;;  %2263 = vmatpush1.bf16.msra.mxu1 %v6223_v42 }
 0x3b4   :  { %v4727_v27 = vpop.eup %4726  ;;  %2223 = vmatprep.subr.bf16.mxu0 %v6226_v24  ;;  %2264 = vmatprep.subr.bf16.mxu1 %v6229_v37 }
 0x3b5   :  { %v2099_v41 = vmul.f32 %v4727_v27, %v4723_v61  ;;  %v7906_v27 = vld [vmem:[#allocation119_spill] sm:$0xff] }
 0x3b6   :  { %v4729_v20 = vpop.eup %4728 }
 0x3b7   :  { %v2098_v43 = vmul.f32 %v4729_v20, %v6252_v48  ;;  %2224 = vmatpush1.bf16.msra.mxu0 %v6235_v1  ;;  %2265 = vmatpush1.bf16.msra.mxu1 %v6238_v55  ;;  %v7908_v20 = vld [vmem:[#allocation121_spill] sm:$0xff] }
 0x3b8   :  { %2225 = vmatprep.subr.bf16.mxu0 %v6241_v52  ;;  %2266 = vmatprep.subr.bf16.mxu1 %v6244_v4 }
 0x3b9   :  { %v2100_v36 = vadd.f32 %v2099_v41, %v2098_v43  ;;  %v7907_v41 = vld [vmem:[#allocation120_spill] sm:$0xff]  ;;  %v7910_v43 = vld [vmem:[#allocation123_spill] sm:$0xff] }
 0x3bb   :  { %4732 = vtanh.f32 %v2100_v36  ;;  %2226 = vmatpush1.bf16.msra.mxu0 %v6254_v10  ;;  %2267 = vmatpush1.bf16.msra.mxu1 %v6257_v46  ;;  %v6410_v40 = vsel %vm2116_vm3, %v2100_v36, %v6252_v48  ;;  %v7901_v48 = vld [vmem:[#allocation109_spill] sm:$0xff]  ;;  %v7911_v36 = vld [vmem:[#allocation124_spill] sm:$0xff] }
 0x3bc   :  { %2227 = vmatprep.subr.bf16.mxu0 %v6260_v47  ;;  %2268 = vmatprep.subr.bf16.mxu1 %v6263_v62  ;;  %v4731_v56 = vpop.eup %4730 }
 0x3bf   :  { %2228 = vmatpush1.bf16.msra.mxu0 %v6266_v39  ;;  %2269 = vmatpush1.bf16.msra.mxu1 %v6269_v63 }
 0x3c0   :  { %2229 = vmatprep.subr.bf16.mxu0 %v6272_v28  ;;  %2270 = vmatprep.subr.bf16.mxu1 %v7897_v51 }
 0x3c3   :  { %2230 = vmatpush1.bf16.msra.mxu0 %v7898_v18  ;;  %2271 = vmatpush1.bf16.msra.mxu1 %v7899_v50 }
 0x3c4   :  { %2231 = vmatprep.subr.bf16.mxu0 %v7900_v34  ;;  %2272 = vmatprep.subr.bf16.mxu1 %v7901_v48 }
 0x3c7   :  { %2232 = vmatpush1.bf16.msra.mxu0 %v7902_v8  ;;  %2273 = vmatpush1.bf16.msra.mxu1 %v6293_v44 }
 0x3c8   :  { %v4733_v32 = vpop.eup %4732  ;;  %2233 = vmatprep.subr.bf16.mxu0 %v7903_v11  ;;  %2274 = vmatprep.subr.bf16.mxu1 %v6299_v33 }
 0x3c9   :  { %v2102_v9 = vmul.f32 %v4733_v32, %v4731_v56  ;;  %v7912_v56 = vld [vmem:[#allocation125_spill] sm:$0xff]  ;;  %v7913_v32 = vld [vmem:[#allocation126_spill] sm:$0xff] }
 0x3cb   :  { %2234 = vmatpush1.bf16.msra.mxu0 %v6304_v54  ;;  %2275 = vmatpush1.bf16.msra.mxu1 %v6307_v25  ;;  %v6431_v29 = vsel %vm2116_vm3, %v2102_v9, %v6313_v2  ;;  %v2121_v35 = vsel %vm2116_vm3, %v2102_v9, 0.0  ;;  %v7904_v2 = vld [vmem:[#allocation117_spill] sm:$0xff]  ;;  %v7914_v9 = vld [vmem:[#allocation127_spill] sm:$0xff] }
 0x3cc   :  { %2122 = vst [vmem:[#allocation11 + $0x98] sm:$0xff] %v2121_v35  ;;  %v2218_v61 = vpack.c.bf16 %v6431_v29, %v6431_v29  ;;  %2378 = vmatprep.subr.bf16.mxu0 %v6077_v13  ;;  %2419 = vmatprep.subr.bf16.mxu1 %v6080_v14  ;;  %v7915_v35 = vld [vmem:[#allocation128_spill] sm:$0xff] }
 0x3ce   :  { %2252 = vmatmul.mubr.bf16.vlgmr.msra.gmra.mxu0 %v2218_v61  ;;  %2293 = vmatmul.mubr.bf16.vlgmr.msra.gmra.mxu1 %v2218_v61  ;;  %v7916_v61 = vld [vmem:[#allocation129_spill] sm:$0xff] }
 0x3cf   :  { %2379 = vmatpush1.bf16.msra.mxu0 %v6087_v0  ;;  %2420 = vmatpush1.bf16.msra.mxu1 %v6090_v15 }
 0x3d0   :  { %2380 = vmatprep.subr.bf16.mxu0 %v6093_v16  ;;  %2421 = vmatprep.subr.bf16.mxu1 %v6096_v17 }
 0x3d1   :  { %2410 = vmatprep.mubr.bf16.mxu0 %v7746_v57  ;;  %2451 = vmatprep.mubr.bf16.mxu1 %v7746_v57 }
 0x3d3   :  { %2381 = vmatpush1.bf16.msra.mxu0 %v6101_v19  ;;  %2422 = vmatpush1.bf16.msra.mxu1 %v6104_v21 }
 0x3d4   :  { %2382 = vmatprep.subr.bf16.mxu0 %v6107_v22  ;;  %2423 = vmatprep.subr.bf16.mxu1 %v6110_v23  ;;  %v7929_v22 = vld [vmem:[#allocation29_spill] sm:$0xff] }
 0x3d7   :  { %2383 = vmatpush1.bf16.msra.mxu0 %v6113_v53  ;;  %2424 = vmatpush1.bf16.msra.mxu1 %v6116_v58 }
 0x3d8   :  { %2384 = vmatprep.subr.bf16.mxu0 %v6119_v59  ;;  %2425 = vmatprep.subr.bf16.mxu1 %v6122_v60 }
 0x3db   :  { %2385 = vmatpush1.bf16.msra.mxu0 %v7904_v2  ;;  %2426 = vmatpush1.bf16.msra.mxu1 %v7905_v31 }
 0x3dc   :  { %2386 = vmatprep.subr.bf16.mxu0 %v7906_v27  ;;  %2427 = vmatprep.subr.bf16.mxu1 %v7907_v41  ;;  %v7924_v41 = vld [vmem:[#allocation22_spill] sm:$0xff] }
 0x3df   :  { %2387 = vmatpush1.bf16.msra.mxu0 %v7908_v20  ;;  %2428 = vmatpush1.bf16.msra.mxu1 %v7909_v12  ;;  %v7919_v20 = vld [vmem:[#allocation132_spill] sm:$0xff]  ;;  %v7920_v12 = vld [vmem:[#allocation134_spill] sm:$0xff] }
 0x3e0   :  { %2388 = vmatprep.subr.bf16.mxu0 %v7910_v43  ;;  %2429 = vmatprep.subr.bf16.mxu1 %v7911_v36  ;;  %v7921_v43 = vld [vmem:[#allocation135_spill] sm:$0xff]  ;;  %v7922_v36 = vld [vmem:[#allocation136_spill] sm:$0xff] }
 0x3e3   :  { %2389 = vmatpush1.bf16.msra.mxu0 %v7912_v56  ;;  %2430 = vmatpush1.bf16.msra.mxu1 %v7913_v32  ;;  %v7923_v56 = vld [vmem:[#allocation137_spill] sm:$0xff] }
 0x3e4   :  { %2390 = vmatprep.subr.bf16.mxu0 %v7914_v9  ;;  %2431 = vmatprep.subr.bf16.mxu1 %v7915_v35  ;;  %v7925_v35 = vld [vmem:[#allocation30_spill] sm:$0xff] }
 0x3e5   :  { %v576_v27 = vadd.f32 %v7925_v35, %v7924_v41 }
 0x3e7   :  { %2391 = vmatpush1.bf16.msra.mxu0 %v7916_v61  ;;  %2432 = vmatpush1.bf16.msra.mxu1 %v7917_v3  ;;  %v7926_v61 = vld [vmem:[#allocation28_spill] sm:$0xff] }
 0x3e8   :  { %2392 = vmatprep.subr.bf16.mxu0 %v7918_v38  ;;  %2433 = vmatprep.subr.bf16.mxu1 %v7919_v20 }
 0x3eb   :  { %2393 = vmatpush1.bf16.msra.mxu0 %v7920_v12  ;;  %2434 = vmatpush1.bf16.msra.mxu1 %v7921_v43 }
 0x3ec   :  { %2469 = vmatprep.subr.bf16.mxu0 %v7922_v36  ;;  %2510 = vmatprep.subr.bf16.mxu1 %v7923_v56  ;;  %v7927_v36 = vld [vmem:[#allocation24_spill] sm:$0xff]  ;;  %v7928_v56 = vld [vmem:[#allocation31_spill] sm:$0xff] }
 0x3ed   :  { %v669_v53 = vadd.f32 %v7928_v56, %v7927_v36  ;;  %v6482_v36 = vpop.permute.xlu0 %2357 }
 0x3ee   :  { %7932 = vst [vmem:[#allocation27_spill] sm:$0xff] %v6482_v36  ;;  %vm2359_vm4 = vcmp.eq.s32.totalorder %v6482_v36, 1  ;;  %v6861_v36 = vld [vmem:[#allocation9 + $0x48] ss:$16 sps:$4 sm:$0xff]  }
 0x46e   :  { %v2162_v32 = vpop.f32.mrf.mxu0  ;;  %v2203_v9 = vpop.f32.mrf.mxu1 }
 0x46f   :  { %v2210_v31 = vadd.f32 %v2162_v32, %v7926_v61  ;;  %v2212_v21 = vadd.f32 %v2203_v9, %v7929_v22 }
 0x470   :  { %v2164_v3 = vpop.f32.mrf.mxu0  ;;  %v2205_v2 = vpop.f32.mrf.mxu1 }
 0x471   :  { %v4474_v38 = vmul.f32 -1.442695, %v2210_v31  ;;  %v2211_v60 = vadd.f32 %v2164_v3, %v576_v27  ;;  %v2213_v23 = vadd.f32 %v2205_v2, %v669_v53  ;;  %v7930_v31 = vld [vmem:[#allocation98_spill] sm:$0xff] }
 0x472   :  { %v2166_v20 = vpop.f32.mrf.mxu0  ;;  %v2207_v59 = vpop.f32.mrf.mxu1 }
 0x473   :  { %4734 = vpow2.f32 %v4474_v38  ;;  %v4475_v12 = vmul.f32 -1.442695, %v2211_v60  ;;  %v4476_v35 = vmul.f32 -1.442695, %v2213_v23  ;;  %v7931_v23 = vld [vmem:[#allocation100_spill] sm:$0xff] }
 0x474   :  { %v2167_v43 = vpop.f32.mrf.mxu0  ;;  %v2208_v58 = vpop.f32.mrf.mxu1 }
 0x475   :  { %4736 = vpow2.f32 %v4475_v12 }
 0x476   :  { %4738 = vtanh.f32 %v2212_v21 }
 0x477   :  { %4740 = vpow2.f32 %v4476_v35 }
 0x480   :  { %v4735_v41 = vpop.eup %4734 }
 0x481   :  { %v2308_v32 = vadd.f32 1.0, %v4735_v41 }
 0x482   :  { %v4737_v61 = vpop.eup %4736 }
 0x483   :  { %4742 = vrcp.f32 %v2308_v32  ;;  %v2314_v3 = vadd.f32 1.0, %v4737_v61  ;;  %v4739_v59 = vpop.eup %4738 }
 0x484   :  { %v4741_v58 = vpop.eup %4740 }
 0x485   :  { %4744 = vrcp.f32 %v2314_v3  ;;  %v2321_v21 = vadd.f32 1.0, %v4741_v58  ;;  %v7933_v58 = vld [vmem:[#allocation101_spill] sm:$0xff] }
 0x48e   :  { %v2253_v60 = vpop.f32.mrf.mxu0  ;;  %v2294_v38 = vpop.f32.mrf.mxu1 }
 0x48f   :  { %v2301_v27 = vadd.f32 %v2253_v60, %v7930_v31 }
 0x490   :  { %v4743_v20 = vpop.eup %4742  ;;  %v2255_v12 = vpop.f32.mrf.mxu0 }
 0x491   :  { %v2296_v53 = vpop.f32.mrf.mxu1  ;;  %v2325_v2 = vmul.f32 %v4743_v20, %v4739_v59  ;;  %v4477_v22 = vmul.f32 -1.442695, %v2301_v27  ;;  %v2302_v43 = vadd.f32 %v2255_v12, %v7931_v23  ;;  %v7934_v27 = vld [vmem:[#allocation99_spill] sm:$0xff] }
 0x492   :  { %v4745_v41 = vpop.eup %4744  ;;  %v2257_v56 = vpop.f32.mrf.mxu0  ;;  %v2304_v31 = vadd.f32 %v2296_v53, %v7933_v58  ;;  %v2303_v20 = vadd.f32 %v2294_v38, %v7934_v27 }
 0x493   :  { %v2298_v9 = vpop.f32.mrf.mxu1  ;;  %v2324_v35 = vmul.f32 %v4745_v41, %v6374_v26  ;;  %4746 = vpow2.f32 %v4477_v22  ;;  %v4478_v32 = vmul.f32 -1.442695, %v2302_v43  ;;  %v6516_v58 = vpop.permute.xlu1 %2364 }
 0x494   :  { %v2258_v61 = vpop.f32.mrf.mxu0  ;;  %v4479_v12 = vmul.f32 -1.442695, %v2304_v31  ;;  %7935 = vst [vmem:[#allocation25_spill] sm:$0xff] %v6516_v58  ;;  %vm2366_vm5 = vcmp.eq.s32.totalorder %v6516_v58, 1  ;;  %v6864_v58 = vld [vmem:[#allocation9 + $0x24] ss:$16 sps:$4 sm:$0xff]  }
 0x495   :  { %v2299_v3 = vpop.f32.mrf.mxu1  ;;  %v2326_v60 = vadd.f32 %v2325_v2, %v2324_v35  ;;  %4748 = vpow2.f32 %v4478_v32 }
 0x496   :  { %4750 = vrcp.f32 %v2321_v21 }
 0x497   :  { %4752 = vtanh.f32 %v2326_v60  ;;  %v6488_v59 = vsel %vm2359_vm4, %v2326_v60, %v6374_v26 }
 0x498   :  { %4754 = vtanh.f32 %v2303_v20 }
 0x499   :  { %4756 = vpow2.f32 %v4479_v12 }
 0x4a0   :  { %v4747_v22 = vpop.eup %4746 }
 0x4a1   :  { %v2332_v23 = vadd.f32 1.0, %v4747_v22 }
 0x4a2   :  { %v4749_v43 = vpop.eup %4748 }
 0x4a3   :  { %v4751_v2 = vpop.eup %4750  ;;  %4758 = vrcp.f32 %v2332_v23  ;;  %v2338_v41 = vadd.f32 1.0, %v4749_v43 }
 0x4a4   :  { %v4753_v21 = vpop.eup %4752 }
 0x4a5   :  { %4760 = vrcp.f32 %v2338_v41  ;;  %v2328_v56 = vmul.f32 %v4753_v21, %v4751_v2  ;;  %v7939_v2 = vld [vmem:[#allocation113_spill] sm:$0xff]  ;;  %v7944_v41 = vld [vmem:[#allocation118_spill] sm:$0xff]  ;;  %v7945_v21 = vld [vmem:[#allocation119_spill] sm:$0xff] }
 0x4a6   :  { %8009 = vst [vmem:[#allocation119_spill] sm:$0xff] %v6861_v36 }
 0x4a7   :  { %v6495_v26 = vsel %vm2359_vm4, %v2328_v56, %v6381_v45  ;;  %v2369_v38 = vsel %vm2359_vm4, %v2328_v56, 0.0  ;;  %v4755_v45 = vpop.eup %4754  ;;  %v7947_v56 = vld [vmem:[#allocation121_spill] sm:$0xff] }
 0x4a8   :  { %2370 = vst [vmem:[#allocation11 + $0x30] sm:$0xff] %v2369_v38  ;;  %v2377_v53 = vpack.c.bf16 %v6495_v26, %v6495_v26  ;;  %v4757_v9 = vpop.eup %4756  ;;  %v7948_v38 = vld [vmem:[#allocation122_spill] sm:$0xff] }
 0x4a9   :  { %v2345_v3 = vadd.f32 1.0, %v4757_v9  ;;  %v7951_v9 = vld [vmem:[#allocation125_spill] sm:$0xff] }
 0x4aa   :  { %2411 = vmatmul.mubr.bf16.vlgmr.msra.gmra.mxu0 %v2377_v53  ;;  %2452 = vmatmul.mubr.bf16.vlgmr.msra.gmra.mxu1 %v2377_v53  ;;  %v7949_v53 = vld [vmem:[#allocation123_spill] sm:$0xff] }
 0x4ab   :  { %2470 = vmatpush1.bf16.msra.mxu0 %v6206_v5  ;;  %2511 = vmatpush1.bf16.msra.mxu1 %v6209_v6  ;;  %4762 = vrcp.f32 %v2345_v3  ;;  %v7955_v3 = vld [vmem:[#allocation129_spill] sm:$0xff] }
 0x4ac   :  { %2471 = vmatprep.subr.bf16.mxu0 %v6212_v7  ;;  %2512 = vmatprep.subr.bf16.mxu1 %v6215_v49 }
 0x4ad   :  { %2501 = vmatprep.mubr.bf16.mxu0 %v7746_v57  ;;  %2542 = vmatprep.mubr.bf16.mxu1 %v7746_v57 }
 0x4af   :  { %2472 = vmatpush1.bf16.msra.mxu0 %v6220_v30  ;;  %2513 = vmatpush1.bf16.msra.mxu1 %v6223_v42 }
 0x4b0   :  { %v4759_v35 = vpop.eup %4758  ;;  %2473 = vmatprep.subr.bf16.mxu0 %v6226_v24  ;;  %2514 = vmatprep.subr.bf16.mxu1 %v6229_v37 }
 0x4b1   :  { %v2349_v32 = vmul.f32 %v4759_v35, %v4755_v45  ;;  %v7950_v45 = vld [vmem:[#allocation124_spill] sm:$0xff]  ;;  %v7952_v35 = vld [vmem:[#allocation126_spill] sm:$0xff] }
 0x4b2   :  { %v4761_v61 = vpop.eup %4760 }
 0x4b3   :  { %v2348_v60 = vmul.f32 %v4761_v61, %v6410_v40  ;;  %2474 = vmatpush1.bf16.msra.mxu0 %v6235_v1  ;;  %2515 = vmatpush1.bf16.msra.mxu1 %v6238_v55  ;;  %v7954_v61 = vld [vmem:[#allocation128_spill] sm:$0xff] }
 0x4b4   :  { %2475 = vmatprep.subr.bf16.mxu0 %v6241_v52  ;;  %2516 = vmatprep.subr.bf16.mxu1 %v6244_v4 }
 0x4b5   :  { %v2350_v31 = vadd.f32 %v2349_v32, %v2348_v60  ;;  %v7953_v32 = vld [vmem:[#allocation127_spill] sm:$0xff]  ;;  %v7956_v60 = vld [vmem:[#allocation130_spill] sm:$0xff] }
 0x4b7   :  { %4764 = vtanh.f32 %v2350_v31  ;;  %2476 = vmatpush1.bf16.msra.mxu0 %v6254_v10  ;;  %2517 = vmatpush1.bf16.msra.mxu1 %v6257_v46  ;;  %v6524_v27 = vsel %vm2366_vm5, %v2350_v31, %v6410_v40  ;;  %v7957_v31 = vld [vmem:[#allocation131_spill] sm:$0xff] }
 0x4b8   :  { %2477 = vmatprep.subr.bf16.mxu0 %v6260_v47  ;;  %2518 = vmatprep.subr.bf16.mxu1 %v6263_v62  ;;  %v4763_v40 = vpop.eup %4762 }
 0x4bb   :  { %2478 = vmatpush1.bf16.msra.mxu0 %v6266_v39  ;;  %2519 = vmatpush1.bf16.msra.mxu1 %v6269_v63 }
 0x4bc   :  { %2479 = vmatprep.subr.bf16.mxu0 %v6272_v28  ;;  %2520 = vmatprep.subr.bf16.mxu1 %v7897_v51 }
 0x4bf   :  { %2480 = vmatpush1.bf16.msra.mxu0 %v7898_v18  ;;  %2521 = vmatpush1.bf16.msra.mxu1 %v7899_v50 }
 0x4c0   :  { %2481 = vmatprep.subr.bf16.mxu0 %v7900_v34  ;;  %2522 = vmatprep.subr.bf16.mxu1 %v7901_v48 }
 0x4c3   :  { %2482 = vmatpush1.bf16.msra.mxu0 %v7902_v8  ;;  %2523 = vmatpush1.bf16.msra.mxu1 %v6293_v44 }
 0x4c4   :  { %v4765_v20 = vpop.eup %4764  ;;  %2483 = vmatprep.subr.bf16.mxu0 %v7903_v11  ;;  %2524 = vmatprep.subr.bf16.mxu1 %v6299_v33 }
 0x4c5   :  { %v2352_v12 = vmul.f32 %v4765_v20, %v4763_v40  ;;  %v7958_v40 = vld [vmem:[#allocation132_spill] sm:$0xff]  ;;  %v7959_v20 = vld [vmem:[#allocation134_spill] sm:$0xff] }
 0x4c7   :  { %2484 = vmatpush1.bf16.msra.mxu0 %v6304_v54  ;;  %2525 = vmatpush1.bf16.msra.mxu1 %v6307_v25  ;;  %v6545_v22 = vsel %vm2366_vm5, %v2352_v12, %v6431_v29  ;;  %v2371_v23 = vsel %vm2366_vm5, %v2352_v12, 0.0  ;;  %v7936_v29 = vld [vmem:[#allocation17_spill] sm:$0xff]  ;;  %v7960_v12 = vld [vmem:[#allocation135_spill] sm:$0xff] }
 0x4c8   :  { %2372 = vst [vmem:[#allocation11 + $0x88] sm:$0xff] %v2371_v23  ;;  %v2468_v43 = vpack.c.bf16 %v6545_v22, %v6545_v22  ;;  %2628 = vmatprep.subr.bf16.mxu0 %v6077_v13  ;;  %2669 = vmatprep.subr.bf16.mxu1 %v6080_v14  ;;  %v7937_v13 = vld [vmem:[#allocation111_spill] sm:$0xff]  ;;  %v7938_v14 = vld [vmem:[#allocation112_spill] sm:$0xff] }
 0x4c9   :  { %v7961_v23 = vld [vmem:[#allocation136_spill] sm:$0xff] }
 0x4ca   :  { %2502 = vmatmul.mubr.bf16.vlgmr.msra.gmra.mxu0 %v2468_v43  ;;  %2543 = vmatmul.mubr.bf16.vlgmr.msra.gmra.mxu1 %v2468_v43  ;;  %v7962_v43 = vld [vmem:[#allocation137_spill] sm:$0xff] }
 0x4cb   :  { %2629 = vmatpush1.bf16.msra.mxu0 %v6087_v0  ;;  %2670 = vmatpush1.bf16.msra.mxu1 %v6090_v15  ;;  %v7940_v0 = vld [vmem:[#allocation114_spill] sm:$0xff]  ;;  %v7941_v15 = vld [vmem:[#allocation115_spill] sm:$0xff] }
 0x4cc   :  { %2630 = vmatprep.subr.bf16.mxu0 %v6093_v16  ;;  %2671 = vmatprep.subr.bf16.mxu1 %v6096_v17  ;;  %v7942_v16 = vld [vmem:[#allocation116_spill] sm:$0xff]  ;;  %v7943_v17 = vld [vmem:[#allocation117_spill] sm:$0xff] }
 0x4cd   :  { %2660 = vmatprep.mubr.bf16.mxu0 %v7746_v57  ;;  %2701 = vmatprep.mubr.bf16.mxu1 %v7746_v57 }
 0x4cf   :  { %2631 = vmatpush1.bf16.msra.mxu0 %v6101_v19  ;;  %2672 = vmatpush1.bf16.msra.mxu1 %v7936_v29  ;;  %v7946_v19 = vld [vmem:[#allocation120_spill] sm:$0xff] }
 0x4d0   :  { %2632 = vmatprep.subr.bf16.mxu0 %v7937_v13  ;;  %2673 = vmatprep.subr.bf16.mxu1 %v7938_v14  ;;  %v7963_v14 = vld [vmem:[#allocation32_spill] sm:$0xff]  ;;  %8010 = vst [vmem:[#allocation120_spill] sm:$0xff] %v6864_v58 }
 0x4d3   :  { %2633 = vmatpush1.bf16.msra.mxu0 %v7939_v2  ;;  %2674 = vmatpush1.bf16.msra.mxu1 %v7940_v0 }
 0x4d4   :  { %2634 = vmatprep.subr.bf16.mxu0 %v7941_v15  ;;  %2675 = vmatprep.subr.bf16.mxu1 %v7942_v16 }
 0x4d7   :  { %2635 = vmatpush1.bf16.msra.mxu0 %v7943_v17  ;;  %2676 = vmatpush1.bf16.msra.mxu1 %v7944_v41  ;;  %v7964_v17 = vld [vmem:[#allocation34_spill] sm:$0xff] }
 0x4d8   :  { %2636 = vmatprep.subr.bf16.mxu0 %v7945_v21  ;;  %2677 = vmatprep.subr.bf16.mxu1 %v7946_v19 }
 0x4db   :  { %2637 = vmatpush1.bf16.msra.mxu0 %v7947_v56  ;;  %2678 = vmatpush1.bf16.msra.mxu1 %v7948_v38 }
 0x4dc   :  { %2638 = vmatprep.subr.bf16.mxu0 %v7949_v53  ;;  %2679 = vmatprep.subr.bf16.mxu1 %v7950_v45  ;;  %v7965_v45 = vld [vmem:[#allocation35_spill] sm:$0xff] }
 0x4df   :  { %2639 = vmatpush1.bf16.msra.mxu0 %v7951_v9  ;;  %2680 = vmatpush1.bf16.msra.mxu1 %v7952_v35  ;;  %v7966_v35 = vld [vmem:[#allocation33_spill] sm:$0xff] }
 0x4e0   :  { %2640 = vmatprep.subr.bf16.mxu0 %v7953_v32  ;;  %2681 = vmatprep.subr.bf16.mxu1 %v7954_v61 }
 0x4e3   :  { %2641 = vmatpush1.bf16.msra.mxu0 %v7955_v3  ;;  %2682 = vmatpush1.bf16.msra.mxu1 %v7956_v60 }
 0x4e4   :  { %2642 = vmatprep.subr.bf16.mxu0 %v7957_v31  ;;  %2683 = vmatprep.subr.bf16.mxu1 %v7958_v40 }
 0x4e7   :  { %2643 = vmatpush1.bf16.msra.mxu0 %v7959_v20  ;;  %2684 = vmatpush1.bf16.msra.mxu1 %v7960_v12 }
 0x4e8   :  { %2719 = vmatprep.subr.bf16.mxu0 %v7961_v23  ;;  %2760 = vmatprep.subr.bf16.mxu1 %v7962_v43 }
 0x56a   :  { %v2412_v29 = vpop.f32.mrf.mxu0  ;;  %v2453_v13 = vpop.f32.mrf.mxu1 }
 0x56b   :  { %v2460_v2 = vadd.f32 %v2412_v29, %v7963_v14  ;;  %v2462_v32 = vadd.f32 %v2453_v13, %v7966_v35 }
 0x56c   :  { %v2414_v0 = vpop.f32.mrf.mxu0  ;;  %v2455_v15 = vpop.f32.mrf.mxu1 }
 0x56d   :  { %v4480_v16 = vmul.f32 -1.442695, %v2460_v2  ;;  %v2461_v41 = vadd.f32 %v2414_v0, %v7964_v17  ;;  %v2463_v9 = vadd.f32 %v2455_v15, %v7965_v45 }
 0x56e   :  { %v2416_v21 = vpop.f32.mrf.mxu0  ;;  %v2457_v19 = vpop.f32.mrf.mxu1 }
 0x56f   :  { %4766 = vpow2.f32 %v4480_v16  ;;  %v4481_v56 = vmul.f32 -1.442695, %v2461_v41  ;;  %v4482_v61 = vmul.f32 -1.442695, %v2463_v9  ;;  %v7967_v16 = vld [vmem:[#allocation94_spill] sm:$0xff] }
 0x570   :  { %v2417_v38 = vpop.f32.mrf.mxu0  ;;  %v2458_v53 = vpop.f32.mrf.mxu1 }
 0x571   :  { %4768 = vpow2.f32 %v4481_v56  ;;  %v7968_v56 = vld [vmem:[#allocation96_spill] sm:$0xff] }
 0x572   :  { %4770 = vtanh.f32 %v2462_v32 }
 0x573   :  { %4772 = vpow2.f32 %v4482_v61 }
 0x57c   :  { %v4767_v3 = vpop.eup %4766 }
 0x57d   :  { %v2558_v60 = vadd.f32 1.0, %v4767_v3 }
 0x57e   :  { %v4769_v31 = vpop.eup %4768 }
 0x57f   :  { %4774 = vrcp.f32 %v2558_v60  ;;  %v2564_v40 = vadd.f32 1.0, %v4769_v31  ;;  %v4771_v29 = vpop.eup %4770  ;;  %v6594_v31 = vpop.permute.xlu0 %2607 }
 0x580   :  { %v4773_v0 = vpop.eup %4772  ;;  %7969 = vst [vmem:[#allocation102_spill] sm:$0xff] %v6594_v31  ;;  %vm2609_vm6 = vcmp.eq.s32.totalorder %v6594_v31, 1  ;;  %v6867_v31 = vld [vmem:[#allocation9 + $0x2c] ss:$16 sps:$4 sm:$0xff]  }
 0x581   :  { %4776 = vrcp.f32 %v2564_v40  ;;  %v2571_v45 = vadd.f32 1.0, %v4773_v0  ;;  %8011 = vst [vmem:[#allocation121_spill] sm:$0xff] %v6867_v31 }
 0x58a   :  { %v2503_v14 = vpop.f32.mrf.mxu0  ;;  %v2544_v2 = vpop.f32.mrf.mxu1 }
 0x58b   :  { %v2551_v17 = vadd.f32 %v2503_v14, %v7967_v16  ;;  %v7970_v14 = vld [vmem:[#allocation97_spill] sm:$0xff]  ;;  %v7971_v16 = vld [vmem:[#allocation95_spill] sm:$0xff] }
 0x58c   :  { %v4775_v41 = vpop.eup %4774  ;;  %v2505_v21 = vpop.f32.mrf.mxu0 }
 0x58d   :  { %v2546_v15 = vpop.f32.mrf.mxu1  ;;  %v2575_v19 = vmul.f32 %v4775_v41, %v4771_v29  ;;  %v4483_v13 = vmul.f32 -1.442695, %v2551_v17  ;;  %v2552_v38 = vadd.f32 %v2505_v21, %v7968_v56  ;;  %v2553_v17 = vadd.f32 %v2544_v2, %v7971_v16  ;;  %v6743_v16 = vld [vmem:[#allocation8 + $0x20] ss:$16 sps:$4 sm:$0xff]  }
 0x58e   :  { %v4777_v53 = vpop.eup %4776  ;;  %v2507_v9 = vpop.f32.mrf.mxu0  ;;  %v2554_v0 = vadd.f32 %v2546_v15, %v7970_v14  ;;  %v6737_v14 = vld [vmem:[#allocation8 + $0x24] ss:$16 sps:$4 sm:$0xff]   ;;  %7992 = vst [vmem:[#allocation112_spill] sm:$0xff] %v6743_v16 }
 0x58f   :  { %v2548_v35 = vpop.f32.mrf.mxu1  ;;  %v2574_v32 = vmul.f32 %v4777_v53, %v6488_v59  ;;  %4778 = vpow2.f32 %v4483_v13  ;;  %v4484_v61 = vmul.f32 -1.442695, %v2552_v38  ;;  %7990 = vst [vmem:[#allocation17_spill] sm:$0xff] %v6737_v14 }
 0x590   :  { %v2508_v3 = vpop.f32.mrf.mxu0  ;;  %v4485_v41 = vmul.f32 -1.442695, %v2554_v0  ;;  %v6740_v0 = vld [vmem:[#allocation8 + $0x2c] ss:$16 sps:$4 sm:$0xff]  }
 0x591   :  { %v2549_v60 = vpop.f32.mrf.mxu1  ;;  %v2576_v40 = vadd.f32 %v2575_v19, %v2574_v32  ;;  %4780 = vpow2.f32 %v4484_v61  ;;  %v6722_v32 = vld [vmem:[#allocation8 + $0x68] ss:$16 sps:$4 sm:$0xff]   ;;  %v6725_v61 = vld [vmem:[#allocation8 + $0x44] ss:$16 sps:$4 sm:$0xff]   ;;  %v6728_v3 = vld [vmem:[#allocation8 + $0x4c] ss:$16 sps:$4 sm:$0xff]  }
 0x592   :  { %4782 = vrcp.f32 %v2571_v45  ;;  %7985 = vst [vmem:[#allocation29_spill] sm:$0xff] %v6722_v32  ;;  %7986 = vst [vmem:[#allocation98_spill] sm:$0xff] %v6725_v61  ;;  %v6731_v60 = vld [vmem:[#allocation8 + $0x40] ss:$16 sps:$4 sm:$0xff]  }
 0x593   :  { %4784 = vtanh.f32 %v2576_v40  ;;  %v6600_v29 = vsel %vm2609_vm6, %v2576_v40, %v6488_v59  ;;  %7987 = vst [vmem:[#allocation100_spill] sm:$0xff] %v6728_v3  ;;  %7988 = vst [vmem:[#allocation101_spill] sm:$0xff] %v6731_v60  ;;  %v6734_v40 = vld [vmem:[#allocation8 + $0x48] ss:$16 sps:$4 sm:$0xff]  }
 0x594   :  { %4786 = vtanh.f32 %v2553_v17  ;;  %7989 = vst [vmem:[#allocation99_spill] sm:$0xff] %v6734_v40  ;;  %7991 = vst [vmem:[#allocation111_spill] sm:$0xff] %v6740_v0  ;;  %v6746_v17 = vld [vmem:[#allocation8 + $0x28] ss:$16 sps:$4 sm:$0xff]  }
 0x595   :  { %4788 = vpow2.f32 %v4485_v41  ;;  %7993 = vst [vmem:[#allocation113_spill] sm:$0xff] %v6746_v17  ;;  %v6749_v41 = vld [vmem:[#allocation8 + $0x4] ss:$16 sps:$4 sm:$0xff]  }
 0x596   :  { %7994 = vst [vmem:[#allocation114_spill] sm:$0xff] %v6749_v41 }
 0x59c   :  { %v4779_v21 = vpop.eup %4778 }
 0x59d   :  { %v2582_v13 = vadd.f32 1.0, %v4779_v21  ;;  %v6752_v21 = vld [vmem:[#allocation8 + $0xc] ss:$16 sps:$4 sm:$0xff]  }
 0x59e   :  { %v4781_v56 = vpop.eup %4780  ;;  %7995 = vst [vmem:[#allocation115_spill] sm:$0xff] %v6752_v21 }
 0x59f   :  { %v4783_v19 = vpop.eup %4782  ;;  %4790 = vrcp.f32 %v2582_v13  ;;  %v2588_v38 = vadd.f32 1.0, %v4781_v56 }
 0x5a0   :  { %v4785_v53 = vpop.eup %4784 }
 0x5a1   :  { %4792 = vrcp.f32 %v2588_v38  ;;  %v2578_v45 = vmul.f32 %v4785_v53, %v4783_v19  ;;  %v7996_v19 = vld [vmem:[#allocation22_spill] sm:$0xff] }
 0x5a2   :  { %v7997_v38 = vld [vmem:[#allocation38_spill] sm:$0xff] }
 0x5a3   :  { %v6607_v59 = vsel %vm2609_vm6, %v2578_v45, %v6495_v26  ;;  %v2619_v2 = vsel %vm2609_vm6, %v2578_v45, 0.0  ;;  %v4787_v26 = vpop.eup %4786  ;;  %v586_v53 = vadd.f32 %v7997_v38, %v7996_v19  ;;  %v7998_v45 = vld [vmem:[#allocation36_spill] sm:$0xff]  ;;  %v6873_v19 = vld [vmem:[#allocation9 + $0x28] ss:$16 sps:$4 sm:$0xff]  }
 0x5a4   :  { %2620 = vst [vmem:[#allocation11 + $0x40] sm:$0xff] %v2619_v2  ;;  %v2627_v15 = vpack.c.bf16 %v6607_v59, %v6607_v59  ;;  %v4789_v9 = vpop.eup %4788  ;;  %8012 = vst [vmem:[#allocation122_spill] sm:$0xff] %v6873_v19 }
 0x5a6   :  { %2661 = vmatmul.mubr.bf16.vlgmr.msra.gmra.mxu0 %v2627_v15  ;;  %2702 = vmatmul.mubr.bf16.vlgmr.msra.gmra.mxu1 %v2627_v15 }
 0x5a7   :  { %2720 = vmatpush1.bf16.msra.mxu0 %v6206_v5  ;;  %2761 = vmatpush1.bf16.msra.mxu1 %v6209_v6 }
 0x5a8   :  { %2721 = vmatprep.subr.bf16.mxu0 %v6212_v7  ;;  %2762 = vmatprep.subr.bf16.mxu1 %v6215_v49  ;;  %v2595_v7 = vadd.f32 1.0, %v4789_v9 }
 0x5a9   :  { %2751 = vmatprep.mubr.bf16.mxu0 %v7746_v57  ;;  %2792 = vmatprep.mubr.bf16.mxu1 %v7746_v57 }
 0x5aa   :  { %4794 = vrcp.f32 %v2595_v7 }
 0x5ab   :  { %2722 = vmatpush1.bf16.msra.mxu0 %v6220_v30  ;;  %2763 = vmatpush1.bf16.msra.mxu1 %v6223_v42  ;;  %v6628_v30 = vpop.permute.xlu1 %2614 }
 0x5ac   :  { %v4791_v35 = vpop.eup %4790  ;;  %2723 = vmatprep.subr.bf16.mxu0 %v6226_v24  ;;  %2764 = vmatprep.subr.bf16.mxu1 %v6229_v37  ;;  %7972 = vst [vmem:[#allocation104_spill] sm:$0xff] %v6628_v30  ;;  %vm2616_vm7 = vcmp.eq.s32.totalorder %v6628_v30, 1 }
 0x5ad   :  { %v2599_v5 = vmul.f32 %v4791_v35, %v4787_v26 }
 0x5ae   :  { %v4793_v6 = vpop.eup %4792 }
 0x5af   :  { %v2598_v49 = vmul.f32 %v4793_v6, %v6524_v27  ;;  %2724 = vmatpush1.bf16.msra.mxu0 %v6235_v1  ;;  %2765 = vmatpush1.bf16.msra.mxu1 %v6238_v55 }
 0x5b0   :  { %2725 = vmatprep.subr.bf16.mxu0 %v6241_v52  ;;  %2766 = vmatprep.subr.bf16.mxu1 %v6244_v4 }
 0x5b1   :  { %v2600_v42 = vadd.f32 %v2599_v5, %v2598_v49 }
 0x5b3   :  { %4796 = vtanh.f32 %v2600_v42  ;;  %2726 = vmatpush1.bf16.msra.mxu0 %v6254_v10  ;;  %2767 = vmatpush1.bf16.msra.mxu1 %v6257_v46  ;;  %v6636_v24 = vsel %vm2616_vm7, %v2600_v42, %v6524_v27  ;;  %v6663_v10 = vld [vmem:[#allocation8 + $0xe4] ss:$16 sps:$4 sm:$0xff]   ;;  %v6672_v46 = vld [vmem:[#allocation8 + $0xe8] ss:$16 sps:$4 sm:$0xff]   ;;  %v6716_v27 = vld [vmem:[#allocation8 + $0x6c] ss:$16 sps:$4 sm:$0xff]  }
 0x5b4   :  { %2727 = vmatprep.subr.bf16.mxu0 %v6260_v47  ;;  %2768 = vmatprep.subr.bf16.mxu1 %v6263_v62  ;;  %v6675_v47 = vld [vmem:[#allocation8 + $0xc4] ss:$16 sps:$4 sm:$0xff]   ;;  %v6678_v62 = vld [vmem:[#allocation8 + $0xcc] ss:$16 sps:$4 sm:$0xff]   ;;  %7983 = vst [vmem:[#allocation28_spill] sm:$0xff] %v6716_v27 }
 0x5b7   :  { %2728 = vmatpush1.bf16.msra.mxu0 %v6266_v39  ;;  %2769 = vmatpush1.bf16.msra.mxu1 %v6269_v63  ;;  %v4795_v37 = vpop.eup %4794  ;;  %v6683_v39 = vld [vmem:[#allocation8 + $0xc0] ss:$16 sps:$4 sm:$0xff]   ;;  %v6686_v63 = vld [vmem:[#allocation8 + $0xc8] ss:$16 sps:$4 sm:$0xff]  }
 0x5b8   :  { %2729 = vmatprep.subr.bf16.mxu0 %v6272_v28  ;;  %2770 = vmatprep.subr.bf16.mxu1 %v7897_v51  ;;  %7973 = vst [vmem:[#allocation105_spill] sm:$0xff] %v6686_v63  ;;  %v6689_v28 = vld [vmem:[#allocation8 + $0xa4] ss:$16 sps:$4 sm:$0xff]   ;;  %v6695_v51 = vld [vmem:[#allocation8 + $0xa0] ss:$16 sps:$4 sm:$0xff]  }
 0x5b9   :  { %7974 = vst [vmem:[#allocation103_spill] sm:$0xff] %v6689_v28  ;;  %7976 = vst [vmem:[#allocation19_spill] sm:$0xff] %v6695_v51 }
 0x5bb   :  { %2730 = vmatpush1.bf16.msra.mxu0 %v7898_v18  ;;  %2771 = vmatpush1.bf16.msra.mxu1 %v7899_v50  ;;  %v6698_v18 = vld [vmem:[#allocation8 + $0xa8] ss:$16 sps:$4 sm:$0xff]   ;;  %v6701_v50 = vld [vmem:[#allocation8 + $0x84] ss:$16 sps:$4 sm:$0xff]  }
 0x5bc   :  { %2731 = vmatprep.subr.bf16.mxu0 %v7900_v34  ;;  %2772 = vmatprep.subr.bf16.mxu1 %v7901_v48  ;;  %7977 = vst [vmem:[#allocation106_spill] sm:$0xff] %v6698_v18  ;;  %7978 = vst [vmem:[#allocation108_spill] sm:$0xff] %v6701_v50  ;;  %v6704_v34 = vld [vmem:[#allocation8 + $0x8c] ss:$16 sps:$4 sm:$0xff]   ;;  %v6707_v48 = vld [vmem:[#allocation8 + $0x80] ss:$16 sps:$4 sm:$0xff]  }
 0x5bd   :  { %7979 = vst [vmem:[#allocation109_spill] sm:$0xff] %v6704_v34  ;;  %7980 = vst [vmem:[#allocation107_spill] sm:$0xff] %v6707_v48 }
 0x5bf   :  { %2732 = vmatpush1.bf16.msra.mxu0 %v7902_v8  ;;  %2773 = vmatpush1.bf16.msra.mxu1 %v6293_v44  ;;  %v6710_v8 = vld [vmem:[#allocation8 + $0x88] ss:$16 sps:$4 sm:$0xff]  }
 0x5c0   :  { %v4797_v1 = vpop.eup %4796  ;;  %2733 = vmatprep.subr.bf16.mxu0 %v7903_v11  ;;  %2774 = vmatprep.subr.bf16.mxu1 %v6299_v33  ;;  %v6666_v33 = vld [vmem:[#allocation8 + $0xec] ss:$16 sps:$4 sm:$0xff]   ;;  %7981 = vst [vmem:[#allocation133_spill] sm:$0xff] %v6710_v8  ;;  %v6713_v11 = vld [vmem:[#allocation8 + $0x64] ss:$16 sps:$4 sm:$0xff]  }
 0x5c1   :  { %v2602_v55 = vmul.f32 %v4797_v1, %v4795_v37  ;;  %7982 = vst [vmem:[#allocation30_spill] sm:$0xff] %v6713_v11  ;;  %v8001_v37 = vld [vmem:[#allocation37_spill] sm:$0xff] }
 0x5c3   :  { %2734 = vmatpush1.bf16.msra.mxu0 %v6304_v54  ;;  %2775 = vmatpush1.bf16.msra.mxu1 %v6307_v25  ;;  %v6657_v52 = vsel %vm2616_vm7, %v2602_v55, %v6545_v22  ;;  %v2621_v4 = vsel %vm2616_vm7, %v2602_v55, 0.0  ;;  %v6669_v25 = vld [vmem:[#allocation8 + $0xe0] ss:$16 sps:$4 sm:$0xff]   ;;  %v6692_v54 = vld [vmem:[#allocation8 + $0xac] ss:$16 sps:$4 sm:$0xff]  }
 0x5c4   :  { %2622 = vst [vmem:[#allocation11 + $0x78] sm:$0xff] %v2621_v4  ;;  %v2718_v44 = vpack.c.bf16 %v6657_v52, %v6657_v52  ;;  %2878 = vmatprep.subr.bf16.mxu0 %v6663_v10  ;;  %2919 = vmatprep.subr.bf16.mxu1 %v6666_v33  ;;  %7975 = vst [vmem:[#allocation21_spill] sm:$0xff] %v6692_v54  ;;  %v6719_v22 = vld [vmem:[#allocation8 + $0x60] ss:$16 sps:$4 sm:$0xff]  }
 0x5c5   :  { %7984 = vst [vmem:[#allocation31_spill] sm:$0xff] %v6719_v22 }
 0x5c6   :  { %2752 = vmatmul.mubr.bf16.vlgmr.msra.gmra.mxu0 %v2718_v44  ;;  %2793 = vmatmul.mubr.bf16.vlgmr.msra.gmra.mxu1 %v2718_v44 }
 0x5c7   :  { %2879 = vmatpush1.bf16.msra.mxu0 %v6669_v25  ;;  %2920 = vmatpush1.bf16.msra.mxu1 %v6672_v46 }
 0x5c8   :  { %2880 = vmatprep.subr.bf16.mxu0 %v6675_v47  ;;  %2921 = vmatprep.subr.bf16.mxu1 %v6678_v62 }
 0x5c9   :  { %2910 = vmatprep.mubr.bf16.mxu0 %v7746_v57  ;;  %2951 = vmatprep.mubr.bf16.mxu1 %v7746_v57 }
 0x5cb   :  { %2881 = vmatpush1.bf16.msra.mxu0 %v6683_v39  ;;  %2922 = vmatpush1.bf16.msra.mxu1 %v6686_v63 }
 0x5cc   :  { %2882 = vmatprep.subr.bf16.mxu0 %v6689_v28  ;;  %2923 = vmatprep.subr.bf16.mxu1 %v6692_v54 }
 0x5cf   :  { %2883 = vmatpush1.bf16.msra.mxu0 %v6695_v51  ;;  %2924 = vmatpush1.bf16.msra.mxu1 %v6698_v18 }
 0x5d0   :  { %2884 = vmatprep.subr.bf16.mxu0 %v6701_v50  ;;  %2925 = vmatprep.subr.bf16.mxu1 %v6704_v34 }
 0x5d3   :  { %2885 = vmatpush1.bf16.msra.mxu0 %v6707_v48  ;;  %2926 = vmatpush1.bf16.msra.mxu1 %v6710_v8 }
 0x5d4   :  { %2886 = vmatprep.subr.bf16.mxu0 %v6713_v11  ;;  %2927 = vmatprep.subr.bf16.mxu1 %v6716_v27 }
 0x5d7   :  { %2887 = vmatpush1.bf16.msra.mxu0 %v6719_v22  ;;  %2928 = vmatpush1.bf16.msra.mxu1 %v6722_v32 }
 0x5d8   :  { %2888 = vmatprep.subr.bf16.mxu0 %v6725_v61  ;;  %2929 = vmatprep.subr.bf16.mxu1 %v6728_v3 }
 0x5db   :  { %2889 = vmatpush1.bf16.msra.mxu0 %v6731_v60  ;;  %2930 = vmatpush1.bf16.msra.mxu1 %v6734_v40 }
 0x5dc   :  { %2890 = vmatprep.subr.bf16.mxu0 %v6737_v14  ;;  %2931 = vmatprep.subr.bf16.mxu1 %v6740_v0 }
 0x5df   :  { %2891 = vmatpush1.bf16.msra.mxu0 %v6743_v16  ;;  %2932 = vmatpush1.bf16.msra.mxu1 %v6746_v17 }
 0x5e0   :  { %2892 = vmatprep.subr.bf16.mxu0 %v6749_v41  ;;  %2933 = vmatprep.subr.bf16.mxu1 %v6752_v21 }
 0x5e3   :  { %2893 = vmatpush1.bf16.msra.mxu0 %v7959_v20  ;;  %2934 = vmatpush1.bf16.msra.mxu1 %v7960_v12 }
 0x5e4   :  { %2969 = vmatprep.subr.bf16.mxu0 %v7961_v23  ;;  %3010 = vmatprep.subr.bf16.mxu1 %v7962_v43  ;;  %v7999_v23 = vld [vmem:[#allocation24_spill] sm:$0xff]  ;;  %v8000_v43 = vld [vmem:[#allocation39_spill] sm:$0xff] }
 0x5e5   :  { %v679_v49 = vadd.f32 %v8000_v43, %v7999_v23  ;;  %v6870_v23 = vld [vmem:[#allocation9 + $0x20] ss:$16 sps:$4 sm:$0xff]  }
 0x666   :  { %v2662_v13 = vpop.f32.mrf.mxu0  ;;  %v2703_v56 = vpop.f32.mrf.mxu1 }
 0x667   :  { %v2710_v2 = vadd.f32 %v2662_v13, %v7998_v45  ;;  %v2712_v1 = vadd.f32 %v2703_v56, %v8001_v37 }
 0x668   :  { %v2664_v15 = vpop.f32.mrf.mxu0  ;;  %v2705_v26 = vpop.f32.mrf.mxu1 }
 0x669   :  { %v4486_v9 = vmul.f32 -1.442695, %v2710_v2  ;;  %v2711_v35 = vadd.f32 %v2664_v15, %v586_v53  ;;  %v2713_v42 = vadd.f32 %v2705_v26, %v679_v49 }
 0x66a   :  { %v2666_v5 = vpop.f32.mrf.mxu0  ;;  %v2707_v6 = vpop.f32.mrf.mxu1 }
 0x66b   :  { %4798 = vpow2.f32 %v4486_v9  ;;  %v4487_v20 = vmul.f32 -1.442695, %v2711_v35  ;;  %v4488_v55 = vmul.f32 -1.442695, %v2713_v42  ;;  %v8002_v9 = vld [vmem:[#allocation90_spill] sm:$0xff] }
 0x66c   :  { %v2667_v12 = vpop.f32.mrf.mxu0  ;;  %v2708_v7 = vpop.f32.mrf.mxu1 }
 0x66d   :  { %4800 = vpow2.f32 %v4487_v20  ;;  %v8003_v12 = vld [vmem:[#allocation92_spill] sm:$0xff] }
 0x66e   :  { %4802 = vtanh.f32 %v2712_v1  ;;  %v6767_v1 = vpop.permute.xlu0 %2857 }
 0x66f   :  { %4804 = vpow2.f32 %v4488_v55  ;;  %vm2859_vm8 = vcmp.eq.s32.totalorder %v6767_v1, 1  ;;  %v8035_v1 = vld [vmem:[#allocation107_spill] sm:$0xff] }
 0x678   :  { %v4799_v4 = vpop.eup %4798 }
 0x679   :  { %v2808_v44 = vadd.f32 1.0, %v4799_v4 }
 0x67a   :  { %v4801_v13 = vpop.eup %4800 }
 0x67b   :  { %4806 = vrcp.f32 %v2808_v44  ;;  %v2814_v38 = vadd.f32 1.0, %v4801_v13  ;;  %v4803_v53 = vpop.eup %4802 }
 0x67c   :  { %v4805_v15 = vpop.eup %4804 }
 0x67d   :  { %4808 = vrcp.f32 %v2814_v38  ;;  %v2821_v49 = vadd.f32 1.0, %v4805_v15 }
 0x686   :  { %v2753_v45 = vpop.f32.mrf.mxu0  ;;  %v2794_v2 = vpop.f32.mrf.mxu1 }
 0x687   :  { %v2801_v35 = vadd.f32 %v2753_v45, %v8002_v9  ;;  %v8004_v45 = vld [vmem:[#allocation93_spill] sm:$0xff]  ;;  %v8005_v9 = vld [vmem:[#allocation91_spill] sm:$0xff] }
 0x688   :  { %v4807_v5 = vpop.eup %4806  ;;  %v2755_v6 = vpop.f32.mrf.mxu0 }
 0x689   :  { %v2796_v26 = vpop.f32.mrf.mxu1  ;;  %v2825_v20 = vmul.f32 %v4807_v5, %v4803_v53  ;;  %v4489_v56 = vmul.f32 -1.442695, %v2801_v35  ;;  %v2802_v7 = vadd.f32 %v2755_v6, %v8003_v12  ;;  %v2803_v35 = vadd.f32 %v2794_v2, %v8005_v9  ;;  %v6810_v9 = vld [vmem:[#allocation9 + $0xac] ss:$16 sps:$4 sm:$0xff]  }
 0x68a   :  { %v4809_v43 = vpop.eup %4808  ;;  %v2757_v42 = vpop.f32.mrf.mxu0  ;;  %v2804_v15 = vadd.f32 %v2796_v26, %v8004_v45 }
 0x68b   :  { %v2798_v37 = vpop.f32.mrf.mxu1  ;;  %v2824_v55 = vmul.f32 %v4809_v43, %v6600_v29  ;;  %4810 = vpow2.f32 %v4489_v56  ;;  %v4490_v4 = vmul.f32 -1.442695, %v2802_v7  ;;  %v6787_v42 = vld [vmem:[#allocation9 + $0xe0] ss:$16 sps:$4 sm:$0xff]  }
 0x68c   :  { %v2758_v44 = vpop.f32.mrf.mxu0  ;;  %v4491_v5 = vmul.f32 -1.442695, %v2804_v15  ;;  %v6790_v37 = vld [vmem:[#allocation9 + $0xe8] ss:$16 sps:$4 sm:$0xff]   ;;  %v6807_v15 = vld [vmem:[#allocation9 + $0xa4] ss:$16 sps:$4 sm:$0xff]  }
 0x68d   :  { %v2799_v13 = vpop.f32.mrf.mxu1  ;;  %v2826_v38 = vadd.f32 %v2825_v20, %v2824_v55  ;;  %4812 = vpow2.f32 %v4490_v4  ;;  %v6793_v55 = vld [vmem:[#allocation9 + $0xc4] ss:$16 sps:$4 sm:$0xff]  }
 0x68e   :  { %4814 = vrcp.f32 %v2821_v49  ;;  %v6801_v13 = vld [vmem:[#allocation9 + $0xc0] ss:$16 sps:$4 sm:$0xff]  }
 0x68f   :  { %4816 = vtanh.f32 %v2826_v38  ;;  %v6774_v53 = vsel %vm2859_vm8, %v2826_v38, %v6600_v29  ;;  %v6804_v38 = vld [vmem:[#allocation9 + $0xc8] ss:$16 sps:$4 sm:$0xff]  }
 0x690   :  { %4818 = vtanh.f32 %v2803_v35 }
 0x691   :  { %4820 = vpow2.f32 %v4491_v5 }
 0x698   :  { %v4811_v6 = vpop.eup %4810 }
 0x699   :  { %v2832_v56 = vadd.f32 1.0, %v4811_v6 }
 0x69a   :  { %v4813_v12 = vpop.eup %4812 }
 0x69b   :  { %v4815_v20 = vpop.eup %4814  ;;  %4822 = vrcp.f32 %v2832_v56  ;;  %v2838_v7 = vadd.f32 1.0, %v4813_v12  ;;  %v6813_v56 = vpop.permute.xlu1 %2864 }
 0x69c   :  { %v4817_v43 = vpop.eup %4816  ;;  %vm2866_vm9 = vcmp.eq.s32.totalorder %v6813_v56, 1 }
 0x69d   :  { %4824 = vrcp.f32 %v2838_v7  ;;  %v2828_v49 = vmul.f32 %v4817_v43, %v4815_v20  ;;  %v4819_v4 = vpop.eup %4818  ;;  %v6816_v20 = vld [vmem:[#allocation9 + $0xa0] ss:$16 sps:$4 sm:$0xff]   ;;  %v6819_v7 = vld [vmem:[#allocation9 + $0xa8] ss:$16 sps:$4 sm:$0xff]   ;;  %v6822_v43 = vld [vmem:[#allocation9 + $0x84] ss:$16 sps:$4 sm:$0xff]  }
 0x69e   :  { %v4821_v44 = vpop.eup %4820 }
 0x69f   :  { %v6781_v29 = vsel %vm2859_vm8, %v2828_v49, %v6607_v59  ;;  %v2869_v2 = vsel %vm2859_vm8, %v2828_v49, 0.0  ;;  %v6796_v59 = vld [vmem:[#allocation9 + $0xcc] ss:$16 sps:$4 sm:$0xff]   ;;  %v2845_v6 = vadd.f32 1.0, %v4821_v44 }
 0x6a0   :  { %2870 = vst [vmem:[#allocation11 + $0x50] sm:$0xff] %v2869_v2  ;;  %v2877_v26 = vpack.c.bf16 %v6781_v29, %v6781_v29  ;;  %v6825_v49 = vld [vmem:[#allocation9 + $0x8c] ss:$16 sps:$4 sm:$0xff]  }
 0x6a1   :  { %4826 = vrcp.f32 %v2845_v6  ;;  %v6849_v6 = vld [vmem:[#allocation9 + $0x68] ss:$16 sps:$4 sm:$0xff]  }
 0x6a2   :  { %2911 = vmatmul.mubr.bf16.vlgmr.msra.gmra.mxu0 %v2877_v26  ;;  %2952 = vmatmul.mubr.bf16.vlgmr.msra.gmra.mxu1 %v2877_v26  ;;  %v6829_v26 = vld [vmem:[#allocation9 + $0x80] ss:$16 sps:$4 sm:$0xff]  }
 0x6a3   :  { %2970 = vmatpush1.bf16.msra.mxu0 %v6787_v42  ;;  %3011 = vmatpush1.bf16.msra.mxu1 %v6790_v37 }
 0x6a4   :  { %2971 = vmatprep.subr.bf16.mxu0 %v6793_v55  ;;  %3012 = vmatprep.subr.bf16.mxu1 %v6796_v59 }
 0x6a5   :  { %3001 = vmatprep.mubr.bf16.mxu0 %v7746_v57  ;;  %3042 = vmatprep.mubr.bf16.mxu1 %v7746_v57 }
 0x6a7   :  { %2972 = vmatpush1.bf16.msra.mxu0 %v6801_v13  ;;  %3013 = vmatpush1.bf16.msra.mxu1 %v6804_v38 }
 0x6a8   :  { %v4823_v45 = vpop.eup %4822  ;;  %2973 = vmatprep.subr.bf16.mxu0 %v6807_v15  ;;  %3014 = vmatprep.subr.bf16.mxu1 %v6810_v9 }
 0x6a9   :  { %v2849_v35 = vmul.f32 %v4823_v45, %v4819_v4  ;;  %v6832_v4 = vld [vmem:[#allocation9 + $0x88] ss:$16 sps:$4 sm:$0xff]   ;;  %v6840_v45 = vld [vmem:[#allocation9 + $0x64] ss:$16 sps:$4 sm:$0xff]  }
 0x6aa   :  { %v4825_v5 = vpop.eup %4824 }
 0x6ab   :  { %v2848_v12 = vmul.f32 %v4825_v5, %v6636_v24  ;;  %2974 = vmatpush1.bf16.msra.mxu0 %v6816_v20  ;;  %3015 = vmatpush1.bf16.msra.mxu1 %v6819_v7  ;;  %v6846_v5 = vld [vmem:[#allocation9 + $0x60] ss:$16 sps:$4 sm:$0xff]  }
 0x6ac   :  { %2975 = vmatprep.subr.bf16.mxu0 %v6822_v43  ;;  %3016 = vmatprep.subr.bf16.mxu1 %v6825_v49 }
 0x6ad   :  { %v2850_v2 = vadd.f32 %v2849_v35, %v2848_v12  ;;  %v6843_v35 = vld [vmem:[#allocation9 + $0x6c] ss:$16 sps:$4 sm:$0xff]   ;;  %v6852_v12 = vld [vmem:[#allocation9 + $0x44] ss:$16 sps:$4 sm:$0xff]  }
 0x6ae   :  { %8006 = vst [vmem:[#allocation116_spill] sm:$0xff] %v6852_v12  ;;  %v4827_v30 = vpop.eup %4826 }
 0x6af   :  { %4828 = vtanh.f32 %v2850_v2  ;;  %2976 = vmatpush1.bf16.msra.mxu0 %v6829_v26  ;;  %3017 = vmatpush1.bf16.msra.mxu1 %v6832_v4  ;;  %v6838_v44 = vsel %vm2866_vm9, %v2850_v2, %v6636_v24  ;;  %v6855_v24 = vld [vmem:[#allocation9 + $0x4c] ss:$16 sps:$4 sm:$0xff]   ;;  %v6858_v2 = vld [vmem:[#allocation9 + $0x40] ss:$16 sps:$4 sm:$0xff]  }
 0x6b0   :  { %2977 = vmatprep.subr.bf16.mxu0 %v6840_v45  ;;  %3018 = vmatprep.subr.bf16.mxu1 %v6843_v35  ;;  %8007 = vst [vmem:[#allocation117_spill] sm:$0xff] %v6855_v24  ;;  %8008 = vst [vmem:[#allocation118_spill] sm:$0xff] %v6858_v2 }
 0x6b3   :  { %2978 = vmatpush1.bf16.msra.mxu0 %v6846_v5  ;;  %3019 = vmatpush1.bf16.msra.mxu1 %v6849_v6 }
 0x6b4   :  { %2979 = vmatprep.subr.bf16.mxu0 %v6852_v12  ;;  %3020 = vmatprep.subr.bf16.mxu1 %v6855_v24  ;;  %v6876_v24 = vld [vmem:[#allocation9 + $0x4] ss:$16 sps:$4 sm:$0xff]   ;;  %v6885_v12 = vld [vmem:[#allocation9 + $0x8] ss:$16 sps:$4 sm:$0xff]  }
 0x6b5   :  { %8013 = vst [vmem:[#allocation123_spill] sm:$0xff] %v6876_v24 }
 0x6b7   :  { %2980 = vmatpush1.bf16.msra.mxu0 %v6858_v2  ;;  %3021 = vmatpush1.bf16.msra.mxu1 %v6861_v36  ;;  %v6879_v36 = vld [vmem:[#allocation9 + $0xc] ss:$16 sps:$4 sm:$0xff]  }
 0x6b8   :  { %2981 = vmatprep.subr.bf16.mxu0 %v6864_v58  ;;  %3022 = vmatprep.subr.bf16.mxu1 %v6867_v31  ;;  %v6882_v31 = vld [vmem:[#allocation9] ss:$16 sps:$4 sm:$0xff]  }
 0x6bb   :  { %2982 = vmatpush1.bf16.msra.mxu0 %v6870_v23  ;;  %3023 = vmatpush1.bf16.msra.mxu1 %v6873_v19 }
 0x6bc   :  { %v4829_v2 = vpop.eup %4828  ;;  %2983 = vmatprep.subr.bf16.mxu0 %v6876_v24  ;;  %3024 = vmatprep.subr.bf16.mxu1 %v6879_v36 }
 0x6bd   :  { %v2852_v58 = vmul.f32 %v4829_v2, %v4827_v30  ;;  %v6938_v2 = vld [vmem:[#allocation9 + $0xec] ss:$16 sps:$4 sm:$0xff]  }
 0x6be   :  { %8017 = vst [vmem:[#allocation127_spill] sm:$0xff] %v6938_v2 }
 0x6bf   :  { %2984 = vmatpush1.bf16.msra.mxu0 %v6882_v31  ;;  %3025 = vmatpush1.bf16.msra.mxu1 %v6885_v12  ;;  %v6891_v19 = vsel %vm2866_vm9, %v2852_v58, %v6657_v52  ;;  %v2871_v24 = vsel %vm2866_vm9, %v2852_v58, 0.0  ;;  %v6929_v58 = vld [vmem:[#allocation8] ss:$16 sps:$4 sm:$0xff]   ;;  %v6932_v52 = vld [vmem:[#allocation8 + $0x8] ss:$16 sps:$4 sm:$0xff]  }
 0x6c0   :  { %2872 = vst [vmem:[#allocation11 + $0x68] sm:$0xff] %v2871_v24  ;;  %v2968_v30 = vpack.c.bf16 %v6891_v19, %v6891_v19  ;;  %3116 = vmatprep.subr.bf16.mxu0 %v6663_v10  ;;  %3157 = vmatprep.subr.bf16.mxu1 %v6666_v33  ;;  %8014 = vst [vmem:[#allocation124_spill] sm:$0xff] %v6929_v58  ;;  %v6935_v24 = vld [vmem:[#allocation9 + $0xe4] ss:$16 sps:$4 sm:$0xff]  }
 0x6c1   :  { %8015 = vst [vmem:[#allocation125_spill] sm:$0xff] %v6932_v52  ;;  %8016 = vst [vmem:[#allocation126_spill] sm:$0xff] %v6935_v24 }
 0x6c2   :  { %3002 = vmatmul.mubr.bf16.vlgmr.msra.gmra.mxu0 %v2968_v30  ;;  %3043 = vmatmul.mubr.bf16.vlgmr.msra.gmra.mxu1 %v2968_v30 }
 0x6c3   :  { %3117 = vmatpush1.bf16.msra.mxu0 %v6669_v25  ;;  %3158 = vmatpush1.bf16.msra.mxu1 %v6672_v46 }
 0x6c4   :  { %3118 = vmatprep.subr.bf16.mxu0 %v6675_v47  ;;  %3159 = vmatprep.subr.bf16.mxu1 %v6678_v62 }
 0x6c5   :  { %3148 = vmatprep.mubr.bf16.mxu0 %v7746_v57  ;;  %3189 = vmatprep.mubr.bf16.mxu1 %v7746_v57 }
 0x6c7   :  { %3119 = vmatpush1.bf16.msra.mxu0 %v6683_v39  ;;  %3160 = vmatpush1.bf16.msra.mxu1 %v6686_v63 }
 0x6c8   :  { %3120 = vmatprep.subr.bf16.mxu0 %v6689_v28  ;;  %3161 = vmatprep.subr.bf16.mxu1 %v6692_v54 }
 0x6cb   :  { %3121 = vmatpush1.bf16.msra.mxu0 %v6695_v51  ;;  %3162 = vmatpush1.bf16.msra.mxu1 %v6698_v18 }
 0x6cc   :  { %3122 = vmatprep.subr.bf16.mxu0 %v6701_v50  ;;  %3163 = vmatprep.subr.bf16.mxu1 %v6704_v34 }
 0x6cf   :  { %3123 = vmatpush1.bf16.msra.mxu0 %v6707_v48  ;;  %3164 = vmatpush1.bf16.msra.mxu1 %v6710_v8 }
 0x6d0   :  { %3124 = vmatprep.subr.bf16.mxu0 %v6713_v11  ;;  %3165 = vmatprep.subr.bf16.mxu1 %v6716_v27  ;;  %v8021_v27 = vld [vmem:[#allocation41_spill] sm:$0xff] }
 0x6d3   :  { %3125 = vmatpush1.bf16.msra.mxu0 %v6719_v22  ;;  %3166 = vmatpush1.bf16.msra.mxu1 %v6722_v32 }
 0x6d4   :  { %3126 = vmatprep.subr.bf16.mxu0 %v6725_v61  ;;  %3167 = vmatprep.subr.bf16.mxu1 %v6728_v3 }
 0x6d7   :  { %3127 = vmatpush1.bf16.msra.mxu0 %v6731_v60  ;;  %3168 = vmatpush1.bf16.msra.mxu1 %v6734_v40 }
 0x6d8   :  { %3128 = vmatprep.subr.bf16.mxu0 %v6737_v14  ;;  %3169 = vmatprep.subr.bf16.mxu1 %v6740_v0 }
 0x6db   :  { %3129 = vmatpush1.bf16.msra.mxu0 %v6743_v16  ;;  %3170 = vmatpush1.bf16.msra.mxu1 %v6746_v17  ;;  %v8018_v17 = vld [vmem:[#allocation40_spill] sm:$0xff] }
 0x6dc   :  { %3130 = vmatprep.subr.bf16.mxu0 %v6749_v41  ;;  %3171 = vmatprep.subr.bf16.mxu1 %v6752_v21 }
 0x6df   :  { %3131 = vmatpush1.bf16.msra.mxu0 %v6929_v58  ;;  %3172 = vmatpush1.bf16.msra.mxu1 %v6932_v52  ;;  %v8019_v58 = vld [vmem:[#allocation42_spill] sm:$0xff] }
 0x6e0   :  { %3207 = vmatprep.subr.bf16.mxu0 %v6935_v24  ;;  %3248 = vmatprep.subr.bf16.mxu1 %v6938_v2  ;;  %v8020_v24 = vld [vmem:[#allocation43_spill] sm:$0xff] }
 0x762   :  { %v2912_v30 = vpop.f32.mrf.mxu0  ;;  %v2953_v41 = vpop.f32.mrf.mxu1 }
 0x763   :  { %v2960_v21 = vadd.f32 %v2912_v30, %v8018_v17  ;;  %v2962_v2 = vadd.f32 %v2953_v41, %v8021_v27 }
 0x764   :  { %v2914_v16 = vpop.f32.mrf.mxu0  ;;  %v2955_v0 = vpop.f32.mrf.mxu1 }
 0x765   :  { %v4492_v14 = vmul.f32 -1.442695, %v2960_v21  ;;  %v2961_v40 = vadd.f32 %v2914_v16, %v8019_v58  ;;  %v2963_v22 = vadd.f32 %v2955_v0, %v8020_v24 }
 0x766   :  { %v2916_v60 = vpop.f32.mrf.mxu0  ;;  %v2957_v3 = vpop.f32.mrf.mxu1 }
 0x767   :  { %4830 = vpow2.f32 %v4492_v14  ;;  %v4493_v52 = vmul.f32 -1.442695, %v2961_v40  ;;  %v4494_v11 = vmul.f32 -1.442695, %v2963_v22  ;;  %v8023_v22 = vld [vmem:[#allocation88_spill] sm:$0xff] }
 0x768   :  { %v2917_v61 = vpop.f32.mrf.mxu0  ;;  %v2958_v32 = vpop.f32.mrf.mxu1 }
 0x769   :  { %4832 = vpow2.f32 %v4493_v52  ;;  %v8022_v61 = vld [vmem:[#allocation86_spill] sm:$0xff] }
 0x76a   :  { %4834 = vtanh.f32 %v2962_v2 }
 0x76b   :  { %4836 = vpow2.f32 %v4494_v11 }
 0x774   :  { %v4831_v8 = vpop.eup %4830 }
 0x775   :  { %v3058_v48 = vadd.f32 1.0, %v4831_v8 }
 0x776   :  { %v4833_v17 = vpop.eup %4832 }
 0x777   :  { %4838 = vrcp.f32 %v3058_v48  ;;  %v3064_v21 = vadd.f32 1.0, %v4833_v17  ;;  %v4835_v60 = vpop.eup %4834 }
 0x778   :  { %v4837_v40 = vpop.eup %4836 }
 0x779   :  { %4840 = vrcp.f32 %v3064_v21  ;;  %v3071_v24 = vadd.f32 1.0, %v4837_v40  ;;  %v8025_v40 = vld [vmem:[#allocation87_spill] sm:$0xff] }
 0x782   :  { %v3003_v3 = vpop.f32.mrf.mxu0  ;;  %v3044_v14 = vpop.f32.mrf.mxu1 }
 0x783   :  { %v3051_v32 = vadd.f32 %v3003_v3, %v8022_v61  ;;  %v8024_v3 = vld [vmem:[#allocation89_spill] sm:$0xff] }
 0x784   :  { %v4839_v16 = vpop.eup %4838  ;;  %v3005_v58 = vpop.f32.mrf.mxu0 }
 0x785   :  { %v3046_v0 = vpop.f32.mrf.mxu1  ;;  %v3075_v52 = vmul.f32 %v4839_v16, %v4835_v60  ;;  %v4495_v27 = vmul.f32 -1.442695, %v3051_v32  ;;  %v3052_v41 = vadd.f32 %v3005_v58, %v8023_v22  ;;  %v3053_v32 = vadd.f32 %v3044_v14, %v8025_v40  ;;  %v8028_v40 = vld [vmem:[#allocation118_spill] sm:$0xff] }
 0x786   :  { %v4841_v8 = vpop.eup %4840  ;;  %v3007_v2 = vpop.f32.mrf.mxu0  ;;  %v3054_v61 = vadd.f32 %v3046_v0, %v8024_v3  ;;  %v8026_v3 = vld [vmem:[#allocation116_spill] sm:$0xff] }
 0x787   :  { %v3048_v11 = vpop.f32.mrf.mxu1  ;;  %v3074_v48 = vmul.f32 %v4841_v8, %v6774_v53  ;;  %4842 = vpow2.f32 %v4495_v27  ;;  %v4496_v30 = vmul.f32 -1.442695, %v3052_v41 }
 0x788   :  { %v3008_v17 = vpop.f32.mrf.mxu0  ;;  %v4497_v16 = vmul.f32 -1.442695, %v3054_v61  ;;  %v8027_v61 = vld [vmem:[#allocation117_spill] sm:$0xff] }
 0x789   :  { %v3049_v21 = vpop.f32.mrf.mxu1  ;;  %v3076_v34 = vadd.f32 %v3075_v52, %v3074_v48  ;;  %4844 = vpow2.f32 %v4496_v30 }
 0x78a   :  { %4846 = vrcp.f32 %v3071_v24 }
 0x78b   :  { %4848 = vtanh.f32 %v3076_v34  ;;  %v6951_v60 = vsel %vm2866_vm9, %v3076_v34, %v6774_v53 }
 0x78c   :  { %4850 = vtanh.f32 %v3053_v32  ;;  %v8029_v32 = vld [vmem:[#allocation119_spill] sm:$0xff] }
 0x78d   :  { %4852 = vpow2.f32 %v4497_v16  ;;  %v8030_v16 = vld [vmem:[#allocation120_spill] sm:$0xff] }
 0x794   :  { %v4843_v58 = vpop.eup %4842 }
 0x795   :  { %v3082_v22 = vadd.f32 1.0, %v4843_v58 }
 0x796   :  { %v4845_v27 = vpop.eup %4844 }
 0x797   :  { %v4847_v41 = vpop.eup %4846  ;;  %4854 = vrcp.f32 %v3082_v22  ;;  %v3088_v52 = vadd.f32 1.0, %v4845_v27  ;;  %v8032_v22 = vld [vmem:[#allocation122_spill] sm:$0xff] }
 0x798   :  { %v4849_v8 = vpop.eup %4848 }
 0x799   :  { %4856 = vrcp.f32 %v3088_v52  ;;  %v3078_v24 = vmul.f32 %v4849_v8, %v4847_v41  ;;  %v8033_v41 = vld [vmem:[#allocation123_spill] sm:$0xff] }
 0x79b   :  { %v6958_v34 = vsel %vm2866_vm9, %v3078_v24, %v6781_v29  ;;  %v3107_v53 = vsel %vm2866_vm9, %v3078_v24, 0.0  ;;  %v4851_v29 = vpop.eup %4850 }
 0x79c   :  { %3108 = vst [vmem:[#allocation11 + $0x60] sm:$0xff] %v3107_v53  ;;  %v3115_v14 = vpack.c.bf16 %v6958_v34, %v6958_v34  ;;  %v4853_v56 = vpop.eup %4852 }
 0x79d   :  { %v3095_v48 = vadd.f32 1.0, %v4853_v56  ;;  %v8038_v56 = vld [vmem:[#allocation28_spill] sm:$0xff] }
 0x79e   :  { %3149 = vmatmul.mubr.bf16.vlgmr.msra.gmra.mxu0 %v3115_v14  ;;  %3190 = vmatmul.mubr.bf16.vlgmr.msra.gmra.mxu1 %v3115_v14  ;;  %v8036_v14 = vld [vmem:[#allocation133_spill] sm:$0xff] }
 0x79f   :  { %3208 = vmatpush1.bf16.msra.mxu0 %v6787_v42  ;;  %3249 = vmatpush1.bf16.msra.mxu1 %v6790_v37  ;;  %4858 = vrcp.f32 %v3095_v48  ;;  %v8042_v48 = vld [vmem:[#allocation100_spill] sm:$0xff] }
 0x7a0   :  { %3209 = vmatprep.subr.bf16.mxu0 %v6793_v55  ;;  %3250 = vmatprep.subr.bf16.mxu1 %v6796_v59 }
 0x7a1   :  { %3239 = vmatprep.mubr.bf16.mxu0 %v7746_v57  ;;  %3280 = vmatprep.mubr.bf16.mxu1 %v7746_v57 }
 0x7a3   :  { %3210 = vmatpush1.bf16.msra.mxu0 %v6801_v13  ;;  %3251 = vmatpush1.bf16.msra.mxu1 %v6804_v38 }
 0x7a4   :  { %v4855_v0 = vpop.eup %4854  ;;  %3211 = vmatprep.subr.bf16.mxu0 %v6807_v15  ;;  %3252 = vmatprep.subr.bf16.mxu1 %v6810_v9 }
 0x7a5   :  { %v3099_v2 = vmul.f32 %v4855_v0, %v4851_v29  ;;  %v8037_v29 = vld [vmem:[#allocation30_spill] sm:$0xff]  ;;  %v8039_v0 = vld [vmem:[#allocation31_spill] sm:$0xff] }
 0x7a6   :  { %v4857_v11 = vpop.eup %4856 }
 0x7a7   :  { %v3098_v30 = vmul.f32 %v4857_v11, %v6838_v44  ;;  %3212 = vmatpush1.bf16.msra.mxu0 %v6816_v20  ;;  %3253 = vmatpush1.bf16.msra.mxu1 %v6819_v7  ;;  %v8041_v11 = vld [vmem:[#allocation98_spill] sm:$0xff] }
 0x7a8   :  { %3213 = vmatprep.subr.bf16.mxu0 %v6822_v43  ;;  %3254 = vmatprep.subr.bf16.mxu1 %v6825_v49 }
 0x7a9   :  { %v3100_v17 = vadd.f32 %v3099_v2, %v3098_v30  ;;  %v8040_v2 = vld [vmem:[#allocation29_spill] sm:$0xff] }
 0x7aa   :  { %v8043_v30 = vld [vmem:[#allocation101_spill] sm:$0xff] }
 0x7ab   :  { %4860 = vtanh.f32 %v3100_v17  ;;  %3214 = vmatpush1.bf16.msra.mxu0 %v6829_v26  ;;  %3255 = vmatpush1.bf16.msra.mxu1 %v6832_v4  ;;  %v6984_v21 = vsel %vm2859_vm8, %v3100_v17, %v6838_v44  ;;  %v8031_v44 = vld [vmem:[#allocation121_spill] sm:$0xff]  ;;  %v8044_v17 = vld [vmem:[#allocation99_spill] sm:$0xff] }
 0x7ac   :  { %3215 = vmatprep.subr.bf16.mxu0 %v6840_v45  ;;  %3256 = vmatprep.subr.bf16.mxu1 %v6843_v35  ;;  %v4859_v58 = vpop.eup %4858 }
 0x7af   :  { %3216 = vmatpush1.bf16.msra.mxu0 %v6846_v5  ;;  %3257 = vmatpush1.bf16.msra.mxu1 %v6849_v6 }
 0x7b0   :  { %3217 = vmatprep.subr.bf16.mxu0 %v8026_v3  ;;  %3258 = vmatprep.subr.bf16.mxu1 %v8027_v61 }
 0x7b3   :  { %3218 = vmatpush1.bf16.msra.mxu0 %v8028_v40  ;;  %3259 = vmatpush1.bf16.msra.mxu1 %v8029_v32 }
 0x7b4   :  { %3219 = vmatprep.subr.bf16.mxu0 %v8030_v16  ;;  %3260 = vmatprep.subr.bf16.mxu1 %v8031_v44 }
 0x7b7   :  { %3220 = vmatpush1.bf16.msra.mxu0 %v6870_v23  ;;  %3261 = vmatpush1.bf16.msra.mxu1 %v8032_v22 }
 0x7b8   :  { %v4861_v27 = vpop.eup %4860  ;;  %3221 = vmatprep.subr.bf16.mxu0 %v8033_v41  ;;  %3262 = vmatprep.subr.bf16.mxu1 %v6879_v36 }
 0x7b9   :  { %v3102_v52 = vmul.f32 %v4861_v27, %v4859_v58  ;;  %v8045_v58 = vld [vmem:[#allocation17_spill] sm:$0xff]  ;;  %v8046_v27 = vld [vmem:[#allocation111_spill] sm:$0xff] }
 0x7bb   :  { %3222 = vmatpush1.bf16.msra.mxu0 %v6882_v31  ;;  %3263 = vmatpush1.bf16.msra.mxu1 %v6885_v12  ;;  %v7005_v8 = vsel %vm2859_vm8, %v3102_v52, %v6891_v19  ;;  %v3109_v24 = vsel %vm2859_vm8, %v3102_v52, 0.0  ;;  %v8034_v19 = vld [vmem:[#allocation109_spill] sm:$0xff]  ;;  %v8047_v52 = vld [vmem:[#allocation112_spill] sm:$0xff] }
 0x7bc   :  { %3110 = vst [vmem:[#allocation11 + $0x58] sm:$0xff] %v3109_v24  ;;  %v3206_v53 = vpack.c.bf16 %v7005_v8, %v7005_v8  ;;  %3354 = vmatprep.subr.bf16.mxu0 %v6663_v10  ;;  %3395 = vmatprep.subr.bf16.mxu1 %v6666_v33  ;;  %v8048_v24 = vld [vmem:[#allocation113_spill] sm:$0xff] }
 0x7be   :  { %3240 = vmatmul.mubr.bf16.vlgmr.msra.gmra.mxu0 %v3206_v53  ;;  %3281 = vmatmul.mubr.bf16.vlgmr.msra.gmra.mxu1 %v3206_v53  ;;  %v8049_v53 = vld [vmem:[#allocation114_spill] sm:$0xff] }
 0x7bf   :  { %3355 = vmatpush1.bf16.msra.mxu0 %v6669_v25  ;;  %3396 = vmatpush1.bf16.msra.mxu1 %v6672_v46 }
 0x7c0   :  { %3356 = vmatprep.subr.bf16.mxu0 %v6675_v47  ;;  %3397 = vmatprep.subr.bf16.mxu1 %v6678_v62 }
 0x7c1   :  { %3386 = vmatprep.mubr.bf16.mxu0 %v7746_v57  ;;  %3427 = vmatprep.mubr.bf16.mxu1 %v7746_v57 }
 0x7c3   :  { %3357 = vmatpush1.bf16.msra.mxu0 %v6683_v39  ;;  %3398 = vmatpush1.bf16.msra.mxu1 %v6686_v63 }
 0x7c4   :  { %3358 = vmatprep.subr.bf16.mxu0 %v6689_v28  ;;  %3399 = vmatprep.subr.bf16.mxu1 %v6692_v54  ;;  %v8060_v28 = vld [vmem:[#allocation45_spill] sm:$0xff] }
 0x7c7   :  { %3359 = vmatpush1.bf16.msra.mxu0 %v6695_v51  ;;  %3400 = vmatpush1.bf16.msra.mxu1 %v6698_v18 }
 0x7c8   :  { %3360 = vmatprep.subr.bf16.mxu0 %v6701_v50  ;;  %3401 = vmatprep.subr.bf16.mxu1 %v8034_v19 }
 0x7cb   :  { %3361 = vmatpush1.bf16.msra.mxu0 %v8035_v1  ;;  %3402 = vmatpush1.bf16.msra.mxu1 %v8036_v14 }
 0x7cc   :  { %3362 = vmatprep.subr.bf16.mxu0 %v8037_v29  ;;  %3403 = vmatprep.subr.bf16.mxu1 %v8038_v56  ;;  %v8055_v56 = vld [vmem:[#allocation22_spill] sm:$0xff] }
 0x7cf   :  { %3363 = vmatpush1.bf16.msra.mxu0 %v8039_v0  ;;  %3404 = vmatpush1.bf16.msra.mxu1 %v8040_v2  ;;  %v8050_v0 = vld [vmem:[#allocation115_spill] sm:$0xff]  ;;  %v8051_v2 = vld [vmem:[#allocation124_spill] sm:$0xff] }
 0x7d0   :  { %3364 = vmatprep.subr.bf16.mxu0 %v8041_v11  ;;  %3405 = vmatprep.subr.bf16.mxu1 %v8042_v48  ;;  %v8052_v11 = vld [vmem:[#allocation125_spill] sm:$0xff]  ;;  %v8053_v48 = vld [vmem:[#allocation126_spill] sm:$0xff] }
 0x7d3   :  { %3365 = vmatpush1.bf16.msra.mxu0 %v8043_v30  ;;  %3406 = vmatpush1.bf16.msra.mxu1 %v8044_v17  ;;  %v8054_v30 = vld [vmem:[#allocation127_spill] sm:$0xff] }
 0x7d4   :  { %3366 = vmatprep.subr.bf16.mxu0 %v8045_v58  ;;  %3407 = vmatprep.subr.bf16.mxu1 %v8046_v27  ;;  %v8056_v27 = vld [vmem:[#allocation46_spill] sm:$0xff] }
 0x7d5   :  { %v596_v29 = vadd.f32 %v8056_v27, %v8055_v56 }
 0x7d7   :  { %3367 = vmatpush1.bf16.msra.mxu0 %v8047_v52  ;;  %3408 = vmatpush1.bf16.msra.mxu1 %v8048_v24  ;;  %v8057_v52 = vld [vmem:[#allocation44_spill] sm:$0xff] }
 0x7d8   :  { %3368 = vmatprep.subr.bf16.mxu0 %v8049_v53  ;;  %3409 = vmatprep.subr.bf16.mxu1 %v8050_v0 }
 0x7db   :  { %3369 = vmatpush1.bf16.msra.mxu0 %v8051_v2  ;;  %3410 = vmatpush1.bf16.msra.mxu1 %v8052_v11 }
 0x7dc   :  { %3445 = vmatprep.subr.bf16.mxu0 %v8053_v48  ;;  %3486 = vmatprep.subr.bf16.mxu1 %v8054_v30  ;;  %v8058_v48 = vld [vmem:[#allocation24_spill] sm:$0xff]  ;;  %v8059_v30 = vld [vmem:[#allocation47_spill] sm:$0xff] }
 0x7dd   :  { %v689_v51 = vadd.f32 %v8059_v30, %v8058_v48 }
 0x85e   :  { %v3150_v17 = vpop.f32.mrf.mxu0  ;;  %v3191_v58 = vpop.f32.mrf.mxu1 }
 0x85f   :  { %v3198_v14 = vadd.f32 %v3150_v17, %v8057_v52  ;;  %v3200_v63 = vadd.f32 %v3191_v58, %v8060_v28 }
 0x860   :  { %v3152_v24 = vpop.f32.mrf.mxu0  ;;  %v3193_v1 = vpop.f32.mrf.mxu1 }
 0x861   :  { %v4498_v53 = vmul.f32 -1.442695, %v3198_v14  ;;  %v3199_v19 = vadd.f32 %v3152_v24, %v596_v29  ;;  %v3201_v54 = vadd.f32 %v3193_v1, %v689_v51 }
 0x862   :  { %v3154_v0 = vpop.f32.mrf.mxu0  ;;  %v3195_v50 = vpop.f32.mrf.mxu1 }
 0x863   :  { %4862 = vpow2.f32 %v4498_v53  ;;  %v4499_v2 = vmul.f32 -1.442695, %v3199_v19  ;;  %v4500_v27 = vmul.f32 -1.442695, %v3201_v54  ;;  %v8061_v0 = vld [vmem:[#allocation82_spill] sm:$0xff]  ;;  %v8062_v54 = vld [vmem:[#allocation84_spill] sm:$0xff] }
 0x864   :  { %v3155_v11 = vpop.f32.mrf.mxu0  ;;  %v3196_v18 = vpop.f32.mrf.mxu1 }
 0x865   :  { %4864 = vpow2.f32 %v4499_v2 }
 0x866   :  { %4866 = vtanh.f32 %v3200_v63 }
 0x867   :  { %4868 = vpow2.f32 %v4500_v27 }
 0x870   :  { %v4863_v56 = vpop.eup %4862 }
 0x871   :  { %v3296_v17 = vadd.f32 1.0, %v4863_v56 }
 0x872   :  { %v4865_v52 = vpop.eup %4864 }
 0x873   :  { %4870 = vrcp.f32 %v3296_v17  ;;  %v3302_v14 = vadd.f32 1.0, %v4865_v52  ;;  %v4867_v50 = vpop.eup %4866 }
 0x874   :  { %v4869_v18 = vpop.eup %4868 }
 0x875   :  { %4872 = vrcp.f32 %v3302_v14  ;;  %v3309_v63 = vadd.f32 1.0, %v4869_v18  ;;  %v8065_v18 = vld [vmem:[#allocation83_spill] sm:$0xff] }
 0x87e   :  { %v3241_v19 = vpop.f32.mrf.mxu0  ;;  %v3282_v29 = vpop.f32.mrf.mxu1 }
 0x87f   :  { %v3289_v2 = vadd.f32 %v3241_v19, %v8061_v0  ;;  %v8064_v0 = vld [vmem:[#allocation85_spill] sm:$0xff] }
 0x880   :  { %v4871_v11 = vpop.eup %4870  ;;  %v3243_v30 = vpop.f32.mrf.mxu0 }
 0x881   :  { %v3284_v51 = vpop.f32.mrf.mxu1  ;;  %v3313_v1 = vmul.f32 %v4871_v11, %v4867_v50  ;;  %v4501_v28 = vmul.f32 -1.442695, %v3289_v2  ;;  %v3290_v58 = vadd.f32 %v3243_v30, %v8062_v54  ;;  %v3291_v11 = vadd.f32 %v3282_v29, %v8065_v18 }
 0x882   :  { %v4873_v56 = vpop.eup %4872  ;;  %v3245_v24 = vpop.f32.mrf.mxu0  ;;  %v3292_v2 = vadd.f32 %v3284_v51, %v8064_v0  ;;  %v8090_v0 = vld [vmem:[#allocation124_spill] sm:$0xff] }
 0x883   :  { %v3286_v53 = vpop.f32.mrf.mxu1  ;;  %v3312_v27 = vmul.f32 %v4873_v56, %v6951_v60  ;;  %4874 = vpow2.f32 %v4501_v28  ;;  %v4502_v17 = vmul.f32 -1.442695, %v3290_v58 }
 0x884   :  { %v3246_v52 = vpop.f32.mrf.mxu0  ;;  %v4503_v30 = vmul.f32 -1.442695, %v3292_v2 }
 0x885   :  { %v3287_v14 = vpop.f32.mrf.mxu1  ;;  %v3314_v48 = vadd.f32 %v3313_v1, %v3312_v27  ;;  %4876 = vpow2.f32 %v4502_v17 }
 0x886   :  { %4878 = vrcp.f32 %v3309_v63 }
 0x887   :  { %4880 = vtanh.f32 %v3314_v48  ;;  %v7059_v50 = vsel %vm2616_vm7, %v3314_v48, %v6951_v60 }
 0x888   :  { %4882 = vtanh.f32 %v3291_v11 }
 0x889   :  { %4884 = vpow2.f32 %v4503_v30 }
 0x890   :  { %v4875_v54 = vpop.eup %4874 }
 0x891   :  { %v3320_v56 = vadd.f32 1.0, %v4875_v54 }
 0x892   :  { %v4877_v28 = vpop.eup %4876 }
 0x893   :  { %v4879_v58 = vpop.eup %4878  ;;  %4886 = vrcp.f32 %v3320_v56  ;;  %v3326_v1 = vadd.f32 1.0, %v4877_v28  ;;  %v8070_v28 = vld [vmem:[#allocation19_spill] sm:$0xff] }
 0x894   :  { %v4881_v63 = vpop.eup %4880 }
 0x895   :  { %4888 = vrcp.f32 %v3326_v1  ;;  %v3316_v24 = vmul.f32 %v4881_v63, %v4879_v58  ;;  %v8075_v58 = vld [vmem:[#allocation133_spill] sm:$0xff]  ;;  %v8076_v1 = vld [vmem:[#allocation30_spill] sm:$0xff]  ;;  %v8078_v63 = vld [vmem:[#allocation31_spill] sm:$0xff] }
 0x897   :  { %v7066_v60 = vsel %vm2616_vm7, %v3316_v24, %v6958_v34  ;;  %v3345_v48 = vsel %vm2616_vm7, %v3316_v24, 0.0  ;;  %v4883_v34 = vpop.eup %4882  ;;  %v8079_v24 = vld [vmem:[#allocation29_spill] sm:$0xff] }
 0x898   :  { %3346 = vst [vmem:[#allocation11 + $0x70] sm:$0xff] %v3345_v48  ;;  %v3353_v29 = vpack.c.bf16 %v7066_v60, %v7066_v60  ;;  %v4885_v51 = vpop.eup %4884  ;;  %v8080_v48 = vld [vmem:[#allocation98_spill] sm:$0xff] }
 0x899   :  { %v3333_v52 = vadd.f32 1.0, %v4885_v51  ;;  %v8083_v51 = vld [vmem:[#allocation99_spill] sm:$0xff] }
 0x89a   :  { %3387 = vmatmul.mubr.bf16.vlgmr.msra.gmra.mxu0 %v3353_v29  ;;  %3428 = vmatmul.mubr.bf16.vlgmr.msra.gmra.mxu1 %v3353_v29  ;;  %v8081_v29 = vld [vmem:[#allocation100_spill] sm:$0xff] }
 0x89b   :  { %3446 = vmatpush1.bf16.msra.mxu0 %v6787_v42  ;;  %3487 = vmatpush1.bf16.msra.mxu1 %v6790_v37  ;;  %4890 = vrcp.f32 %v3333_v52  ;;  %v8087_v52 = vld [vmem:[#allocation113_spill] sm:$0xff] }
 0x89c   :  { %3447 = vmatprep.subr.bf16.mxu0 %v6793_v55  ;;  %3488 = vmatprep.subr.bf16.mxu1 %v6796_v59 }
 0x89d   :  { %3477 = vmatprep.mubr.bf16.mxu0 %v7746_v57  ;;  %3518 = vmatprep.mubr.bf16.mxu1 %v7746_v57 }
 0x89f   :  { %3448 = vmatpush1.bf16.msra.mxu0 %v6801_v13  ;;  %3489 = vmatpush1.bf16.msra.mxu1 %v6804_v38 }
 0x8a0   :  { %v4887_v53 = vpop.eup %4886  ;;  %3449 = vmatprep.subr.bf16.mxu0 %v6807_v15  ;;  %3490 = vmatprep.subr.bf16.mxu1 %v6810_v9 }
 0x8a1   :  { %v3337_v27 = vmul.f32 %v4887_v53, %v4883_v34  ;;  %v8082_v34 = vld [vmem:[#allocation101_spill] sm:$0xff] }
 0x8a2   :  { %v4889_v17 = vpop.eup %4888  ;;  %v8084_v53 = vld [vmem:[#allocation17_spill] sm:$0xff] }
 0x8a3   :  { %v3336_v14 = vmul.f32 %v4889_v17, %v6984_v21  ;;  %3450 = vmatpush1.bf16.msra.mxu0 %v6816_v20  ;;  %3491 = vmatpush1.bf16.msra.mxu1 %v6819_v7  ;;  %v8086_v17 = vld [vmem:[#allocation112_spill] sm:$0xff] }
 0x8a4   :  { %3451 = vmatprep.subr.bf16.mxu0 %v6822_v43  ;;  %3492 = vmatprep.subr.bf16.mxu1 %v6825_v49 }
 0x8a5   :  { %v3338_v19 = vadd.f32 %v3337_v27, %v3336_v14  ;;  %v8085_v27 = vld [vmem:[#allocation111_spill] sm:$0xff]  ;;  %v8088_v14 = vld [vmem:[#allocation114_spill] sm:$0xff] }
 0x8a7   :  { %4892 = vtanh.f32 %v3338_v19  ;;  %3452 = vmatpush1.bf16.msra.mxu0 %v6829_v26  ;;  %3493 = vmatpush1.bf16.msra.mxu1 %v6832_v4  ;;  %v7092_v2 = vsel %vm2609_vm6, %v3338_v19, %v6984_v21  ;;  %v8089_v19 = vld [vmem:[#allocation115_spill] sm:$0xff] }
 0x8a8   :  { %3453 = vmatprep.subr.bf16.mxu0 %v6840_v45  ;;  %3494 = vmatprep.subr.bf16.mxu1 %v6843_v35  ;;  %v4891_v21 = vpop.eup %4890 }
 0x8ab   :  { %3454 = vmatpush1.bf16.msra.mxu0 %v6846_v5  ;;  %3495 = vmatpush1.bf16.msra.mxu1 %v6849_v6 }
 0x8ac   :  { %3455 = vmatprep.subr.bf16.mxu0 %v8026_v3  ;;  %3496 = vmatprep.subr.bf16.mxu1 %v8027_v61 }
 0x8af   :  { %3456 = vmatpush1.bf16.msra.mxu0 %v8028_v40  ;;  %3497 = vmatpush1.bf16.msra.mxu1 %v8029_v32 }
 0x8b0   :  { %3457 = vmatprep.subr.bf16.mxu0 %v8030_v16  ;;  %3498 = vmatprep.subr.bf16.mxu1 %v8031_v44 }
 0x8b3   :  { %3458 = vmatpush1.bf16.msra.mxu0 %v6870_v23  ;;  %3499 = vmatpush1.bf16.msra.mxu1 %v8032_v22 }
 0x8b4   :  { %v4893_v18 = vpop.eup %4892  ;;  %3459 = vmatprep.subr.bf16.mxu0 %v8033_v41  ;;  %3500 = vmatprep.subr.bf16.mxu1 %v6879_v36 }
 0x8b5   :  { %v3340_v11 = vmul.f32 %v4893_v18, %v4891_v21  ;;  %v8091_v21 = vld [vmem:[#allocation125_spill] sm:$0xff]  ;;  %v8092_v18 = vld [vmem:[#allocation126_spill] sm:$0xff] }
 0x8b7   :  { %3460 = vmatpush1.bf16.msra.mxu0 %v6882_v31  ;;  %3501 = vmatpush1.bf16.msra.mxu1 %v6885_v12  ;;  %v7113_v30 = vsel %vm2609_vm6, %v3340_v11, %v7005_v8  ;;  %v3347_v54 = vsel %vm2609_vm6, %v3340_v11, 0.0  ;;  %v8067_v8 = vld [vmem:[#allocation105_spill] sm:$0xff]  ;;  %v8093_v11 = vld [vmem:[#allocation127_spill] sm:$0xff] }
 0x8b8   :  { %3348 = vst [vmem:[#allocation11 + $0x48] sm:$0xff] %v3347_v54  ;;  %v3444_v56 = vpack.c.bf16 %v7113_v30, %v7113_v30  ;;  %3592 = vmatprep.subr.bf16.mxu0 %v6663_v10  ;;  %3633 = vmatprep.subr.bf16.mxu1 %v6666_v33  ;;  %v8068_v10 = vld [vmem:[#allocation103_spill] sm:$0xff]  ;;  %v8069_v33 = vld [vmem:[#allocation21_spill] sm:$0xff] }
 0x8ba   :  { %3478 = vmatmul.mubr.bf16.vlgmr.msra.gmra.mxu0 %v3444_v56  ;;  %3519 = vmatmul.mubr.bf16.vlgmr.msra.gmra.mxu1 %v3444_v56 }
 0x8bb   :  { %3593 = vmatpush1.bf16.msra.mxu0 %v6669_v25  ;;  %3634 = vmatpush1.bf16.msra.mxu1 %v6672_v46  ;;  %v8071_v25 = vld [vmem:[#allocation106_spill] sm:$0xff]  ;;  %v8072_v46 = vld [vmem:[#allocation108_spill] sm:$0xff] }
 0x8bc   :  { %3594 = vmatprep.subr.bf16.mxu0 %v6675_v47  ;;  %3635 = vmatprep.subr.bf16.mxu1 %v6678_v62  ;;  %v8073_v47 = vld [vmem:[#allocation109_spill] sm:$0xff]  ;;  %v8074_v62 = vld [vmem:[#allocation107_spill] sm:$0xff] }
 0x8bd   :  { %3624 = vmatprep.mubr.bf16.mxu0 %v7746_v57  ;;  %3665 = vmatprep.mubr.bf16.mxu1 %v7746_v57 }
 0x8bf   :  { %3595 = vmatpush1.bf16.msra.mxu0 %v6683_v39  ;;  %3636 = vmatpush1.bf16.msra.mxu1 %v8067_v8  ;;  %v8077_v39 = vld [vmem:[#allocation28_spill] sm:$0xff] }
 0x8c0   :  { %3596 = vmatprep.subr.bf16.mxu0 %v8068_v10  ;;  %3637 = vmatprep.subr.bf16.mxu1 %v8069_v33  ;;  %v8094_v8 = vld [vmem:[#allocation48_spill] sm:$0xff] }
 0x8c3   :  { %3597 = vmatpush1.bf16.msra.mxu0 %v8070_v28  ;;  %3638 = vmatpush1.bf16.msra.mxu1 %v8071_v25 }
 0x8c4   :  { %3598 = vmatprep.subr.bf16.mxu0 %v8072_v46  ;;  %3639 = vmatprep.subr.bf16.mxu1 %v8073_v47  ;;  %v8095_v46 = vld [vmem:[#allocation50_spill] sm:$0xff] }
 0x8c7   :  { %3599 = vmatpush1.bf16.msra.mxu0 %v8074_v62  ;;  %3640 = vmatpush1.bf16.msra.mxu1 %v8075_v58 }
 0x8c8   :  { %3600 = vmatprep.subr.bf16.mxu0 %v8076_v1  ;;  %3641 = vmatprep.subr.bf16.mxu1 %v8077_v39 }
 0x8cb   :  { %3601 = vmatpush1.bf16.msra.mxu0 %v8078_v63  ;;  %3642 = vmatpush1.bf16.msra.mxu1 %v8079_v24  ;;  %v8096_v24 = vld [vmem:[#allocation51_spill] sm:$0xff] }
 0x8cc   :  { %3602 = vmatprep.subr.bf16.mxu0 %v8080_v48  ;;  %3643 = vmatprep.subr.bf16.mxu1 %v8081_v29  ;;  %v8097_v29 = vld [vmem:[#allocation49_spill] sm:$0xff] }
 0x8cf   :  { %3603 = vmatpush1.bf16.msra.mxu0 %v8082_v34  ;;  %3644 = vmatpush1.bf16.msra.mxu1 %v8083_v51 }
 0x8d0   :  { %3604 = vmatprep.subr.bf16.mxu0 %v8084_v53  ;;  %3645 = vmatprep.subr.bf16.mxu1 %v8085_v27 }
 0x8d3   :  { %3605 = vmatpush1.bf16.msra.mxu0 %v8086_v17  ;;  %3646 = vmatpush1.bf16.msra.mxu1 %v8087_v52 }
 0x8d4   :  { %3606 = vmatprep.subr.bf16.mxu0 %v8088_v14  ;;  %3647 = vmatprep.subr.bf16.mxu1 %v8089_v19 }
 0x8d7   :  { %3607 = vmatpush1.bf16.msra.mxu0 %v8090_v0  ;;  %3648 = vmatpush1.bf16.msra.mxu1 %v8091_v21 }
 0x8d8   :  { %3683 = vmatprep.subr.bf16.mxu0 %v8092_v18  ;;  %3724 = vmatprep.subr.bf16.mxu1 %v8093_v11 }
 0x95a   :  { %v3388_v54 = vpop.f32.mrf.mxu0  ;;  %v3429_v56 = vpop.f32.mrf.mxu1 }
 0x95b   :  { %v3436_v10 = vadd.f32 %v3388_v54, %v8094_v8  ;;  %v3438_v34 = vadd.f32 %v3429_v56, %v8097_v29 }
 0x95c   :  { %v3390_v33 = vpop.f32.mrf.mxu0  ;;  %v3431_v28 = vpop.f32.mrf.mxu1 }
 0x95d   :  { %v4504_v25 = vmul.f32 -1.442695, %v3436_v10  ;;  %v3437_v47 = vadd.f32 %v3390_v33, %v8095_v46  ;;  %v3439_v48 = vadd.f32 %v3431_v28, %v8096_v24  ;;  %v8098_v10 = vld [vmem:[#allocation64_spill] sm:$0xff]  ;;  %v8100_v46 = vld [vmem:[#allocation78_spill] sm:$0xff] }
 0x95e   :  { %v3392_v62 = vpop.f32.mrf.mxu0  ;;  %v3433_v58 = vpop.f32.mrf.mxu1  ;;  %v8099_v33 = vld [vmem:[#allocation80_spill] sm:$0xff] }
 0x95f   :  { %4894 = vpow2.f32 %v4504_v25  ;;  %v4505_v1 = vmul.f32 -1.442695, %v3437_v47  ;;  %v4506_v51 = vmul.f32 -1.442695, %v3439_v48  ;;  %v762_v25 = vadd.f32 %v8099_v33, %v8098_v10  ;;  %v8103_v33 = vld [vmem:[#allocation81_spill] sm:$0xff] }
 0x960   :  { %v3393_v39 = vpop.f32.mrf.mxu0  ;;  %v3434_v63 = vpop.f32.mrf.mxu1 }
 0x961   :  { %4896 = vpow2.f32 %v4505_v1 }
 0x962   :  { %4898 = vtanh.f32 %v3438_v34 }
 0x963   :  { %4900 = vpow2.f32 %v4506_v51 }
 0x96c   :  { %v4895_v53 = vpop.eup %4894 }
 0x96d   :  { %v3534_v27 = vadd.f32 1.0, %v4895_v53 }
 0x96e   :  { %v4897_v17 = vpop.eup %4896 }
 0x96f   :  { %4902 = vrcp.f32 %v3534_v27  ;;  %v3540_v52 = vadd.f32 1.0, %v4897_v17  ;;  %v4899_v14 = vpop.eup %4898 }
 0x970   :  { %v4901_v8 = vpop.eup %4900 }
 0x971   :  { %4904 = vrcp.f32 %v3540_v52  ;;  %v3547_v24 = vadd.f32 1.0, %v4901_v8  ;;  %v7298_v52 = vld [vmem:[#allocation8 + $0x48] ss:$16 sps:$4 sm:$0xff]  }
 0x97a   :  { %v3479_v19 = vpop.f32.mrf.mxu0  ;;  %v3520_v54 = vpop.f32.mrf.mxu1 }
 0x97b   :  { %v3527_v28 = vadd.f32 %v3479_v19, %v8100_v46  ;;  %v8102_v19 = vld [vmem:[#allocation65_spill] sm:$0xff]  ;;  %v8104_v46 = vld [vmem:[#allocation79_spill] sm:$0xff] }
 0x97c   :  { %v4903_v47 = vpop.eup %4902  ;;  %v3481_v56 = vpop.f32.mrf.mxu0  ;;  %v855_v8 = vadd.f32 %v8103_v33, %v8102_v19  ;;  %v7301_v33 = vld [vmem:[#allocation8 + $0x24] ss:$16 sps:$4 sm:$0xff]  }
 0x97d   :  { %v3522_v62 = vpop.f32.mrf.mxu1  ;;  %v3551_v58 = vmul.f32 %v4903_v47, %v4899_v14  ;;  %v4507_v1 = vmul.f32 -1.442695, %v3527_v28  ;;  %v3528_v39 = vadd.f32 %v3481_v56, %v762_v25  ;;  %v3529_v28 = vadd.f32 %v3520_v54, %v8104_v46  ;;  %v7310_v46 = vld [vmem:[#allocation8 + $0x28] ss:$16 sps:$4 sm:$0xff]  }
 0x97e   :  { %v4905_v63 = vpop.eup %4904  ;;  %v3483_v48 = vpop.f32.mrf.mxu0  ;;  %v3530_v25 = vadd.f32 %v3522_v62, %v855_v8  ;;  %v7304_v8 = vld [vmem:[#allocation8 + $0x2c] ss:$16 sps:$4 sm:$0xff]  }
 0x97f   :  { %v3524_v29 = vpop.f32.mrf.mxu1  ;;  %v3550_v34 = vmul.f32 %v4905_v63, %v7059_v50  ;;  %4906 = vpow2.f32 %v4507_v1  ;;  %v4508_v51 = vmul.f32 -1.442695, %v3528_v39 }
 0x980   :  { %v3484_v53 = vpop.f32.mrf.mxu0  ;;  %v4509_v47 = vmul.f32 -1.442695, %v3530_v25  ;;  %v7307_v25 = vld [vmem:[#allocation8 + $0x20] ss:$16 sps:$4 sm:$0xff]  }
 0x981   :  { %v3525_v27 = vpop.f32.mrf.mxu1  ;;  %v3552_v17 = vadd.f32 %v3551_v58, %v3550_v34  ;;  %4908 = vpow2.f32 %v4508_v51  ;;  %v7286_v51 = vld [vmem:[#allocation8 + $0x68] ss:$16 sps:$4 sm:$0xff]   ;;  %v7289_v53 = vld [vmem:[#allocation8 + $0x44] ss:$16 sps:$4 sm:$0xff]  }
 0x982   :  { %4910 = vrcp.f32 %v3547_v24  ;;  %v7292_v27 = vld [vmem:[#allocation8 + $0x4c] ss:$16 sps:$4 sm:$0xff]  }
 0x983   :  { %4912 = vtanh.f32 %v3552_v17  ;;  %v7166_v14 = vsel %vm2366_vm5, %v3552_v17, %v7059_v50  ;;  %v7295_v17 = vld [vmem:[#allocation8 + $0x40] ss:$16 sps:$4 sm:$0xff]  }
 0x984   :  { %4914 = vtanh.f32 %v3529_v28  ;;  %v7313_v28 = vld [vmem:[#allocation8 + $0x4] ss:$16 sps:$4 sm:$0xff]  }
 0x985   :  { %4916 = vpow2.f32 %v4509_v47  ;;  %v7316_v47 = vld [vmem:[#allocation8 + $0xc] ss:$16 sps:$4 sm:$0xff]  }
 0x98c   :  { %v4907_v56 = vpop.eup %4906 }
 0x98d   :  { %v3558_v1 = vadd.f32 1.0, %v4907_v56 }
 0x98e   :  { %v4909_v39 = vpop.eup %4908 }
 0x98f   :  { %v4911_v58 = vpop.eup %4910  ;;  %4918 = vrcp.f32 %v3558_v1  ;;  %v3564_v63 = vadd.f32 1.0, %v4909_v39  ;;  %v8106_v39 = vld [vmem:[#allocation22_spill] sm:$0xff] }
 0x990   :  { %v4913_v24 = vpop.eup %4912 }
 0x991   :  { %4920 = vrcp.f32 %v3564_v63  ;;  %v3554_v48 = vmul.f32 %v4913_v24, %v4911_v58  ;;  %v8107_v58 = vld [vmem:[#allocation54_spill] sm:$0xff]  ;;  %v8108_v24 = vld [vmem:[#allocation52_spill] sm:$0xff] }
 0x992   :  { %v606_v63 = vadd.f32 %v8107_v58, %v8106_v39  ;;  %v7428_v39 = vld [vmem:[#allocation9 + $0x20] ss:$16 sps:$4 sm:$0xff]  }
 0x993   :  { %v7174_v50 = vsel %vm2366_vm5, %v3554_v48, %v7066_v60  ;;  %v3583_v54 = vsel %vm2366_vm5, %v3554_v48, 0.0  ;;  %v4915_v60 = vpop.eup %4914 }
 0x994   :  { %3584 = vst [vmem:[#allocation11 + $0x80] sm:$0xff] %v3583_v54  ;;  %v3591_v62 = vpack.c.bf16 %v7174_v50, %v7174_v50  ;;  %v4917_v29 = vpop.eup %4916 }
 0x996   :  { %3625 = vmatmul.mubr.bf16.vlgmr.msra.gmra.mxu0 %v3591_v62  ;;  %3666 = vmatmul.mubr.bf16.vlgmr.msra.gmra.mxu1 %v3591_v62 }
 0x997   :  { %3684 = vmatpush1.bf16.msra.mxu0 %v6787_v42  ;;  %3725 = vmatpush1.bf16.msra.mxu1 %v6790_v37 }
 0x998   :  { %3685 = vmatprep.subr.bf16.mxu0 %v6793_v55  ;;  %3726 = vmatprep.subr.bf16.mxu1 %v6796_v59  ;;  %v3571_v55 = vadd.f32 1.0, %v4917_v29 }
 0x999   :  { %3715 = vmatprep.mubr.bf16.mxu0 %v7746_v57  ;;  %3756 = vmatprep.mubr.bf16.mxu1 %v7746_v57 }
 0x99a   :  { %4922 = vrcp.f32 %v3571_v55 }
 0x99b   :  { %3686 = vmatpush1.bf16.msra.mxu0 %v6801_v13  ;;  %3727 = vmatpush1.bf16.msra.mxu1 %v6804_v38 }
 0x99c   :  { %v4919_v34 = vpop.eup %4918  ;;  %3687 = vmatprep.subr.bf16.mxu0 %v6807_v15  ;;  %3728 = vmatprep.subr.bf16.mxu1 %v6810_v9 }
 0x99d   :  { %v3575_v42 = vmul.f32 %v4919_v34, %v4915_v60 }
 0x99e   :  { %v4921_v37 = vpop.eup %4920 }
 0x99f   :  { %v3574_v59 = vmul.f32 %v4921_v37, %v7092_v2  ;;  %3688 = vmatpush1.bf16.msra.mxu0 %v6816_v20  ;;  %3729 = vmatpush1.bf16.msra.mxu1 %v6819_v7 }
 0x9a0   :  { %3689 = vmatprep.subr.bf16.mxu0 %v6822_v43  ;;  %3730 = vmatprep.subr.bf16.mxu1 %v6825_v49 }
 0x9a1   :  { %v3576_v13 = vadd.f32 %v3575_v42, %v3574_v59 }
 0x9a3   :  { %4924 = vtanh.f32 %v3576_v13  ;;  %3690 = vmatpush1.bf16.msra.mxu0 %v6829_v26  ;;  %3731 = vmatpush1.bf16.msra.mxu1 %v6832_v4  ;;  %v7200_v15 = vsel %vm2359_vm4, %v3576_v13, %v7092_v2  ;;  %v7227_v26 = vld [vmem:[#allocation8 + $0xe4] ss:$16 sps:$4 sm:$0xff]   ;;  %v7236_v4 = vld [vmem:[#allocation8 + $0xe8] ss:$16 sps:$4 sm:$0xff]   ;;  %v7280_v2 = vld [vmem:[#allocation8 + $0x6c] ss:$16 sps:$4 sm:$0xff]  }
 0x9a4   :  { %3691 = vmatprep.subr.bf16.mxu0 %v6840_v45  ;;  %3732 = vmatprep.subr.bf16.mxu1 %v6843_v35  ;;  %v7239_v45 = vld [vmem:[#allocation8 + $0xc4] ss:$16 sps:$4 sm:$0xff]   ;;  %v7242_v35 = vld [vmem:[#allocation8 + $0xcc] ss:$16 sps:$4 sm:$0xff]  }
 0x9a5   :  { %v8111_v13 = vld [vmem:[#allocation53_spill] sm:$0xff] }
 0x9a7   :  { %3692 = vmatpush1.bf16.msra.mxu0 %v6846_v5  ;;  %3733 = vmatpush1.bf16.msra.mxu1 %v6849_v6  ;;  %v4923_v9 = vpop.eup %4922  ;;  %v7247_v5 = vld [vmem:[#allocation8 + $0xc0] ss:$16 sps:$4 sm:$0xff]   ;;  %v7250_v6 = vld [vmem:[#allocation8 + $0xc8] ss:$16 sps:$4 sm:$0xff]  }
 0x9a8   :  { %3693 = vmatprep.subr.bf16.mxu0 %v8026_v3  ;;  %3734 = vmatprep.subr.bf16.mxu1 %v8027_v61  ;;  %v7256_v3 = vld [vmem:[#allocation8 + $0xac] ss:$16 sps:$4 sm:$0xff]   ;;  %v7259_v61 = vld [vmem:[#allocation8 + $0xa0] ss:$16 sps:$4 sm:$0xff]  }
 0x9ab   :  { %3694 = vmatpush1.bf16.msra.mxu0 %v8028_v40  ;;  %3735 = vmatpush1.bf16.msra.mxu1 %v8029_v32  ;;  %v7262_v40 = vld [vmem:[#allocation8 + $0xa8] ss:$16 sps:$4 sm:$0xff]   ;;  %v7265_v32 = vld [vmem:[#allocation8 + $0x84] ss:$16 sps:$4 sm:$0xff]  }
 0x9ac   :  { %3695 = vmatprep.subr.bf16.mxu0 %v8030_v16  ;;  %3736 = vmatprep.subr.bf16.mxu1 %v8031_v44  ;;  %v7268_v16 = vld [vmem:[#allocation8 + $0x8c] ss:$16 sps:$4 sm:$0xff]   ;;  %v7271_v44 = vld [vmem:[#allocation8 + $0x80] ss:$16 sps:$4 sm:$0xff]  }
 0x9af   :  { %3696 = vmatpush1.bf16.msra.mxu0 %v6870_v23  ;;  %3737 = vmatpush1.bf16.msra.mxu1 %v8032_v22  ;;  %v7274_v22 = vld [vmem:[#allocation8 + $0x88] ss:$16 sps:$4 sm:$0xff]  }
 0x9b0   :  { %v4925_v20 = vpop.eup %4924  ;;  %3697 = vmatprep.subr.bf16.mxu0 %v8033_v41  ;;  %3738 = vmatprep.subr.bf16.mxu1 %v6879_v36  ;;  %v7230_v36 = vld [vmem:[#allocation8 + $0xec] ss:$16 sps:$4 sm:$0xff]   ;;  %v7277_v41 = vld [vmem:[#allocation8 + $0x64] ss:$16 sps:$4 sm:$0xff]  }
 0x9b1   :  { %v3578_v7 = vmul.f32 %v4925_v20, %v4923_v9 }
 0x9b3   :  { %3698 = vmatpush1.bf16.msra.mxu0 %v6882_v31  ;;  %3739 = vmatpush1.bf16.msra.mxu1 %v6885_v12  ;;  %v7221_v43 = vsel %vm2359_vm4, %v3578_v7, %v7113_v30  ;;  %v3585_v23 = vsel %vm2359_vm4, %v3578_v7, 0.0  ;;  %v7233_v31 = vld [vmem:[#allocation8 + $0xe0] ss:$16 sps:$4 sm:$0xff]   ;;  %v7253_v12 = vld [vmem:[#allocation8 + $0xa4] ss:$16 sps:$4 sm:$0xff]  }
 0x9b4   :  { %3586 = vst [vmem:[#allocation11 + $0x38] sm:$0xff] %v3585_v23  ;;  %v3682_v49 = vpack.c.bf16 %v7221_v43, %v7221_v43  ;;  %3830 = vmatprep.subr.bf16.mxu0 %v7227_v26  ;;  %3871 = vmatprep.subr.bf16.mxu1 %v7230_v36  ;;  %v7283_v30 = vld [vmem:[#allocation8 + $0x60] ss:$16 sps:$4 sm:$0xff]  }
 0x9b6   :  { %3716 = vmatmul.mubr.bf16.vlgmr.msra.gmra.mxu0 %v3682_v49  ;;  %3757 = vmatmul.mubr.bf16.vlgmr.msra.gmra.mxu1 %v3682_v49 }
 0x9b7   :  { %3831 = vmatpush1.bf16.msra.mxu0 %v7233_v31  ;;  %3872 = vmatpush1.bf16.msra.mxu1 %v7236_v4 }
 0x9b8   :  { %3832 = vmatprep.subr.bf16.mxu0 %v7239_v45  ;;  %3873 = vmatprep.subr.bf16.mxu1 %v7242_v35 }
 0x9b9   :  { %3862 = vmatprep.mubr.bf16.mxu0 %v7746_v57  ;;  %3903 = vmatprep.mubr.bf16.mxu1 %v7746_v57 }
 0x9bb   :  { %3833 = vmatpush1.bf16.msra.mxu0 %v7247_v5  ;;  %3874 = vmatpush1.bf16.msra.mxu1 %v7250_v6 }
 0x9bc   :  { %3834 = vmatprep.subr.bf16.mxu0 %v7253_v12  ;;  %3875 = vmatprep.subr.bf16.mxu1 %v7256_v3 }
 0x9bf   :  { %3835 = vmatpush1.bf16.msra.mxu0 %v7259_v61  ;;  %3876 = vmatpush1.bf16.msra.mxu1 %v7262_v40 }
 0x9c0   :  { %3836 = vmatprep.subr.bf16.mxu0 %v7265_v32  ;;  %3877 = vmatprep.subr.bf16.mxu1 %v7268_v16 }
 0x9c3   :  { %3837 = vmatpush1.bf16.msra.mxu0 %v7271_v44  ;;  %3878 = vmatpush1.bf16.msra.mxu1 %v7274_v22 }
 0x9c4   :  { %3838 = vmatprep.subr.bf16.mxu0 %v7277_v41  ;;  %3879 = vmatprep.subr.bf16.mxu1 %v7280_v2 }
 0x9c7   :  { %3839 = vmatpush1.bf16.msra.mxu0 %v7283_v30  ;;  %3880 = vmatpush1.bf16.msra.mxu1 %v7286_v51 }
 0x9c8   :  { %3840 = vmatprep.subr.bf16.mxu0 %v7289_v53  ;;  %3881 = vmatprep.subr.bf16.mxu1 %v7292_v27 }
 0x9cb   :  { %3841 = vmatpush1.bf16.msra.mxu0 %v7295_v17  ;;  %3882 = vmatpush1.bf16.msra.mxu1 %v7298_v52 }
 0x9cc   :  { %3842 = vmatprep.subr.bf16.mxu0 %v7301_v33  ;;  %3883 = vmatprep.subr.bf16.mxu1 %v7304_v8 }
 0x9cf   :  { %3843 = vmatpush1.bf16.msra.mxu0 %v7307_v25  ;;  %3884 = vmatpush1.bf16.msra.mxu1 %v7310_v46 }
 0x9d0   :  { %3844 = vmatprep.subr.bf16.mxu0 %v7313_v28  ;;  %3885 = vmatprep.subr.bf16.mxu1 %v7316_v47 }
 0x9d3   :  { %3845 = vmatpush1.bf16.msra.mxu0 %v8090_v0  ;;  %3886 = vmatpush1.bf16.msra.mxu1 %v8091_v21 }
 0x9d4   :  { %3921 = vmatprep.subr.bf16.mxu0 %v8092_v18  ;;  %3962 = vmatprep.subr.bf16.mxu1 %v8093_v11  ;;  %v8109_v18 = vld [vmem:[#allocation24_spill] sm:$0xff]  ;;  %v8110_v11 = vld [vmem:[#allocation55_spill] sm:$0xff] }
 0x9d5   :  { %v699_v55 = vadd.f32 %v8110_v11, %v8109_v18 }
 0xa56   :  { %v3626_v56 = vpop.f32.mrf.mxu0  ;;  %v3667_v1 = vpop.f32.mrf.mxu1 }
 0xa57   :  { %v3674_v48 = vadd.f32 %v3626_v56, %v8108_v24  ;;  %v3676_v38 = vadd.f32 %v3667_v1, %v8111_v13 }
 0xa58   :  { %v3628_v54 = vpop.f32.mrf.mxu0  ;;  %v3669_v62 = vpop.f32.mrf.mxu1 }
 0xa59   :  { %v4510_v60 = vmul.f32 -1.442695, %v3674_v48  ;;  %v3675_v29 = vadd.f32 %v3628_v54, %v606_v63  ;;  %v3677_v59 = vadd.f32 %v3669_v62, %v699_v55  ;;  %v8112_v48 = vld [vmem:[#allocation74_spill] sm:$0xff] }
 0xa5a   :  { %v3630_v34 = vpop.f32.mrf.mxu0  ;;  %v3671_v42 = vpop.f32.mrf.mxu1 }
 0xa5b   :  { %4926 = vpow2.f32 %v4510_v60  ;;  %v4511_v0 = vmul.f32 -1.442695, %v3675_v29  ;;  %v4512_v9 = vmul.f32 -1.442695, %v3677_v59  ;;  %v8113_v42 = vld [vmem:[#allocation76_spill] sm:$0xff] }
 0xa5c   :  { %v3631_v21 = vpop.f32.mrf.mxu0  ;;  %v3672_v37 = vpop.f32.mrf.mxu1 }
 0xa5d   :  { %4928 = vpow2.f32 %v4511_v0 }
 0xa5e   :  { %4930 = vtanh.f32 %v3676_v38 }
 0xa5f   :  { %4932 = vpow2.f32 %v4512_v9 }
 0xa68   :  { %v4927_v20 = vpop.eup %4926 }
 0xa69   :  { %v3772_v7 = vadd.f32 1.0, %v4927_v20 }
 0xa6a   :  { %v4929_v23 = vpop.eup %4928 }
 0xa6b   :  { %4934 = vrcp.f32 %v3772_v7  ;;  %v3778_v49 = vadd.f32 1.0, %v4929_v23  ;;  %v4931_v56 = vpop.eup %4930  ;;  %v7371_v7 = vld [vmem:[#allocation9 + $0xac] ss:$16 sps:$4 sm:$0xff]  }
 0xa6c   :  { %v4933_v24 = vpop.eup %4932 }
 0xa6d   :  { %4936 = vrcp.f32 %v3778_v49  ;;  %v3785_v37 = vadd.f32 1.0, %v4933_v24  ;;  %v8115_v49 = vld [vmem:[#allocation77_spill] sm:$0xff] }
 0xa76   :  { %v3717_v58 = vpop.f32.mrf.mxu0  ;;  %v3758_v63 = vpop.f32.mrf.mxu1 }
 0xa77   :  { %v3765_v54 = vadd.f32 %v3717_v58, %v8112_v48  ;;  %v8116_v58 = vld [vmem:[#allocation75_spill] sm:$0xff] }
 0xa78   :  { %v4935_v60 = vpop.eup %4934  ;;  %v3719_v29 = vpop.f32.mrf.mxu0  ;;  %v3767_v24 = vadd.f32 %v3758_v63, %v8116_v58 }
 0xa79   :  { %v3760_v62 = vpop.f32.mrf.mxu1  ;;  %v3789_v34 = vmul.f32 %v4935_v60, %v4931_v56  ;;  %v4513_v1 = vmul.f32 -1.442695, %v3765_v54  ;;  %v3766_v0 = vadd.f32 %v3719_v29, %v8113_v42 }
 0xa7a   :  { %v4937_v21 = vpop.eup %4936  ;;  %v3721_v11 = vpop.f32.mrf.mxu0  ;;  %v3768_v56 = vadd.f32 %v3760_v62, %v8115_v49 }
 0xa7b   :  { %v3762_v55 = vpop.f32.mrf.mxu1  ;;  %v3788_v59 = vmul.f32 %v4937_v21, %v7166_v14  ;;  %4938 = vpow2.f32 %v4513_v1  ;;  %v4514_v13 = vmul.f32 -1.442695, %v3766_v0  ;;  %v7348_v21 = vld [vmem:[#allocation9 + $0xe0] ss:$16 sps:$4 sm:$0xff]   ;;  %v7354_v11 = vld [vmem:[#allocation9 + $0xc4] ss:$16 sps:$4 sm:$0xff]  }
 0xa7c   :  { %v3722_v38 = vpop.f32.mrf.mxu0  ;;  %v4515_v48 = vmul.f32 -1.442695, %v3768_v56 }
 0xa7d   :  { %v3763_v9 = vpop.f32.mrf.mxu1  ;;  %v3790_v20 = vadd.f32 %v3789_v34, %v3788_v59  ;;  %4940 = vpow2.f32 %v4514_v13  ;;  %v7362_v13 = vld [vmem:[#allocation9 + $0xc0] ss:$16 sps:$4 sm:$0xff]   ;;  %v7365_v38 = vld [vmem:[#allocation9 + $0xc8] ss:$16 sps:$4 sm:$0xff]  }
 0xa7e   :  { %4942 = vrcp.f32 %v3785_v37  ;;  %v7351_v37 = vld [vmem:[#allocation9 + $0xe8] ss:$16 sps:$4 sm:$0xff]  }
 0xa7f   :  { %4944 = vtanh.f32 %v3790_v20  ;;  %v7335_v23 = vsel %vm2116_vm3, %v3790_v20, %v7166_v14  ;;  %v7368_v20 = vld [vmem:[#allocation9 + $0xa4] ss:$16 sps:$4 sm:$0xff]  }
 0xa80   :  { %4946 = vtanh.f32 %v3767_v24 }
 0xa81   :  { %4948 = vpow2.f32 %v4515_v48  ;;  %v7375_v48 = vld [vmem:[#allocation9 + $0xa0] ss:$16 sps:$4 sm:$0xff]  }
 0xa88   :  { %v4939_v54 = vpop.eup %4938 }
 0xa89   :  { %v3796_v60 = vadd.f32 1.0, %v4939_v54  ;;  %v7378_v54 = vld [vmem:[#allocation9 + $0xa8] ss:$16 sps:$4 sm:$0xff]  }
 0xa8a   :  { %v4941_v29 = vpop.eup %4940 }
 0xa8b   :  { %v4943_v1 = vpop.eup %4942  ;;  %4950 = vrcp.f32 %v3796_v60  ;;  %v3802_v34 = vadd.f32 1.0, %v4941_v29  ;;  %v7381_v60 = vld [vmem:[#allocation9 + $0x84] ss:$16 sps:$4 sm:$0xff]   ;;  %v7384_v29 = vld [vmem:[#allocation9 + $0x8c] ss:$16 sps:$4 sm:$0xff]  }
 0xa8c   :  { %v4945_v42 = vpop.eup %4944 }
 0xa8d   :  { %4952 = vrcp.f32 %v3802_v34  ;;  %v3792_v0 = vmul.f32 %v4945_v42, %v4943_v1  ;;  %v4947_v55 = vpop.eup %4946  ;;  %v7387_v34 = vld [vmem:[#allocation9 + $0x80] ss:$16 sps:$4 sm:$0xff]   ;;  %v7390_v42 = vld [vmem:[#allocation9 + $0x88] ss:$16 sps:$4 sm:$0xff]  }
 0xa8e   :  { %v4949_v59 = vpop.eup %4948 }
 0xa8f   :  { %v7342_v14 = vsel %vm2116_vm3, %v3792_v0, %v7174_v50  ;;  %v3821_v63 = vsel %vm2116_vm3, %v3792_v0, 0.0  ;;  %v7357_v50 = vld [vmem:[#allocation9 + $0xcc] ss:$16 sps:$4 sm:$0xff]   ;;  %v3809_v58 = vadd.f32 1.0, %v4949_v59  ;;  %v7404_v59 = vld [vmem:[#allocation9 + $0x60] ss:$16 sps:$4 sm:$0xff]  }
 0xa90   :  { %3822 = vst [vmem:[#allocation11 + $0x90] sm:$0xff] %v3821_v63  ;;  %v3829_v62 = vpack.c.bf16 %v7342_v14, %v7342_v14  ;;  %v8131_v0 = vld [vmem:[#allocation72_spill] sm:$0xff] }
 0xa91   :  { %4954 = vrcp.f32 %v3809_v58  ;;  %v7419_v58 = vld [vmem:[#allocation9 + $0x48] ss:$16 sps:$4 sm:$0xff]  }
 0xa92   :  { %3863 = vmatmul.mubr.bf16.vlgmr.msra.gmra.mxu0 %v3829_v62  ;;  %3904 = vmatmul.mubr.bf16.vlgmr.msra.gmra.mxu1 %v3829_v62  ;;  %v7398_v62 = vld [vmem:[#allocation9 + $0x64] ss:$16 sps:$4 sm:$0xff]   ;;  %8122 = vst [vmem:[#allocation132_spill] sm:$0xff] %v7419_v58 }
 0xa93   :  { %3922 = vmatpush1.bf16.msra.mxu0 %v7348_v21  ;;  %3963 = vmatpush1.bf16.msra.mxu1 %v7351_v37 }
 0xa94   :  { %3923 = vmatprep.subr.bf16.mxu0 %v7354_v11  ;;  %3964 = vmatprep.subr.bf16.mxu1 %v7357_v50 }
 0xa95   :  { %3953 = vmatprep.mubr.bf16.mxu0 %v7746_v57  ;;  %3994 = vmatprep.mubr.bf16.mxu1 %v7746_v57 }
 0xa97   :  { %3924 = vmatpush1.bf16.msra.mxu0 %v7362_v13  ;;  %3965 = vmatpush1.bf16.msra.mxu1 %v7365_v38 }
 0xa98   :  { %v4951_v9 = vpop.eup %4950  ;;  %3925 = vmatprep.subr.bf16.mxu0 %v7368_v20  ;;  %3966 = vmatprep.subr.bf16.mxu1 %v7371_v7 }
 0xa99   :  { %v3813_v49 = vmul.f32 %v4951_v9, %v4947_v55  ;;  %v7401_v55 = vld [vmem:[#allocation9 + $0x6c] ss:$16 sps:$4 sm:$0xff]   ;;  %v7407_v9 = vld [vmem:[#allocation9 + $0x68] ss:$16 sps:$4 sm:$0xff]  }
 0xa9a   :  { %v4953_v56 = vpop.eup %4952  ;;  %8118 = vst [vmem:[#allocation128_spill] sm:$0xff] %v7407_v9 }
 0xa9b   :  { %v3812_v24 = vmul.f32 %v4953_v56, %v7200_v15  ;;  %3926 = vmatpush1.bf16.msra.mxu0 %v7375_v48  ;;  %3967 = vmatpush1.bf16.msra.mxu1 %v7378_v54  ;;  %v7416_v56 = vld [vmem:[#allocation9 + $0x40] ss:$16 sps:$4 sm:$0xff]  }
 0xa9c   :  { %3927 = vmatprep.subr.bf16.mxu0 %v7381_v60  ;;  %3968 = vmatprep.subr.bf16.mxu1 %v7384_v29  ;;  %8121 = vst [vmem:[#allocation131_spill] sm:$0xff] %v7416_v56 }
 0xa9d   :  { %v3814_v1 = vadd.f32 %v3813_v49, %v3812_v24  ;;  %v7410_v49 = vld [vmem:[#allocation9 + $0x44] ss:$16 sps:$4 sm:$0xff]  }
 0xa9e   :  { %8119 = vst [vmem:[#allocation129_spill] sm:$0xff] %v7410_v49  ;;  %v7422_v24 = vld [vmem:[#allocation9 + $0x24] ss:$16 sps:$4 sm:$0xff]   ;;  %v4955_v18 = vpop.eup %4954 }
 0xa9f   :  { %4956 = vtanh.f32 %v3814_v1  ;;  %3928 = vmatpush1.bf16.msra.mxu0 %v7387_v34  ;;  %3969 = vmatpush1.bf16.msra.mxu1 %v7390_v42  ;;  %v7396_v63 = vsel %vm2109_vm2, %v3814_v1, %v7200_v15  ;;  %v7413_v15 = vld [vmem:[#allocation9 + $0x4c] ss:$16 sps:$4 sm:$0xff]   ;;  %8123 = vst [vmem:[#allocation134_spill] sm:$0xff] %v7422_v24 }
 0xaa0   :  { %3929 = vmatprep.subr.bf16.mxu0 %v7398_v62  ;;  %3970 = vmatprep.subr.bf16.mxu1 %v7401_v55  ;;  %8120 = vst [vmem:[#allocation130_spill] sm:$0xff] %v7413_v15  ;;  %v7425_v1 = vld [vmem:[#allocation9 + $0x2c] ss:$16 sps:$4 sm:$0xff]  }
 0xaa1   :  { %8124 = vst [vmem:[#allocation135_spill] sm:$0xff] %v7425_v1 }
 0xaa3   :  { %3930 = vmatpush1.bf16.msra.mxu0 %v7404_v59  ;;  %3971 = vmatpush1.bf16.msra.mxu1 %v7407_v9  ;;  %v7443_v9 = vld [vmem:[#allocation9 + $0x8] ss:$16 sps:$4 sm:$0xff]  }
 0xaa4   :  { %3931 = vmatprep.subr.bf16.mxu0 %v7410_v49  ;;  %3972 = vmatprep.subr.bf16.mxu1 %v7413_v15  ;;  %v7431_v15 = vld [vmem:[#allocation9 + $0x28] ss:$16 sps:$4 sm:$0xff]   ;;  %v7434_v49 = vld [vmem:[#allocation9 + $0x4] ss:$16 sps:$4 sm:$0xff]  }
 0xaa5   :  { %8125 = vst [vmem:[#allocation136_spill] sm:$0xff] %v7431_v15  ;;  %8126 = vst [vmem:[#allocation137_spill] sm:$0xff] %v7434_v49 }
 0xaa7   :  { %3932 = vmatpush1.bf16.msra.mxu0 %v7416_v56  ;;  %3973 = vmatpush1.bf16.msra.mxu1 %v7419_v58  ;;  %v7437_v58 = vld [vmem:[#allocation9 + $0xc] ss:$16 sps:$4 sm:$0xff]  }
 0xaa8   :  { %3933 = vmatprep.subr.bf16.mxu0 %v7422_v24  ;;  %3974 = vmatprep.subr.bf16.mxu1 %v7425_v1  ;;  %v7440_v1 = vld [vmem:[#allocation9] ss:$16 sps:$4 sm:$0xff]  }
 0xaab   :  { %3934 = vmatpush1.bf16.msra.mxu0 %v7428_v39  ;;  %3975 = vmatpush1.bf16.msra.mxu1 %v7431_v15 }
 0xaac   :  { %v4957_v56 = vpop.eup %4956  ;;  %3935 = vmatprep.subr.bf16.mxu0 %v7434_v49  ;;  %3976 = vmatprep.subr.bf16.mxu1 %v7437_v58 }
 0xaad   :  { %v3816_v24 = vmul.f32 %v4957_v56, %v4955_v18  ;;  %v8132_v56 = vld [vmem:[#allocation70_spill] sm:$0xff] }
 0xaaf   :  { %3936 = vmatpush1.bf16.msra.mxu0 %v7440_v1  ;;  %3977 = vmatpush1.bf16.msra.mxu1 %v7443_v9  ;;  %v7449_v15 = vsel %vm2109_vm2, %v3816_v24, %v7221_v43  ;;  %v3823_v49 = vsel %vm2109_vm2, %v3816_v24, 0.0  ;;  %v5210_v43 = vld [vmem:[#allocation8] ss:$16 sps:$4 sm:$0xff]  }
 0xab0   :  { %3824 = vst [vmem:[#allocation11 + $0x28] sm:$0xff] %v3823_v49  ;;  %v3920_v18 = vpack.c.bf16 %v7449_v15, %v7449_v15  ;;  %4068 = vmatprep.subr.bf16.mxu0 %v7227_v26  ;;  %4109 = vmatprep.subr.bf16.mxu1 %v7230_v36  ;;  %v5211_v26 = vld [vmem:[#allocation8 + $0x8] ss:$16 sps:$4 sm:$0xff]   ;;  %v5212_v36 = vld [vmem:[#allocation9 + $0xe4] ss:$16 sps:$4 sm:$0xff]   ;;  %v752_v49 = vadd.f32 %v8131_v0, %v8098_v10 }
 0xab2   :  { %3954 = vmatmul.mubr.bf16.vlgmr.msra.gmra.mxu0 %v3920_v18  ;;  %3995 = vmatmul.mubr.bf16.vlgmr.msra.gmra.mxu1 %v3920_v18 }
 0xab3   :  { %4069 = vmatpush1.bf16.msra.mxu0 %v7233_v31  ;;  %4110 = vmatpush1.bf16.msra.mxu1 %v7236_v4  ;;  %v5213_v31 = vld [vmem:[#allocation9 + $0xec] ss:$16 sps:$4 sm:$0xff]  }
 0xab4   :  { %4070 = vmatprep.subr.bf16.mxu0 %v7239_v45  ;;  %4111 = vmatprep.subr.bf16.mxu1 %v7242_v35  ;;  %v8127_v35 = vld [vmem:[#allocation56_spill] sm:$0xff] }
 0xab5   :  { %4100 = vmatprep.mubr.bf16.mxu0 %v7746_v57  ;;  %4141 = vmatprep.mubr.bf16.mxu1 %v7746_v57 }
 0xab7   :  { %4071 = vmatpush1.bf16.msra.mxu0 %v7247_v5  ;;  %4112 = vmatpush1.bf16.msra.mxu1 %v7250_v6 }
 0xab8   :  { %4072 = vmatprep.subr.bf16.mxu0 %v7253_v12  ;;  %4113 = vmatprep.subr.bf16.mxu1 %v7256_v3 }
 0xabb   :  { %4073 = vmatpush1.bf16.msra.mxu0 %v7259_v61  ;;  %4114 = vmatpush1.bf16.msra.mxu1 %v7262_v40  ;;  %v8128_v61 = vld [vmem:[#allocation58_spill] sm:$0xff] }
 0xabc   :  { %4074 = vmatprep.subr.bf16.mxu0 %v7265_v32  ;;  %4115 = vmatprep.subr.bf16.mxu1 %v7268_v16 }
 0xabf   :  { %4075 = vmatpush1.bf16.msra.mxu0 %v7271_v44  ;;  %4116 = vmatpush1.bf16.msra.mxu1 %v7274_v22 }
 0xac0   :  { %4076 = vmatprep.subr.bf16.mxu0 %v7277_v41  ;;  %4117 = vmatprep.subr.bf16.mxu1 %v7280_v2  ;;  %v8129_v2 = vld [vmem:[#allocation59_spill] sm:$0xff] }
 0xac3   :  { %4077 = vmatpush1.bf16.msra.mxu0 %v7283_v30  ;;  %4118 = vmatpush1.bf16.msra.mxu1 %v7286_v51  ;;  %v8130_v51 = vld [vmem:[#allocation57_spill] sm:$0xff] }
 0xac4   :  { %4078 = vmatprep.subr.bf16.mxu0 %v7289_v53  ;;  %4119 = vmatprep.subr.bf16.mxu1 %v7292_v27 }
 0xac7   :  { %4079 = vmatpush1.bf16.msra.mxu0 %v7295_v17  ;;  %4120 = vmatpush1.bf16.msra.mxu1 %v7298_v52 }
 0xac8   :  { %4080 = vmatprep.subr.bf16.mxu0 %v7301_v33  ;;  %4121 = vmatprep.subr.bf16.mxu1 %v7304_v8 }
 0xacb   :  { %4081 = vmatpush1.bf16.msra.mxu0 %v7307_v25  ;;  %4122 = vmatpush1.bf16.msra.mxu1 %v7310_v46 }
 0xacc   :  { %4082 = vmatprep.subr.bf16.mxu0 %v7313_v28  ;;  %4123 = vmatprep.subr.bf16.mxu1 %v7316_v47 }
 0xacf   :  { %4083 = vmatpush1.bf16.msra.mxu0 %v5210_v43  ;;  %4124 = vmatpush1.bf16.msra.mxu1 %v5211_v26 }
 0xad0   :  { %4159 = vmatprep.subr.bf16.mxu0 %v5212_v36  ;;  %4200 = vmatprep.subr.bf16.mxu1 %v5213_v31 }
 0xb52   :  { %v3864_v4 = vpop.f32.mrf.mxu0  ;;  %v3905_v45 = vpop.f32.mrf.mxu1 }
 0xb53   :  { %v3912_v5 = vadd.f32 %v3864_v4, %v8127_v35  ;;  %v3914_v53 = vadd.f32 %v3905_v45, %v8130_v51 }
 0xb54   :  { %v3866_v6 = vpop.f32.mrf.mxu0  ;;  %v3907_v12 = vpop.f32.mrf.mxu1 }
 0xb55   :  { %v4516_v3 = vmul.f32 -1.442695, %v3912_v5  ;;  %v3913_v40 = vadd.f32 %v3866_v6, %v8128_v61  ;;  %v3915_v30 = vadd.f32 %v3907_v12, %v8129_v2  ;;  %v8135_v2 = vld [vmem:[#allocation71_spill] sm:$0xff] }
 0xb56   :  { %v3868_v32 = vpop.f32.mrf.mxu0  ;;  %v3909_v16 = vpop.f32.mrf.mxu1 }
 0xb57   :  { %4958 = vpow2.f32 %v4516_v3  ;;  %v4517_v44 = vmul.f32 -1.442695, %v3913_v40  ;;  %v4518_v27 = vmul.f32 -1.442695, %v3915_v30 }
 0xb58   :  { %v3869_v22 = vpop.f32.mrf.mxu0  ;;  %v3910_v41 = vpop.f32.mrf.mxu1 }
 0xb59   :  { %4960 = vpow2.f32 %v4517_v44  ;;  %v8134_v44 = vld [vmem:[#allocation73_spill] sm:$0xff] }
 0xb5a   :  { %4962 = vtanh.f32 %v3914_v53  ;;  %v845_v22 = vadd.f32 %v8134_v44, %v8102_v19 }
 0xb5b   :  { %4964 = vpow2.f32 %v4518_v27 }
 0xb64   :  { %v4959_v17 = vpop.eup %4958 }
 0xb65   :  { %v4010_v52 = vadd.f32 1.0, %v4959_v17 }
 0xb66   :  { %v4961_v33 = vpop.eup %4960 }
 0xb67   :  { %4966 = vrcp.f32 %v4010_v52  ;;  %v4016_v8 = vadd.f32 1.0, %v4961_v33  ;;  %v4963_v25 = vpop.eup %4962 }
 0xb68   :  { %v4965_v47 = vpop.eup %4964 }
 0xb69   :  { %4968 = vrcp.f32 %v4016_v8  ;;  %v4023_v35 = vadd.f32 1.0, %v4965_v47 }
 0xb72   :  { %v3955_v46 = vpop.f32.mrf.mxu0  ;;  %v3996_v28 = vpop.f32.mrf.mxu1 }
 0xb73   :  { %v4003_v24 = vadd.f32 %v3955_v46, %v8132_v56  ;;  %v4005_v30 = vadd.f32 %v3996_v28, %v8135_v2 }
 0xb74   :  { %v4967_v18 = vpop.eup %4966  ;;  %v3957_v43 = vpop.f32.mrf.mxu0 }
 0xb75   :  { %v3998_v26 = vpop.f32.mrf.mxu1  ;;  %v4027_v36 = vmul.f32 %v4967_v18, %v4963_v25  ;;  %v4519_v31 = vmul.f32 -1.442695, %v4003_v24  ;;  %v4004_v4 = vadd.f32 %v3957_v43, %v752_v49  ;;  %v8146_v18 = vld [vmem:[#allocation22_spill] sm:$0xff] }
 0xb76   :  { %v4969_v45 = vpop.eup %4968  ;;  %v3959_v5 = vpop.f32.mrf.mxu0  ;;  %v4006_v41 = vadd.f32 %v3998_v26, %v845_v22  ;;  %v8148_v26 = vld [vmem:[#allocation60_spill] sm:$0xff] }
 0xb77   :  { %v4000_v6 = vpop.f32.mrf.mxu1  ;;  %v4026_v12 = vmul.f32 %v4969_v45, %v7335_v23  ;;  %4970 = vpow2.f32 %v4519_v31  ;;  %v4520_v3 = vmul.f32 -1.442695, %v4004_v4 }
 0xb78   :  { %v3960_v61 = vpop.f32.mrf.mxu0  ;;  %v4521_v51 = vmul.f32 -1.442695, %v4006_v41 }
 0xb79   :  { %v4001_v40 = vpop.f32.mrf.mxu1  ;;  %v4028_v32 = vadd.f32 %v4027_v36, %v4026_v12  ;;  %4972 = vpow2.f32 %v4520_v3  ;;  %v8149_v12 = vld [vmem:[#allocation24_spill] sm:$0xff]  ;;  %v8150_v3 = vld [vmem:[#allocation63_spill] sm:$0xff] }
 0xb7a   :  { %4974 = vrcp.f32 %v4023_v35  ;;  %v709_v61 = vadd.f32 %v8150_v3, %v8149_v12 }
 0xb7b   :  { %4976 = vtanh.f32 %v4028_v32  ;;  %v7498_v16 = vsel %vm1866_vm1, %v4028_v32, %v7335_v23  ;;  %v8151_v32 = vld [vmem:[#allocation61_spill] sm:$0xff] }
 0xb7c   :  { %4978 = vtanh.f32 %v4005_v30 }
 0xb7d   :  { %4980 = vpow2.f32 %v4521_v51 }
 0xb84   :  { %v4971_v53 = vpop.eup %4970 }
 0xb85   :  { %v4034_v27 = vadd.f32 1.0, %v4971_v53 }
 0xb86   :  { %v4973_v17 = vpop.eup %4972 }
 0xb87   :  { %v4975_v52 = vpop.eup %4974  ;;  %4982 = vrcp.f32 %v4034_v27  ;;  %v4040_v33 = vadd.f32 1.0, %v4973_v17 }
 0xb88   :  { %v4977_v8 = vpop.eup %4976 }
 0xb89   :  { %4984 = vrcp.f32 %v4040_v33  ;;  %v4030_v25 = vmul.f32 %v4977_v8, %v4975_v52  ;;  %v8152_v52 = vld [vmem:[#allocation66_spill] sm:$0xff] }
 0xb8b   :  { %v4055_v23 = vsel %vm1866_vm1, %v4030_v25, %v7342_v14  ;;  %v4059_v19 = vsel %vm1866_vm1, %v4030_v25, 0.0  ;;  %v4979_v14 = vpop.eup %4978 }
 0xb8c   :  { %4060 = vst [vmem:[#allocation11 + $0xa0] sm:$0xff] %v4059_v19  ;;  %v4067_v46 = vpack.c.bf16 %v4055_v23, %v4055_v23  ;;  %v4981_v28 = vpop.eup %4980 }
 0xb8e   :  { %4101 = vmatmul.mubr.bf16.vlgmr.msra.gmra.mxu0 %v4067_v46  ;;  %4142 = vmatmul.mubr.bf16.vlgmr.msra.gmra.mxu1 %v4067_v46 }
 0xb8f   :  { %4160 = vmatpush1.bf16.msra.mxu0 %v7348_v21  ;;  %4201 = vmatpush1.bf16.msra.mxu1 %v7351_v37 }
 0xb90   :  { %4161 = vmatprep.subr.bf16.mxu0 %v7354_v11  ;;  %4202 = vmatprep.subr.bf16.mxu1 %v7357_v50  ;;  %v4047_v11 = vadd.f32 1.0, %v4981_v28 }
 0xb91   :  { %4191 = vmatprep.mubr.bf16.mxu0 %v7746_v57  ;;  %4232 = vmatprep.mubr.bf16.mxu1 %v7746_v57 }
 0xb92   :  { %4986 = vrcp.f32 %v4047_v11 }
 0xb93   :  { %4162 = vmatpush1.bf16.msra.mxu0 %v7362_v13  ;;  %4203 = vmatpush1.bf16.msra.mxu1 %v7365_v38 }
 0xb94   :  { %v4983_v47 = vpop.eup %4982  ;;  %4163 = vmatprep.subr.bf16.mxu0 %v7368_v20  ;;  %4204 = vmatprep.subr.bf16.mxu1 %v7371_v7  ;;  %v8137_v20 = vld [vmem:[#allocation128_spill] sm:$0xff]  ;;  %v8138_v7 = vld [vmem:[#allocation129_spill] sm:$0xff] }
 0xb95   :  { %v4051_v21 = vmul.f32 %v4983_v47, %v4979_v14  ;;  %v8153_v14 = vld [vmem:[#allocation68_spill] sm:$0xff] }
 0xb96   :  { %v4985_v37 = vpop.eup %4984 }
 0xb97   :  { %v4050_v50 = vmul.f32 %v4985_v37, %v7396_v63  ;;  %4164 = vmatpush1.bf16.msra.mxu0 %v7375_v48  ;;  %4205 = vmatpush1.bf16.msra.mxu1 %v7378_v54  ;;  %v8139_v48 = vld [vmem:[#allocation130_spill] sm:$0xff]  ;;  %v8140_v54 = vld [vmem:[#allocation131_spill] sm:$0xff] }
 0xb98   :  { %4165 = vmatprep.subr.bf16.mxu0 %v7381_v60  ;;  %4206 = vmatprep.subr.bf16.mxu1 %v7384_v29  ;;  %v8141_v60 = vld [vmem:[#allocation132_spill] sm:$0xff]  ;;  %v8142_v29 = vld [vmem:[#allocation134_spill] sm:$0xff] }
 0xb99   :  { %v4052_v57 = vadd.f32 %v4051_v21, %v4050_v50 }
 0xb9b   :  { %4988 = vtanh.f32 %v4052_v57  ;;  %4166 = vmatpush1.bf16.msra.mxu0 %v7387_v34  ;;  %4207 = vmatpush1.bf16.msra.mxu1 %v7390_v42  ;;  %v7528_v38 = vsel %vm1859_vm0, %v4052_v57, %v7396_v63  ;;  %v8143_v34 = vld [vmem:[#allocation135_spill] sm:$0xff]  ;;  %v8144_v63 = vld [vmem:[#allocation136_spill] sm:$0xff] }
 0xb9c   :  { %4167 = vmatprep.subr.bf16.mxu0 %v7398_v62  ;;  %4208 = vmatprep.subr.bf16.mxu1 %v7401_v55  ;;  %v8145_v55 = vld [vmem:[#allocation137_spill] sm:$0xff] }
 0xb9f   :  { %4168 = vmatpush1.bf16.msra.mxu0 %v7404_v59  ;;  %4209 = vmatpush1.bf16.msra.mxu1 %v8137_v20  ;;  %v4987_v42 = vpop.eup %4986 }
 0xba0   :  { %4169 = vmatprep.subr.bf16.mxu0 %v8138_v7  ;;  %4210 = vmatprep.subr.bf16.mxu1 %v8139_v48  ;;  %v8154_v48 = vld [vmem:[#allocation69_spill] sm:$0xff] }
 0xba3   :  { %4170 = vmatpush1.bf16.msra.mxu0 %v8140_v54  ;;  %4211 = vmatpush1.bf16.msra.mxu1 %v8141_v60  ;;  %v8155_v60 = vld [vmem:[#allocation67_spill] sm:$0xff] }
 0xba4   :  { %4171 = vmatprep.subr.bf16.mxu0 %v8142_v29  ;;  %4212 = vmatprep.subr.bf16.mxu1 %v8143_v34 }
 0xba7   :  { %4172 = vmatpush1.bf16.msra.mxu0 %v7428_v39  ;;  %4213 = vmatpush1.bf16.msra.mxu1 %v8144_v63 }
 0xba8   :  { %v4989_v62 = vpop.eup %4988  ;;  %4173 = vmatprep.subr.bf16.mxu0 %v8145_v55  ;;  %4214 = vmatprep.subr.bf16.mxu1 %v7437_v58  ;;  %v8147_v58 = vld [vmem:[#allocation62_spill] sm:$0xff] }
 0xba9   :  { %v4054_v59 = vmul.f32 %v4989_v62, %v4987_v42  ;;  %v616_v43 = vadd.f32 %v8147_v58, %v8146_v18 }
 0xbab   :  { %4174 = vmatpush1.bf16.msra.mxu0 %v7440_v1  ;;  %4215 = vmatpush1.bf16.msra.mxu1 %v7443_v9  ;;  %v4057_v0 = vsel %vm1859_vm0, %v4054_v59, %v7449_v15  ;;  %v4061_v49 = vsel %vm1859_vm0, %v4054_v59, 0.0 }
 0xbac   :  { %4062 = vst [vmem:[#allocation11 + $0x18] sm:$0xff] %v4061_v49  ;;  %v4158_v39 = vpack.c.bf16 %v4057_v0, %v4057_v0 }
 0xbae   :  { %4192 = vmatmul.mubr.bf16.vlgmr.msra.gmra.mxu0 %v4158_v39  ;;  %4233 = vmatmul.mubr.bf16.vlgmr.msra.gmra.mxu1 %v4158_v39 }
 0xc4e   :  { %v4102_v56 = vpop.f32.mrf.mxu0  ;;  %v4143_v24 = vpop.f32.mrf.mxu1 }
 0xc4f   :  { %v4150_v1 = vadd.f32 %v4102_v56, %v8148_v26  ;;  %v4152_v10 = vadd.f32 %v4143_v24, %v8151_v32 }
 0xc50   :  { %v4104_v36 = vpop.f32.mrf.mxu0  ;;  %v4145_v9 = vpop.f32.mrf.mxu1 }
 0xc51   :  { %v4522_v31 = vmul.f32 -1.442695, %v4150_v1  ;;  %v4151_v4 = vadd.f32 %v4104_v36, %v616_v43  ;;  %v4153_v40 = vadd.f32 %v4145_v9, %v709_v61 }
 0xc52   :  { %v4106_v45 = vpop.f32.mrf.mxu0  ;;  %v4147_v15 = vpop.f32.mrf.mxu1 }
 0xc53   :  { %4990 = vpow2.f32 %v4522_v31  ;;  %v4523_v35 = vmul.f32 -1.442695, %v4151_v4  ;;  %v4524_v44 = vmul.f32 -1.442695, %v4153_v40 }
 0xc54   :  { %v4107_v5 = vpop.f32.mrf.mxu0  ;;  %v4148_v6 = vpop.f32.mrf.mxu1 }
 0xc55   :  { %4992 = vpow2.f32 %v4523_v35 }
 0xc56   :  { %4994 = vtanh.f32 %v4152_v10 }
 0xc57   :  { %4996 = vpow2.f32 %v4524_v44 }
 0xc60   :  { %v4991_v22 = vpop.eup %4990 }
 0xc61   :  { %v4248_v41 = vadd.f32 1.0, %v4991_v22 }
 0xc62   :  { %v4993_v2 = vpop.eup %4992 }
 0xc63   :  { %4998 = vrcp.f32 %v4248_v41  ;;  %v4254_v30 = vadd.f32 1.0, %v4993_v2  ;;  %v4995_v51 = vpop.eup %4994 }
 0xc64   :  { %v4997_v17 = vpop.eup %4996 }
 0xc65   :  { %5000 = vrcp.f32 %v4254_v30  ;;  %v4261_v21 = vadd.f32 1.0, %v4997_v17 }
 0xc6e   :  { %v4193_v53 = vpop.f32.mrf.mxu0  ;;  %v4234_v27 = vpop.f32.mrf.mxu1 }
 0xc6f   :  { %v4241_v33 = vadd.f32 %v4193_v53, %v8152_v52  ;;  %v4243_v29 = vadd.f32 %v4234_v27, %v8155_v60 }
 0xc70   :  { %v4999_v8 = vpop.eup %4998  ;;  %v4195_v25 = vpop.f32.mrf.mxu0 }
 0xc71   :  { %v4236_v23 = vpop.f32.mrf.mxu1  ;;  %v4265_v19 = vmul.f32 %v4999_v8, %v4995_v51  ;;  %v4525_v46 = vmul.f32 -1.442695, %v4241_v33  ;;  %v4242_v28 = vadd.f32 %v4195_v25, %v8153_v14 }
 0xc72   :  { %v5001_v47 = vpop.eup %5000  ;;  %v4197_v37 = vpop.f32.mrf.mxu0  ;;  %v4244_v54 = vadd.f32 %v4236_v23, %v8154_v48 }
 0xc73   :  { %v4238_v11 = vpop.f32.mrf.mxu1  ;;  %v4264_v50 = vmul.f32 %v5001_v47, %v7498_v16  ;;  %5002 = vpow2.f32 %v4525_v46  ;;  %v4526_v57 = vmul.f32 -1.442695, %v4242_v28 }
 0xc74   :  { %v4198_v13 = vpop.f32.mrf.mxu0  ;;  %v4527_v34 = vmul.f32 -1.442695, %v4244_v54 }
 0xc75   :  { %v4239_v20 = vpop.f32.mrf.mxu1  ;;  %v4266_v7 = vadd.f32 %v4265_v19, %v4264_v50  ;;  %5004 = vpow2.f32 %v4526_v57 }
 0xc76   :  { %5006 = vrcp.f32 %v4261_v21 }
 0xc77   :  { %5008 = vtanh.f32 %v4266_v7 }
 0xc78   :  { %5010 = vtanh.f32 %v4243_v29 }
 0xc79   :  { %5012 = vpow2.f32 %v4527_v34 }
 0xc80   :  { %v5003_v42 = vpop.eup %5002 }
 0xc81   :  { %v4272_v63 = vadd.f32 1.0, %v5003_v42 }
 0xc82   :  { %v5005_v62 = vpop.eup %5004 }
 0xc83   :  { %v5007_v55 = vpop.eup %5006  ;;  %5014 = vrcp.f32 %v4272_v63  ;;  %v4278_v16 = vadd.f32 1.0, %v5005_v62 }
 0xc84   :  { %v5009_v59 = vpop.eup %5008 }
 0xc85   :  { %v4268_v0 = vmul.f32 %v5009_v59, %v5007_v55  ;;  %5016 = vrcp.f32 %v4278_v16  ;;  %v5011_v56 = vpop.eup %5010 }
 0xc86   :  { %v5013_v24 = vpop.eup %5012 }
 0xc87   :  { %v4293_v39 = vsel %vm1618_vm14, %v4268_v0, 0.0  ;;  %v4285_v26 = vadd.f32 1.0, %v5013_v24 }
 0xc88   :  { %4294 = vst [vmem:[#allocation11 + $0xb0] sm:$0xff] %v4293_v39 }
 0xc89   :  { %5018 = vrcp.f32 %v4285_v26 }
 0xc90   :  { %v5015_v18 = vpop.eup %5014 }
 0xc91   :  { %v4289_v58 = vmul.f32 %v5015_v18, %v5011_v56 }
 0xc92   :  { %v5017_v43 = vpop.eup %5016 }
 0xc93   :  { %v4288_v1 = vmul.f32 %v5017_v43, %v7528_v38 }
 0xc95   :  { %v4290_v36 = vadd.f32 %v4289_v58, %v4288_v1 }
 0xc96   :  { %v5019_v9 = vpop.eup %5018 }
 0xc97   :  { %5020 = vtanh.f32 %v4290_v36 }
 0xca4   :  { %v5021_v31 = vpop.eup %5020 }
 0xca5   :  { %v4292_v4 = vmul.f32 %v5021_v31, %v5019_v9 }
 0xca7   :  { %v4295_v15 = vsel %vm1611_vm12, %v4292_v4, 0.0 }
 0xca8   :  { %4296 = vst [vmem:[#allocation11 + $0x8] sm:$0xff] %v4295_v15 }
 0xca9   :  { %5305 = shalt.err (!%p5302_p10)
}
 0xcaa   :  { %4308 = dma.vmem_to_hbm [thread:$0]  %s4303_s22, 3072, %s7579_s6, [#allocation5], %s5329_s13, %s5329_s13, %s5330_s14  }
 0xcab   :  { %5320 = dma.done.wait [#allocation5], 3072  }
 0xcac   :  { %5321 = vsyncadd [#allocation5], 4294964224 }
 0xcad   :  { %4312 = vsyncpa [#allocation4], 1 }
 0xcae   :  { %4313 = vsyncpa [#allocation7], 1 }
 0xcaf   :  { %4314 = vsyncpa [#allocation10], 1 }
 0xcb0   :  { %4315 = vsyncpa [#allocation5], 1 }

</bundles_post_ra>
